<compile_context>
chip_gen: v7x
topology: tpu7x:2x2x1
jax: 0.10.0
libtpu: 0.0.40
codegen_flags: <defaults>
</compile_context>

<pallas_src>
import functools

import jax
import jax.numpy as jnp
from jax import lax
from jax.experimental import pallas as pl
from jax.experimental.pallas import tpu as pltpu


def _round_up(x, m):
    return (x + m - 1) // m * m


# ----------------------------------------------------------------------------- kernel
def _dncnn_fused_kernel(x_ref, mask_ref, w_ref, b_ref, wl_ref, o_ref,
                        buf_a, buf_b, *, H, W, C, F, Wp, BASE, M, S0):
    """One image; the whole DnCNN runs VMEM-resident.

    Flat layout: padded pixel (r, c) of an (H+2) x Wp image lives at flat row
    BASE + r*Wp + c of a (FLAT, F) scratch buffer.  Outputs are computed over the full
    padded width (garbage columns masked to zero) so each layer is one contiguous store
    starting at S0 = BASE + Wp + 1 (8-aligned).

    x_ref:    (1, H, W, C)      input image (NHWC, original C channels)
    mask_ref: (M, 1) f32        1.0 for valid columns of the virtual flat output, 0.0 else
    w_ref:    (n_cr, 3, 3F, F)  Conv(+folded BN) weights, layer-0 Cin zero-padded to F,
                                kx taps concatenated along the contraction dim
    b_ref:    (n_cr, 1, F)      folded BN shifts (layer 0: zeros)
    wl_ref:   (3, 3F, C)        final conv weights (no BN / bias)
    o_ref:    (1, H, W, C)      residual output y = x - net(x)
    buf_a/b:  (FLAT, F) f32     VMEM ping-pong activation buffers
    """
    n_cr = w_ref.shape[0]                       # number of Conv(+BN)+ReLU layers

    # ---- per-image init: zero ONLY the halo strips (not the full buffers) ----------
    zrow = jnp.zeros((Wp, F), jnp.float32)
    zstrip = jnp.zeros((Wp - W, F), jnp.float32)
    for buf in (buf_a, buf_b):
        buf[pl.ds(BASE, Wp), :] = zrow                          # top halo row
        buf[pl.ds(BASE + (H + 1) * Wp, Wp), :] = zrow           # bottom halo row

    def _zero_side_cols(r, c):
        # covers right-halo column of row r and left-halo column of row r+1
        off = BASE + r * Wp + W + 1
        buf_a[pl.ds(off, Wp - W), :] = zstrip
        buf_b[pl.ds(off, Wp - W), :] = zstrip
        return c
    lax.fori_loop(0, H + 1, _zero_side_cols, 0)

    # ---- stage the input image into buf_a's interior (lanes C..F zeroed in VMEM) ---
    zline = jnp.zeros((W, F), jnp.float32)

    def _stage_row(h, c):
        off = BASE + (h + 1) * Wp + 1
        buf_a[pl.ds(off, W), :] = zline
        buf_a[pl.ds(off, W), 0:C] = x_ref[0, h].astype(jnp.float32)
        return c
    lax.fori_loop(0, H, _stage_row, 0)

    # ---- 3x3 'same' conv: per ky one (M, 3F) patch (kx taps fused) -> one MXU dot ---
    def conv3x3(src, get_w):
        acc = None
        for ky in range(3):
            off = BASE + ky * Wp
            patch = jnp.concatenate(
                [src[pl.ds(off + kx, M), :] for kx in range(3)], axis=1)
            d = jnp.dot(patch, get_w(ky), preferred_element_type=jnp.float32)
            acc = d if acc is None else acc + d
        return acc

    def hidden_layer(src, dst, idx):
        acc = conv3x3(src, lambda ky: w_ref[idx, ky])
        acc = jnp.maximum(acc + b_ref[idx], 0.0)
        valid = mask_ref[...] != 0.0
        # masking garbage columns to 0 keeps the halo columns of dst zero for free
        dst[pl.ds(S0, M), :] = jnp.where(valid, acc, 0.0)

    def layer_pair(p, c):
        hidden_layer(buf_a, buf_b, 2 * p)
        hidden_layer(buf_b, buf_a, 2 * p + 1)
        return c
    lax.fori_loop(0, n_cr // 2, layer_pair, 0)

    if n_cr % 2 == 1:                            # (not hit for the 17-layer DnCNN)
        hidden_layer(buf_a, buf_b, n_cr - 1)
        src_final, stage = buf_b, buf_a
    else:
        src_final, stage = buf_a, buf_b

    # ---- final conv (F -> C) fused with the residual y = x - net(x) ----------------
    acc_last = conv3x3(src_final, lambda ky: wl_ref[ky])        # (M, C)
    stage[pl.ds(S0, M), 0:C] = acc_last                         # stage in free buffer

    def _emit_row(h, c):
        off = S0 + h * Wp
        conv_row = stage[pl.ds(off, W), 0:C]
        o_ref[0, h] = (x_ref[0, h].astype(jnp.float32) - conv_row).astype(o_ref.dtype)
        return c
    lax.fori_loop(0, H, _emit_row, 0)


def dncnn_pallas(x_nhwc, valid_mask, w_all, shift_all, w_last, *,
                 H, W, C, F, Wp, BASE, M, S0, FLAT):
    N = x_nhwc.shape[0]
    n_cr = w_all.shape[0]
    kernel = functools.partial(_dncnn_fused_kernel, H=H, W=W, C=C, F=F,
                               Wp=Wp, BASE=BASE, M=M, S0=S0)
    return pl.pallas_call(
        kernel,
        out_shape=jax.ShapeDtypeStruct((N, H, W, C), x_nhwc.dtype),
        grid=(N,),
        in_specs=[
            pl.BlockSpec((1, H, W, C), lambda n: (n, 0, 0, 0)),
            pl.BlockSpec((M, 1), lambda n: (0, 0)),
            pl.BlockSpec((n_cr, 3, 3 * F, F), lambda n: (0, 0, 0, 0)),
            pl.BlockSpec((n_cr, 1, F), lambda n: (0, 0, 0)),
            pl.BlockSpec((3, 3 * F, C), lambda n: (0, 0, 0)),
        ],
        out_specs=pl.BlockSpec((1, H, W, C), lambda n: (n, 0, 0, 0)),
        scratch_shapes=[pltpu.VMEM((FLAT, F), jnp.float32),
                        pltpu.VMEM((FLAT, F), jnp.float32)],
        compiler_params=pltpu.CompilerParams(
            dimension_semantics=("parallel",),
            vmem_limit_bytes=64 * 1024 * 1024),
    )(x_nhwc, valid_mask, w_all, shift_all, w_last)


# ----------------------------------------------------------------------------- model
def init_dncnn_params(key, channels=3, num_of_layers=17, features=64):
    """Deterministic synthetic parameters. Each layer: (weight HWIO, bn_scale, bn_shift).
    BatchNorm folded to inference-mode per-channel affine:
      scale = gamma / sqrt(running_var + eps), shift = beta - running_mean * scale.
    Layers without BN use scale=1, shift=0."""
    eps = 1e-5
    params = []
    cins = [channels] + [features] * (num_of_layers - 1)
    couts = [features] * (num_of_layers - 1) + [channels]
    for i in range(num_of_layers):
        key, kw, kg, kb, km = jax.random.split(key, 5)
        cin, cout = cins[i], couts[i]
        std = (2.0 / (9.0 * cin)) ** 0.5
        w = std * jax.random.normal(kw, (3, 3, cin, cout), jnp.float32)
        if 0 < i < num_of_layers - 1:
            gamma = 1.0 + 0.1 * jax.random.normal(kg, (cout,), jnp.float32)
            beta = 0.1 * jax.random.normal(kb, (cout,), jnp.float32)
            running_mean = 0.1 * jax.random.normal(km, (cout,), jnp.float32)
            running_var = jnp.ones((cout,), jnp.float32)
            scale = gamma / jnp.sqrt(running_var + eps)
            shift = beta - running_mean * scale
        else:
            scale = jnp.ones((cout,), jnp.float32)
            shift = jnp.zeros((cout,), jnp.float32)
        params.append((w, scale, shift))
    # TODO(synk): PyTorch BatchNorm2d in train mode uses batch statistics; we
    # implement eval-mode BN folded to a per-channel affine.
    return params


def dncnn_forward(x_nchw, params):
    """Matches DnCNN.forward (eval-mode BN): returns x - dncnn(x). Input/output NCHW."""
    N, C, H, W = x_nchw.shape
    F = params[0][0].shape[-1]
    n_cr = len(params) - 1                       # Conv(+BN)+ReLU layers, incl. the first

    # flat-layout geometry
    Wp = _round_up(W + 2, 8)                     # padded width (multiple of 8 sublanes)
    BASE = 7                                     # makes the layer-store offset 8-aligned
    M = H * Wp                                   # rows computed per layer (incl. garbage cols)
    S0 = BASE + Wp + 1                           # flat offset of interior pixel (1, 1)
    FLAT = _round_up(BASE + (H + 2) * Wp + 2, 8)
    assert Wp >= W + 2

    # Fold BN scale into weights; zero-pad layer-0 Cin C->F; lay every layer's weights
    # out as (3, 3F, F): the three kx taps of each ky form one contraction block that
    # matches the in-kernel patch concat order.
    w_list, b_list = [], []
    for i, (w, scale, shift) in enumerate(params[:-1]):
        wf = w * scale                                             # (3,3,cin,F)
        if i == 0:
            wf = jnp.pad(wf, ((0, 0), (0, 0), (0, F - C), (0, 0)))  # Cin C -> F
        w_list.append(wf.reshape(3, 3 * F, F))
        b_list.append(shift.reshape(1, F))
    w_all = jnp.stack(w_list)                                      # (n_cr, 3, 3F, F)
    shift_all = jnp.stack(b_list)                                  # (n_cr, 1, F)
    wl, sl, _ = params[-1]
    w_last = (wl * sl).reshape(3, 3 * F, C)                        # (3, 3F, C)

    # valid-column mask for the virtual flat output layout
    col = jnp.arange(M, dtype=jnp.int32) % Wp
    valid_mask = (col < W).astype(jnp.float32).reshape(M, 1)

    # NCHW -> NHWC (no channel padding of the activations in HBM)
    x_nhwc = jnp.transpose(x_nchw, (0, 2, 3, 1))
    out_nhwc = dncnn_pallas(x_nhwc, valid_mask, w_all, shift_all, w_last,
                            H=H, W=W, C=C, F=F, Wp=Wp, BASE=BASE, M=M, S0=S0,
                            FLAT=FLAT)
    return jnp.transpose(out_nhwc, (0, 3, 1, 2))                   # back to NCHW


# ----------------------------------------------------------------------------- reference
def dncnn_reference(x_nchw, params):
    x = jnp.transpose(x_nchw, (0, 2, 3, 1))
    h = x
    L = len(params)
    for i, (w, scale, shift) in enumerate(params):
        h = jax.lax.conv_general_dilated(
            h, w, window_strides=(1, 1), padding="SAME",
            dimension_numbers=("NHWC", "HWIO", "NHWC"))
        h = h * scale + shift
        if i < L - 1:
            h = jnp.maximum(h, 0.0)
    return jnp.transpose(x - h, (0, 3, 1, 2))


# ----------------------------------------------------------------------------- main
if __name__ == "__main__":
    key = jax.random.PRNGKey(0)
    k_params, k_x = jax.random.split(key)

    channels, num_of_layers = 3, 17
    N, H, W = 2, 16, 16

    params = init_dncnn_params(k_params, channels=channels,
                               num_of_layers=num_of_layers)
    x = jax.random.normal(k_x, (N, channels, H, W), jnp.float32)

    out = jax.block_until_ready(dncnn_forward(x, params))
    assert out.shape == (N, channels, H, W)
    assert out.dtype == jnp.float32

    ref = jax.block_until_ready(dncnn_reference(x, params))
    max_err = float(jnp.max(jnp.abs(out - ref)))
    assert jnp.allclose(out, ref, rtol=1e-3, atol=1e-3), max_err

    print("KERNEL_OK")
</pallas_src>

<mosaic_0001>
module attributes {stable_mosaic.version = 11 : i64} {
  func.func @_dncnn_fused_kernel(%arg0: i32, %arg1: memref<1x16x16x3xf32, #tpu.memory_space<vmem>>, %arg2: memref<384x1xf32, #tpu.memory_space<vmem>>, %arg3: memref<16x3x192x64xf32, #tpu.memory_space<vmem>>, %arg4: memref<16x1x64xf32, #tpu.memory_space<vmem>>, %arg5: memref<3x192x3xf32, #tpu.memory_space<vmem>>, %arg6: memref<1x16x16x3xf32, #tpu.memory_space<vmem>>, %arg7: memref<448x64xf32, #tpu.memory_space<vmem>>, %arg8: memref<448x64xf32, #tpu.memory_space<vmem>>) attributes {dimension_semantics = [#tpu.dimension_semantics<parallel>], iteration_bounds = array<i64: 2>, scalar_prefetch = 0 : i64, scratch_operands = 2 : i64, tpu.core_type = #tpu.core_type<tc>, window_params = [{transform_indices = @transform_0, window_bounds = array<i64: 1, 16, 16, 3>}, {pipeline_mode = #tpu.pipeline_mode<synchronous>, transform_indices = @transform_1, window_bounds = array<i64: 384, 1>}, {pipeline_mode = #tpu.pipeline_mode<synchronous>, transform_indices = @transform_2, window_bounds = array<i64: 16, 3, 192, 64>}, {pipeline_mode = #tpu.pipeline_mode<synchronous>, transform_indices = @transform_3, window_bounds = array<i64: 16, 1, 64>}, {pipeline_mode = #tpu.pipeline_mode<synchronous>, transform_indices = @transform_4, window_bounds = array<i64: 3, 192, 3>}, {transform_indices = @transform_5, window_bounds = array<i64: 1, 16, 16, 3>}]} {
    %cst = arith.constant 0.000000e+00 : f32
    %0 = vector.broadcast %cst : f32 to vector<24x64xf32>
    %cst_0 = arith.constant 0.000000e+00 : f32
    %1 = vector.broadcast %cst_0 : f32 to vector<8x64xf32>
    %c7 = arith.constant 7 : index
    %c0 = arith.constant 0 : index
    %2 = vector.load %arg7[%c7, %c0] : memref<448x64xf32, #tpu.memory_space<vmem>>, vector<24x64xf32>
    tpu.vector_store %arg7[%c7, %c0], %0 {strides = array<i32>} : memref<448x64xf32, #tpu.memory_space<vmem>>, vector<24x64xf32>,
    %c415 = arith.constant 415 : index
    %c0_1 = arith.constant 0 : index
    %3 = vector.load %arg7[%c415, %c0_1] : memref<448x64xf32, #tpu.memory_space<vmem>>, vector<24x64xf32>
    tpu.vector_store %arg7[%c415, %c0_1], %0 {strides = array<i32>} : memref<448x64xf32, #tpu.memory_space<vmem>>, vector<24x64xf32>,
    %c7_2 = arith.constant 7 : index
    %c0_3 = arith.constant 0 : index
    %4 = vector.load %arg8[%c7_2, %c0_3] : memref<448x64xf32, #tpu.memory_space<vmem>>, vector<24x64xf32>
    tpu.vector_store %arg8[%c7_2, %c0_3], %0 {strides = array<i32>} : memref<448x64xf32, #tpu.memory_space<vmem>>, vector<24x64xf32>,
    %c415_4 = arith.constant 415 : index
    %c0_5 = arith.constant 0 : index
    %5 = vector.load %arg8[%c415_4, %c0_5] : memref<448x64xf32, #tpu.memory_space<vmem>>, vector<24x64xf32>
    tpu.vector_store %arg8[%c415_4, %c0_5], %0 {strides = array<i32>} : memref<448x64xf32, #tpu.memory_space<vmem>>, vector<24x64xf32>,
    %c0_i32 = arith.constant 0 : i32
    %c17_i32 = arith.constant 17 : i32
    %6 = arith.addi %c0_i32, %c17_i32 : i32
    %c1_i32 = arith.constant 1 : i32
    scf.for %arg9 = %c0_i32 to %6 step %c1_i32  : i32 {
      %c24_i32 = arith.constant 24 : i32
      %35 = arith.muli %arg9, %c24_i32 : i32
      %c7_i32 = arith.constant 7 : i32
      %36 = arith.addi %c7_i32, %35 : i32
      %c16_i32_40 = arith.constant 16 : i32
      %37 = arith.addi %36, %c16_i32_40 : i32
      %c1_i32_41 = arith.constant 1 : i32
      %38 = arith.addi %37, %c1_i32_41 : i32
      %39 = arith.index_cast %38 : i32 to index
      %c0_42 = arith.constant 0 : index
      %40 = vector.load %arg7[%39, %c0_42] : memref<448x64xf32, #tpu.memory_space<vmem>>, vector<8x64xf32>
      tpu.vector_store %arg7[%39, %c0_42], %1 {strides = array<i32>} : memref<448x64xf32, #tpu.memory_space<vmem>>, vector<8x64xf32>,
      %41 = arith.index_cast %38 : i32 to index
      %c0_43 = arith.constant 0 : index
      %42 = vector.load %arg8[%41, %c0_43] : memref<448x64xf32, #tpu.memory_space<vmem>>, vector<8x64xf32>
      tpu.vector_store %arg8[%41, %c0_43], %1 {strides = array<i32>} : memref<448x64xf32, #tpu.memory_space<vmem>>, vector<8x64xf32>,
    }
    %c17_i32_6 = arith.constant 17 : i32
    %cst_7 = arith.constant 0.000000e+00 : f32
    %7 = vector.broadcast %cst_7 : f32 to vector<16x64xf32>
    %c0_i32_8 = arith.constant 0 : i32
    %c16_i32 = arith.constant 16 : i32
    %8 = arith.addi %c0_i32_8, %c16_i32 : i32
    %c1_i32_9 = arith.constant 1 : i32
    scf.for %arg9 = %c0_i32_8 to %8 step %c1_i32_9  : i32 {
      %c1_i32_40 = arith.constant 1 : i32
      %35 = arith.addi %arg9, %c1_i32_40 : i32
      %c24_i32 = arith.constant 24 : i32
      %36 = arith.muli %35, %c24_i32 : i32
      %c7_i32 = arith.constant 7 : i32
      %37 = arith.addi %c7_i32, %36 : i32
      %c1_i32_41 = arith.constant 1 : i32
      %38 = arith.addi %37, %c1_i32_41 : i32
      %39 = arith.index_cast %38 : i32 to index
      %c0_42 = arith.constant 0 : index
      %40 = vector.load %arg7[%39, %c0_42] : memref<448x64xf32, #tpu.memory_space<vmem>>, vector<16x64xf32>
      tpu.vector_store %arg7[%39, %c0_42], %7 {strides = array<i32>} : memref<448x64xf32, #tpu.memory_space<vmem>>, vector<16x64xf32>,
      %c0_43 = arith.constant 0 : index
      %41 = arith.index_cast %arg9 : i32 to index
      %c0_44 = arith.constant 0 : index
      %c0_45 = arith.constant 0 : index
      %42 = vector.load %arg1[%c0_43, %41, %c0_44, %c0_45] : memref<1x16x16x3xf32, #tpu.memory_space<vmem>>, vector<1x1x16x3xf32>
      %43 = vector.shape_cast %42 : vector<1x1x16x3xf32> to vector<16x3xf32>
      %44 = arith.index_cast %38 : i32 to index
      %c0_46 = arith.constant 0 : index
      %45 = vector.load %arg7[%44, %c0_46] : memref<448x64xf32, #tpu.memory_space<vmem>>, vector<16x3xf32>
      tpu.vector_store %arg7[%44, %c0_46], %43 {strides = array<i32>} : memref<448x64xf32, #tpu.memory_space<vmem>>, vector<16x3xf32>,
    }
    %c16_i32_10 = arith.constant 16 : i32
    %c0_i32_11 = arith.constant 0 : i32
    %c8_i32 = arith.constant 8 : i32
    %9 = arith.addi %c0_i32_11, %c8_i32 : i32
    %c1_i32_12 = arith.constant 1 : i32
    scf.for %arg9 = %c0_i32_11 to %9 step %c1_i32_12  : i32 {
      %c2_i32 = arith.constant 2 : i32
      %35 = arith.muli %c2_i32, %arg9 : i32
      %c7_40 = arith.constant 7 : index
      %c0_41 = arith.constant 0 : index
      %36 = vector.load %arg7[%c7_40, %c0_41] : memref<448x64xf32, #tpu.memory_space<vmem>>, vector<384x64xf32>
      %c8_42 = arith.constant 8 : index
      %c0_43 = arith.constant 0 : index
      %37 = vector.load %arg7[%c8_42, %c0_43] : memref<448x64xf32, #tpu.memory_space<vmem>>, vector<384x64xf32>
      %c9_44 = arith.constant 9 : index
      %c0_45 = arith.constant 0 : index
      %38 = vector.load %arg7[%c9_44, %c0_45] : memref<448x64xf32, #tpu.memory_space<vmem>>, vector<384x64xf32>
      %39 = tpu.concatenate %36, %37, %38 in 1 : vector<384x64xf32>, vector<384x64xf32>, vector<384x64xf32> -> vector<384x192xf32>
      %40 = arith.index_cast %35 : i32 to index
      %c0_46 = arith.constant 0 : index
      %c0_47 = arith.constant 0 : index
      %c0_48 = arith.constant 0 : index
      %41 = vector.load %arg3[%40, %c0_46, %c0_47, %c0_48] : memref<16x3x192x64xf32, #tpu.memory_space<vmem>>, vector<1x1x192x64xf32>
      %42 = vector.shape_cast %41 : vector<1x1x192x64xf32> to vector<192x64xf32>
      %cst_49 = arith.constant dense<0.000000e+00> : vector<384x64xf32>
      %43 = tpu.matmul %39, %42, %cst_49 {dimension_numbers = #tpu.dot_dimension_numbers<[1], [0], [0], [1], [0, 0, 1, 1], [], []>} : vector<384x192xf32>, vector<192x64xf32>, vector<384x64xf32> -> vector<384x64xf32>
      %c31_50 = arith.constant 31 : index
      %c0_51 = arith.constant 0 : index
      %44 = vector.load %arg7[%c31_50, %c0_51] : memref<448x64xf32, #tpu.memory_space<vmem>>, vector<384x64xf32>
      %c32_52 = arith.constant 32 : index
      %c0_53 = arith.constant 0 : index
      %45 = vector.load %arg7[%c32_52, %c0_53] : memref<448x64xf32, #tpu.memory_space<vmem>>, vector<384x64xf32>
      %c33_54 = arith.constant 33 : index
      %c0_55 = arith.constant 0 : index
      %46 = vector.load %arg7[%c33_54, %c0_55] : memref<448x64xf32, #tpu.memory_space<vmem>>, vector<384x64xf32>
      %47 = tpu.concatenate %44, %45, %46 in 1 : vector<384x64xf32>, vector<384x64xf32>, vector<384x64xf32> -> vector<384x192xf32>
      %48 = arith.index_cast %35 : i32 to index
      %c1_56 = arith.constant 1 : index
      %c0_57 = arith.constant 0 : index
      %c0_58 = arith.constant 0 : index
      %49 = vector.load %arg3[%48, %c1_56, %c0_57, %c0_58] : memref<16x3x192x64xf32, #tpu.memory_space<vmem>>, vector<1x1x192x64xf32>
      %50 = vector.shape_cast %49 : vector<1x1x192x64xf32> to vector<192x64xf32>
      %cst_59 = arith.constant dense<0.000000e+00> : vector<384x64xf32>
      %51 = tpu.matmul %47, %50, %cst_59 {dimension_numbers = #tpu.dot_dimension_numbers<[1], [0], [0], [1], [0, 0, 1, 1], [], []>} : vector<384x192xf32>, vector<192x64xf32>, vector<384x64xf32> -> vector<384x64xf32>
      %52 = arith.addf %43, %51 : vector<384x64xf32>
      %c55_60 = arith.constant 55 : index
      %c0_61 = arith.constant 0 : index
      %53 = vector.load %arg7[%c55_60, %c0_61] : memref<448x64xf32, #tpu.memory_space<vmem>>, vector<384x64xf32>
      %c56_62 = arith.constant 56 : index
      %c0_63 = arith.constant 0 : index
      %54 = vector.load %arg7[%c56_62, %c0_63] : memref<448x64xf32, #tpu.memory_space<vmem>>, vector<384x64xf32>
      %c57_64 = arith.constant 57 : index
      %c0_65 = arith.constant 0 : index
      %55 = vector.load %arg7[%c57_64, %c0_65] : memref<448x64xf32, #tpu.memory_space<vmem>>, vector<384x64xf32>
      %56 = tpu.concatenate %53, %54, %55 in 1 : vector<384x64xf32>, vector<384x64xf32>, vector<384x64xf32> -> vector<384x192xf32>
      %57 = arith.index_cast %35 : i32 to index
      %c2_66 = arith.constant 2 : index
      %c0_67 = arith.constant 0 : index
      %c0_68 = arith.constant 0 : index
      %58 = vector.load %arg3[%57, %c2_66, %c0_67, %c0_68] : memref<16x3x192x64xf32, #tpu.memory_space<vmem>>, vector<1x1x192x64xf32>
      %59 = vector.shape_cast %58 : vector<1x1x192x64xf32> to vector<192x64xf32>
      %cst_69 = arith.constant dense<0.000000e+00> : vector<384x64xf32>
      %60 = tpu.matmul %56, %59, %cst_69 {dimension_numbers = #tpu.dot_dimension_numbers<[1], [0], [0], [1], [0, 0, 1, 1], [], []>} : vector<384x192xf32>, vector<192x64xf32>, vector<384x64xf32> -> vector<384x64xf32>
      %61 = arith.addf %52, %60 : vector<384x64xf32>
      %62 = arith.index_cast %35 : i32 to index
      %c0_70 = arith.constant 0 : index
      %c0_71 = arith.constant 0 : index
      %63 = vector.load %arg4[%62, %c0_70, %c0_71] : memref<16x1x64xf32, #tpu.memory_space<vmem>>, vector<1x1x64xf32>
      %64 = vector.shape_cast %63 : vector<1x1x64xf32> to vector<1x64xf32>
      %65 = vector.broadcast %64 : vector<1x64xf32> to vector<384x64xf32>
      %66 = arith.addf %61, %65 : vector<384x64xf32>
      %cst_72 = arith.constant 0.000000e+00 : f32
      %67 = vector.broadcast %cst_72 : f32 to vector<384x64xf32>
      %68 = arith.maximumf %66, %67 : vector<384x64xf32>
      %c0_73 = arith.constant 0 : index
      %c0_74 = arith.constant 0 : index
      %69 = vector.load %arg2[%c0_73, %c0_74] : memref<384x1xf32, #tpu.memory_space<vmem>>, vector<384x1xf32>
      %cst_75 = arith.constant 0.000000e+00 : f32
      %70 = vector.broadcast %cst_75 : f32 to vector<384x1xf32>
      %71 = arith.cmpf one, %69, %70 : vector<384x1xf32>
      %cst_76 = arith.constant 0.000000e+00 : f32
      %72 = vector.shape_cast %71 : vector<384x1xi1> to vector<384x1xi1>
      %73 = vector.broadcast %72 : vector<384x1xi1> to vector<384x64xi1>
      %74 = vector.broadcast %cst_76 : f32 to vector<384x64xf32>
      %75 = arith.select %73, %68, %74 : vector<384x64xi1>, vector<384x64xf32>
      %c32_77 = arith.constant 32 : index
      %c0_78 = arith.constant 0 : index
      %76 = vector.load %arg8[%c32_77, %c0_78] : memref<448x64xf32, #tpu.memory_space<vmem>>, vector<384x64xf32>
      tpu.vector_store %arg8[%c32_77, %c0_78], %75 {strides = array<i32>} : memref<448x64xf32, #tpu.memory_space<vmem>>, vector<384x64xf32>,
      %c2_i32_79 = arith.constant 2 : i32
      %77 = arith.muli %c2_i32_79, %arg9 : i32
      %c1_i32_80 = arith.constant 1 : i32
      %78 = arith.addi %77, %c1_i32_80 : i32
      %c7_81 = arith.constant 7 : index
      %c0_82 = arith.constant 0 : index
      %79 = vector.load %arg8[%c7_81, %c0_82] : memref<448x64xf32, #tpu.memory_space<vmem>>, vector<384x64xf32>
      %c8_83 = arith.constant 8 : index
      %c0_84 = arith.constant 0 : index
      %80 = vector.load %arg8[%c8_83, %c0_84] : memref<448x64xf32, #tpu.memory_space<vmem>>, vector<384x64xf32>
      %c9_85 = arith.constant 9 : index
      %c0_86 = arith.constant 0 : index
      %81 = vector.load %arg8[%c9_85, %c0_86] : memref<448x64xf32, #tpu.memory_space<vmem>>, vector<384x64xf32>
      %82 = tpu.concatenate %79, %80, %81 in 1 : vector<384x64xf32>, vector<384x64xf32>, vector<384x64xf32> -> vector<384x192xf32>
      %83 = arith.index_cast %78 : i32 to index
      %c0_87 = arith.constant 0 : index
      %c0_88 = arith.constant 0 : index
      %c0_89 = arith.constant 0 : index
      %84 = vector.load %arg3[%83, %c0_87, %c0_88, %c0_89] : memref<16x3x192x64xf32, #tpu.memory_space<vmem>>, vector<1x1x192x64xf32>
      %85 = vector.shape_cast %84 : vector<1x1x192x64xf32> to vector<192x64xf32>
      %cst_90 = arith.constant dense<0.000000e+00> : vector<384x64xf32>
      %86 = tpu.matmul %82, %85, %cst_90 {dimension_numbers = #tpu.dot_dimension_numbers<[1], [0], [0], [1], [0, 0, 1, 1], [], []>} : vector<384x192xf32>, vector<192x64xf32>, vector<384x64xf32> -> vector<384x64xf32>
      %c31_91 = arith.constant 31 : index
      %c0_92 = arith.constant 0 : index
      %87 = vector.load %arg8[%c31_91, %c0_92] : memref<448x64xf32, #tpu.memory_space<vmem>>, vector<384x64xf32>
      %c32_93 = arith.constant 32 : index
      %c0_94 = arith.constant 0 : index
      %88 = vector.load %arg8[%c32_93, %c0_94] : memref<448x64xf32, #tpu.memory_space<vmem>>, vector<384x64xf32>
      %c33_95 = arith.constant 33 : index
      %c0_96 = arith.constant 0 : index
      %89 = vector.load %arg8[%c33_95, %c0_96] : memref<448x64xf32, #tpu.memory_space<vmem>>, vector<384x64xf32>
      %90 = tpu.concatenate %87, %88, %89 in 1 : vector<384x64xf32>, vector<384x64xf32>, vector<384x64xf32> -> vector<384x192xf32>
      %91 = arith.index_cast %78 : i32 to index
      %c1_97 = arith.constant 1 : index
      %c0_98 = arith.constant 0 : index
      %c0_99 = arith.constant 0 : index
      %92 = vector.load %arg3[%91, %c1_97, %c0_98, %c0_99] : memref<16x3x192x64xf32, #tpu.memory_space<vmem>>, vector<1x1x192x64xf32>
      %93 = vector.shape_cast %92 : vector<1x1x192x64xf32> to vector<192x64xf32>
      %cst_100 = arith.constant dense<0.000000e+00> : vector<384x64xf32>
      %94 = tpu.matmul %90, %93, %cst_100 {dimension_numbers = #tpu.dot_dimension_numbers<[1], [0], [0], [1], [0, 0, 1, 1], [], []>} : vector<384x192xf32>, vector<192x64xf32>, vector<384x64xf32> -> vector<384x64xf32>
      %95 = arith.addf %86, %94 : vector<384x64xf32>
      %c55_101 = arith.constant 55 : index
      %c0_102 = arith.constant 0 : index
      %96 = vector.load %arg8[%c55_101, %c0_102] : memref<448x64xf32, #tpu.memory_space<vmem>>, vector<384x64xf32>
      %c56_103 = arith.constant 56 : index
      %c0_104 = arith.constant 0 : index
      %97 = vector.load %arg8[%c56_103, %c0_104] : memref<448x64xf32, #tpu.memory_space<vmem>>, vector<384x64xf32>
      %c57_105 = arith.constant 57 : index
      %c0_106 = arith.constant 0 : index
      %98 = vector.load %arg8[%c57_105, %c0_106] : memref<448x64xf32, #tpu.memory_space<vmem>>, vector<384x64xf32>
      %99 = tpu.concatenate %96, %97, %98 in 1 : vector<384x64xf32>, vector<384x64xf32>, vector<384x64xf32> -> vector<384x192xf32>
      %100 = arith.index_cast %78 : i32 to index
      %c2_107 = arith.constant 2 : index
      %c0_108 = arith.constant 0 : index
      %c0_109 = arith.constant 0 : index
      %101 = vector.load %arg3[%100, %c2_107, %c0_108, %c0_109] : memref<16x3x192x64xf32, #tpu.memory_space<vmem>>, vector<1x1x192x64xf32>
      %102 = vector.shape_cast %101 : vector<1x1x192x64xf32> to vector<192x64xf32>
      %cst_110 = arith.constant dense<0.000000e+00> : vector<384x64xf32>
      %103 = tpu.matmul %99, %102, %cst_110 {dimension_numbers = #tpu.dot_dimension_numbers<[1], [0], [0], [1], [0, 0, 1, 1], [], []>} : vector<384x192xf32>, vector<192x64xf32>, vector<384x64xf32> -> vector<384x64xf32>
      %104 = arith.addf %95, %103 : vector<384x64xf32>
      %105 = arith.index_cast %78 : i32 to index
      %c0_111 = arith.constant 0 : index
      %c0_112 = arith.constant 0 : index
      %106 = vector.load %arg4[%105, %c0_111, %c0_112] : memref<16x1x64xf32, #tpu.memory_space<vmem>>, vector<1x1x64xf32>
      %107 = vector.shape_cast %106 : vector<1x1x64xf32> to vector<1x64xf32>
      %108 = vector.broadcast %107 : vector<1x64xf32> to vector<384x64xf32>
      %109 = arith.addf %104, %108 : vector<384x64xf32>
      %cst_113 = arith.constant 0.000000e+00 : f32
      %110 = vector.broadcast %cst_113 : f32 to vector<384x64xf32>
      %111 = arith.maximumf %109, %110 : vector<384x64xf32>
      %c0_114 = arith.constant 0 : index
      %c0_115 = arith.constant 0 : index
      %112 = vector.load %arg2[%c0_114, %c0_115] : memref<384x1xf32, #tpu.memory_space<vmem>>, vector<384x1xf32>
      %cst_116 = arith.constant 0.000000e+00 : f32
      %113 = vector.broadcast %cst_116 : f32 to vector<384x1xf32>
      %114 = arith.cmpf one, %112, %113 : vector<384x1xf32>
      %cst_117 = arith.constant 0.000000e+00 : f32
      %115 = vector.shape_cast %114 : vector<384x1xi1> to vector<384x1xi1>
      %116 = vector.broadcast %115 : vector<384x1xi1> to vector<384x64xi1>
      %117 = vector.broadcast %cst_117 : f32 to vector<384x64xf32>
      %118 = arith.select %116, %111, %117 : vector<384x64xi1>, vector<384x64xf32>
      %c32_118 = arith.constant 32 : index
      %c0_119 = arith.constant 0 : index
      %119 = vector.load %arg7[%c32_118, %c0_119] : memref<448x64xf32, #tpu.memory_space<vmem>>, vector<384x64xf32>
      tpu.vector_store %arg7[%c32_118, %c0_119], %118 {strides = array<i32>} : memref<448x64xf32, #tpu.memory_space<vmem>>, vector<384x64xf32>,
    }
    %c8_i32_13 = arith.constant 8 : i32
    %c7_14 = arith.constant 7 : index
    %c0_15 = arith.constant 0 : index
    %10 = vector.load %arg7[%c7_14, %c0_15] : memref<448x64xf32, #tpu.memory_space<vmem>>, vector<384x64xf32>
    %c8 = arith.constant 8 : index
    %c0_16 = arith.constant 0 : index
    %11 = vector.load %arg7[%c8, %c0_16] : memref<448x64xf32, #tpu.memory_space<vmem>>, vector<384x64xf32>
    %c9 = arith.constant 9 : index
    %c0_17 = arith.constant 0 : index
    %12 = vector.load %arg7[%c9, %c0_17] : memref<448x64xf32, #tpu.memory_space<vmem>>, vector<384x64xf32>
    %13 = tpu.concatenate %10, %11, %12 in 1 : vector<384x64xf32>, vector<384x64xf32>, vector<384x64xf32> -> vector<384x192xf32>
    %c0_18 = arith.constant 0 : index
    %c0_19 = arith.constant 0 : index
    %c0_20 = arith.constant 0 : index
    %14 = vector.load %arg5[%c0_18, %c0_19, %c0_20] : memref<3x192x3xf32, #tpu.memory_space<vmem>>, vector<1x192x3xf32>
    %15 = vector.shape_cast %14 : vector<1x192x3xf32> to vector<192x3xf32>
    %cst_21 = arith.constant dense<0.000000e+00> : vector<384x3xf32>
    %16 = tpu.matmul %13, %15, %cst_21 {dimension_numbers = #tpu.dot_dimension_numbers<[1], [0], [0], [1], [0, 0, 1, 1], [], []>} : vector<384x192xf32>, vector<192x3xf32>, vector<384x3xf32> -> vector<384x3xf32>
    %c31 = arith.constant 31 : index
    %c0_22 = arith.constant 0 : index
    %17 = vector.load %arg7[%c31, %c0_22] : memref<448x64xf32, #tpu.memory_space<vmem>>, vector<384x64xf32>
    %c32 = arith.constant 32 : index
    %c0_23 = arith.constant 0 : index
    %18 = vector.load %arg7[%c32, %c0_23] : memref<448x64xf32, #tpu.memory_space<vmem>>, vector<384x64xf32>
    %c33 = arith.constant 33 : index
    %c0_24 = arith.constant 0 : index
    %19 = vector.load %arg7[%c33, %c0_24] : memref<448x64xf32, #tpu.memory_space<vmem>>, vector<384x64xf32>
    %20 = tpu.concatenate %17, %18, %19 in 1 : vector<384x64xf32>, vector<384x64xf32>, vector<384x64xf32> -> vector<384x192xf32>
    %c1 = arith.constant 1 : index
    %c0_25 = arith.constant 0 : index
    %c0_26 = arith.constant 0 : index
    %21 = vector.load %arg5[%c1, %c0_25, %c0_26] : memref<3x192x3xf32, #tpu.memory_space<vmem>>, vector<1x192x3xf32>
    %22 = vector.shape_cast %21 : vector<1x192x3xf32> to vector<192x3xf32>
    %cst_27 = arith.constant dense<0.000000e+00> : vector<384x3xf32>
    %23 = tpu.matmul %20, %22, %cst_27 {dimension_numbers = #tpu.dot_dimension_numbers<[1], [0], [0], [1], [0, 0, 1, 1], [], []>} : vector<384x192xf32>, vector<192x3xf32>, vector<384x3xf32> -> vector<384x3xf32>
    %24 = arith.addf %16, %23 : vector<384x3xf32>
    %c55 = arith.constant 55 : index
    %c0_28 = arith.constant 0 : index
    %25 = vector.load %arg7[%c55, %c0_28] : memref<448x64xf32, #tpu.memory_space<vmem>>, vector<384x64xf32>
    %c56 = arith.constant 56 : index
    %c0_29 = arith.constant 0 : index
    %26 = vector.load %arg7[%c56, %c0_29] : memref<448x64xf32, #tpu.memory_space<vmem>>, vector<384x64xf32>
    %c57 = arith.constant 57 : index
    %c0_30 = arith.constant 0 : index
    %27 = vector.load %arg7[%c57, %c0_30] : memref<448x64xf32, #tpu.memory_space<vmem>>, vector<384x64xf32>
    %28 = tpu.concatenate %25, %26, %27 in 1 : vector<384x64xf32>, vector<384x64xf32>, vector<384x64xf32> -> vector<384x192xf32>
    %c2 = arith.constant 2 : index
    %c0_31 = arith.constant 0 : index
    %c0_32 = arith.constant 0 : index
    %29 = vector.load %arg5[%c2, %c0_31, %c0_32] : memref<3x192x3xf32, #tpu.memory_space<vmem>>, vector<1x192x3xf32>
    %30 = vector.shape_cast %29 : vector<1x192x3xf32> to vector<192x3xf32>
    %cst_33 = arith.constant dense<0.000000e+00> : vector<384x3xf32>
    %31 = tpu.matmul %28, %30, %cst_33 {dimension_numbers = #tpu.dot_dimension_numbers<[1], [0], [0], [1], [0, 0, 1, 1], [], []>} : vector<384x192xf32>, vector<192x3xf32>, vector<384x3xf32> -> vector<384x3xf32>
    %32 = arith.addf %24, %31 : vector<384x3xf32>
    %c32_34 = arith.constant 32 : index
    %c0_35 = arith.constant 0 : index
    %33 = vector.load %arg8[%c32_34, %c0_35] : memref<448x64xf32, #tpu.memory_space<vmem>>, vector<384x3xf32>
    tpu.vector_store %arg8[%c32_34, %c0_35], %32 {strides = array<i32>} : memref<448x64xf32, #tpu.memory_space<vmem>>, vector<384x3xf32>,
    %c0_i32_36 = arith.constant 0 : i32
    %c16_i32_37 = arith.constant 16 : i32
    %34 = arith.addi %c0_i32_36, %c16_i32_37 : i32
    %c1_i32_38 = arith.constant 1 : i32
    scf.for %arg9 = %c0_i32_36 to %34 step %c1_i32_38  : i32 {
      %c24_i32 = arith.constant 24 : i32
      %35 = arith.muli %arg9, %c24_i32 : i32
      %c32_i32 = arith.constant 32 : i32
      %36 = arith.addi %c32_i32, %35 : i32
      %37 = arith.index_cast %36 : i32 to index
      %c0_40 = arith.constant 0 : index
      %38 = vector.load %arg8[%37, %c0_40] : memref<448x64xf32, #tpu.memory_space<vmem>>, vector<16x3xf32>
      %c0_41 = arith.constant 0 : index
      %39 = arith.index_cast %arg9 : i32 to index
      %c0_42 = arith.constant 0 : index
      %c0_43 = arith.constant 0 : index
      %40 = vector.load %arg1[%c0_41, %39, %c0_42, %c0_43] : memref<1x16x16x3xf32, #tpu.memory_space<vmem>>, vector<1x1x16x3xf32>
      %41 = vector.shape_cast %40 : vector<1x1x16x3xf32> to vector<16x3xf32>
      %42 = arith.subf %41, %38 : vector<16x3xf32>
      %c0_44 = arith.constant 0 : index
      %43 = arith.index_cast %arg9 : i32 to index
      %c0_45 = arith.constant 0 : index
      %c0_46 = arith.constant 0 : index
      %44 = vector.load %arg6[%c0_44, %43, %c0_45, %c0_46] : memref<1x16x16x3xf32, #tpu.memory_space<vmem>>, vector<1x1x16x3xf32>
      %45 = vector.shape_cast %44 : vector<1x1x16x3xf32> to vector<16x3xf32>
      %46 = vector.shape_cast %42 : vector<16x3xf32> to vector<1x1x16x3xf32>
      tpu.vector_store %arg6[%c0_44, %43, %c0_45, %c0_46], %46 {strides = array<i32>} : memref<1x16x16x3xf32, #tpu.memory_space<vmem>>, vector<1x1x16x3xf32>,
    }
    %c16_i32_39 = arith.constant 16 : i32
    return
  }
  func.func @transform_0(%arg0: i32) -> (i32, i32, i32, i32) {
    %c0_i32 = arith.constant 0 : i32
    %c0_i32_0 = arith.constant 0 : i32
    %c0_i32_1 = arith.constant 0 : i32
    %c0_i32_2 = arith.constant 0 : i32
    return %arg0, %c0_i32, %c0_i32_0, %c0_i32_1 : i32, i32, i32, i32
  }
  func.func @transform_1(%arg0: i32) -> (i32, i32) {
    %c0_i32 = arith.constant 0 : i32
    %c0_i32_0 = arith.constant 0 : i32
    %c0_i32_1 = arith.constant 0 : i32
    return %c0_i32, %c0_i32_0 : i32, i32
  }
  func.func @transform_2(%arg0: i32) -> (i32, i32, i32, i32) {
    %c0_i32 = arith.constant 0 : i32
    %c0_i32_0 = arith.constant 0 : i32
    %c0_i32_1 = arith.constant 0 : i32
    %c0_i32_2 = arith.constant 0 : i32
    %c0_i32_3 = arith.constant 0 : i32
    return %c0_i32, %c0_i32_0, %c0_i32_1, %c0_i32_2 : i32, i32, i32, i32
  }
  func.func @transform_3(%arg0: i32) -> (i32, i32, i32) {
    %c0_i32 = arith.constant 0 : i32
    %c0_i32_0 = arith.constant 0 : i32
    %c0_i32_1 = arith.constant 0 : i32
    %c0_i32_2 = arith.constant 0 : i32
    return %c0_i32, %c0_i32_0, %c0_i32_1 : i32, i32, i32
  }
  func.func @transform_4(%arg0: i32) -> (i32, i32, i32) {
    %c0_i32 = arith.constant 0 : i32
    %c0_i32_0 = arith.constant 0 : i32
    %c0_i32_1 = arith.constant 0 : i32
    %c0_i32_2 = arith.constant 0 : i32
    return %c0_i32, %c0_i32_0, %c0_i32_1 : i32, i32, i32
  }
  func.func @transform_5(%arg0: i32) -> (i32, i32, i32, i32) {
    %c0_i32 = arith.constant 0 : i32
    %c0_i32_0 = arith.constant 0 : i32
    %c0_i32_1 = arith.constant 0 : i32
    %c0_i32_2 = arith.constant 0 : i32
    return %arg0, %c0_i32, %c0_i32_0, %c0_i32_1 : i32, i32, i32, i32
  }
}

</mosaic_0001>

<bundles_post_ra>
// kernel: tpu_custom_call.1
= control target key start
LH: loop header
LB: loop body
LE: loop exit
PB: predicated region body
PF: predicated region fallthrough
CT: control target
= control target key end

     0   :  { %10 = vsyncpa [#allocation5], 0  ;;  %s13897_s0 = inlined_call_operand.hbm [shape: f32[2,16,16,3], index: 0, kind: input, shape index: {}]   ;;  %s13898_s1 = inlined_call_operand.hbm [shape: f32[384,1], index: 1, kind: input, shape index: {}]   ;;  %s13899_s2 = inlined_call_operand.hbm [shape: f32[16,3,192,64], index: 2, kind: input, shape index: {}]   ;;  %s13900_s3 = inlined_call_operand.hbm [shape: f32[16,1,64], index: 3, kind: input, shape index: {}]   ;;  %s13901_s4 = inlined_call_operand.hbm [shape: f32[3,192,3], index: 4, kind: input, shape index: {}]   ;;  %s13902_s5 = inlined_call_operand.hbm [shape: f32[2,16,16,3], index: 5, kind: output, shape index: {}]  }
   0x1   :  { %12 = vsyncpa [#allocation5 + $0x1], 0 }
   0x2   :  { %13 = vsyncpa [#allocation8], 0 }
   0x3   :  { %14 = vsyncpa [#allocation11], 0 }
   0x4   :  { %15 = vsyncpa [#allocation6], 0 }
   0x5   :  { %17 = vsyncpa [#allocation6 + $0x1], 0  ;;  %s9792_s18 = smov 0   ;;  %s9794_s19 = smov 0  }
   0x6   :  { %s9796_s20 = smov 0   ;;  %s9798_s21 = smov 0  }
   0x7 LB: > { %s9813_s22 = sadd.s32 4294967295, %s9724_s21   ;;  %s8068_s23 = sadd.s32 4294967294, %s9724_s21   ;;  %s9724_s21 = sphi %s9798_s21, %s14060_s21   ;;  %s9720_s20 = sphi %s9796_s20, %s14059_s20   ;;  %s9716_s19 = sphi %s9794_s19, %s14058_s19   ;;  %s9712_s18 = sphi %s9792_s18, %s14057_s18  }
   0x8   : > { %p43_p0 = scmp.ne.s32.totalorder %s9716_s19, %s9712_s18  ;;  %p13903_p1 = scmp.eq.s32.totalorder %s9813_s22, 0 }
   0x9   : > { %p157_p3 = scmp.eq.s32.totalorder %s8068_s23, 1  ;;  %p8069_p5 = scmp.ge.s32.totalorder %s9724_s21, 1 }
   0xa   : > { %p9822_p4 = por %p13903_p1, %p43_p0  ;;  %p164_p7 = scmp.lt.s32.totalorder %s9724_s21, 3 }
   0xb   : > { %p9827_p6 = por %p157_p3, %p43_p0  ;;  %s9742_s27 = smov [#allocation7]  }
   0xc   : > { %s13947_s24 = scalar_select %p9822_p4, 1, 0 }
   0xd   : > { %s13948_s25 = scalar_select %p9827_p6, 1, 0 }
   0xe   : > { %p9832_p8 = pnand %p8069_p5, %p164_p7  ;;  %s176_s28 = sshll.u32 %s9742_s27, 4  ;;  %s9836_s28 = int_to_ptr.vmem [resolvable:$true] %s176_s28 }
   0xf   : > { %s9743_s30 = smov [#allocation10]   ;;  %s9492_s9 = scalar_lea.hbm %s13898_s1, 6144 }
  0x10   : > { %s13949_s26 = scalar_select %p9832_p8, 1, 0 }
  0x11   : > { %p9178_p9 = pneg %p9832_p8  ;;  %s202_s6 = sshll.u32 %s9743_s30, 4  ;;  %s9847_s6 = int_to_ptr.vmem [resolvable:$true] %s202_s6 }
  0x12   : > { %p9493_p12 = scmp.ne.s32.totalorder %s13898_s1, %s9492_s9  ;;  %p9499_p5 = scmp.lt.u32.totalorder %s9492_s9, %s13898_s1 }
  0x13   : > { %p9843_p11 = pnand %p9178_p9, %p13903_p1 }
  0x15   : > { %p9857_p13 = pneg %p9843_p11 }
  0x17   : > { %p9495_p0 = pnand %p9857_p13, %p9493_p12 }
  0x19   : > { %p9496_p3 = pneg %p9495_p0 }
  0x1b   : > { %p9501_p7 = pnand %p9499_p5, %p9496_p3 }
  0x1d   : > { %9504 = shalt.err (!%p9501_p7)
}
  0x1e   : > { %s9505_s15 = scalar_lea.vmem %s9836_s28, 6144  ;;  %p9513_p2 = scmp.lt.s32.totalorder %s9836_s28, %s9836_s28 }
  0x1f   : > { %p9506_p9 = scmp.ne.s32.totalorder %s9836_s28, %s9505_s15  ;;  %p9514_p6 = scmp.lt.s32.totalorder %s9505_s15, %s9505_s15 }
  0x21   : > { %p9508_p10 = pnand %p9506_p9, %p9857_p13  ;;  %p9515_p12 = por %p9514_p6, %p9513_p2 }
  0x23   : > { %p9509_p1 = pneg %p9508_p10 }
  0x25   : > { %p9516_p0 = pnand %p9515_p12, %p9509_p1 }
  0x27   : > { %9519 = shalt.err (!%p9516_p0)
}
  0x28   : > { %s13904_s16 = smov 128   ;;  %s9745_s17 = smov 8  }
  0x29   : > { %9181 = dma.hbm_to_vmem [thread:$0]  (!%p9843_p11), %s13898_s1, 6144, %s9836_s28, [#allocation8], %s13904_s16, %s13904_s16, %s9745_s17  }
  0x2a   : > { %s9520_s8 = scalar_lea.hbm %s13900_s3, 256 }
  0x2b   : > { %p9521_p1 = scmp.ne.s32.totalorder %s13900_s3, %s9520_s8  ;;  %p9527_p10 = scmp.lt.u32.totalorder %s9520_s8, %s13900_s3 }
  0x2d   : > { %p9523_p2 = pnand %p9521_p1, %p9857_p13 }
  0x2f   : > { %p9524_p6 = pneg %p9523_p2 }
  0x31   : > { %p9529_p3 = pnand %p9527_p10, %p9524_p6 }
  0x33   : > { %9532 = shalt.err (!%p9529_p3)
}
  0x34   : > { %s9533_s28 = scalar_lea.vmem %s9847_s6, 256  ;;  %p9541_p12 = scmp.lt.s32.totalorder %s9847_s6, %s9847_s6 }
  0x35   : > { %p9534_p5 = scmp.ne.s32.totalorder %s9847_s6, %s9533_s28  ;;  %p9542_p0 = scmp.lt.s32.totalorder %s9533_s28, %s9533_s28 }
  0x37   : > { %p9536_p7 = pnand %p9534_p5, %p9857_p13  ;;  %p9543_p1 = por %p9542_p0, %p9541_p12 }
  0x39   : > { %p9537_p9 = pneg %p9536_p7 }
  0x3b   : > { %p9544_p2 = pnand %p9543_p1, %p9537_p9 }
  0x3d   : > { %9547 = shalt.err (!%p9544_p2)
}
  0x3e   : > { %s9746_s14 = smov 16   ;;  %s9747_s15 = smov 1  }
  0x3f   : > { %9187 = dma.hbm_to_vmem [thread:$0]  (!%p9843_p11), %s13900_s3, 256, %s9847_s6, [#allocation11], %s9746_s14, %s9746_s14, %s9747_s15  }
  0x40   : > { %s9748_s30 = smov [#allocation9]   ;;  %s9749_s8 = smov [#allocation12]  }
  0x41   : > { %s189_s7 = sshll.u32 %s9748_s30, 4  ;;  %s215_s9 = sshll.u32 %s9749_s8, 4  ;;  %s190_s7 = int_to_ptr.vmem [resolvable:$true] %s189_s7  ;;  %s9904_s9 = int_to_ptr.vmem [resolvable:$true] %s215_s9 }
  0x42   : > { %s9548_s13 = scalar_lea.hbm %s13899_s2, 147456 }
  0x43   : > { %p9549_p6 = scmp.ne.s32.totalorder %s13899_s2, %s9548_s13  ;;  %p9555_p5 = scmp.lt.u32.totalorder %s9548_s13, %s13899_s2 }
  0x45   : > { %p9551_p10 = pnand %p9549_p6, %p9857_p13 }
  0x47   : > { %p9552_p3 = pneg %p9551_p10 }
  0x49   : > { %p9557_p7 = pnand %p9555_p5, %p9552_p3 }
  0x4b   : > { %9560 = shalt.err (!%p9557_p7)
}
  0x4c   : > { %s9561_s14 = scalar_lea.vmem %s190_s7, 147456  ;;  %p9569_p1 = scmp.lt.s32.totalorder %s190_s7, %s190_s7 }
  0x4d   : > { %p9562_p9 = scmp.ne.s32.totalorder %s190_s7, %s9561_s14  ;;  %p9570_p2 = scmp.lt.s32.totalorder %s9561_s14, %s9561_s14 }
  0x4f   : > { %p9564_p12 = pnand %p9562_p9, %p9857_p13  ;;  %p9571_p4 = por %p9570_p2, %p9569_p1 }
  0x51   : > { %p9565_p0 = pneg %p9564_p12 }
  0x53   : > { %p9572_p8 = pnand %p9571_p4, %p9565_p0 }
  0x55   : > { %9575 = shalt.err (!%p9572_p8)
}
  0x56   : > { %s13952_s16 = smov 128   ;;  %s9576_s10 = scalar_lea.hbm %s13901_s4, 9216 }
  0x57   : > { %9184 = dma.hbm_to_vmem [thread:$0]  (!%p9843_p11), %s13899_s2, 147456, %s190_s7, [#allocation8], %s13952_s16, %s13952_s16, %s9745_s17  }
  0x58   : > { %p9577_p6 = scmp.ne.s32.totalorder %s13901_s4, %s9576_s10  ;;  %p9583_p10 = scmp.lt.u32.totalorder %s9576_s10, %s13901_s4 }
  0x5a   : > { %p9579_p4 = pnand %p9577_p6, %p9857_p13 }
  0x5c   : > { %p9580_p8 = pneg %p9579_p4 }
  0x5e   : > { %p9585_p3 = pnand %p9583_p10, %p9580_p8 }
  0x60   : > { %9588 = shalt.err (!%p9585_p3)
}
  0x61   : > { %s9589_s7 = scalar_lea.vmem %s9904_s9, 9216  ;;  %p9597_p12 = scmp.lt.s32.totalorder %s9904_s9, %s9904_s9 }
  0x62   : > { %p9590_p5 = scmp.ne.s32.totalorder %s9904_s9, %s9589_s7  ;;  %p9598_p0 = scmp.lt.s32.totalorder %s9589_s7, %s9589_s7 }
  0x64   : > { %p9592_p7 = pnand %p9590_p5, %p9857_p13  ;;  %p9599_p1 = por %p9598_p0, %p9597_p12 }
  0x66   : > { %p9593_p9 = pneg %p9592_p7 }
  0x68   : > { %p9600_p2 = pnand %p9599_p1, %p9593_p9 }
  0x6a   : > { %9603 = shalt.err (!%p9600_p2)
}
  0x6b   : > { %9190 = dma.hbm_to_vmem [thread:$0]  (!%p9843_p11), %s13901_s4, 9216, %s9904_s9, [#allocation11], %s13952_s16, %s13952_s16, %s9745_s17  }
  0x6c   : > { %s9954_s29 = sadd.s32 1, %s9724_s21   ;;  %s30_s15 = sadd.s32 1, %s9720_s20 }
  0x6d   : > { %s27_s12 = ssub.s32 %s9724_s21, %s9954_s29  ;;  %p37_p6 = scmp.ne.s32.totalorder %s9720_s20, %s9716_s19 }
  0x6e   : > { %p28_p13 = scmp.eq.s32.totalorder %s27_s12, 0  ;;  %p38_p4 = scmp.eq.s32.totalorder %s9724_s21, 0 }
  0x6f   : > { %p13953_p10 = scmp.eq.s32.totalorder %s9813_s22, 1  ;;  %p9203_p5 = scmp.lt.s32.totalorder %s9724_s21, 2 }
  0x70   : > { %s9963_s27 = scalar_select %p28_p13, %s9720_s20, %s30_s15  }
  0x71   : > { %p39_p8 = por %p38_p4, %p37_p6  ;;  %p9967_p3 = por %p13953_p10, %p37_p6 }
  0x72   : > { %s229_s8 = sand.u32 1, %s9720_s20   ;;  %s8664_s9 = sshll.u32 %s9724_s21, 12 }
  0x73   : > { %s8075_s10 = sshll.u32 %s229_s8, 8  ;;  %s9977_s28 = scalar_lea.hbm %s13897_s0, %s8664_s9 }
  0x74   : > { %s233_s23 = scalar_lea.vmem [#allocation4], %s8075_s10  ;;  %p9981_p11 = pnand %p9203_p5, %p39_p8 }
  0x75   : > { %s240_s7 = sshll.u32 %s233_s23, 4  ;;  %s9985_s14 = scalar_lea.sflag [#allocation5], %s229_s8  ;;  %s9979_s7 = int_to_ptr.vmem [resolvable:$true] %s240_s7 }
  0x76   : > { %s9604_s12 = scalar_lea.hbm %s9977_s28, 4096  ;;  %p9606_p9 = pneg %p9981_p11 }
  0x77   : > { %p9605_p7 = scmp.ne.s32.totalorder %s9977_s28, %s9604_s12  ;;  %s9609_s9 = scalar_lea.hbm %s13897_s0, 8192 }
  0x78   : > { %p9610_p1 = scmp.lt.u32.totalorder %s9977_s28, %s13897_s0  ;;  %p9611_p2 = scmp.lt.u32.totalorder %s9609_s9, %s9604_s12 }
  0x79   : > { %p9607_p12 = pnand %p9606_p9, %p9605_p7  ;;  %p9613_p6 = scmp.lt.u32.totalorder %s9604_s12, %s9977_s28 }
  0x7a   : > { %p9612_p13 = por %p9611_p2, %p9610_p1 }
  0x7b   : > { %p9608_p0 = pneg %p9607_p12 }
  0x7c   : > { %p9614_p4 = por %p9613_p6, %p9612_p13 }
  0x7e   : > { %p9615_p8 = pnand %p9614_p4, %p9608_p0 }
  0x80   : > { %9618 = shalt.err (!%p9615_p8)
}
  0x81   : > { %s9619_s8 = scalar_lea.vmem %s9979_s7, 4096  ;;  %s9750_s23 = smov [#allocation4]  }
  0x82   : > { %p9620_p10 = scmp.ne.s32.totalorder %s9979_s7, %s9619_s8  ;;  %s9624_s15 = sshll.u32 %s9750_s23, 4  ;;  %s9625_s15 = int_to_ptr.vmem [resolvable:$false] %s9624_s15 }
  0x83   : > { %s9626_s10 = scalar_lea.vmem %s9625_s15, 8192  ;;  %p9627_p12 = scmp.lt.s32.totalorder %s9979_s7, %s9625_s15 }
  0x84   : > { %p9622_p5 = pnand %p9620_p10, %p9606_p9  ;;  %p9628_p1 = scmp.lt.s32.totalorder %s9626_s10, %s9619_s8 }
  0x86   : > { %p9623_p7 = pneg %p9622_p5  ;;  %p9629_p2 = por %p9628_p1, %p9627_p12 }
  0x88   : > { %p9630_p13 = pnand %p9629_p2, %p9623_p7 }
  0x8a   : > { %9633 = shalt.err (!%p9630_p13)
}
  0x8b   : > { %9194 = dma.hbm_to_vmem [thread:$0]  (!%p9981_p11), %s9977_s28, 4096, %s9979_s7, %s9985_s14, %s13952_s16, %s13952_s16, %s9745_s17  }
  0x8c   : > { %p13956_p9 = scmp.ne.s32.totalorder %s13949_s26, 0 }
  0x8e   : > { %252 = sbr.rel (%p13956_p9) target bundleno = 2067 (0x813), region = 40 }
  0x95   : > { %s10019_s12 = sand.u32 1, %s9716_s19   ;;  %p13957_p0 = scmp.ne.s32.totalorder %s13947_s24, 0 }
  0x96   : > { %s8079_s9 = sshll.u32 %s10019_s12, 8  ;;  %s255_s11 = scalar_lea.sflag [#allocation5], %s10019_s12 }
  0x97   : > { %s10023_s13 = scalar_lea.vmem [#allocation4], %s8079_s9 }
  0x98   : > { %9695 = dma.done.wait (%p13957_p0), %s255_s11, 4096  }
  0x99   : > { %9697 = vsyncadd (%p13957_p0), %s255_s11, 4294963200  ;;  %p13958_p11 = scmp.eq.s32.totalorder %s9813_s22, 0 }
  0x9b   : > { %9699 = dma.done.wait (%p13958_p11), [#allocation8], 153600   ;;  %p13959_p6 = pmov %p13958_p11 }
  0x9d   : > { %9701 = vsyncadd (%p13959_p6), [#allocation8], 4294813696  ;;  %p13960_p4 = pmov %p13959_p6 }
  0x9f   : > { %9703 = dma.done.wait (%p13960_p4), [#allocation11], 9472   ;;  %p13961_p8 = pmov %p13960_p4 }
  0xa0   : > { %vm301_vm0 = vcmask 523264   ;;  %v9751_v0 = vmov 0.0   ;;  %s10049_s24 = scalar_lea.vmem [#allocation13], %s8079_s9  ;;  %s9726_s26 = smov 0  }
  0xa1   : > { %9705 = vsyncadd (%p13961_p8), [#allocation11], 4294957824  ;;  %302 = vst.msk [vmem:[#allocation2 + $0x7] sm:$0xff] %vm301_vm0, %v9751_v0 }
  0xa2   : > { %303 = vst.msk [vmem:[#allocation2 + $0xf] sm:$0xff] %vm301_vm0, %v9751_v0  ;;  %304 = vst.msk [vmem:[#allocation2 + $0x17] sm:$0xff] %vm301_vm0, %v9751_v0 }
  0xa3   : > { %305 = vst.msk [vmem:[#allocation2 + $0x19f] sm:$0xff] %vm301_vm0, %v9751_v0  ;;  %306 = vst.msk [vmem:[#allocation2 + $0x1a7] sm:$0xff] %vm301_vm0, %v9751_v0 }
  0xa4   : > { %307 = vst.msk [vmem:[#allocation2 + $0x1af] sm:$0xff] %vm301_vm0, %v9751_v0  ;;  %308 = vst.msk [vmem:[#allocation3 + $0x7] sm:$0xff] %vm301_vm0, %v9751_v0 }
  0xa5   : > { %309 = vst.msk [vmem:[#allocation3 + $0xf] sm:$0xff] %vm301_vm0, %v9751_v0  ;;  %310 = vst.msk [vmem:[#allocation3 + $0x17] sm:$0xff] %vm301_vm0, %v9751_v0 }
  0xa6   : > { %311 = vst.msk [vmem:[#allocation3 + $0x19f] sm:$0xff] %vm301_vm0, %v9751_v0  ;;  %312 = vst.msk [vmem:[#allocation3 + $0x1a7] sm:$0xff] %vm301_vm0, %v9751_v0 }
  0xa7   : > { %313 = vst.msk [vmem:[#allocation3 + $0x1af] sm:$0xff] %vm301_vm0, %v9751_v0 }
  0xa8 LB: >> { %s7937_s17 = smul.u32 24, %s9728_s26  ;;  %v9752_v1 = vmov 0.0   ;;  %s319_s26 = sadd.s32 1, %s9728_s26   ;;  %s9728_s26 = sphi %s9726_s26, %s319_s26  }
  0xa9   : >> { %p316_p10 = scmp.ge.s32.totalorder %s319_s26, 17  }
  0xaa   : >> { %s7938_s16 = scalar_lea.vmem [#allocation2], %s7937_s17  ;;  %s7941_s28 = scalar_lea.vmem [#allocation3], %s7937_s17 }
  0xab   : >> { %8085 = vst.msk [vmem:[%s7938_s16 + $0x18] sm:$0xff] %vm301_vm0, %v9752_v1  ;;  %8086 = vst.msk [vmem:[%s7941_s28 + $0x18] sm:$0xff] %vm301_vm0, %v9752_v1  ;;  %318 = sbr.rel (!%p316_p10) target bundleno = 168 (0xa8), region = 146  ;;  %s9730_s7 = smov (%p316_p10), 0  }
  0xb2 LB: >> { %s7943_s6 = smul.u32 24, %s9732_s7  ;;  %s8089_s14 = sshll.u32 %s9732_s7, 4  ;;  %vm342_vm1 = vcmask 23552   ;;  %v9753_v4 = vmov 0.0   ;;  %s9732_s7 = sphi %s9730_s7, %s331_s7  }
  0xb3   : >> { %s339_s8 = scalar_lea.vmem %s10023_s13, %s8089_s14 [#allocation4]  ;;  %s331_s7 = sadd.s32 1, %s9732_s7  }
  0xb4   : >> { %v340_v2 = vld [vmem:[%s339_s8] sm:$0xff]  ;;  %v341_v3 = vld [vmem:[%s339_s8 + $0x8] sm:$0xff]  ;;  %s7944_s23 = scalar_lea.vmem [#allocation2], %s7943_s6  ;;  %p328_p5 = scmp.ge.s32.totalorder %s331_s7, 16  }
  0xb5   : >> { %8087 = vst.msk [vmem:[%s7944_s23 + $0x20] sm:$0xff] %vm301_vm0, %v9753_v4  ;;  %8088 = vst.msk [vmem:[%s7944_s23 + $0x28] sm:$0xff] %vm301_vm0, %v9753_v4  ;;  %s10058_s15 = smov (%p328_p5), 0  }
  0xb6   : >> { %8090 = vst.msk [vmem:[%s7944_s23 + $0x20] sm:$0xff] %vm342_vm1, %v340_v2  ;;  %8091 = vst.msk [vmem:[%s7944_s23 + $0x28] sm:$0xff] %vm342_vm1, %v341_v3  ;;  %330 = sbr.rel (!%p328_p5) target bundleno = 178 (0xb2), region = 157 }
  0xbd LB: >> { %v403_v5 = vld [vmem:[#allocation2 + $0x20] sm:$0xff]  ;;  %v405_v6 = vld [vmem:[#allocation2 + $0x30] sm:$0xff]  ;;  %s9754_s10 = smov 64   ;;  %v404_v7 = vld [vmem:[#allocation2 + $0x28] sm:$0xff]  ;;  %v13908_v9 = vmov 0.0|0.0   ;;  %s8093_s9 = smul.u32 1152, %s9736_s15  ;;  %s9736_s15 = sphi %s10058_s15, %s350_s15  }
  0xbe   : >> { %550 = vrot.lane.b32.xlu0 %v403_v5, %s9754_s10  ;;  %554 = vrot.lane.b32.xlu1 %v405_v6, %s9754_s10  ;;  %v10065_v8 = vld [vmem:[#allocation2 + $0x38] sm:$0xff]  ;;  %v10073_v10 = vld [vmem:[#allocation2 + $0x40] sm:$0xff]  ;;  %v10075_v11 = vld [vmem:[#allocation2 + $0x48] sm:$0xff]  ;;  %s8092_s26 = sshll.u32 %s9736_s15, 1  ;;  %s350_s15 = sadd.s32 1, %s9736_s15  }
  0xbf   : >> { %8666 = vmatprep.subr.bf16.mxu0 %v13908_v9  ;;  %8702 = vmatprep.subr.bf16.mxu1 %v13908_v9  ;;  %v10079_v12 = vld [vmem:[#allocation2 + $0x50] sm:$0xff]  ;;  %s10083_s11 = scalar_lea.vmem [#allocation9], %s8093_s9  ;;  %v10087_v15 = vld [vmem:[#allocation2 + $0x58] sm:$0xff]  ;;  %v10097_v22 = vld [vmem:[#allocation2 + $0x60] sm:$0xff]  ;;  %s11390_s17 = scalar_lea.vmem [#allocation10], %s8092_s26 }
  0xc0   : >> { %v8094_v13 = vld [vmem:[%s10083_s11 + $0xc0] sm:$0xff]  ;;  %v8095_v14 = vld [vmem:[%s10083_s11 + $0xc8] sm:$0xff]  ;;  %v8096_v17 = vld [vmem:[%s10083_s11 + $0xd0] sm:$0xff]  ;;  %p347_p7 = scmp.ge.s32.totalorder %s350_s15, 8  }
  0xc1   : >> { %v8667_v16 = vpack.c.bf16 %v8095_v14, %v8094_v13  ;;  %v8097_v18 = vld [vmem:[%s10083_s11 + $0xd8] sm:$0xff]  ;;  %v8098_v20 = vld [vmem:[%s10083_s11 + $0xe0] sm:$0xff]  ;;  %v8099_v21 = vld [vmem:[%s10083_s11 + $0xe8] sm:$0xff]  ;;  %s9758_s16 = smov (%p347_p7), 64   ;;  %s9738_s28 = smov (%p347_p7), 0  }
  0xc2   : >> { %552 = vrot.lane.b32.xlu0 %v404_v7, %s9754_s10  ;;  %556 = vrot.lane.b32.xlu1 %v10065_v8, %s9754_s10  ;;  %v8670_v19 = vpack.c.bf16 %v8097_v18, %v8096_v17  ;;  %v10099_v23 = vld [vmem:[#allocation2 + $0x68] sm:$0xff]  ;;  %v8673_v24 = vpack.c.bf16 %v8099_v21, %v8098_v20  ;;  %v8100_v25 = vld [vmem:[%s10083_s11 + $0xf0] sm:$0xff]  ;;  %v8101_v26 = vld [vmem:[%s10083_s11 + $0xf8] sm:$0xff] }
  0xc3   : >> { %8668 = vmatpush1.bf16.msra.mxu0 %v8667_v16  ;;  %v10108_v27 = vld [vmem:[#allocation2 + $0x70] sm:$0xff]  ;;  %v10110_v28 = vld [vmem:[#allocation2 + $0x78] sm:$0xff]  ;;  %v8676_v29 = vpack.c.bf16 %v8101_v26, %v8100_v25  ;;  %v8102_v30 = vld [vmem:[%s10083_s11 + $0x100] sm:$0xff] }
  0xc4   : >> { %8669 = vmatprep.subr.bf16.mxu0 %v13908_v9  ;;  %v8103_v31 = vld [vmem:[%s10083_s11 + $0x108] sm:$0xff]  ;;  %v10119_v33 = vld [vmem:[#allocation2 + $0x80] sm:$0xff]  ;;  %v8104_v36 = vld [vmem:[%s10083_s11 + $0x110] sm:$0xff] }
  0xc5   : >> { %v451_v32 = vld [vmem:[#allocation2 + $0x21] sm:$0xff]  ;;  %v8679_v35 = vpack.c.bf16 %v8103_v31, %v8102_v30  ;;  %v8105_v37 = vld [vmem:[%s10083_s11 + $0x118] sm:$0xff]  ;;  %v10131_v38 = vld [vmem:[#allocation2 + $0x90] sm:$0xff] }
  0xc6   : >> { %558 = vrot.lane.b32.xlu0 %v10073_v10, %s9754_s10  ;;  %560 = vrot.lane.b32.xlu1 %v10075_v11, %s9754_s10  ;;  %v10121_v34 = vld [vmem:[#allocation2 + $0x88] sm:$0xff]  ;;  %v10133_v39 = vld [vmem:[#allocation2 + $0x98] sm:$0xff]  ;;  %v8682_v40 = vpack.c.bf16 %v8105_v37, %v8104_v36  ;;  %v8106_v41 = vld [vmem:[%s10083_s11 + $0x120] sm:$0xff] }
  0xc7   : >> { %8671 = vmatpush1.bf16.msra.mxu0 %v8670_v19  ;;  %8118 = vmatprep.mubr.msk.f32.mxu0 %vm301_vm0, %v451_v32  ;;  %v8107_v42 = vld [vmem:[%s10083_s11 + $0x128] sm:$0xff]  ;;  %v10142_v43 = vld [vmem:[#allocation2 + $0xa0] sm:$0xff]  ;;  %v8108_v46 = vld [vmem:[%s10083_s11 + $0x130] sm:$0xff] }
  0xc8   : >> { %8672 = vmatprep.subr.bf16.mxu0 %v13908_v9  ;;  %v420_v44 = vld [vmem:[#allocation2 + $0xa8] sm:$0xff]  ;;  %v8685_v45 = vpack.c.bf16 %v8107_v42, %v8106_v41  ;;  %v8109_v47 = vld [vmem:[%s10083_s11 + $0x138] sm:$0xff]  ;;  %v10150_v48 = vld [vmem:[#allocation2 + $0xb0] sm:$0xff] }
  0xc9   : >> { %v422_v49 = vld [vmem:[#allocation2 + $0xb8] sm:$0xff]  ;;  %v8688_v50 = vpack.c.bf16 %v8109_v47, %v8108_v46  ;;  %v738_v51 = vld [vmem:[%s10083_s11] sm:$0xff]  ;;  %v739_v52 = vld [vmem:[%s10083_s11 + $0x8] sm:$0xff] }
  0xca   : >> { %562 = vrot.lane.b32.xlu0 %v10079_v12, %s9754_s10  ;;  %564 = vrot.lane.b32.xlu1 %v10087_v15, %s9754_s10  ;;  %v8110_v53 = vld [vmem:[%s10083_s11 + $0x140] sm:$0xff]  ;;  %v8111_v54 = vld [vmem:[%s10083_s11 + $0x148] sm:$0xff]  ;;  %v8703_v55 = vpack.c.bf16 %v739_v52, %v738_v51  ;;  %v10171_v0 = vld [vmem:[#allocation2 + $0xd0] sm:$0xff] }
  0xcb   : >> { %8674 = vmatpush1.bf16.msra.mxu0 %v8673_v24  ;;  %v10160_v56 = vld [vmem:[#allocation2 + $0xc0] sm:$0xff]  ;;  %v424_v57 = vld [vmem:[#allocation2 + $0xc8] sm:$0xff]  ;;  %v740_v58 = vld [vmem:[%s10083_s11 + $0x10] sm:$0xff]  ;;  %v8691_v59 = vpack.c.bf16 %v8111_v54, %v8110_v53 }
  0xcc   : >> { %8675 = vmatprep.subr.bf16.mxu0 %v13908_v9  ;;  %8704 = vmatpush1.bf16.msra.mxu1 %v8703_v55  ;;  %v741_v60 = vld [vmem:[%s10083_s11 + $0x18] sm:$0xff]  ;;  %v8112_v61 = vld [vmem:[%s10083_s11 + $0x150] sm:$0xff]  ;;  %v742_v3 = vld [vmem:[%s10083_s11 + $0x20] sm:$0xff] }
  0xcd   : >> { %8705 = vmatprep.subr.bf16.mxu1 %v13908_v9  ;;  %v8113_v62 = vld [vmem:[%s10083_s11 + $0x158] sm:$0xff]  ;;  %v8706_v63 = vpack.c.bf16 %v741_v60, %v740_v58  ;;  %v743_v4 = vld [vmem:[%s10083_s11 + $0x28] sm:$0xff]  ;;  %v8114_v5 = vld [vmem:[%s10083_s11 + $0x160] sm:$0xff] }
  0xce   : >> { %566 = vrot.lane.b32.xlu0 %v10097_v22, %s9754_s10  ;;  %568 = vrot.lane.b32.xlu1 %v10099_v23, %s9754_s10  ;;  %v426_v1 = vld [vmem:[#allocation2 + $0xd8] sm:$0xff]  ;;  %v8694_v2 = vpack.c.bf16 %v8113_v62, %v8112_v61  ;;  %v8115_v6 = vld [vmem:[%s10083_s11 + $0x168] sm:$0xff]  ;;  %v8709_v7 = vpack.c.bf16 %v743_v4, %v742_v3  ;;  %v10182_v13 = vld [vmem:[#allocation2 + $0xe0] sm:$0xff] }
  0xcf   : >> { %8677 = vmatpush1.bf16.msra.mxu0 %v8676_v29  ;;  %v428_v14 = vld [vmem:[#allocation2 + $0xe8] sm:$0xff]  ;;  %v744_v16 = vld [vmem:[%s10083_s11 + $0x30] sm:$0xff]  ;;  %v8697_v17 = vpack.c.bf16 %v8115_v6, %v8114_v5  ;;  %v745_v18 = vld [vmem:[%s10083_s11 + $0x38] sm:$0xff] }
  0xd0   : >> { %8678 = vmatprep.subr.bf16.mxu0 %v13908_v9  ;;  %8707 = vmatpush1.bf16.msra.mxu1 %v8706_v63  ;;  %v8116_v19 = vld [vmem:[%s10083_s11 + $0x170] sm:$0xff]  ;;  %v8117_v20 = vld [vmem:[%s10083_s11 + $0x178] sm:$0xff]  ;;  %v8712_v21 = vpack.c.bf16 %v745_v18, %v744_v16  ;;  %v746_v29 = vld [vmem:[%s10083_s11 + $0x40] sm:$0xff] }
  0xd1   : >> { %8708 = vmatprep.subr.bf16.mxu1 %v13908_v9  ;;  %v10193_v24 = vld [vmem:[#allocation2 + $0xf0] sm:$0xff]  ;;  %v430_v25 = vld [vmem:[#allocation2 + $0xf8] sm:$0xff]  ;;  %v8700_v26 = vpack.c.bf16 %v8117_v20, %v8116_v19  ;;  %v747_v30 = vld [vmem:[%s10083_s11 + $0x48] sm:$0xff] }
  0xd2   : >> { %570 = vrot.lane.b32.xlu0 %v10108_v27, %s9754_s10  ;;  %572 = vrot.lane.b32.xlu1 %v10110_v28, %s9754_s10  ;;  %v8715_v31 = vpack.c.bf16 %v747_v30, %v746_v29  ;;  %v10202_v32 = vld [vmem:[#allocation2 + $0x100] sm:$0xff]  ;;  %v748_v36 = vld [vmem:[%s10083_s11 + $0x50] sm:$0xff]  ;;  %v749_v37 = vld [vmem:[%s10083_s11 + $0x58] sm:$0xff] }
  0xd3   : >> { %8680 = vmatpush1.bf16.msra.mxu0 %v8679_v35  ;;  %v432_v35 = vld [vmem:[#allocation2 + $0x108] sm:$0xff]  ;;  %v10211_v41 = vld [vmem:[#allocation2 + $0x110] sm:$0xff]  ;;  %v434_v42 = vld [vmem:[#allocation2 + $0x118] sm:$0xff] }
  0xd4   : >> { %8681 = vmatprep.subr.bf16.mxu0 %v13908_v9  ;;  %8710 = vmatpush1.bf16.msra.mxu1 %v8709_v7  ;;  %v10219_v47 = vld [vmem:[#allocation2 + $0x120] sm:$0xff]  ;;  %v753_v51 = vld [vmem:[%s10083_s11 + $0x78] sm:$0xff]  ;;  %v10227_v53 = vld [vmem:[#allocation2 + $0x130] sm:$0xff] }
  0xd5   : >> { %8711 = vmatprep.subr.bf16.mxu1 %v13908_v9  ;;  %v438_v54 = vld [vmem:[#allocation2 + $0x138] sm:$0xff]  ;;  %v754_v55 = vld [vmem:[%s10083_s11 + $0x80] sm:$0xff]  ;;  %v440_v60 = vld [vmem:[#allocation2 + $0x148] sm:$0xff] }
  0xd6   : >> { %574 = vrot.lane.b32.xlu0 %v10119_v33, %s9754_s10  ;;  %576 = vrot.lane.b32.xlu1 %v10121_v34, %s9754_s10  ;;  %v756_v61 = vld [vmem:[%s10083_s11 + $0x90] sm:$0xff]  ;;  %v757_v62 = vld [vmem:[%s10083_s11 + $0x98] sm:$0xff]  ;;  %v10251_v6 = vld [vmem:[#allocation2 + $0x160] sm:$0xff] }
  0xd7   : >> { %8683 = vmatpush1.bf16.msra.mxu0 %v8682_v40  ;;  %v8718_v40 = vpack.c.bf16 %v749_v37, %v748_v36  ;;  %v8730_v63 = vpack.c.bf16 %v757_v62, %v756_v61  ;;  %v758_v3 = vld [vmem:[%s10083_s11 + $0xa0] sm:$0xff]  ;;  %v759_v4 = vld [vmem:[%s10083_s11 + $0xa8] sm:$0xff]  ;;  %v761_v16 = vld [vmem:[%s10083_s11 + $0xb8] sm:$0xff] }
  0xd8   : >> { %8684 = vmatprep.subr.bf16.mxu0 %v13908_v9  ;;  %8713 = vmatpush1.bf16.msra.mxu1 %v8712_v21  ;;  %v8733_v5 = vpack.c.bf16 %v759_v4, %v758_v3  ;;  %v444_v7 = vld [vmem:[#allocation2 + $0x168] sm:$0xff]  ;;  %v10259_v18 = vld [vmem:[#allocation2 + $0x170] sm:$0xff]  ;;  %v446_v19 = vld [vmem:[#allocation2 + $0x178] sm:$0xff] }
  0xd9   : >> { %8714 = vmatprep.subr.bf16.mxu1 %v13908_v9  ;;  %v448_v20 = vld [vmem:[#allocation2 + $0x9] sm:$0xff]  ;;  %v10266_v21 = vld [vmem:[#allocation2 + $0x180] sm:$0xff]  ;;  %v767_v29 = vld [vmem:[#allocation2 + $0x198] sm:$0xff] }
  0xda   : >> { %578 = vrot.lane.b32.xlu0 %v10131_v38, %s9754_s10  ;;  %580 = vrot.lane.b32.xlu1 %v10133_v39, %s9754_s10  ;;  %v400_v30 = vld [vmem:[#allocation2 + $0x8] sm:$0xff]  ;;  %v355_v37 = vld [vmem:[#allocation2 + $0x1f] sm:$0xff] }
  0xdb   : >> { %8686 = vmatpush1.bf16.msra.mxu0 %v8685_v45  ;;  %v751_v45 = vld [vmem:[%s10083_s11 + $0x68] sm:$0xff]  ;;  %8166 = vmatprep.mubr.msk.f32.mxu1 %vm301_vm0, %v448_v20  ;;  %v8221_v61 = vld [vmem:[%s10083_s11 + $0x1b8] sm:$0xff]  ;;  %v8222_v4 = vld [vmem:[%s10083_s11 + $0x1c0] sm:$0xff] }
  0xdc   : >> { %8687 = vmatprep.subr.bf16.mxu0 %v13908_v9  ;;  %8716 = vmatpush1.bf16.msra.mxu1 %v8715_v31  ;;  %v401_v31 = vld [vmem:[#allocation2 + $0x10] sm:$0xff]  ;;  %v8215_v36 = vld [vmem:[%s10083_s11 + $0x188] sm:$0xff]  ;;  %v359_v3 = vld [vmem:[#allocation2 + $0x3f] sm:$0xff] }
  0xdd   : >> { %8717 = vmatprep.subr.bf16.mxu1 %v13908_v9  ;;  %v360_v20 = vld [vmem:[#allocation2 + $0x47] sm:$0xff] }
  0xde   : >> { %582 = vrot.lane.b32.xlu0 %v10142_v43, %s9754_s10  ;;  %584 = vrot.lane.b32.xlu1 %v420_v44, %s9754_s10  ;;  %v750_v44 = vld [vmem:[%s10083_s11 + $0x60] sm:$0xff] }
  0xdf   : >> { %8689 = vmatpush1.bf16.msra.mxu0 %v8688_v50  ;;  %v8721_v46 = vpack.c.bf16 %v751_v45, %v750_v44  ;;  %v752_v50 = vld [vmem:[%s10083_s11 + $0x70] sm:$0xff] }
  0xe0   : >> { %8690 = vmatprep.subr.bf16.mxu0 %v13908_v9  ;;  %8719 = vmatpush1.bf16.msra.mxu1 %v8718_v40  ;;  %v8724_v52 = vpack.c.bf16 %v753_v51, %v752_v50  ;;  %v8218_v50 = vld [vmem:[%s10083_s11 + $0x1a0] sm:$0xff]  ;;  %v8219_v51 = vld [vmem:[%s10083_s11 + $0x1a8] sm:$0xff] }
  0xe1   : >> { %8720 = vmatprep.subr.bf16.mxu1 %v13908_v9 }
  0xe2   : >> { %586 = vrot.lane.b32.xlu0 %v10150_v48, %s9754_s10  ;;  %588 = vrot.lane.b32.xlu1 %v422_v49, %s9754_s10  ;;  %v436_v49 = vld [vmem:[#allocation2 + $0x128] sm:$0xff] }
  0xe3   : >> { %8692 = vmatpush1.bf16.msra.mxu0 %v8691_v59  ;;  %v10235_v59 = vld [vmem:[#allocation2 + $0x140] sm:$0xff] }
  0xe4   : >> { %8693 = vmatprep.subr.bf16.mxu0 %v13908_v9  ;;  %8722 = vmatpush1.bf16.msra.mxu1 %v8721_v46 }
  0xe5   : >> { %8723 = vmatprep.subr.bf16.mxu1 %v13908_v9 }
  0xe6   : >> { %590 = vrot.lane.b32.xlu0 %v10160_v56, %s9754_s10  ;;  %592 = vrot.lane.b32.xlu1 %v424_v57, %s9754_s10  ;;  %v755_v57 = vld [vmem:[%s10083_s11 + $0x88] sm:$0xff] }
  0xe7   : >> { %8695 = vmatpush1.bf16.msra.mxu0 %v8694_v2  ;;  %v8727_v58 = vpack.c.bf16 %v755_v57, %v754_v55  ;;  %v442_v2 = vld [vmem:[#allocation2 + $0x158] sm:$0xff]  ;;  %v8745_v55 = vpack.c.bf16 %v8219_v51, %v8218_v50 }
  0xe8   : >> { %8696 = vmatprep.subr.bf16.mxu0 %v13908_v9  ;;  %8725 = vmatpush1.bf16.msra.mxu1 %v8724_v52  ;;  %v1643_v51 = vld [vmem:[#allocation2 + $0xd8] sm:$0xff] }
  0xe9   : >> { %8726 = vmatprep.subr.bf16.mxu1 %v13908_v9 }
  0xea   : >> { %594 = vrot.lane.b32.xlu0 %v10171_v0, %s9754_s10  ;;  %596 = vrot.lane.b32.xlu1 %v426_v1, %s9754_s10  ;;  %v10243_v1 = vld [vmem:[#allocation2 + $0x150] sm:$0xff] }
  0xeb   : >> { %8698 = vmatpush1.bf16.msra.mxu0 %v8697_v17 }
  0xec   : >> { %8699 = vmatprep.subr.bf16.mxu0 %v13908_v9  ;;  %8728 = vmatpush1.bf16.msra.mxu1 %v8727_v58  ;;  %v358_v58 = vld [vmem:[#allocation2 + $0x37] sm:$0xff] }
  0xed   : >> { %8729 = vmatprep.subr.bf16.mxu1 %v13908_v9 }
  0xee   : >> { %598 = vrot.lane.b32.xlu0 %v10182_v13, %s9754_s10  ;;  %600 = vrot.lane.b32.xlu1 %v428_v14, %s9754_s10  ;;  %v760_v14 = vld [vmem:[%s10083_s11 + $0xb0] sm:$0xff] }
  0xef   : >> { %8701 = vmatpush1.bf16.msra.mxu0 %v8700_v26  ;;  %v8736_v17 = vpack.c.bf16 %v761_v16, %v760_v14  ;;  %v10271_v26 = vld [vmem:[#allocation2 + $0x190] sm:$0xff] }
  0xf0   : >> { %8738 = vmatprep.subr.bf16.mxu0 %v13908_v9  ;;  %8731 = vmatpush1.bf16.msra.mxu1 %v8730_v63  ;;  %v10343_v63 = vld [vmem:[#allocation2 + $0x41] sm:$0xff]  ;;  %v10358_v14 = vld [vmem:[#allocation2 + $0x49] sm:$0xff] }
  0xf1   : >> { %8732 = vmatprep.subr.bf16.mxu1 %v13908_v9 }
  0xf2   : >> { %602 = vrot.lane.b32.xlu0 %v10193_v24, %s9754_s10  ;;  %604 = vrot.lane.b32.xlu1 %v430_v25, %s9754_s10  ;;  %v765_v25 = vld [vmem:[#allocation2 + $0x188] sm:$0xff] }
  0xf4   : >> { %8734 = vmatpush1.bf16.msra.mxu1 %v8733_v5  ;;  %v8223_v5 = vld [vmem:[%s10083_s11 + $0x1c8] sm:$0xff] }
  0xf5   : >> { %8735 = vmatprep.subr.bf16.mxu1 %v13908_v9  ;;  %v8751_v16 = vpack.c.bf16 %v8223_v5, %v8222_v4  ;;  %v8232_v4 = vld [vmem:[%s10083_s11 + $0x210] sm:$0xff] }
  0xf6   : >> { %606 = vrot.lane.b32.xlu0 %v10202_v32, %s9754_s10  ;;  %608 = vrot.lane.b32.xlu1 %v432_v35, %s9754_s10  ;;  %v402_v35 = vld [vmem:[#allocation2 + $0x18] sm:$0xff] }
  0xf8   : >> { %8737 = vmatpush1.bf16.msra.mxu1 %v8736_v17 }
  0xf9   : >> { %8774 = vmatprep.subr.bf16.mxu1 %v13908_v9 }
  0xfa   : >> { %610 = vrot.lane.b32.xlu0 %v10211_v41, %s9754_s10  ;;  %612 = vrot.lane.b32.xlu1 %v434_v42, %s9754_s10  ;;  %v10296_v42 = vld [vmem:[#allocation2 + $0x29] sm:$0xff] }
  0xfe   : >> { %614 = vrot.lane.b32.xlu0 %v10219_v47, %s9754_s10  ;;  %616 = vrot.lane.b32.xlu1 %v436_v49, %s9754_s10  ;;  %v357_v49 = vld [vmem:[#allocation2 + $0x2f] sm:$0xff] }
 0x102   : >> { %618 = vrot.lane.b32.xlu0 %v10227_v53, %s9754_s10  ;;  %620 = vrot.lane.b32.xlu1 %v438_v54, %s9754_s10  ;;  %v10326_v54 = vld [vmem:[#allocation2 + $0x39] sm:$0xff] }
 0x106   : >> { %622 = vrot.lane.b32.xlu0 %v10235_v59, %s9754_s10  ;;  %624 = vrot.lane.b32.xlu1 %v440_v60, %s9754_s10  ;;  %v8220_v60 = vld [vmem:[%s10083_s11 + $0x1b0] sm:$0xff] }
 0x10a   : >> { %626 = vrot.lane.b32.xlu0 %v10243_v1, %s9754_s10  ;;  %628 = vrot.lane.b32.xlu1 %v442_v2, %s9754_s10 }
 0x10e   : >> { %630 = vrot.lane.b32.xlu0 %v10251_v6, %s9754_s10  ;;  %632 = vrot.lane.b32.xlu1 %v444_v7, %s9754_s10 }
 0x112   : >> { %634 = vrot.lane.b32.xlu0 %v10259_v18, %s9754_s10  ;;  %636 = vrot.lane.b32.xlu1 %v446_v19, %s9754_s10 }
 0x116   : >> { %638 = vrot.lane.b32.xlu0 %v10266_v21, %s9754_s10  ;;  %774 = vrot.lane.b32.xlu1 %v765_v25, %s9754_s10  ;;  %v8225_v25 = vld [vmem:[%s10083_s11 + $0x1d8] sm:$0xff] }
 0x11a   : >> { %776 = vrot.lane.b32.xlu0 %v10271_v26, %s9754_s10  ;;  %778 = vrot.lane.b32.xlu1 %v767_v29, %s9754_s10 }
 0x11e   : >> { %544 = vrot.lane.b32.xlu0 %v400_v30, %s9754_s10  ;;  %1767 = vrot.lane.b32.xlu1 %v10065_v8, %s9754_s10  ;;  %v8214_v8 = vld [vmem:[%s10083_s11 + $0x180] sm:$0xff]  ;;  %v10372_v30 = vld [vmem:[#allocation2 + $0x51] sm:$0xff] }
 0x11f   : >> { %v8739_v40 = vpack.c.bf16 %v8215_v36, %v8214_v8  ;;  %v361_v8 = vld [vmem:[#allocation2 + $0x4f] sm:$0xff]  ;;  %v8226_v36 = vld [vmem:[%s10083_s11 + $0x1e0] sm:$0xff] }
 0x122   : >> { %546 = vrot.lane.b32.xlu0 %v401_v31, %s9754_s10  ;;  %1769 = vrot.lane.b32.xlu1 %v10073_v10, %s9754_s10 }
 0x126   : >> { %548 = vrot.lane.b32.xlu0 %v402_v35, %s9754_s10  ;;  %1771 = vrot.lane.b32.xlu1 %v10075_v11, %s9754_s10  ;;  %v8216_v11 = vld [vmem:[%s10083_s11 + $0x190] sm:$0xff] }
 0x12a   : >> { %1773 = vrot.lane.b32.xlu0 %v10079_v12, %s9754_s10  ;;  %1775 = vrot.lane.b32.xlu1 %v10087_v15, %s9754_s10  ;;  %v8217_v12 = vld [vmem:[%s10083_s11 + $0x198] sm:$0xff]  ;;  %v356_v15 = vld [vmem:[#allocation2 + $0x27] sm:$0xff] }
 0x12e   : >> { %1777 = vrot.lane.b32.xlu0 %v10097_v22, %s9754_s10  ;;  %1779 = vrot.lane.b32.xlu1 %v10099_v23, %s9754_s10  ;;  %v10308_v22 = vld [vmem:[#allocation2 + $0x31] sm:$0xff]  ;;  %v8742_v23 = vpack.c.bf16 %v8217_v12, %v8216_v11 }
 0x130   : >> { %v551_v10 = vpop.permute.xlu0 %550  ;;  %v555_v45 = vpop.permute.xlu1 %554 }
 0x131   : >> { %v10301_v44 = vsel %vm301_vm0, %v355_v37, %v551_v10  ;;  %v10324_v52 = vsel %vm301_vm0, %v357_v49, %v555_v45  ;;  %v8227_v37 = vld [vmem:[%s10083_s11 + $0x1e8] sm:$0xff]  ;;  %v10388_v10 = vld [vmem:[#allocation2 + $0x59] sm:$0xff] }
 0x132   : >> { %1021 = vmatmul.mubr.f32.vlgmr.msra.gmra.mrb[0].mxu0 %v10301_v44  ;;  %1781 = vrot.lane.b32.xlu0 %v10108_v27, %s9754_s10  ;;  %v8757_v11 = vpack.c.bf16 %v8227_v37, %v8226_v36  ;;  %v362_v45 = vld [vmem:[#allocation2 + $0x57] sm:$0xff]  ;;  %v10404_v49 = vld [vmem:[#allocation2 + $0x61] sm:$0xff] }
 0x133   : >> { %8740 = vmatpush1.bf16.msra.mxu0 %v8739_v40  ;;  %8119 = vmatprep.mubr.msk.f32.mxu0 %vm301_vm0, %v10296_v42  ;;  %v10454_v36 = vld [vmem:[#allocation2 + $0x79] sm:$0xff] }
 0x134   : >> { %v553_v46 = vpop.permute.xlu0 %552  ;;  %8741 = vmatprep.subr.bf16.mxu0 %v13908_v9  ;;  %1783 = vrot.lane.b32.xlu1 %v10110_v28, %s9754_s10  ;;  %v557_v28 = vpop.permute.xlu1 %556  ;;  %v366_v37 = vld [vmem:[#allocation2 + $0x77] sm:$0xff] }
 0x135   : >> { %v10316_v27 = vsel %vm301_vm0, %v356_v15, %v553_v46  ;;  %v10341_v62 = vsel %vm301_vm0, %v358_v58, %v557_v28  ;;  %v8230_v28 = vld [vmem:[%s10083_s11 + $0x200] sm:$0xff] }
 0x136   : >> { %1026 = vmatmul.mubr.f32.gmra.mrb[2].mxu0 %v10316_v27  ;;  %1785 = vrot.lane.b32.xlu0 %v10119_v33, %s9754_s10  ;;  %v13915_v33 = vmov 0  }
 0x137   : >> { %8120 = vmatprep.mubr.msk.f32.mxu0 %vm301_vm0, %v10308_v22  ;;  %8743 = vmatpush1.bf16.msra.mxu0 %v8742_v23  ;;  %v8228_v23 = vld [vmem:[%s10083_s11 + $0x1f0] sm:$0xff] }
 0x138   : >> { %v559_v57 = vpop.permute.xlu0 %558  ;;  %8744 = vmatprep.subr.bf16.mxu0 %v13908_v9  ;;  %1787 = vrot.lane.b32.xlu1 %v10121_v34, %s9754_s10  ;;  %v8748_v34 = vpack.c.bf16 %v8221_v61, %v8220_v60  ;;  %v561_v19 = vpop.permute.xlu1 %560  ;;  %v10420_v60 = vld [vmem:[#allocation2 + $0x69] sm:$0xff] }
 0x139   : >> { %9292 = vset.pattern.permute.xlu0 %v13915_v33  ;;  %9291 = vset.pattern.permute.xlu1 %v13915_v33  ;;  %v10356_v7 = vsel %vm301_vm0, %v359_v3, %v559_v57  ;;  %v10370_v29 = vsel %vm301_vm0, %v360_v20, %v561_v19  ;;  %v363_v57 = vld [vmem:[#allocation2 + $0x5f] sm:$0xff]  ;;  %v364_v3 = vld [vmem:[#allocation2 + $0x67] sm:$0xff]  ;;  %v365_v20 = vld [vmem:[#allocation2 + $0x6f] sm:$0xff] }
 0x13a   : >> { %1031 = vmatmul.mubr.f32.gmra.mrb[4].mxu0 %v10324_v52  ;;  %1789 = vrot.lane.b32.xlu0 %v10131_v38, %s9754_s10  ;;  %v1637_v38 = vld [vmem:[#allocation2 + $0xa8] sm:$0xff] }
 0x13b   : >> { %8121 = vmatprep.mubr.msk.f32.mxu0 %vm301_vm0, %v10326_v54  ;;  %8746 = vmatpush1.bf16.msra.mxu0 %v8745_v55 }
 0x13c   : >> { %v563_v2 = vpop.permute.xlu0 %562  ;;  %8747 = vmatprep.subr.bf16.mxu0 %v13908_v9  ;;  %1791 = vrot.lane.b32.xlu1 %v10133_v39, %s9754_s10  ;;  %v8224_v39 = vld [vmem:[%s10083_s11 + $0x1d0] sm:$0xff]  ;;  %v565_v15 = vpop.permute.xlu1 %564 }
 0x13d   : >> { %v8754_v31 = vpack.c.bf16 %v8225_v25, %v8224_v39  ;;  %v10386_v40 = vsel %vm301_vm0, %v361_v8, %v563_v2  ;;  %v10402_v46 = vsel %vm301_vm0, %v362_v45, %v565_v15  ;;  %v8234_v39 = vld [vmem:[%s10083_s11 + $0x220] sm:$0xff]  ;;  %v8235_v25 = vld [vmem:[%s10083_s11 + $0x228] sm:$0xff] }
 0x13e   : >> { %1036 = vmatmul.mubr.f32.gmra.mrb[6].mxu0 %v10341_v62  ;;  %1793 = vrot.lane.b32.xlu0 %v10142_v43, %s9754_s10  ;;  %v1639_v43 = vld [vmem:[#allocation2 + $0xb8] sm:$0xff] }
 0x13f   : >> { %8122 = vmatprep.mubr.msk.f32.mxu0 %vm301_vm0, %v10343_v63  ;;  %8749 = vmatpush1.bf16.msra.mxu0 %v8748_v34  ;;  %v367_v15 = vld [vmem:[#allocation2 + $0x7f] sm:$0xff] }
 0x140   : >> { %v567_v17 = vpop.permute.xlu0 %566  ;;  %8750 = vmatprep.subr.bf16.mxu0 %v13908_v9  ;;  %1795 = vrot.lane.b32.xlu1 %v1637_v38, %s9754_s10  ;;  %v569_v2 = vpop.permute.xlu1 %568  ;;  %v10435_v38 = vld [vmem:[#allocation2 + $0x71] sm:$0xff] }
 0x141   : >> { %v10418_v58 = vsel %vm301_vm0, %v363_v57, %v567_v17  ;;  %v10433_v5 = vsel %vm301_vm0, %v364_v3, %v569_v2  ;;  %v1645_v17 = vld [vmem:[#allocation2 + $0xe8] sm:$0xff] }
 0x142   : >> { %1041 = vmatmul.mubr.f32.gmra.mrb[8].mxu0 %v10356_v7  ;;  %1797 = vrot.lane.b32.xlu0 %v10150_v48, %s9754_s10  ;;  %v1641_v48 = vld [vmem:[#allocation2 + $0xc8] sm:$0xff] }
 0x143   : >> { %8123 = vmatprep.mubr.msk.f32.mxu0 %vm301_vm0, %v10358_v14  ;;  %8752 = vmatpush1.bf16.msra.mxu0 %v8751_v16  ;;  %v369_v2 = vld [vmem:[#allocation2 + $0x8f] sm:$0xff] }
 0x144   : >> { %v10374_v35 = vpop.permute.xlu0 %570  ;;  %8753 = vmatprep.subr.bf16.mxu0 %v13908_v9  ;;  %1799 = vrot.lane.b32.xlu1 %v1639_v43, %s9754_s10  ;;  %v8769_v43 = vpack.c.bf16 %v8235_v25, %v8234_v39  ;;  %v573_v8 = vpop.permute.xlu1 %572  ;;  %v371_v39 = vld [vmem:[#allocation2 + $0x9f] sm:$0xff] }
 0x146   : >> { %1046 = vmatmul.mubr.f32.gmra.mrb[10].mxu0 %v10370_v29  ;;  %1801 = vrot.lane.b32.xlu0 %v10160_v56, %s9754_s10  ;;  %v8229_v56 = vld [vmem:[%s10083_s11 + $0x1f8] sm:$0xff] }
 0x147   : >> { %8124 = vmatprep.mubr.msk.f32.mxu0 %vm301_vm0, %v10372_v30  ;;  %8755 = vmatpush1.bf16.msra.mxu0 %v8754_v31  ;;  %v8760_v50 = vpack.c.bf16 %v8229_v56, %v8228_v23  ;;  %v10482_v56 = vld [vmem:[#allocation2 + $0x89] sm:$0xff] }
 0x148   : >> { %v10390_v12 = vpop.permute.xlu0 %574  ;;  %8756 = vmatprep.subr.bf16.mxu0 %v13908_v9  ;;  %1803 = vrot.lane.b32.xlu1 %v1641_v48, %s9754_s10  ;;  %v577_v23 = vpop.permute.xlu1 %576 }
 0x14a   : >> { %1051 = vmatmul.mubr.f32.gmra.mrb[12].mxu0 %v10386_v40  ;;  %1805 = vrot.lane.b32.xlu0 %v10171_v0, %s9754_s10  ;;  %v8231_v0 = vld [vmem:[%s10083_s11 + $0x208] sm:$0xff] }
 0x14b   : >> { %8125 = vmatprep.mubr.msk.f32.mxu0 %vm301_vm0, %v10388_v10  ;;  %8758 = vmatpush1.bf16.msra.mxu0 %v8757_v11  ;;  %v8763_v61 = vpack.c.bf16 %v8231_v0, %v8230_v28  ;;  %v10467_v11 = vld [vmem:[#allocation2 + $0x81] sm:$0xff] }
 0x14c   : >> { %v10406_v55 = vpop.permute.xlu0 %578  ;;  %8759 = vmatprep.subr.bf16.mxu0 %v13908_v9  ;;  %1807 = vrot.lane.b32.xlu1 %v1643_v51, %s9754_s10  ;;  %v8236_v51 = vld [vmem:[%s10083_s11 + $0x230] sm:$0xff]  ;;  %v1649_v28 = vld [vmem:[#allocation2 + $0x108] sm:$0xff] }
 0x14e   : >> { %1056 = vmatmul.mubr.f32.gmra.mrb[14].mxu0 %v10402_v46  ;;  %1809 = vrot.lane.b32.xlu0 %v10182_v13, %s9754_s10  ;;  %v8233_v13 = vld [vmem:[%s10083_s11 + $0x218] sm:$0xff] }
 0x14f   : >> { %8126 = vmatprep.mubr.msk.f32.mxu0 %vm301_vm0, %v10404_v49  ;;  %8761 = vmatpush1.bf16.msra.mxu0 %v8760_v50  ;;  %v8766_v16 = vpack.c.bf16 %v8233_v13, %v8232_v4  ;;  %v368_v50 = vld [vmem:[#allocation2 + $0x87] sm:$0xff]  ;;  %v581_v4 = vpop.permute.xlu1 %580  ;;  %v10511_v13 = vld [vmem:[#allocation2 + $0x99] sm:$0xff] }
 0x150   : >> { %v10422_v34 = vpop.permute.xlu0 %582  ;;  %8762 = vmatprep.subr.bf16.mxu0 %v13908_v9  ;;  %1811 = vrot.lane.b32.xlu1 %v1645_v17, %s9754_s10  ;;  %v10492_v57 = vsel %vm301_vm0, %v368_v50, %v577_v23  ;;  %v373_v23 = vld [vmem:[#allocation2 + $0xaf] sm:$0xff] }
 0x152   : >> { %1061 = vmatmul.mubr.f32.gmra.mrb[16].mxu0 %v10418_v58  ;;  %1813 = vrot.lane.b32.xlu0 %v10193_v24, %s9754_s10  ;;  %v10450_v24 = vsel %vm301_vm0, %v365_v20, %v10374_v35  ;;  %v1647_v35 = vld [vmem:[#allocation2 + $0xf8] sm:$0xff]  ;;  %v10523_v20 = vld [vmem:[#allocation2 + $0xa1] sm:$0xff] }
 0x153   : >> { %8127 = vmatprep.mubr.msk.f32.mxu0 %vm301_vm0, %v10420_v60  ;;  %8764 = vmatpush1.bf16.msra.mxu0 %v8763_v61  ;;  %v10496_v61 = vld [vmem:[#allocation2 + $0x91] sm:$0xff] }
 0x154   : >> { %v10437_v19 = vpop.permute.xlu0 %586  ;;  %8765 = vmatprep.subr.bf16.mxu0 %v13908_v9  ;;  %1815 = vrot.lane.b32.xlu1 %v1647_v35, %s9754_s10  ;;  %v1653_v35 = vld [vmem:[#allocation2 + $0x128] sm:$0xff] }
 0x156   : >> { %1066 = vmatmul.mubr.f32.gmra.mrb[18].mxu0 %v10433_v5  ;;  %1817 = vrot.lane.b32.xlu0 %v10202_v32, %s9754_s10  ;;  %v10463_v32 = vsel %vm301_vm0, %v366_v37, %v573_v8  ;;  %v10537_v8 = vld [vmem:[#allocation2 + $0xa9] sm:$0xff] }
 0x157   : >> { %8128 = vmatprep.mubr.msk.f32.mxu0 %vm301_vm0, %v10435_v38  ;;  %8767 = vmatpush1.bf16.msra.mxu0 %v8766_v16  ;;  %v370_v16 = vld [vmem:[#allocation2 + $0x97] sm:$0xff]  ;;  %v372_v37 = vld [vmem:[#allocation2 + $0xa7] sm:$0xff] }
 0x158   : >> { %v10452_v31 = vpop.permute.xlu0 %590  ;;  %8768 = vmatprep.subr.bf16.mxu0 %v13908_v9  ;;  %1819 = vrot.lane.b32.xlu1 %v1649_v28, %s9754_s10  ;;  %v1668_v28 = vld [vmem:[#allocation2 + $0x1a0] sm:$0xff] }
 0x15a   : >> { %1071 = vmatmul.mubr.f32.gmra.mrb[20].mxu0 %v10450_v24  ;;  %1821 = vrot.lane.b32.xlu0 %v10211_v41, %s9754_s10  ;;  %v10478_v41 = vsel %vm301_vm0, %v367_v15, %v10390_v12  ;;  %v10549_v15 = vld [vmem:[#allocation2 + $0xb1] sm:$0xff] }
 0x15b   : >> { %8129 = vmatprep.mubr.msk.f32.mxu0 %vm301_vm0, %v10454_v36  ;;  %8770 = vmatpush1.bf16.msra.mxu0 %v8769_v43  ;;  %v585_v43 = vpop.permute.xlu1 %584 }
 0x15c   : >> { %v10465_v48 = vpop.permute.xlu0 %594  ;;  %8771 = vmatprep.subr.bf16.mxu0 %v13908_v9 }
 0x15e   : >> { %1076 = vmatmul.mubr.f32.gmra.mrb[22].mxu0 %v10463_v32  ;;  %1825 = vrot.lane.b32.xlu0 %v10219_v47, %s9754_s10  ;;  %v8237_v47 = vld [vmem:[%s10083_s11 + $0x238] sm:$0xff] }
 0x15f   : >> { %8130 = vmatprep.mubr.msk.f32.mxu0 %vm301_vm0, %v10467_v11  ;;  %v8772_v12 = vpack.c.bf16 %v8237_v47, %v8236_v51  ;;  %v589_v51 = vpop.permute.xlu1 %588  ;;  %v10563_v47 = vld [vmem:[#allocation2 + $0xb9] sm:$0xff] }
 0x160   : >> { %v10480_v45 = vpop.permute.xlu0 %598  ;;  %13962 = vst [vmem:[#allocation18_spill] sm:$0xff] %v10563_v47 }
 0x161   : >> { %8773 = vmatpush1.bf16.msra.mxu0 %v8772_v12  ;;  %v374_v12 = vld [vmem:[#allocation2 + $0xb7] sm:$0xff] }
 0x162   : >> { %1081 = vmatmul.mubr.f32.gmra.mrb[24].mxu0 %v10478_v41  ;;  %1829 = vrot.lane.b32.xlu0 %v10227_v53, %s9754_s10  ;;  %v10506_v53 = vsel %vm301_vm0, %v369_v2, %v10406_v55  ;;  %v1651_v55 = vld [vmem:[#allocation2 + $0x118] sm:$0xff] }
 0x163   : >> { %8131 = vmatprep.mubr.msk.f32.mxu0 %vm301_vm0, %v10482_v56  ;;  %8810 = vmatprep.subr.bf16.mxu0 %v13908_v9  ;;  %v1657_v9 = vld [vmem:[#allocation2 + $0x148] sm:$0xff] }
 0x164   : >> { %v10494_v0 = vpop.permute.xlu0 %602  ;;  %1823 = vrot.lane.b32.xlu1 %v1651_v55, %s9754_s10  ;;  %v2587_v55 = vld [vmem:[#allocation7 + $0x8] sm:$0xff] }
 0x165   : >> { %vm2635_vm2 = vcmp.ne.f32.partialorder %v2587_v55, 0.0  ;;  %v2592_v55 = vld [vmem:[#allocation7 + $0x30] sm:$0xff] }
 0x166   : >> { %1086 = vmatmul.mubr.f32.gmra.mrb[26].mxu0 %v10492_v57  ;;  %1833 = vrot.lane.b32.xlu0 %v10235_v59, %s9754_s10  ;;  %v10519_v59 = vsel %vm301_vm0, %v370_v16, %v581_v4  ;;  %v10575_v4 = vld [vmem:[#allocation2 + $0xc1] sm:$0xff]  ;;  %vm2640_vm4 = vcmp.ne.f32.partialorder %v2592_v55, 0.0 }
 0x167   : >> { %8132 = vmatprep.mubr.msk.f32.mxu0 %vm301_vm0, %v10496_v61  ;;  %13964 = vst [vmem:[#allocation20_spill] sm:$0xff] %v10575_v4  ;;  %v375_v16 = vld [vmem:[#allocation2 + $0xbf] sm:$0xff]  ;;  %v352_v55 = vld [vmem:[#allocation2 + $0x7] sm:$0xff] }
 0x168   : >> { %v10509_v3 = vpop.permute.xlu0 %606  ;;  %1827 = vrot.lane.b32.xlu1 %v1653_v35, %s9754_s10  ;;  %v10588_v35 = vld [vmem:[#allocation2 + $0xc9] sm:$0xff] }
 0x169   : >> { %13966 = vst [vmem:[#allocation22_spill] sm:$0xff] %v10588_v35 }
 0x16a   : >> { %1091 = vmatmul.mubr.f32.gmra.mrb[28].mxu0 %v10506_v53  ;;  %1837 = vrot.lane.b32.xlu0 %v10243_v1, %s9754_s10  ;;  %v10533_v1 = vsel %vm301_vm0, %v371_v39, %v10422_v34  ;;  %v1670_v39 = vld [vmem:[#allocation2 + $0x1b0] sm:$0xff] }
 0x16b   : >> { %8133 = vmatprep.mubr.msk.f32.mxu0 %vm301_vm0, %v10511_v13 }
 0x16c   : >> { %v10521_v17 = vpop.permute.xlu0 %610 }
 0x16e   : >> { %1096 = vmatmul.mubr.f32.gmra.mrb[30].mxu0 %v10519_v59  ;;  %1841 = vrot.lane.b32.xlu0 %v10251_v6, %s9754_s10  ;;  %v10545_v6 = vsel %vm301_vm0, %v372_v37, %v585_v43  ;;  %v593_v37 = vpop.permute.xlu1 %592 }
 0x16f   : >> { %8134 = vmatprep.mubr.msk.f32.mxu0 %vm301_vm0, %v10523_v20 }
 0x170   : >> { %v10535_v25 = vpop.permute.xlu0 %614 }
 0x172   : >> { %1101 = vmatmul.mubr.f32.gmra.mrb[32].mxu0 %v10533_v1  ;;  %1845 = vrot.lane.b32.xlu0 %v10259_v18, %s9754_s10  ;;  %v10559_v18 = vsel %vm301_vm0, %v373_v23, %v10437_v19  ;;  %v1655_v19 = vld [vmem:[#allocation2 + $0x138] sm:$0xff]  ;;  %v376_v23 = vld [vmem:[#allocation2 + $0xc7] sm:$0xff] }
 0x173   : >> { %8135 = vmatprep.mubr.msk.f32.mxu0 %vm301_vm0, %v10537_v8  ;;  %1831 = vrot.lane.b32.xlu1 %v1655_v19, %s9754_s10  ;;  %v10600_v19 = vld [vmem:[#allocation2 + $0xd1] sm:$0xff] }
 0x174   : >> { %v10547_v34 = vpop.permute.xlu0 %618  ;;  %13968 = vst [vmem:[#allocation24_spill] sm:$0xff] %v10600_v19 }
 0x176   : >> { %1106 = vmatmul.mubr.f32.gmra.mrb[34].mxu0 %v10545_v6  ;;  %1849 = vrot.lane.b32.xlu0 %v10266_v21, %s9754_s10  ;;  %v10571_v21 = vsel %vm301_vm0, %v374_v12, %v589_v51  ;;  %v2590_v51 = vld [vmem:[#allocation7 + $0x20] sm:$0xff]  ;;  %v10595_v12 = vsel %vm301_vm0, %v376_v23, %v593_v37 }
 0x177   : >> { %8136 = vmatprep.mubr.msk.f32.mxu0 %vm301_vm0, %v10549_v15  ;;  %13963 = vst [vmem:[#allocation19_spill] sm:$0xff] %v10571_v21  ;;  %13967 = vst [vmem:[#allocation23_spill] sm:$0xff] %v10595_v12  ;;  %vm2638_vm3 = vcmp.ne.f32.partialorder %v2590_v51, 0.0  ;;  %1835 = vrot.lane.b32.xlu1 %v1657_v9, %s9754_s10  ;;  %v10613_v51 = vld [vmem:[#allocation2 + $0xd9] sm:$0xff] }
 0x178   : >> { %v10561_v50 = vpop.permute.xlu0 %622  ;;  %v2686_v37 = vsel %vm2638_vm3, 1, %v13915_v33  ;;  %13970 = vst [vmem:[#allocation26_spill] sm:$0xff] %v10613_v51 }
 0x17a   : >> { %1111 = vmatmul.mubr.f32.gmra.mrb[36].mxu0 %v10559_v18  ;;  %1853 = vrot.lane.b32.xlu0 %v10271_v26, %s9754_s10  ;;  %v10584_v26 = vsel %vm301_vm0, %v375_v16, %v10452_v31  ;;  %v2683_v31 = vsel %vm2635_vm2, 1, %v13915_v33  ;;  %v377_v16 = vld [vmem:[#allocation2 + $0xcf] sm:$0xff] }
 0x17b   : >> { %8137 = vmatprep.mubr.msk.f32.mxu0 %vm301_vm0, %v10563_v47  ;;  %13965 = vst [vmem:[#allocation21_spill] sm:$0xff] %v10584_v26  ;;  %v10645_v47 = vld [vmem:[#allocation2 + $0xf1] sm:$0xff] }
 0x17c   : >> { %v10573_v2 = vpop.permute.xlu0 %626 }
 0x17e   : >> { %1116 = vmatmul.mubr.f32.gmra.mrb[38].mxu0 %v10571_v21  ;;  %1857 = vrot.lane.b32.xlu0 %v1668_v28, %s9754_s10  ;;  %v380_v21 = vld [vmem:[#allocation2 + $0xe7] sm:$0xff] }
 0x17f   : >> { %8138 = vmatprep.mubr.msk.f32.mxu0 %vm301_vm0, %v10575_v4  ;;  %v1659_v4 = vld [vmem:[#allocation2 + $0x158] sm:$0xff] }
 0x180   : >> { %v10586_v43 = vpop.permute.xlu0 %630  ;;  %1839 = vrot.lane.b32.xlu1 %v1659_v4, %s9754_s10 }
 0x182   : >> { %1121 = vmatmul.mubr.f32.gmra.mrb[40].mxu0 %v10584_v26  ;;  %1861 = vrot.lane.b32.xlu0 %v1670_v39, %s9754_s10  ;;  %v10607_v39 = vsel %vm301_vm0, %v377_v16, %v10465_v48  ;;  %v378_v26 = vld [vmem:[#allocation2 + $0xd7] sm:$0xff]  ;;  %v2594_v16 = vld [vmem:[#allocation7 + $0x40] sm:$0xff] }
 0x183   : >> { %8139 = vmatprep.mubr.msk.f32.mxu0 %vm301_vm0, %v10588_v35  ;;  %13969 = vst [vmem:[#allocation25_spill] sm:$0xff] %v10607_v39  ;;  %v597_v35 = vpop.permute.xlu1 %596  ;;  %vm2642_vm5 = vcmp.ne.f32.partialorder %v2594_v16, 0.0 }
 0x184   : >> { %v10598_v28 = vpop.permute.xlu0 %634  ;;  %v10619_v48 = vsel %vm301_vm0, %v378_v26, %v597_v35  ;;  %v2596_v35 = vld [vmem:[#allocation7 + $0x50] sm:$0xff] }
 0x185   : >> { %13971 = vst [vmem:[#allocation27_spill] sm:$0xff] %v10619_v48  ;;  %vm2644_vm6 = vcmp.ne.f32.partialorder %v2596_v35, 0.0 }
 0x186   : >> { %1126 = vmatmul.mubr.f32.gmra.mrb[42].mxu0 %v10595_v12  ;;  %2734 = vperm.xlu0 %9292, %v2683_v31   ;;  %v2688_v31 = vsel %vm2640_vm4, 1, %v13915_v33  ;;  %v379_v12 = vld [vmem:[#allocation2 + $0xdf] sm:$0xff] }
 0x187   : >> { %8140 = vmatprep.mubr.msk.f32.mxu0 %vm301_vm0, %v10600_v19  ;;  %v10624_v19 = vld [vmem:[#allocation2 + $0xe1] sm:$0xff]  ;;  %v10631_v26 = vsel %vm301_vm0, %v379_v12, %v10480_v45  ;;  %v601_v33 = vpop.permute.xlu1 %600 }
 0x188   : >> { %v10611_v23 = vpop.permute.xlu0 %638  ;;  %13973 = vst [vmem:[#allocation29_spill] sm:$0xff] %v10624_v19  ;;  %v1661_v45 = vld [vmem:[#allocation2 + $0x168] sm:$0xff]  ;;  %v10643_v4 = vsel %vm301_vm0, %v380_v21, %v601_v33  ;;  %v2598_v12 = vld [vmem:[#allocation7 + $0x60] sm:$0xff]  ;;  %v1663_v33 = vld [vmem:[#allocation2 + $0x178] sm:$0xff] }
 0x189   : >> { %1843 = vrot.lane.b32.xlu1 %v1661_v45, %s9754_s10  ;;  %vm2646_vm7 = vcmp.ne.f32.partialorder %v2598_v12, 0.0 }
 0x18a   : >> { %1131 = vmatmul.mubr.f32.gmra.mrb[44].mxu0 %v10607_v39  ;;  %2743 = vperm.xlu0 %9292, %v2686_v37   ;;  %v449_v39 = vld [vmem:[#allocation2 + $0x11] sm:$0xff] }
 0x18b   : >> { %8141 = vmatprep.mubr.msk.f32.mxu0 %vm301_vm0, %v10613_v51  ;;  %v10634_v51 = vld [vmem:[#allocation2 + $0xe9] sm:$0xff] }
 0x18c   : >> { %v10622_v9 = vpop.permute.xlu0 %776  ;;  %13974 = vst [vmem:[#allocation30_spill] sm:$0xff] %v10634_v51 }
 0x18d   : >> { %13972 = vst [vmem:[#allocation28_spill] sm:$0xff] %v10622_v9  ;;  %1847 = vrot.lane.b32.xlu1 %v1663_v33, %s9754_s10  ;;  %v10670_v33 = vld [vmem:[#allocation2 + $0x101] sm:$0xff] }
 0x18e   : >> { %1136 = vmatmul.mubr.f32.gmra.mrb[46].mxu0 %v10619_v48  ;;  %2749 = vperm.xlu0 %9292, %v2688_v31   ;;  %v13975_v31 = vmov 0  }
 0x18f   : >> { %8142 = vmatprep.mubr.msk.f32.mxu0 %vm301_vm0, %v10624_v19  ;;  %v2690_v16 = vsel %vm2642_vm5, 1, %v13975_v31  ;;  %v353_v19 = vld [vmem:[#allocation2 + $0xf] sm:$0xff]  ;;  %v2692_v35 = vsel %vm2644_vm6, 1, %v13975_v31 }
 0x190   : >> { %v545_v37 = vpop.permute.xlu0 %544 }
 0x191   : >> { %v688_v48 = vsel %vm301_vm0, %v352_v55, %v545_v37  ;;  %v450_v55 = vld [vmem:[#allocation2 + $0x19] sm:$0xff]  ;;  %v381_v37 = vld [vmem:[#allocation2 + $0xef] sm:$0xff] }
 0x192   : >> { %1141 = vmatmul.mubr.f32.gmra.mrb[48].mxu0 %v10631_v26  ;;  %1335 = vmatmul.mubr.f32.vlgmr.msra.gmra.mrb[0].mxu1 %v688_v48  ;;  %v10656_v21 = vsel %vm301_vm0, %v381_v37, %v10494_v0  ;;  %v9293_v0 = vld [vmem:[#allocation2 + $0x21] sm:$0xff] }
 0x193   : >> { %8143 = vmatprep.mubr.msk.f32.mxu0 %vm301_vm0, %v10634_v51  ;;  %8167 = vmatprep.mubr.msk.f32.mxu1 %vm301_vm0, %v449_v39  ;;  %v354_v39 = vld [vmem:[#allocation2 + $0x17] sm:$0xff] }
 0x194   : >> { %v547_v9 = vpop.permute.xlu0 %546  ;;  %2755 = vperm.xlu0 %9292, %v2690_v16   ;;  %v2600_v16 = vld [vmem:[#allocation7 + $0x70] sm:$0xff] }
 0x195   : >> { %v689_v48 = vsel %vm301_vm0, %v353_v19, %v547_v9  ;;  %v605_v19 = vpop.permute.xlu1 %604  ;;  %v10658_v9 = vld [vmem:[#allocation2 + $0xf9] sm:$0xff]  ;;  %vm2648_vm8 = vcmp.ne.f32.partialorder %v2600_v16, 0.0 }
 0x196   : >> { %1146 = vmatmul.mubr.f32.gmra.mrb[50].mxu0 %v10643_v4  ;;  %1340 = vmatmul.mubr.f32.gmra.mrb[2].mxu1 %v689_v48  ;;  %v382_v51 = vld [vmem:[#allocation2 + $0xf7] sm:$0xff]  ;;  %v2694_v48 = vsel %vm2646_vm7, 1, %v13975_v31 }
 0x197   : >> { %8144 = vmatprep.mubr.msk.f32.mxu0 %vm301_vm0, %v10645_v47  ;;  %8168 = vmatprep.mubr.msk.f32.mxu1 %vm301_vm0, %v450_v55  ;;  %v1665_v55 = vld [vmem:[#allocation2 + $0x188] sm:$0xff]  ;;  %v10668_v37 = vsel %vm301_vm0, %v382_v51, %v605_v19  ;;  %v1667_v16 = vld [vmem:[#allocation2 + $0x198] sm:$0xff]  ;;  %v2604_v19 = vld [vmem:[#allocation7 + $0x90] sm:$0xff] }
 0x198   : >> { %v549_v45 = vpop.permute.xlu0 %548  ;;  %2761 = vperm.xlu0 %9292, %v2692_v35   ;;  %v2602_v35 = vld [vmem:[#allocation7 + $0x80] sm:$0xff]  ;;  %1851 = vrot.lane.b32.xlu1 %v1665_v55, %s9754_s10  ;;  %vm2652_vm10 = vcmp.ne.f32.partialorder %v2604_v19, 0.0 }
 0x199   : >> { %v690_v12 = vsel %vm301_vm0, %v354_v39, %v549_v45  ;;  %v383_v39 = vld [vmem:[#allocation2 + $0xff] sm:$0xff]  ;;  %v2696_v45 = vsel %vm2648_vm8, 1, %v13975_v31  ;;  %vm2650_vm9 = vcmp.ne.f32.partialorder %v2602_v35, 0.0  ;;  %v384_v55 = vld [vmem:[#allocation2 + $0x107] sm:$0xff]  ;;  %v10697_v35 = vld [vmem:[#allocation2 + $0x111] sm:$0xff] }
 0x19a   : >> { %1151 = vmatmul.mubr.f32.gmra.mrb[52].mxu0 %v10656_v21  ;;  %1345 = vmatmul.mubr.f32.gmra.mrb[4].mxu1 %v690_v12  ;;  %v10682_v51 = vsel %vm301_vm0, %v383_v39, %v10509_v3  ;;  %v609_v12 = vpop.permute.xlu1 %608  ;;  %v385_v39 = vld [vmem:[#allocation2 + $0x10f] sm:$0xff]  ;;  %v2606_v19 = vld [vmem:[#allocation7 + $0xa0] sm:$0xff] }
 0x19b   : >> { %8145 = vmatprep.mubr.msk.f32.mxu0 %vm301_vm0, %v10658_v9  ;;  %8169 = vmatprep.mubr.msk.f32.mxu1 %vm301_vm0, %v9293_v0  ;;  %v10695_v3 = vsel %vm301_vm0, %v384_v55, %v609_v12  ;;  %v2605_v0 = vld [vmem:[#allocation7 + $0x98] sm:$0xff]  ;;  %vm2654_vm14 = vcmp.ne.f32.partialorder %v2606_v19, 0.0  ;;  %v2608_v19 = vld [vmem:[#allocation7 + $0xb0] sm:$0xff] }
 0x19c   : >> { %2767 = vperm.xlu0 %9292, %v2694_v48   ;;  %v10684_v48 = vld [vmem:[#allocation2 + $0x109] sm:$0xff]  ;;  %1855 = vrot.lane.b32.xlu1 %v1667_v16, %s9754_s10  ;;  %vm2653_vm12 = vcmp.ne.f32.partialorder %v2605_v0, 0.0  ;;  %v10710_v16 = vsel %vm301_vm0, %v385_v39, %v10521_v17  ;;  %v10712_v55 = vld [vmem:[#allocation2 + $0x119] sm:$0xff]  ;;  %v10725_v39 = vld [vmem:[#allocation2 + $0x121] sm:$0xff]  ;;  %vm2656_vm4 = vcmp.ne.f32.partialorder %v2608_v19, 0.0 }
 0x19d   : >> { %v2607_v0 = vld [vmem:[#allocation7 + $0xa8] sm:$0xff] }
 0x19e   : >> { %1156 = vmatmul.mubr.f32.gmra.mrb[54].mxu0 %v10668_v37  ;;  %1350 = vmatmul.mubr.f32.gmra.mrb[6].mxu1 %v10301_v44  ;;  %v2698_v44 = vsel %vm2650_vm9, 1, %v13975_v31  ;;  %v613_v12 = vpop.permute.xlu1 %612  ;;  %vm2655_vm2 = vcmp.ne.f32.partialorder %v2607_v0, 0.0  ;;  %v10752_v0 = vld [vmem:[#allocation2 + $0x131] sm:$0xff] }
 0x19f   : >> { %8146 = vmatprep.mubr.msk.f32.mxu0 %vm301_vm0, %v10670_v33  ;;  %8170 = vmatprep.mubr.msk.f32.mxu1 %vm301_vm0, %v10296_v42  ;;  %v1669_v42 = vld [vmem:[#allocation2 + $0x1a8] sm:$0xff] }
 0x1a0   : >> { %2773 = vperm.xlu0 %9292, %v2696_v45   ;;  %1859 = vrot.lane.b32.xlu1 %v1669_v42, %s9754_s10  ;;  %v2586_v45 = vld [vmem:[#allocation7] sm:$0xff]  ;;  %v2701_v42 = vsel %vm2653_vm12, 1, %v13975_v31 }
 0x1a1   : >> { %vm2634_vm11 = vcmp.ne.f32.partialorder %v2586_v45, 0.0  ;;  %v387_v45 = vld [vmem:[#allocation2 + $0x11f] sm:$0xff] }
 0x1a2   : >> { %1161 = vmatmul.mubr.f32.gmra.mrb[56].mxu0 %v10682_v51  ;;  %1355 = vmatmul.mubr.f32.gmra.mrb[8].mxu1 %v10316_v27  ;;  %v2700_v27 = vsel %vm2652_vm10, 1, %v13975_v31 }
 0x1a3   : >> { %8147 = vmatprep.mubr.msk.f32.mxu0 %vm301_vm0, %v10684_v48  ;;  %8171 = vmatprep.mubr.msk.f32.mxu1 %vm301_vm0, %v10308_v22  ;;  %v2682_v22 = vsel %vm2634_vm11, 1, %v13975_v31 }
 0x1a4   : >> { %2779 = vperm.xlu0 %9292, %v2698_v44   ;;  %v386_v44 = vld [vmem:[#allocation2 + $0x117] sm:$0xff]  ;;  %2731 = vperm.xlu1 %9291, %v2682_v22   ;;  %v10737_v22 = vsel %vm301_vm0, %v387_v45, %v10535_v25  ;;  %v389_v45 = vld [vmem:[#allocation2 + $0x12f] sm:$0xff] }
 0x1a5   : >> { %v10723_v17 = vsel %vm301_vm0, %v386_v44, %v613_v12  ;;  %v617_v12 = vpop.permute.xlu1 %616  ;;  %v10739_v44 = vld [vmem:[#allocation2 + $0x129] sm:$0xff] }
 0x1a6   : >> { %1166 = vmatmul.mubr.f32.gmra.mrb[58].mxu0 %v10695_v3  ;;  %1360 = vmatmul.mubr.f32.gmra.mrb[10].mxu1 %v10324_v52  ;;  %v2588_v52 = vld [vmem:[#allocation7 + $0x10] sm:$0xff] }
 0x1a7   : >> { %8148 = vmatprep.mubr.msk.f32.mxu0 %vm301_vm0, %v10697_v35  ;;  %8172 = vmatprep.mubr.msk.f32.mxu1 %vm301_vm0, %v10326_v54  ;;  %vm2636_vm13 = vcmp.ne.f32.partialorder %v2588_v52, 0.0  ;;  %v388_v52 = vld [vmem:[#allocation2 + $0x127] sm:$0xff] }
 0x1a8   : >> { %2785 = vperm.xlu0 %9292, %v2700_v27   ;;  %v2684_v54 = vsel %vm2636_vm13, 1, %v13975_v31  ;;  %v2589_v27 = vld [vmem:[#allocation7 + $0x18] sm:$0xff]  ;;  %v10750_v25 = vsel %vm301_vm0, %v388_v52, %v617_v12 }
 0x1a9   : >> { %2737 = vperm.xlu1 %9291, %v2684_v54   ;;  %vm2637_vm15 = vcmp.ne.f32.partialorder %v2589_v27, 0.0  ;;  %v2609_v54 = vld [vmem:[#allocation7 + $0xb8] sm:$0xff]  ;;  %v621_v19 = vpop.permute.xlu1 %620 }
 0x1aa   : >> { %1171 = vmatmul.mubr.f32.gmra.mrb[60].mxu0 %v10710_v16  ;;  %1365 = vmatmul.mubr.f32.gmra.mrb[12].mxu1 %v10341_v62  ;;  %v2702_v62 = vsel %vm2654_vm14, 1, %v13975_v31  ;;  %v2593_v27 = vld [vmem:[#allocation7 + $0x38] sm:$0xff]  ;;  %vm2657_vm6 = vcmp.ne.f32.partialorder %v2609_v54, 0.0 }
 0x1ab   : >> { %8149 = vmatprep.mubr.msk.f32.mxu0 %vm301_vm0, %v10712_v55  ;;  %8173 = vmatprep.mubr.msk.f32.mxu1 %vm301_vm0, %v10343_v63  ;;  %v2685_v63 = vsel %vm2637_vm15, 1, %v13975_v31  ;;  %vm2641_vm5 = vcmp.ne.f32.partialorder %v2593_v27, 0.0  ;;  %v10766_v12 = vld [vmem:[#allocation2 + $0x139] sm:$0xff] }
 0x1ac   : >> { %2788 = vperm.xlu0 %9292, %v2701_v42   ;;  %v2703_v42 = vsel %vm2655_vm2, 1, %v13975_v31  ;;  %v390_v52 = vld [vmem:[#allocation2 + $0x137] sm:$0xff]  ;;  %v391_v54 = vld [vmem:[#allocation2 + $0x13f] sm:$0xff] }
 0x1ad   : >> { %2740 = vperm.xlu1 %9291, %v2685_v63   ;;  %v2610_v63 = vld [vmem:[#allocation7 + $0xc0] sm:$0xff]  ;;  %v10791_v27 = vsel %vm301_vm0, %v391_v54, %v10561_v50 }
 0x1ae   : >> { %1176 = vmatmul.mubr.f32.gmra.mrb[62].mxu0 %v10723_v17  ;;  %1370 = vmatmul.mubr.f32.gmra.mrb[14].mxu1 %v10356_v7  ;;  %v2591_v7 = vld [vmem:[#allocation7 + $0x28] sm:$0xff]  ;;  %vm2658_vm8 = vcmp.ne.f32.partialorder %v2610_v63, 0.0 }
 0x1af   : >> { %8150 = vmatprep.mubr.msk.f32.mxu0 %vm301_vm0, %v10725_v39  ;;  %8174 = vmatprep.mubr.msk.f32.mxu1 %vm301_vm0, %v10358_v14  ;;  %vm2639_vm3 = vcmp.ne.f32.partialorder %v2591_v7, 0.0  ;;  %v2705_v7 = vsel %vm2657_vm6, 1, %v13975_v31  ;;  %v10793_v63 = vld [vmem:[#allocation2 + $0x149] sm:$0xff] }
 0x1b0   : >> { %2791 = vperm.xlu0 %9292, %v2702_v62   ;;  %v2687_v14 = vsel %vm2639_vm3, 1, %v13975_v31  ;;  %v10764_v62 = vsel %vm301_vm0, %v389_v45, %v10547_v34  ;;  %v10777_v34 = vsel %vm301_vm0, %v390_v52, %v621_v19  ;;  %v2597_v45 = vld [vmem:[#allocation7 + $0x58] sm:$0xff]  ;;  %v392_v19 = vld [vmem:[#allocation2 + $0x147] sm:$0xff] }
 0x1b1   : >> { %2746 = vperm.xlu1 %9291, %v2687_v14   ;;  %v10779_v14 = vld [vmem:[#allocation2 + $0x141] sm:$0xff]  ;;  %vm2645_vm9 = vcmp.ne.f32.partialorder %v2597_v45, 0.0 }
 0x1b2   : >> { %1181 = vmatmul.mubr.f32.gmra.mrb[64].mxu0 %v10737_v22  ;;  %1375 = vmatmul.mubr.f32.gmra.mrb[16].mxu1 %v10370_v29  ;;  %v2704_v29 = vsel %vm2656_vm4, 1, %v13975_v31  ;;  %v2614_v45 = vld [vmem:[#allocation7 + $0xe0] sm:$0xff] }
 0x1b3   : >> { %8151 = vmatprep.mubr.msk.f32.mxu0 %vm301_vm0, %v10739_v44  ;;  %8175 = vmatprep.mubr.msk.f32.mxu1 %vm301_vm0, %v10372_v30  ;;  %v2689_v30 = vsel %vm2641_vm5, 1, %v13975_v31  ;;  %vm2662_vm2 = vcmp.ne.f32.partialorder %v2614_v45, 0.0 }
 0x1b4   : >> { %2794 = vperm.xlu0 %9292, %v2703_v42   ;;  %v2611_v42 = vld [vmem:[#allocation7 + $0xc8] sm:$0xff] }
 0x1b5   : >> { %2752 = vperm.xlu1 %9291, %v2689_v30   ;;  %vm2659_vm10 = vcmp.ne.f32.partialorder %v2611_v42, 0.0  ;;  %v625_v30 = vpop.permute.xlu1 %624  ;;  %v2601_v42 = vld [vmem:[#allocation7 + $0x78] sm:$0xff] }
 0x1b6   : >> { %1186 = vmatmul.mubr.f32.gmra.mrb[66].mxu0 %v10750_v25  ;;  %1380 = vmatmul.mubr.f32.gmra.mrb[18].mxu1 %v10386_v40  ;;  %v2595_v40 = vld [vmem:[#allocation7 + $0x48] sm:$0xff]  ;;  %v2707_v52 = vsel %vm2659_vm10, 1, %v13975_v31  ;;  %v10804_v50 = vsel %vm301_vm0, %v392_v19, %v625_v30  ;;  %vm2649_vm13 = vcmp.ne.f32.partialorder %v2601_v42, 0.0 }
 0x1b7   : >> { %8152 = vmatprep.mubr.msk.f32.mxu0 %vm301_vm0, %v10752_v0  ;;  %8176 = vmatprep.mubr.msk.f32.mxu1 %vm301_vm0, %v10388_v10  ;;  %vm2643_vm7 = vcmp.ne.f32.partialorder %v2595_v40, 0.0  ;;  %v2613_v40 = vld [vmem:[#allocation7 + $0xd8] sm:$0xff]  ;;  %v2615_v19 = vld [vmem:[#allocation7 + $0xe8] sm:$0xff] }
 0x1b8   : >> { %2797 = vperm.xlu0 %9292, %v2704_v29   ;;  %v2691_v10 = vsel %vm2643_vm7, 1, %v13975_v31  ;;  %v2612_v29 = vld [vmem:[#allocation7 + $0xd0] sm:$0xff]  ;;  %vm2661_vm14 = vcmp.ne.f32.partialorder %v2613_v40, 0.0  ;;  %vm2663_vm3 = vcmp.ne.f32.partialorder %v2615_v19, 0.0  ;;  %v396_v42 = vld [vmem:[#allocation2 + $0x167] sm:$0xff]  ;;  %v399_v19 = vld [vmem:[#allocation2 + $0x17f] sm:$0xff] }
 0x1b9   : >> { %2758 = vperm.xlu1 %9291, %v2691_v10   ;;  %vm2660_vm12 = vcmp.ne.f32.partialorder %v2612_v29, 0.0  ;;  %v393_v10 = vld [vmem:[#allocation2 + $0x14f] sm:$0xff]  ;;  %v394_v29 = vld [vmem:[#allocation2 + $0x157] sm:$0xff]  ;;  %v2709_v30 = vsel %vm2661_vm14, 1, %v13975_v31 }
 0x1ba   : >> { %1191 = vmatmul.mubr.f32.gmra.mrb[68].mxu0 %v10764_v62  ;;  %1385 = vmatmul.mubr.f32.gmra.mrb[20].mxu1 %v10402_v46  ;;  %v2706_v46 = vsel %vm2658_vm8, 1, %v13975_v31  ;;  %v10818_v54 = vsel %vm301_vm0, %v393_v10, %v10573_v2  ;;  %v10846_v10 = vld [vmem:[#allocation2 + $0x169] sm:$0xff] }
 0x1bb   : >> { %8153 = vmatprep.mubr.msk.f32.mxu0 %vm301_vm0, %v10766_v12  ;;  %8177 = vmatprep.mubr.msk.f32.mxu1 %vm301_vm0, %v10404_v49  ;;  %v2693_v49 = vsel %vm2645_vm9, 1, %v13975_v31 }
 0x1bc   : >> { %2800 = vperm.xlu0 %9292, %v2705_v7   ;;  %v10806_v7 = vld [vmem:[#allocation2 + $0x151] sm:$0xff] }
 0x1bd   : >> { %2764 = vperm.xlu1 %9291, %v2693_v49   ;;  %v10820_v49 = vld [vmem:[#allocation2 + $0x159] sm:$0xff] }
 0x1be   : >> { %1196 = vmatmul.mubr.f32.gmra.mrb[70].mxu0 %v10777_v34  ;;  %1390 = vmatmul.mubr.f32.gmra.mrb[22].mxu1 %v10418_v58  ;;  %v2599_v58 = vld [vmem:[#allocation7 + $0x68] sm:$0xff] }
 0x1bf   : >> { %8154 = vmatprep.mubr.msk.f32.mxu0 %vm301_vm0, %v10779_v14  ;;  %8178 = vmatprep.mubr.msk.f32.mxu1 %vm301_vm0, %v10420_v60  ;;  %vm2647_vm11 = vcmp.ne.f32.partialorder %v2599_v58, 0.0  ;;  %v10833_v58 = vld [vmem:[#allocation2 + $0x161] sm:$0xff] }
 0x1c0   : >> { %2803 = vperm.xlu0 %9292, %v2706_v46   ;;  %v2695_v60 = vsel %vm2647_vm11, 1, %v13975_v31  ;;  %v629_v46 = vpop.permute.xlu1 %628 }
 0x1c1   : >> { %2770 = vperm.xlu1 %9291, %v2695_v60   ;;  %v10831_v2 = vsel %vm301_vm0, %v394_v29, %v629_v46  ;;  %v2616_v60 = vld [vmem:[#allocation7 + $0xf0] sm:$0xff]  ;;  %v10871_v29 = vld [vmem:[#allocation2 + $0x179] sm:$0xff] }
 0x1c2   : >> { %1201 = vmatmul.mubr.f32.gmra.mrb[72].mxu0 %v10791_v27  ;;  %1395 = vmatmul.mubr.f32.gmra.mrb[24].mxu1 %v10433_v5  ;;  %v2708_v5 = vsel %vm2660_vm12, 1, %v13975_v31  ;;  %vm2664_vm4 = vcmp.ne.f32.partialorder %v2616_v60, 0.0 }
 0x1c3   : >> { %8155 = vmatprep.mubr.msk.f32.mxu0 %vm301_vm0, %v10793_v63  ;;  %8179 = vmatprep.mubr.msk.f32.mxu1 %vm301_vm0, %v10435_v38  ;;  %v2697_v38 = vsel %vm2649_vm13, 1, %v13975_v31  ;;  %v2712_v45 = vsel %vm2664_vm4, 1, %v13975_v31 }
 0x1c4   : >> { %2806 = vperm.xlu0 %9292, %v2707_v52   ;;  %v395_v52 = vld [vmem:[#allocation2 + $0x15f] sm:$0xff]  ;;  %v633_v40 = vpop.permute.xlu1 %632 }
 0x1c5   : >> { %2776 = vperm.xlu1 %9291, %v2697_v38   ;;  %v397_v38 = vld [vmem:[#allocation2 + $0x16f] sm:$0xff] }
 0x1c6   : >> { %1206 = vmatmul.mubr.f32.gmra.mrb[74].mxu0 %v10804_v50  ;;  %1400 = vmatmul.mubr.f32.gmra.mrb[26].mxu1 %v10450_v24  ;;  %v2603_v24 = vld [vmem:[#allocation7 + $0x88] sm:$0xff] }
 0x1c7   : >> { %8156 = vmatprep.mubr.msk.f32.mxu0 %vm301_vm0, %v10806_v7  ;;  %8180 = vmatprep.mubr.msk.f32.mxu1 %vm301_vm0, %v10454_v36  ;;  %vm2651_vm15 = vcmp.ne.f32.partialorder %v2603_v24, 0.0  ;;  %v398_v24 = vld [vmem:[#allocation2 + $0x177] sm:$0xff] }
 0x1c8   : >> { %2809 = vperm.xlu0 %9292, %v2708_v5   ;;  %v2699_v36 = vsel %vm2651_vm15, 1, %v13975_v31  ;;  %v2711_v5 = vsel %vm2663_vm3, 1, %v13975_v31  ;;  %v637_v46 = vpop.permute.xlu1 %636 }
 0x1c9   : >> { %2782 = vperm.xlu1 %9291, %v2699_v36   ;;  %v10885_v36 = vld [vmem:[#allocation2 + $0x181] sm:$0xff] }
 0x1ca   : >> { %1211 = vmatmul.mubr.f32.gmra.mrb[76].mxu0 %v10818_v54  ;;  %1405 = vmatmul.mubr.f32.gmra.mrb[28].mxu1 %v10463_v32  ;;  %v2710_v32 = vsel %vm2662_vm2, 1, %v13975_v31 }
 0x1cb   : >> { %8157 = vmatprep.mubr.msk.f32.mxu0 %vm301_vm0, %v10820_v49  ;;  %8181 = vmatprep.mubr.msk.f32.mxu1 %vm301_vm0, %v10467_v11  ;;  %v10844_v11 = vsel %vm301_vm0, %v395_v52, %v10586_v43  ;;  %v10858_v43 = vld [vmem:[#allocation2 + $0x171] sm:$0xff] }
 0x1cc   : >> { %2812 = vperm.xlu0 %9292, %v2709_v30  }
 0x1ce   : >> { %1216 = vmatmul.mubr.f32.gmra.mrb[78].mxu0 %v10831_v2  ;;  %1410 = vmatmul.mubr.f32.gmra.mrb[30].mxu1 %v10478_v41  ;;  %v10856_v41 = vsel %vm301_vm0, %v396_v42, %v633_v40  ;;  %v768_v40 = vld [vmem:[#allocation2 + $0x189] sm:$0xff] }
 0x1cf   : >> { %8158 = vmatprep.mubr.msk.f32.mxu0 %vm301_vm0, %v10833_v58  ;;  %8182 = vmatprep.mubr.msk.f32.mxu1 %vm301_vm0, %v10482_v56  ;;  %v2617_v56 = vld [vmem:[#allocation7 + $0xf8] sm:$0xff]  ;;  %v762_v42 = vld [vmem:[#allocation2 + $0x187] sm:$0xff] }
 0x1d0   : >> { %2815 = vperm.xlu0 %9292, %v2710_v32   ;;  %vm2665_vm5 = vcmp.ne.f32.partialorder %v2617_v56, 0.0  ;;  %v2620_v32 = vld [vmem:[#allocation7 + $0x110] sm:$0xff] }
 0x1d1   : >> { %v2713_v30 = vsel %vm2665_vm5, 1, %v13975_v31  ;;  %vm2668_vm8 = vcmp.ne.f32.partialorder %v2620_v32, 0.0  ;;  %v769_v56 = vld [vmem:[#allocation2 + $0x191] sm:$0xff] }
 0x1d2   : >> { %1221 = vmatmul.mubr.f32.gmra.mrb[80].mxu0 %v10844_v11  ;;  %1415 = vmatmul.mubr.f32.gmra.mrb[32].mxu1 %v10492_v57  ;;  %v10869_v57 = vsel %vm301_vm0, %v397_v38, %v10598_v28  ;;  %v2619_v28 = vld [vmem:[#allocation7 + $0x108] sm:$0xff] }
 0x1d3   : >> { %8159 = vmatprep.mubr.msk.f32.mxu0 %vm301_vm0, %v10846_v10  ;;  %8183 = vmatprep.mubr.msk.f32.mxu1 %vm301_vm0, %v10496_v61  ;;  %v2618_v61 = vld [vmem:[#allocation7 + $0x100] sm:$0xff]  ;;  %vm2667_vm7 = vcmp.ne.f32.partialorder %v2619_v28, 0.0  ;;  %v763_v38 = vld [vmem:[#allocation2 + $0x18f] sm:$0xff]  ;;  %v764_v28 = vld [vmem:[#allocation2 + $0x197] sm:$0xff] }
 0x1d4   : >> { %2818 = vperm.xlu0 %9292, %v2711_v5   ;;  %vm2666_vm6 = vcmp.ne.f32.partialorder %v2618_v61, 0.0 }
 0x1d5   : >> { %v2714_v52 = vsel %vm2666_vm6, 1, %v13975_v31 }
 0x1d6   : >> { %1226 = vmatmul.mubr.f32.gmra.mrb[82].mxu0 %v10856_v41  ;;  %1420 = vmatmul.mubr.f32.gmra.mrb[34].mxu1 %v10506_v53  ;;  %v10876_v53 = vpop.permute.xlu0 %1773 }
 0x1d7   : >> { %8160 = vmatprep.mubr.msk.f32.mxu0 %vm301_vm0, %v10858_v43  ;;  %8184 = vmatprep.mubr.msk.f32.mxu1 %vm301_vm0, %v10511_v13  ;;  %v10883_v13 = vsel %vm301_vm0, %v398_v24, %v637_v46  ;;  %v2622_v24 = vld [vmem:[#allocation7 + $0x120] sm:$0xff] }
 0x1d8   : >> { %2821 = vperm.xlu0 %9292, %v2712_v45   ;;  %v2716_v45 = vsel %vm2668_vm8, 1, %v13975_v31  ;;  %vm2670_vm10 = vcmp.ne.f32.partialorder %v2622_v24, 0.0 }
 0x1da   : >> { %1231 = vmatmul.mubr.f32.gmra.mrb[84].mxu0 %v10869_v57  ;;  %1425 = vmatmul.mubr.f32.gmra.mrb[36].mxu1 %v10519_v59  ;;  %v775_v59 = vpop.permute.xlu1 %774  ;;  %v10898_v60 = vpop.permute.xlu0 %1777 }
 0x1db   : >> { %8161 = vmatprep.mubr.msk.f32.mxu0 %vm301_vm0, %v10871_v29  ;;  %8185 = vmatprep.mubr.msk.f32.mxu1 %vm301_vm0, %v10523_v20  ;;  %v10896_v20 = vsel %vm301_vm0, %v399_v19, %v10611_v23  ;;  %v2621_v23 = vld [vmem:[#allocation7 + $0x118] sm:$0xff] }
 0x1dc   : >> { %2824 = vperm.xlu0 %9292, %v2713_v30   ;;  %vm2669_vm9 = vcmp.ne.f32.partialorder %v2621_v23, 0.0  ;;  %v770_v30 = vld [vmem:[#allocation2 + $0x199] sm:$0xff]  ;;  %v2718_v23 = vsel %vm2670_vm10, 1, %v13975_v31 }
 0x1de   : >> { %1236 = vmatmul.mubr.f32.gmra.mrb[86].mxu0 %v10883_v13  ;;  %1430 = vmatmul.mubr.f32.gmra.mrb[38].mxu1 %v10533_v1  ;;  %v2715_v1 = vsel %vm2667_vm7, 1, %v13975_v31  ;;  %v779_v5 = vpop.permute.xlu1 %778  ;;  %v10908_v61 = vpop.permute.xlu0 %1781 }
 0x1df   : >> { %8162 = vmatprep.mubr.msk.f32.mxu0 %vm301_vm0, %v10885_v36  ;;  %8186 = vmatprep.mubr.msk.f32.mxu1 %vm301_vm0, %v10537_v8  ;;  %v783_v8 = vsel %vm301_vm0, %v762_v42, %v775_v59  ;;  %v13978_v59 = vld [vmem:[#allocation19_spill] sm:$0xff]  ;;  %v785_v32 = vsel %vm301_vm0, %v764_v28, %v779_v5 }
 0x1e0   : >> { %2827 = vperm.xlu0 %9292, %v2714_v52   ;;  %v2717_v52 = vsel %vm2669_vm9, 1, %v13975_v31  ;;  %v2624_v5 = vld [vmem:[#allocation7 + $0x130] sm:$0xff] }
 0x1e1   : >> { %v13982_v28 = vld [vmem:[#allocation23_spill] sm:$0xff]  ;;  %vm2672_vm12 = vcmp.ne.f32.partialorder %v2624_v5, 0.0 }
 0x1e2   : >> { %1241 = vmatmul.mubr.f32.gmra.mrb[88].mxu0 %v10896_v20  ;;  %1435 = vmatmul.mubr.f32.gmra.mrb[40].mxu1 %v10545_v6  ;;  %v13976_v6 = vld [vmem:[#allocation18_spill] sm:$0xff]  ;;  %v1768_v19 = vpop.permute.xlu1 %1767  ;;  %v10922_v42 = vpop.permute.xlu0 %1785 }
 0x1e3   : >> { %8163 = vmatprep.mubr.msk.f32.mxu0 %vm301_vm0, %v768_v40  ;;  %8187 = vmatprep.mubr.msk.f32.mxu1 %vm301_vm0, %v10549_v15  ;;  %v13977_v15 = vld [vmem:[#allocation28_spill] sm:$0xff]  ;;  %v2623_v40 = vld [vmem:[#allocation7 + $0x128] sm:$0xff] }
 0x1e4   : >> { %2830 = vperm.xlu0 %9292, %v2715_v1   ;;  %v784_v46 = vsel %vm301_vm0, %v763_v38, %v13977_v15  ;;  %v1575_v1 = vld [vmem:[#allocation2 + $0x37] sm:$0xff]  ;;  %vm2671_vm11 = vcmp.ne.f32.partialorder %v2623_v40, 0.0  ;;  %v1672_v15 = vld [vmem:[#allocation2 + $0x41] sm:$0xff]  ;;  %v1578_v5 = vld [vmem:[#allocation2 + $0x4f] sm:$0xff] }
 0x1e5   : >> { %v2719_v24 = vsel %vm2671_vm11, 1, %v13975_v31  ;;  %v1577_v40 = vld [vmem:[#allocation2 + $0x47] sm:$0xff] }
 0x1e6   : >> { %1246 = vmatmul.mubr.f32.gmra.mrb[90].mxu0 %v783_v8  ;;  %1440 = vmatmul.mubr.f32.gmra.mrb[42].mxu1 %v10559_v18  ;;  %v13979_v18 = vld [vmem:[#allocation20_spill] sm:$0xff]  ;;  %v1770_v38 = vpop.permute.xlu1 %1769 }
 0x1e7   : >> { %8164 = vmatprep.mubr.msk.f32.mxu0 %vm301_vm0, %v769_v56  ;;  %8188 = vmatprep.mubr.msk.f32.mxu1 %vm301_vm0, %v13976_v6  ;;  %v1671_v8 = vld [vmem:[#allocation2 + $0x39] sm:$0xff]  ;;  %v13981_v6 = vld [vmem:[#allocation22_spill] sm:$0xff] }
 0x1e8   : >> { %2833 = vperm.xlu0 %9292, %v2716_v45   ;;  %v13980_v56 = vld [vmem:[#allocation21_spill] sm:$0xff]  ;;  %v1911_v45 = vsel %vm301_vm0, %v1575_v1, %v1768_v19  ;;  %v2720_v1 = vsel %vm2672_vm12, 1, %v13975_v31 }
 0x1ea   : >> { %1251 = vmatmul.mubr.f32.gmra.mrb[92].mxu0 %v784_v46  ;;  %1445 = vmatmul.mubr.f32.gmra.mrb[44].mxu1 %v13978_v59  ;;  %v1576_v46 = vld [vmem:[#allocation2 + $0x3f] sm:$0xff] }
 0x1eb   : >> { %8165 = vmatprep.mubr.msk.f32.mxu0 %vm301_vm0, %v770_v30  ;;  %8189 = vmatprep.mubr.msk.f32.mxu1 %vm301_vm0, %v13979_v18  ;;  %v10931_v30 = vpop.permute.xlu0 %1789  ;;  %v1912_v19 = vsel %vm301_vm0, %v1576_v46, %v1770_v38  ;;  %v2625_v59 = vld [vmem:[#allocation7 + $0x138] sm:$0xff]  ;;  %v1772_v18 = vpop.permute.xlu1 %1771  ;;  %v13986_v46 = vld [vmem:[#allocation27_spill] sm:$0xff] }
 0x1ec   : >> { %2836 = vperm.xlu0 %9292, %v2717_v52   ;;  %v13983_v52 = vld [vmem:[#allocation24_spill] sm:$0xff]  ;;  %vm2673_vm13 = vcmp.ne.f32.partialorder %v2625_v59, 0.0 }
 0x1ed   : >> { %v1675_v59 = vld [vmem:[#allocation2 + $0x59] sm:$0xff] }
 0x1ee   : >> { %1256 = vmatmul.mubr.f32.gmra.mrb[94].mxu0 %v785_v32  ;;  %1450 = vmatmul.mubr.f32.gmra.mrb[46].mxu1 %v13980_v56  ;;  %v1673_v32 = vld [vmem:[#allocation2 + $0x49] sm:$0xff]  ;;  %v1913_v56 = vsel %vm301_vm0, %v1577_v40, %v1772_v18  ;;  %v1579_v18 = vld [vmem:[#allocation2 + $0x57] sm:$0xff] }
 0x1ef   : >> { %8190 = vmatprep.mubr.msk.f32.mxu1 %vm301_vm0, %v13981_v6  ;;  %8238 = vmatprep.mubr.msk.f32.mxu0 %vm301_vm0, %v1671_v8  ;;  %v13984_v8 = vld [vmem:[#allocation25_spill] sm:$0xff]  ;;  %v10944_v38 = vpop.permute.xlu0 %1793  ;;  %v1674_v6 = vld [vmem:[#allocation2 + $0x51] sm:$0xff] }
 0x1f0   : >> { %2839 = vperm.xlu0 %9292, %v2718_v23   ;;  %v13985_v23 = vld [vmem:[#allocation26_spill] sm:$0xff] }
 0x1f2   : >> { %1455 = vmatmul.mubr.f32.gmra.mrb[48].mxu1 %v13982_v28  ;;  %2194 = vmatmul.mubr.f32.vlgmr.msra.gmra.mrb[96].mxu0 %v1911_v45  ;;  %v2626_v45 = vld [vmem:[#allocation7 + $0x140] sm:$0xff]  ;;  %v1914_v28 = vsel %vm301_vm0, %v1578_v5, %v10876_v53 }
 0x1f3   : >> { %8191 = vmatprep.mubr.msk.f32.mxu1 %vm301_vm0, %v13983_v52  ;;  %8239 = vmatprep.mubr.msk.f32.mxu0 %vm301_vm0, %v1672_v15  ;;  %v2721_v15 = vsel %vm2673_vm13, 1, %v13975_v31  ;;  %vm2674_vm14 = vcmp.ne.f32.partialorder %v2626_v45, 0.0  ;;  %v2627_v52 = vld [vmem:[#allocation7 + $0x148] sm:$0xff]  ;;  %v10954_v40 = vpop.permute.xlu0 %1797 }
 0x1f4   : >> { %2842 = vperm.xlu0 %9292, %v2719_v24   ;;  %v13987_v24 = vld [vmem:[#allocation29_spill] sm:$0xff]  ;;  %vm2675_vm15 = vcmp.ne.f32.partialorder %v2627_v52, 0.0 }
 0x1f5   : >> { %v2723_v45 = vsel %vm2675_vm15, 1, %v13975_v31 }
 0x1f6   : >> { %1460 = vmatmul.mubr.f32.gmra.mrb[50].mxu1 %v13984_v8  ;;  %2199 = vmatmul.mubr.f32.gmra.mrb[98].mxu0 %v1912_v19  ;;  %v1776_v19 = vpop.permute.xlu1 %1775  ;;  %v2628_v8 = vld [vmem:[#allocation7 + $0x150] sm:$0xff] }
 0x1f7   : >> { %8192 = vmatprep.mubr.msk.f32.mxu1 %vm301_vm0, %v13985_v23  ;;  %8240 = vmatprep.mubr.msk.f32.mxu0 %vm301_vm0, %v1673_v32  ;;  %v2722_v32 = vsel %vm2674_vm14, 1, %v13975_v31  ;;  %v1915_v53 = vsel %vm301_vm0, %v1579_v18, %v1776_v19  ;;  %v1676_v23 = vld [vmem:[#allocation2 + $0x61] sm:$0xff]  ;;  %vm2676_vm2 = vcmp.ne.f32.partialorder %v2628_v8, 0.0  ;;  %v10968_v5 = vpop.permute.xlu0 %1801  ;;  %v1678_v19 = vld [vmem:[#allocation2 + $0x71] sm:$0xff] }
 0x1f8   : >> { %2845 = vperm.xlu0 %9292, %v2720_v1   ;;  %v13988_v1 = vld [vmem:[#allocation30_spill] sm:$0xff] }
 0x1fa   : >> { %1465 = vmatmul.mubr.f32.gmra.mrb[52].mxu1 %v13986_v46  ;;  %2204 = vmatmul.mubr.f32.gmra.mrb[100].mxu0 %v1913_v56  ;;  %v1580_v56 = vld [vmem:[#allocation2 + $0x5f] sm:$0xff]  ;;  %v1677_v46 = vld [vmem:[#allocation2 + $0x69] sm:$0xff] }
 0x1fb   : >> { %8193 = vmatprep.mubr.msk.f32.mxu1 %vm301_vm0, %v13987_v24  ;;  %8241 = vmatprep.mubr.msk.f32.mxu0 %vm301_vm0, %v1674_v6  ;;  %v2629_v6 = vld [vmem:[#allocation7 + $0x158] sm:$0xff]  ;;  %v1581_v24 = vld [vmem:[#allocation2 + $0x67] sm:$0xff] }
 0x1fc   : >> { %2848 = vperm.xlu0 %9292, %v2721_v15   ;;  %v1780_v15 = vpop.permute.xlu1 %1779  ;;  %vm2677_vm3 = vcmp.ne.f32.partialorder %v2629_v6, 0.0  ;;  %v1583_v6 = vld [vmem:[#allocation2 + $0x77] sm:$0xff] }
 0x1fe   : >> { %1470 = vmatmul.mubr.f32.gmra.mrb[54].mxu1 %v10631_v26  ;;  %2209 = vmatmul.mubr.f32.gmra.mrb[102].mxu0 %v1914_v28  ;;  %v1916_v26 = vsel %vm301_vm0, %v1580_v56, %v10898_v60  ;;  %v2630_v60 = vld [vmem:[#allocation7 + $0x160] sm:$0xff]  ;;  %v2631_v56 = vld [vmem:[#allocation7 + $0x168] sm:$0xff] }
 0x1ff   : >> { %8194 = vmatprep.mubr.msk.f32.mxu1 %vm301_vm0, %v13988_v1  ;;  %8242 = vmatprep.mubr.msk.f32.mxu0 %vm301_vm0, %v1675_v59  ;;  %v1582_v59 = vld [vmem:[#allocation2 + $0x6f] sm:$0xff]  ;;  %v8315_v1 = vld [vmem:[%s10083_s11 + $0x300] sm:$0xff]  ;;  %vm2678_vm4 = vcmp.ne.f32.partialorder %v2630_v60, 0.0  ;;  %vm2679_vm5 = vcmp.ne.f32.partialorder %v2631_v56, 0.0 }
 0x200   : >> { %2851 = vperm.xlu0 %9292, %v2722_v32   ;;  %v2725_v32 = vsel %vm2677_vm3, 1, %v13975_v31  ;;  %v1586_v56 = vld [vmem:[#allocation2 + $0x8f] sm:$0xff] }
 0x202   : >> { %1475 = vmatmul.mubr.f32.gmra.mrb[56].mxu1 %v10643_v4  ;;  %2214 = vmatmul.mubr.f32.gmra.mrb[104].mxu0 %v1915_v53  ;;  %v2724_v4 = vsel %vm2676_vm2, 1, %v13975_v31  ;;  %v8316_v53 = vld [vmem:[%s10083_s11 + $0x308] sm:$0xff] }
 0x203   : >> { %8195 = vmatprep.mubr.msk.f32.mxu1 %vm301_vm0, %v10645_v47  ;;  %8243 = vmatprep.mubr.msk.f32.mxu0 %vm301_vm0, %v1676_v23  ;;  %v1917_v47 = vsel %vm301_vm0, %v1581_v24, %v1780_v15  ;;  %v1918_v23 = vsel %vm301_vm0, %v1582_v59, %v10908_v61  ;;  %v2632_v61 = vld [vmem:[#allocation7 + $0x170] sm:$0xff]  ;;  %v2633_v59 = vld [vmem:[#allocation7 + $0x178] sm:$0xff] }
 0x204   : >> { %2854 = vperm.xlu0 %9292, %v2723_v45   ;;  %v1784_v45 = vpop.permute.xlu1 %1783  ;;  %vm2680_vm6 = vcmp.ne.f32.partialorder %v2632_v61, 0.0  ;;  %vm2681_vm7 = vcmp.ne.f32.partialorder %v2633_v59, 0.0 }
 0x205   : >> { %v10970_v28 = vpop.f32.mrb[0].mxu0 }
 0x206   : >> { %v1024_v52 = vpop.f32.mrb[1].mxu0  ;;  %1480 = vmatmul.mubr.f32.gmra.mrb[58].mxu1 %v10656_v21  ;;  %2219 = vmatmul.mubr.f32.gmra.mrb[106].mxu0 %v1916_v26  ;;  %v10983_v21 = vpop.permute.xlu0 %1805  ;;  %v1679_v26 = vld [vmem:[#allocation2 + $0x79] sm:$0xff] }
 0x207   : >> { %8196 = vmatprep.mubr.msk.f32.mxu1 %vm301_vm0, %v10658_v9  ;;  %8244 = vmatprep.mubr.msk.f32.mxu0 %vm301_vm0, %v1677_v46  ;;  %v8775_v9 = vpack.c.bf16 %v8316_v53, %v8315_v1  ;;  %v13989_v46 = vmov 0.0|0.0   ;;  %v1680_v52 = vld [vmem:[#allocation2 + $0x81] sm:$0xff]  ;;  %v1681_v1 = vld [vmem:[#allocation2 + $0x89] sm:$0xff] }
 0x208   : >> { %2857 = vperm.xlu0 %9292, %v2724_v4   ;;  %v1585_v53 = vld [vmem:[#allocation2 + $0x87] sm:$0xff] }
 0x209   : >> { %v10978_v18 = vpop.f32.mrb[2].mxu0  ;;  %8776 = vmatpush1.bf16.msra.mxu1 %v8775_v9 }
 0x20a   : >> { %v1029_v8 = vpop.f32.mrb[3].mxu0  ;;  %1485 = vmatmul.mubr.f32.gmra.mrb[60].mxu1 %v10668_v37  ;;  %2224 = vmatmul.mubr.f32.gmra.mrb[108].mxu0 %v1917_v47  ;;  %v2726_v37 = vsel %vm2678_vm4, 1, %v13975_v31  ;;  %v11000_v4 = vpop.permute.xlu0 %1809  ;;  %v1584_v47 = vld [vmem:[#allocation2 + $0x7f] sm:$0xff] }
 0x20b   : >> { %8197 = vmatprep.mubr.msk.f32.mxu1 %vm301_vm0, %v10670_v33  ;;  %8245 = vmatprep.mubr.msk.f32.mxu0 %vm301_vm0, %v1678_v19  ;;  %v1919_v33 = vsel %vm301_vm0, %v1583_v6, %v1784_v45  ;;  %v2727_v19 = vsel %vm2679_vm5, 1, %v13975_v31  ;;  %v8317_v6 = vld [vmem:[%s10083_s11 + $0x310] sm:$0xff] }
 0x20c   : >> { %2860 = vperm.xlu0 %9292, %v2725_v32   ;;  %8777 = vmatprep.subr.bf16.mxu1 %v13989_v46  ;;  %v1788_v32 = vpop.permute.xlu1 %1787 }
 0x20d   : >> { %v10991_v15 = vpop.f32.mrb[4].mxu0 }
 0x20e   : >> { %v1034_v24 = vpop.f32.mrb[5].mxu0  ;;  %1490 = vmatmul.mubr.f32.gmra.mrb[62].mxu1 %v10682_v51  ;;  %2229 = vmatmul.mubr.f32.gmra.mrb[110].mxu0 %v1918_v23  ;;  %v11014_v9 = vpop.permute.xlu0 %1813 }
 0x20f   : >> { %8198 = vmatprep.mubr.msk.f32.mxu1 %vm301_vm0, %v10684_v48  ;;  %8246 = vmatprep.mubr.msk.f32.mxu0 %vm301_vm0, %v1679_v26  ;;  %v1920_v48 = vsel %vm301_vm0, %v1584_v47, %v10922_v42  ;;  %v1682_v42 = vld [vmem:[#allocation2 + $0x91] sm:$0xff]  ;;  %v2729_v26 = vsel %vm2681_vm7, 1, %v13975_v31 }
 0x210   : >> { %2863 = vperm.xlu0 %9292, %v2726_v37   ;;  %v8318_v37 = vld [vmem:[%s10083_s11 + $0x318] sm:$0xff]  ;;  %v1792_v61 = vpop.permute.xlu1 %1791 }
 0x211   : >> { %v11002_v60 = vpop.f32.mrb[6].mxu0  ;;  %v1587_v47 = vld [vmem:[#allocation2 + $0x97] sm:$0xff] }
 0x212   : >> { %v1039_v51 = vpop.f32.mrb[7].mxu0  ;;  %1495 = vmatmul.mubr.f32.gmra.mrb[64].mxu1 %v10695_v3  ;;  %2234 = vmatmul.mubr.f32.gmra.mrb[112].mxu0 %v1919_v33  ;;  %v2728_v3 = vsel %vm2680_vm6, 1, %v13975_v31  ;;  %v11032_v33 = vpop.permute.xlu0 %1817 }
 0x213   : >> { %8199 = vmatprep.mubr.msk.f32.mxu1 %vm301_vm0, %v10697_v35  ;;  %8247 = vmatprep.mubr.msk.f32.mxu0 %vm301_vm0, %v1680_v52  ;;  %v1921_v35 = vsel %vm301_vm0, %v1585_v53, %v1788_v32  ;;  %v1683_v52 = vld [vmem:[#allocation2 + $0x99] sm:$0xff]  ;;  %v1685_v32 = vld [vmem:[#allocation2 + $0xa9] sm:$0xff] }
 0x214   : >> { %2866 = vperm.xlu0 %9292, %v2727_v19   ;;  %v1588_v51 = vld [vmem:[#allocation2 + $0x9f] sm:$0xff] }
 0x215   : >> { %v11011_v8 = vpop.f32.mrb[8].mxu0 }
 0x216   : >> { %v1044_v23 = vpop.f32.mrb[9].mxu0  ;;  %1500 = vmatmul.mubr.f32.gmra.mrb[66].mxu1 %v10710_v16  ;;  %2239 = vmatmul.mubr.f32.gmra.mrb[114].mxu0 %v1920_v48  ;;  %v8778_v16 = vpack.c.bf16 %v8318_v37, %v8317_v6  ;;  %v1687_v6 = vld [vmem:[#allocation2 + $0xb9] sm:$0xff] }
 0x217   : >> { %8200 = vmatprep.mubr.msk.f32.mxu1 %vm301_vm0, %v10712_v55  ;;  %8248 = vmatprep.mubr.msk.f32.mxu0 %vm301_vm0, %v1681_v1  ;;  %v1922_v55 = vsel %vm301_vm0, %v1586_v56, %v10931_v30  ;;  %v1684_v30 = vld [vmem:[#allocation2 + $0xa1] sm:$0xff]  ;;  %v1591_v37 = vld [vmem:[#allocation2 + $0xb7] sm:$0xff] }
 0x218   : >> { %2869 = vperm.xlu0 %9292, %v2728_v3   ;;  %8779 = vmatpush1.bf16.msra.mxu1 %v8778_v16  ;;  %v1589_v1 = vld [vmem:[#allocation2 + $0xa7] sm:$0xff] }
 0x219   : >> { %v11021_v45 = vpop.f32.mrb[10].mxu0  ;;  %8780 = vmatprep.subr.bf16.mxu1 %v13989_v46  ;;  %v8320_v56 = vld [vmem:[%s10083_s11 + $0x328] sm:$0xff] }
 0x21a   : >> { %v1049_v24 = vpop.f32.mrb[11].mxu0  ;;  %1505 = vmatmul.mubr.f32.gmra.mrb[68].mxu1 %v10723_v17  ;;  %2244 = vmatmul.mubr.f32.gmra.mrb[116].mxu0 %v1921_v35 }
 0x21b   : >> { %8201 = vmatprep.mubr.msk.f32.mxu1 %vm301_vm0, %v10725_v39  ;;  %8249 = vmatprep.mubr.msk.f32.mxu0 %vm301_vm0, %v1682_v42  ;;  %v1923_v39 = vsel %vm301_vm0, %v1587_v47, %v1792_v61  ;;  %v8319_v42 = vld [vmem:[%s10083_s11 + $0x320] sm:$0xff]  ;;  %v1689_v47 = vld [vmem:[#allocation2 + $0xc9] sm:$0xff] }
 0x21c   : >> { %2872 = vperm.xlu0 %9292, %v2729_v26  }
 0x21d   : >> { %v11034_v19 = vpop.f32.mrb[12].mxu0 }
 0x21e   : >> { %v1054_v17 = vpop.f32.mrb[13].mxu0  ;;  %1510 = vmatmul.mubr.f32.gmra.mrb[70].mxu1 %v10737_v22  ;;  %2249 = vmatmul.mubr.f32.gmra.mrb[118].mxu0 %v1922_v55  ;;  %v1924_v22 = vsel %vm301_vm0, %v1588_v51, %v10944_v38  ;;  %v1590_v38 = vld [vmem:[#allocation2 + $0xaf] sm:$0xff] }
 0x21f   : >> { %8202 = vmatprep.mubr.msk.f32.mxu1 %vm301_vm0, %v10739_v44  ;;  %8250 = vmatprep.mubr.msk.f32.mxu0 %vm301_vm0, %v1683_v52  ;;  %v1796_v44 = vpop.permute.xlu1 %1795  ;;  %v1593_v17 = vld [vmem:[#allocation2 + $0xc7] sm:$0xff] }
 0x221   : >> { %v11042_v48 = vpop.f32.mrb[14].mxu0 }
 0x222   : >> { %v1059_v59 = vpop.f32.mrb[15].mxu0  ;;  %1515 = vmatmul.mubr.f32.gmra.mrb[72].mxu1 %v10750_v25  ;;  %2254 = vmatmul.mubr.f32.gmra.mrb[120].mxu0 %v1923_v39  ;;  %v1925_v25 = vsel %vm301_vm0, %v1589_v1, %v1796_v44  ;;  %v8321_v44 = vld [vmem:[%s10083_s11 + $0x330] sm:$0xff] }
 0x223   : >> { %8203 = vmatprep.mubr.msk.f32.mxu1 %vm301_vm0, %v10752_v0  ;;  %8251 = vmatprep.mubr.msk.f32.mxu0 %vm301_vm0, %v1684_v30  ;;  %v1686_v0 = vld [vmem:[#allocation2 + $0xb1] sm:$0xff]  ;;  %v1800_v26 = vpop.permute.xlu1 %1799 }
 0x225   : >> { %v11050_v53 = vpop.f32.mrb[16].mxu0 }
 0x226   : >> { %v1064_v3 = vpop.f32.mrb[17].mxu0  ;;  %1520 = vmatmul.mubr.f32.gmra.mrb[74].mxu1 %v10764_v62  ;;  %2259 = vmatmul.mubr.f32.gmra.mrb[122].mxu0 %v1924_v22  ;;  %v1926_v62 = vsel %vm301_vm0, %v1590_v38, %v10954_v40  ;;  %v1592_v40 = vld [vmem:[#allocation2 + $0xbf] sm:$0xff] }
 0x227   : >> { %8204 = vmatprep.mubr.msk.f32.mxu1 %vm301_vm0, %v10766_v12  ;;  %8252 = vmatprep.mubr.msk.f32.mxu0 %vm301_vm0, %v1685_v32  ;;  %v8781_v12 = vpack.c.bf16 %v8320_v56, %v8319_v42  ;;  %v1804_v52 = vpop.permute.xlu1 %1803  ;;  %v1691_v3 = vld [vmem:[#allocation2 + $0xd9] sm:$0xff] }
 0x229   : >> { %v11057_v23 = vpop.f32.mrb[18].mxu0  ;;  %8782 = vmatpush1.bf16.msra.mxu1 %v8781_v12  ;;  %v1597_v12 = vld [vmem:[#allocation2 + $0xe7] sm:$0xff] }
 0x22a   : >> { %v1069_v35 = vpop.f32.mrb[19].mxu0  ;;  %1525 = vmatmul.mubr.f32.gmra.mrb[76].mxu1 %v10777_v34  ;;  %2264 = vmatmul.mubr.f32.gmra.mrb[124].mxu0 %v1925_v25  ;;  %v1927_v34 = vsel %vm301_vm0, %v1591_v37, %v1800_v26  ;;  %v1595_v25 = vld [vmem:[#allocation2 + $0xd7] sm:$0xff] }
 0x22b   : >> { %8205 = vmatprep.mubr.msk.f32.mxu1 %vm301_vm0, %v10779_v14  ;;  %8253 = vmatprep.mubr.msk.f32.mxu0 %vm301_vm0, %v1686_v0  ;;  %v1688_v14 = vld [vmem:[#allocation2 + $0xc1] sm:$0xff]  ;;  %v1808_v1 = vpop.permute.xlu1 %1807 }
 0x22c   : >> { %8783 = vmatprep.subr.bf16.mxu1 %v13989_v46  ;;  %v1596_v35 = vld [vmem:[#allocation2 + $0xdf] sm:$0xff] }
 0x22d   : >> { %v11067_v24 = vpop.f32.mrb[20].mxu0 }
 0x22e   : >> { %v1074_v16 = vpop.f32.mrb[21].mxu0  ;;  %1530 = vmatmul.mubr.f32.gmra.mrb[78].mxu1 %v10791_v27  ;;  %2269 = vmatmul.mubr.f32.gmra.mrb[126].mxu0 %v1926_v62  ;;  %v1928_v27 = vsel %vm301_vm0, %v1592_v40, %v10968_v5  ;;  %v1594_v5 = vld [vmem:[#allocation2 + $0xcf] sm:$0xff]  ;;  %v1695_v40 = vld [vmem:[#allocation2 + $0xf9] sm:$0xff] }
 0x22f   : >> { %8206 = vmatprep.mubr.msk.f32.mxu1 %vm301_vm0, %v10793_v63  ;;  %8254 = vmatprep.mubr.msk.f32.mxu0 %vm301_vm0, %v1687_v6  ;;  %v11083_v63 = vpop.permute.xlu0 %1821  ;;  %v1693_v62 = vld [vmem:[#allocation2 + $0xe9] sm:$0xff] }
 0x231   : >> { %v11075_v55 = vpop.f32.mrb[22].mxu0 }
 0x232   : >> { %v1079_v61 = vpop.f32.mrb[23].mxu0  ;;  %1535 = vmatmul.mubr.f32.gmra.mrb[80].mxu1 %v10804_v50  ;;  %2274 = vmatmul.mubr.f32.gmra.mrb[128].mxu0 %v1927_v34  ;;  %v1929_v50 = vsel %vm301_vm0, %v1593_v17, %v1804_v52 }
 0x233   : >> { %8207 = vmatprep.mubr.msk.f32.mxu1 %vm301_vm0, %v10806_v7  ;;  %8255 = vmatprep.mubr.msk.f32.mxu0 %vm301_vm0, %v1688_v14  ;;  %v1690_v7 = vld [vmem:[#allocation2 + $0xd1] sm:$0xff]  ;;  %v11094_v59 = vpop.permute.xlu0 %1825 }
 0x234   : >> { %v1599_v61 = vld [vmem:[#allocation2 + $0xf7] sm:$0xff] }
 0x235   : >> { %v11085_v39 = vpop.f32.mrb[24].mxu0 }
 0x236   : >> { %v1084_v30 = vpop.f32.mrb[25].mxu0  ;;  %1540 = vmatmul.mubr.f32.gmra.mrb[82].mxu1 %v10818_v54  ;;  %2279 = vmatmul.mubr.f32.gmra.mrb[130].mxu0 %v1928_v27  ;;  %v8322_v54 = vld [vmem:[%s10083_s11 + $0x338] sm:$0xff] }
 0x237   : >> { %8208 = vmatprep.mubr.msk.f32.mxu1 %vm301_vm0, %v10820_v49  ;;  %8256 = vmatprep.mubr.msk.f32.mxu0 %vm301_vm0, %v1689_v47  ;;  %v1930_v49 = vsel %vm301_vm0, %v1594_v5, %v10983_v21  ;;  %v8784_v32 = vpack.c.bf16 %v8322_v54, %v8321_v44  ;;  %v1692_v21 = vld [vmem:[#allocation2 + $0xe1] sm:$0xff]  ;;  %v1697_v44 = vld [vmem:[#allocation2 + $0x109] sm:$0xff] }
 0x238   : >> { %v1600_v47 = vld [vmem:[#allocation2 + $0xff] sm:$0xff]  ;;  %v8324_v30 = vld [vmem:[%s10083_s11 + $0x348] sm:$0xff] }
 0x239   : >> { %v11092_v51 = vpop.f32.mrb[26].mxu0  ;;  %8785 = vmatpush1.bf16.msra.mxu1 %v8784_v32  ;;  %v1601_v54 = vld [vmem:[#allocation2 + $0x107] sm:$0xff] }
 0x23a   : >> { %v1089_v22 = vpop.f32.mrb[27].mxu0  ;;  %1545 = vmatmul.mubr.f32.gmra.mrb[84].mxu1 %v10831_v2  ;;  %2284 = vmatmul.mubr.f32.gmra.mrb[132].mxu0 %v1929_v50  ;;  %v1931_v2 = vsel %vm301_vm0, %v1595_v25, %v1808_v1  ;;  %v1698_v25 = vld [vmem:[#allocation2 + $0x111] sm:$0xff] }
 0x23b   : >> { %8209 = vmatprep.mubr.msk.f32.mxu1 %vm301_vm0, %v10833_v58  ;;  %8257 = vmatprep.mubr.msk.f32.mxu0 %vm301_vm0, %v1690_v7  ;;  %v11111_v58 = vpop.permute.xlu0 %1829 }
 0x23c   : >> { %8786 = vmatprep.subr.bf16.mxu1 %v13989_v46 }
 0x23d   : >> { %v11104_v0 = vpop.f32.mrb[28].mxu0 }
 0x23e   : >> { %v1094_v38 = vpop.f32.mrb[29].mxu0  ;;  %1550 = vmatmul.mubr.f32.gmra.mrb[86].mxu1 %v10844_v11  ;;  %2289 = vmatmul.mubr.f32.gmra.mrb[134].mxu0 %v1930_v49  ;;  %v1932_v11 = vsel %vm301_vm0, %v1596_v35, %v11000_v4  ;;  %v1598_v4 = vld [vmem:[#allocation2 + $0xef] sm:$0xff] }
 0x23f   : >> { %8210 = vmatprep.mubr.msk.f32.mxu1 %vm301_vm0, %v10846_v10  ;;  %8258 = vmatprep.mubr.msk.f32.mxu0 %vm301_vm0, %v1691_v3  ;;  %v1812_v10 = vpop.permute.xlu1 %1811  ;;  %v11124_v6 = vpop.permute.xlu0 %1833  ;;  %v1602_v38 = vld [vmem:[#allocation2 + $0x10f] sm:$0xff] }
 0x241   : >> { %v11114_v42 = vpop.f32.mrb[30].mxu0 }
 0x242   : >> { %v1099_v56 = vpop.f32.mrb[31].mxu0  ;;  %1555 = vmatmul.mubr.f32.gmra.mrb[88].mxu1 %v10856_v41  ;;  %2294 = vmatmul.mubr.f32.gmra.mrb[136].mxu0 %v1931_v2  ;;  %v1933_v41 = vsel %vm301_vm0, %v1597_v12, %v1812_v10 }
 0x243   : >> { %8211 = vmatprep.mubr.msk.f32.mxu1 %vm301_vm0, %v10858_v43  ;;  %8259 = vmatprep.mubr.msk.f32.mxu0 %vm301_vm0, %v1692_v21  ;;  %v1694_v43 = vld [vmem:[#allocation2 + $0xf1] sm:$0xff]  ;;  %v1816_v14 = vpop.permute.xlu1 %1815  ;;  %v1938_v21 = vsel %vm301_vm0, %v1602_v38, %v11083_v63  ;;  %v1699_v56 = vld [vmem:[#allocation2 + $0x119] sm:$0xff] }
 0x245   : >> { %v11122_v26 = vpop.f32.mrb[32].mxu0 }
 0x246   : >> { %v1104_v37 = vpop.f32.mrb[33].mxu0  ;;  %1560 = vmatmul.mubr.f32.gmra.mrb[90].mxu1 %v10869_v57  ;;  %2299 = vmatmul.mubr.f32.gmra.mrb[138].mxu0 %v1932_v11  ;;  %v1934_v57 = vsel %vm301_vm0, %v1598_v4, %v11014_v9  ;;  %v8323_v9 = vld [vmem:[%s10083_s11 + $0x340] sm:$0xff]  ;;  %v1603_v11 = vld [vmem:[#allocation2 + $0x117] sm:$0xff] }
 0x247   : >> { %8212 = vmatprep.mubr.msk.f32.mxu1 %vm301_vm0, %v10871_v29  ;;  %8260 = vmatprep.mubr.msk.f32.mxu0 %vm301_vm0, %v1693_v62  ;;  %v11139_v29 = vpop.permute.xlu0 %1837  ;;  %v8787_v5 = vpack.c.bf16 %v8324_v30, %v8323_v9  ;;  %v1820_v22 = vpop.permute.xlu1 %1819 }
 0x248   : >> { %v1937_v1 = vsel %vm301_vm0, %v1601_v54, %v1820_v22  ;;  %v1606_v22 = vld [vmem:[#allocation2 + $0x12f] sm:$0xff] }
 0x249   : >> { %v11131_v16 = vpop.f32.mrb[34].mxu0  ;;  %8788 = vmatpush1.bf16.msra.mxu1 %v8787_v5 }
 0x24a   : >> { %v1109_v34 = vpop.f32.mrb[35].mxu0  ;;  %1565 = vmatmul.mubr.f32.gmra.mrb[92].mxu1 %v10883_v13  ;;  %2304 = vmatmul.mubr.f32.gmra.mrb[140].mxu0 %v1933_v41  ;;  %v1935_v13 = vsel %vm301_vm0, %v1599_v61, %v1816_v14  ;;  %v1700_v41 = vld [vmem:[#allocation2 + $0x121] sm:$0xff] }
 0x24b   : >> { %8213 = vmatprep.mubr.msk.f32.mxu1 %vm301_vm0, %v10885_v36  ;;  %8261 = vmatprep.mubr.msk.f32.mxu0 %vm301_vm0, %v1694_v43  ;;  %v1696_v36 = vld [vmem:[#allocation2 + $0x101] sm:$0xff]  ;;  %v11150_v50 = vpop.permute.xlu0 %1841  ;;  %v1824_v35 = vpop.permute.xlu1 %1823  ;;  %v8325_v34 = vld [vmem:[%s10083_s11 + $0x350] sm:$0xff] }
 0x24c   : >> { %8789 = vmatprep.subr.bf16.mxu1 %v13989_v46  ;;  %v1939_v37 = vsel %vm301_vm0, %v1603_v11, %v1824_v35  ;;  %v1604_v43 = vld [vmem:[#allocation2 + $0x11f] sm:$0xff]  ;;  %v1607_v35 = vld [vmem:[#allocation2 + $0x137] sm:$0xff] }
 0x24d   : >> { %v11141_v27 = vpop.f32.mrb[36].mxu0 }
 0x24e   : >> { %v1114_v52 = vpop.f32.mrb[37].mxu0  ;;  %1570 = vmatmul.mubr.f32.gmra.mrb[94].mxu1 %v10896_v20  ;;  %2309 = vmatmul.mubr.f32.gmra.mrb[142].mxu0 %v1934_v57  ;;  %v1936_v20 = vsel %vm301_vm0, %v1600_v47, %v11032_v33  ;;  %v8326_v57 = vld [vmem:[%s10083_s11 + $0x358] sm:$0xff] }
 0x24f   : >> { %8262 = vmatprep.mubr.msk.f32.mxu0 %vm301_vm0, %v1695_v40  ;;  %v11160_v3 = vpop.permute.xlu0 %1845  ;;  %v8790_v14 = vpack.c.bf16 %v8326_v57, %v8325_v34  ;;  %v1940_v40 = vsel %vm301_vm0, %v1604_v43, %v11094_v59  ;;  %v1828_v52 = vpop.permute.xlu1 %1827  ;;  %v1608_v43 = vld [vmem:[#allocation2 + $0x13f] sm:$0xff] }
 0x251   : >> { %v11146_v17 = vpop.f32.mrb[38].mxu0  ;;  %8791 = vmatpush1.bf16.msra.mxu1 %v8790_v14  ;;  %v8328_v14 = vld [vmem:[%s10083_s11 + $0x368] sm:$0xff] }
 0x252   : >> { %v1119_v7 = vpop.f32.mrb[39].mxu0  ;;  %2314 = vmatmul.mubr.f32.gmra.mrb[144].mxu0 %v1935_v13  ;;  %v1701_v13 = vld [vmem:[#allocation2 + $0x129] sm:$0xff]  ;;  %8792 = vmatprep.subr.bf16.mxu1 %v13989_v46 }
 0x253   : >> { %8263 = vmatprep.mubr.msk.f32.mxu0 %vm301_vm0, %v1696_v36  ;;  %v11169_v62 = vpop.permute.xlu0 %1849  ;;  %v1605_v36 = vld [vmem:[#allocation2 + $0x127] sm:$0xff] }
 0x254   : >> { %v1941_v59 = vsel %vm301_vm0, %v1605_v36, %v1828_v52 }
 0x255   : >> { %v11155_v49 = vpop.f32.mrb[40].mxu0 }
 0x256   : >> { %v1124_v32 = vpop.f32.mrb[41].mxu0  ;;  %2319 = vmatmul.mubr.f32.gmra.mrb[146].mxu0 %v1936_v20  ;;  %v1702_v20 = vld [vmem:[#allocation2 + $0x131] sm:$0xff] }
 0x257   : >> { %8264 = vmatprep.mubr.msk.f32.mxu0 %vm301_vm0, %v1697_v44  ;;  %v11180_v61 = vpop.permute.xlu0 %1853 }
 0x259   : >> { %v11162_v2 = vpop.f32.mrb[42].mxu0 }
 0x25a   : >> { %v1129_v33 = vpop.f32.mrb[43].mxu0  ;;  %2324 = vmatmul.mubr.f32.gmra.mrb[148].mxu0 %v1937_v1 }
 0x25b   : >> { %8265 = vmatprep.mubr.msk.f32.mxu0 %vm301_vm0, %v1698_v25  ;;  %v11198_v38 = vpop.permute.xlu0 %1857  ;;  %v1832_v33 = vpop.permute.xlu1 %1831 }
 0x25d   : >> { %v11167_v10 = vpop.f32.mrb[44].mxu0 }
 0x25e   : >> { %v1134_v12 = vpop.f32.mrb[45].mxu0  ;;  %2329 = vmatmul.mubr.f32.gmra.mrb[150].mxu0 %v1938_v21  ;;  %v1703_v21 = vld [vmem:[#allocation2 + $0x139] sm:$0xff] }
 0x25f   : >> { %8266 = vmatprep.mubr.msk.f32.mxu0 %vm301_vm0, %v1699_v56 }
 0x261   : >> { %v11173_v4 = vpop.f32.mrb[46].mxu0 }
 0x262   : >> { %v1139_v63 = vpop.f32.mrb[47].mxu0  ;;  %2334 = vmatmul.mubr.f32.gmra.mrb[152].mxu0 %v1939_v37 }
 0x263   : >> { %8267 = vmatprep.mubr.msk.f32.mxu0 %vm301_vm0, %v1700_v41  ;;  %v1704_v41 = vld [vmem:[#allocation2 + $0x141] sm:$0xff] }
 0x264   : >> { %v8327_v63 = vld [vmem:[%s10083_s11 + $0x360] sm:$0xff] }
 0x265   : >> { %v11182_v47 = vpop.f32.mrb[48].mxu0  ;;  %v1336_v9 = vpop.f32.mrb[0].mxu1  ;;  %v8793_v36 = vpack.c.bf16 %v8328_v14, %v8327_v63 }
 0x266   : >> { %v1144_v30 = vpop.f32.mrb[49].mxu0  ;;  %2339 = vmatmul.mubr.f32.gmra.mrb[154].mxu0 %v1940_v40  ;;  %v1338_v7 = vpop.f32.mrb[1].mxu1  ;;  %v11186_v5 = vadd.f32 %v1336_v9, %v10970_v28  ;;  %v1942_v28 = vsel %vm301_vm0, %v1606_v22, %v11111_v58  ;;  %v1943_v58 = vsel %vm301_vm0, %v1607_v35, %v1832_v33 }
 0x267   : >> { %8268 = vmatprep.mubr.msk.f32.mxu0 %vm301_vm0, %v1701_v13  ;;  %v11217_v9 = vpop.permute.xlu0 %1861  ;;  %v1836_v30 = vpop.permute.xlu1 %1835  ;;  %v1705_v7 = vld [vmem:[#allocation2 + $0x149] sm:$0xff]  ;;  %8794 = vmatpush1.bf16.msra.mxu1 %v8793_v36  ;;  %v1612_v36 = vld [vmem:[#allocation2 + $0x15f] sm:$0xff] }
 0x268   : >> { %8795 = vmatprep.subr.bf16.mxu1 %v13989_v46 }
 0x269   : >> { %v11190_v44 = vpop.f32.mrb[50].mxu0  ;;  %v1341_v54 = vpop.f32.mrb[2].mxu1 }
 0x26a   : >> { %v1149_v32 = vpop.f32.mrb[51].mxu0  ;;  %2344 = vmatmul.mubr.f32.gmra.mrb[156].mxu0 %v1941_v59  ;;  %v1343_v1 = vpop.f32.mrb[3].mxu1  ;;  %v11193_v25 = vadd.f32 %v1341_v54, %v10978_v18  ;;  %v1609_v59 = vld [vmem:[#allocation2 + $0x147] sm:$0xff] }
 0x26b   : >> { %8269 = vmatprep.mubr.msk.f32.mxu0 %vm301_vm0, %v1702_v20  ;;  %v1706_v1 = vld [vmem:[#allocation2 + $0x151] sm:$0xff] }
 0x26d   : >> { %v11200_v56 = vpop.f32.mrb[52].mxu0  ;;  %v1346_v11 = vpop.f32.mrb[4].mxu1 }
 0x26e   : >> { %v1154_v12 = vpop.f32.mrb[53].mxu0  ;;  %2349 = vmatmul.mubr.f32.gmra.mrb[158].mxu0 %v1942_v28  ;;  %v1348_v37 = vpop.f32.mrb[5].mxu1  ;;  %v11203_v18 = vadd.f32 %v1346_v11, %v10991_v15  ;;  %v1944_v15 = vsel %vm301_vm0, %v1608_v43, %v11124_v6  ;;  %v1945_v6 = vsel %vm301_vm0, %v1609_v59, %v1836_v30  ;;  %v1610_v28 = vld [vmem:[#allocation2 + $0x14f] sm:$0xff]  ;;  %v1611_v43 = vld [vmem:[#allocation2 + $0x157] sm:$0xff] }
 0x26f   : >> { %8270 = vmatprep.mubr.msk.f32.mxu0 %vm301_vm0, %v1703_v21  ;;  %v11235_v37 = vpop.permute.xlu0 %2734  ;;  %v8330_v59 = vld [vmem:[%s10083_s11 + $0x378] sm:$0xff] }
 0x270   : >> { %vm2875_vm9 = vcmp.eq.s32.totalorder %v11235_v37, 1 }
 0x271   : >> { %v11207_v34 = vpop.f32.mrb[54].mxu0  ;;  %v1351_v57 = vpop.f32.mrb[6].mxu1 }
 0x272   : >> { %v1159_v40 = vpop.f32.mrb[55].mxu0  ;;  %v1353_v52 = vpop.f32.mrb[7].mxu1  ;;  %2354 = vmatmul.mubr.f32.gmra.mrb[160].mxu0 %v1943_v58  ;;  %v11212_v13 = vadd.f32 %v1351_v57, %v11002_v60 }
 0x273   : >> { %8271 = vmatprep.mubr.msk.f32.mxu0 %vm301_vm0, %v1704_v41  ;;  %v1840_v58 = vpop.permute.xlu1 %1839  ;;  %v1707_v41 = vld [vmem:[#allocation2 + $0x159] sm:$0xff]  ;;  %v1708_v52 = vld [vmem:[#allocation2 + $0x161] sm:$0xff] }
 0x275   : >> { %v11219_v20 = vpop.f32.mrb[56].mxu0  ;;  %v1356_v22 = vpop.f32.mrb[8].mxu1 }
 0x276   : >> { %v1164_v54 = vpop.f32.mrb[57].mxu0  ;;  %v1358_v60 = vpop.f32.mrb[9].mxu1  ;;  %2359 = vmatmul.mubr.f32.gmra.mrb[162].mxu0 %v1944_v15  ;;  %v11223_v32 = vadd.f32 %v1356_v22, %v11011_v8  ;;  %v1946_v8 = vsel %vm301_vm0, %v1610_v28, %v11139_v29  ;;  %v1947_v29 = vsel %vm301_vm0, %v1611_v43, %v1840_v58  ;;  %v1710_v43 = vld [vmem:[#allocation2 + $0x171] sm:$0xff] }
 0x277   : >> { %8272 = vmatprep.mubr.msk.f32.mxu0 %vm301_vm0, %v1705_v7  ;;  %v8329_v7 = vld [vmem:[%s10083_s11 + $0x370] sm:$0xff]  ;;  %v1844_v28 = vpop.permute.xlu1 %1843 }
 0x279   : >> { %v11227_v33 = vpop.f32.mrb[58].mxu0  ;;  %v1361_v21 = vpop.f32.mrb[10].mxu1 }
 0x27a   : >> { %v1169_v35 = vpop.f32.mrb[59].mxu0  ;;  %v1363_v11 = vpop.f32.mrb[11].mxu1  ;;  %2364 = vmatmul.mubr.f32.gmra.mrb[164].mxu0 %v1945_v6  ;;  %v11230_v12 = vadd.f32 %v1361_v21, %v11021_v45  ;;  %v8796_v6 = vpack.c.bf16 %v8330_v59, %v8329_v7  ;;  %v1709_v21 = vld [vmem:[#allocation2 + $0x169] sm:$0xff]  ;;  %v1711_v59 = vld [vmem:[#allocation2 + $0x179] sm:$0xff] }
 0x27b   : >> { %8273 = vmatprep.mubr.msk.f32.mxu0 %vm301_vm0, %v1706_v1  ;;  %v11254_v1 = vpop.permute.xlu0 %2743  ;;  %v1613_v35 = vld [vmem:[#allocation2 + $0x167] sm:$0xff]  ;;  %v1848_v7 = vpop.permute.xlu1 %1847 }
 0x27c   : >> { %8797 = vmatpush1.bf16.msra.mxu1 %v8796_v6  ;;  %vm2878_vm12 = vcmp.eq.s32.totalorder %v11254_v1, 1 }
 0x27d   : >> { %v11237_v57 = vpop.f32.mrb[60].mxu0  ;;  %v1366_v63 = vpop.f32.mrb[12].mxu1  ;;  %8798 = vmatprep.subr.bf16.mxu1 %v13989_v46 }
 0x27e   : >> { %v1174_v14 = vpop.f32.mrb[61].mxu0  ;;  %v1368_v40 = vpop.f32.mrb[13].mxu1  ;;  %2369 = vmatmul.mubr.f32.gmra.mrb[166].mxu0 %v1946_v8  ;;  %v11240_v45 = vadd.f32 %v1366_v63, %v11034_v19  ;;  %v1948_v19 = vsel %vm301_vm0, %v1612_v36, %v11150_v50  ;;  %v1949_v50 = vsel %vm301_vm0, %v1613_v35, %v1844_v28  ;;  %v1614_v63 = vld [vmem:[#allocation2 + $0x16f] sm:$0xff]  ;;  %v1616_v35 = vld [vmem:[#allocation2 + $0x17f] sm:$0xff] }
 0x27f   : >> { %8274 = vmatprep.mubr.msk.f32.mxu0 %vm301_vm0, %v1707_v41 }
 0x281   : >> { %v11244_v15 = vpop.f32.mrb[62].mxu0  ;;  %v1371_v30 = vpop.f32.mrb[14].mxu1 }
 0x282   : >> { %v1179_v22 = vpop.f32.mrb[63].mxu0  ;;  %v1373_v54 = vpop.f32.mrb[15].mxu1  ;;  %2374 = vmatmul.mubr.f32.gmra.mrb[168].mxu0 %v1947_v29  ;;  %v11249_v60 = vadd.f32 %v1371_v30, %v11042_v48 }
 0x283   : >> { %8275 = vmatprep.mubr.msk.f32.mxu0 %vm301_vm0, %v1708_v52  ;;  %v11272_v30 = vpop.permute.xlu0 %2749  ;;  %v1615_v22 = vld [vmem:[#allocation2 + $0x177] sm:$0xff] }
 0x284   : >> { %vm2880_vm14 = vcmp.eq.s32.totalorder %v11272_v30, 1 }
 0x285   : >> { %v11256_v11 = vpop.f32.mrb[64].mxu0  ;;  %v1376_v8 = vpop.f32.mrb[16].mxu1 }
 0x286   : >> { %v1184_v58 = vpop.f32.mrb[65].mxu0  ;;  %v1378_v48 = vpop.f32.mrb[17].mxu1  ;;  %2379 = vmatmul.mubr.f32.gmra.mrb[170].mxu0 %v1948_v19  ;;  %v11260_v41 = vadd.f32 %v1376_v8, %v11050_v53  ;;  %v1950_v53 = vsel %vm301_vm0, %v1614_v63, %v11160_v3  ;;  %v1951_v3 = vsel %vm301_vm0, %v1615_v22, %v1848_v7  ;;  %v1713_v7 = vld [vmem:[#allocation2 + $0x189] sm:$0xff] }
 0x287   : >> { %8276 = vmatprep.mubr.msk.f32.mxu0 %vm301_vm0, %v1709_v21  ;;  %v1712_v21 = vld [vmem:[#allocation2 + $0x181] sm:$0xff] }
 0x288   : >> { %v8331_v48 = vld [vmem:[%s10083_s11 + $0x380] sm:$0xff] }
 0x289   : >> { %v11264_v14 = vpop.f32.mrb[66].mxu0  ;;  %v1381_v40 = vpop.f32.mrb[18].mxu1 }
 0x28a   : >> { %v1189_v29 = vpop.f32.mrb[67].mxu0  ;;  %v1383_v52 = vpop.f32.mrb[19].mxu1  ;;  %2384 = vmatmul.mubr.f32.gmra.mrb[172].mxu0 %v1949_v50  ;;  %v11267_v36 = vadd.f32 %v1381_v40, %v11057_v23  ;;  %v8332_v50 = vld [vmem:[%s10083_s11 + $0x388] sm:$0xff] }
 0x28b   : >> { %8277 = vmatprep.mubr.msk.f32.mxu0 %vm301_vm0, %v1710_v43  ;;  %v8799_v29 = vpack.c.bf16 %v8332_v50, %v8331_v48  ;;  %v11291_v52 = vpop.permute.xlu0 %2755 }
 0x28c   : >> { %vm2882_vm2 = vcmp.eq.s32.totalorder %v11291_v52, 1 }
 0x28d   : >> { %v11274_v54 = vpop.f32.mrb[68].mxu0  ;;  %v1386_v6 = vpop.f32.mrb[20].mxu1  ;;  %8800 = vmatpush1.bf16.msra.mxu1 %v8799_v29 }
 0x28e   : >> { %v1194_v19 = vpop.f32.mrb[69].mxu0  ;;  %v1388_v28 = vpop.f32.mrb[21].mxu1  ;;  %2389 = vmatmul.mubr.f32.gmra.mrb[174].mxu0 %v1950_v53  ;;  %v11277_v23 = vadd.f32 %v1386_v6, %v11067_v24  ;;  %v1952_v24 = vsel %vm301_vm0, %v1616_v35, %v11169_v62  ;;  %8801 = vmatprep.subr.bf16.mxu1 %v13989_v46 }
 0x28f   : >> { %8278 = vmatprep.mubr.msk.f32.mxu0 %vm301_vm0, %v1711_v59  ;;  %v1852_v53 = vpop.permute.xlu1 %1851  ;;  %v1617_v59 = vld [vmem:[#allocation2 + $0x187] sm:$0xff] }
 0x290   : >> { %v1953_v62 = vsel %vm301_vm0, %v1617_v59, %v1852_v53  ;;  %v1619_v53 = vld [vmem:[#allocation2 + $0x197] sm:$0xff] }
 0x291   : >> { %v11281_v8 = vpop.f32.mrb[70].mxu0  ;;  %v1391_v58 = vpop.f32.mrb[22].mxu1 }
 0x292   : >> { %v1199_v43 = vpop.f32.mrb[71].mxu0  ;;  %v1393_v63 = vpop.f32.mrb[23].mxu1  ;;  %2394 = vmatmul.mubr.f32.gmra.mrb[176].mxu0 %v1951_v3  ;;  %v11286_v40 = vadd.f32 %v1391_v58, %v11075_v55  ;;  %v1714_v3 = vld [vmem:[#allocation2 + $0x191] sm:$0xff] }
 0x293   : >> { %8279 = vmatprep.mubr.msk.f32.mxu0 %vm301_vm0, %v1712_v21  ;;  %v1618_v21 = vld [vmem:[#allocation2 + $0x18f] sm:$0xff]  ;;  %v11309_v63 = vpop.permute.xlu0 %2761  ;;  %v1856_v29 = vpop.permute.xlu1 %1855 }
 0x294   : >> { %vm2884_vm4 = vcmp.eq.s32.totalorder %v11309_v63, 1 }
 0x295   : >> { %v11293_v22 = vpop.f32.mrb[72].mxu0  ;;  %v1396_v6 = vpop.f32.mrb[24].mxu1 }
 0x296   : >> { %v1204_v19 = vpop.f32.mrb[73].mxu0  ;;  %v1398_v55 = vpop.f32.mrb[25].mxu1  ;;  %2399 = vmatmul.mubr.f32.gmra.mrb[178].mxu0 %v1952_v24  ;;  %v11297_v28 = vadd.f32 %v1396_v6, %v11085_v39  ;;  %v1954_v39 = vsel %vm301_vm0, %v1618_v21, %v11180_v61  ;;  %v1715_v24 = vld [vmem:[#allocation2 + $0x199] sm:$0xff]  ;;  %v1955_v61 = vsel %vm301_vm0, %v1619_v53, %v1856_v29  ;;  %v1717_v53 = vld [vmem:[#allocation2 + $0x1a9] sm:$0xff] }
 0x297   : >> { %8280 = vmatprep.mubr.msk.f32.mxu0 %vm301_vm0, %v1713_v7  ;;  %v1716_v55 = vld [vmem:[#allocation2 + $0x1a1] sm:$0xff]  ;;  %v11328_v29 = vpop.permute.xlu0 %2767 }
 0x298   : >> { %vm2886_vm6 = vcmp.eq.s32.totalorder %v11328_v29, 1 }
 0x299   : >> { %v11301_v35 = vpop.f32.mrb[74].mxu0  ;;  %v1401_v58 = vpop.f32.mrb[26].mxu1 }
 0x29a   : >> { %v1209_v48 = vpop.f32.mrb[75].mxu0  ;;  %v1403_v50 = vpop.f32.mrb[27].mxu1  ;;  %2404 = vmatmul.mubr.f32.gmra.mrb[180].mxu0 %v1953_v62  ;;  %v11304_v43 = vadd.f32 %v1401_v58, %v11092_v51  ;;  %v1620_v62 = vld [vmem:[#allocation2 + $0x19f] sm:$0xff]  ;;  %v8333_v58 = vld [vmem:[%s10083_s11 + $0x390] sm:$0xff] }
 0x29b   : >> { %8281 = vmatprep.mubr.msk.f32.mxu0 %vm301_vm0, %v1714_v3  ;;  %v8334_v48 = vld [vmem:[%s10083_s11 + $0x398] sm:$0xff] }
 0x29d   : >> { %v11311_v7 = vpop.f32.mrb[76].mxu0  ;;  %v1406_v59 = vpop.f32.mrb[28].mxu1 }
 0x29e   : >> { %v1214_v6 = vpop.f32.mrb[77].mxu0  ;;  %v1408_v19 = vpop.f32.mrb[29].mxu1  ;;  %2409 = vmatmul.mubr.f32.gmra.mrb[182].mxu0 %v1954_v39  ;;  %v11314_v51 = vadd.f32 %v1406_v59, %v11104_v0  ;;  %v8802_v39 = vpack.c.bf16 %v8334_v48, %v8333_v58  ;;  %v1956_v0 = vsel %vm301_vm0, %v1620_v62, %v11198_v38  ;;  %v1621_v59 = vld [vmem:[#allocation2 + $0x1a7] sm:$0xff]  ;;  %v1622_v62 = vld [vmem:[#allocation2 + $0x1af] sm:$0xff] }
 0x29f   : >> { %8282 = vmatprep.mubr.msk.f32.mxu0 %vm301_vm0, %v1715_v24  ;;  %v1860_v24 = vpop.permute.xlu1 %1859 }
 0x2a0   : >> { %8803 = vmatpush1.bf16.msra.mxu1 %v8802_v39  ;;  %v1957_v38 = vsel %vm301_vm0, %v1621_v59, %v1860_v24 }
 0x2a1   : >> { %v11318_v3 = vpop.f32.mrb[78].mxu0  ;;  %v1411_v21 = vpop.f32.mrb[30].mxu1  ;;  %8804 = vmatprep.subr.bf16.mxu1 %v13989_v46 }
 0x2a2   : >> { %v1219_v50 = vpop.f32.mrb[79].mxu0  ;;  %v1413_v31 = vpop.f32.mrb[31].mxu1  ;;  %2414 = vmatmul.mubr.f32.gmra.mrb[184].mxu0 %v1955_v61  ;;  %v11323_v6 = vadd.f32 %v1411_v21, %v11114_v42 }
 0x2a3   : >> { %8283 = vmatprep.mubr.msk.f32.mxu0 %vm301_vm0, %v1716_v55  ;;  %v1718_v55 = vld [vmem:[#allocation2 + $0x1b1] sm:$0xff] }
 0x2a5   : >> { %v11330_v19 = vpop.f32.mrb[80].mxu0  ;;  %v1416_v50 = vpop.f32.mrb[32].mxu1 }
 0x2a6   : >> { %v11334_v31 = vadd.f32 %v1416_v50, %v11122_v26  ;;  %v1224_v42 = vpop.f32.mrb[81].mxu0  ;;  %v1418_v61 = vpop.f32.mrb[33].mxu1  ;;  %2419 = vmatmul.mubr.f32.gmra.mrb[186].mxu0 %v1956_v0  ;;  %v1958_v0 = vsel %vm301_vm0, %v1622_v62, %v11217_v9 }
 0x2a7   : >> { %8284 = vmatprep.mubr.msk.f32.mxu0 %vm301_vm0, %v1717_v53  ;;  %v11346_v53 = vpop.permute.xlu0 %2773 }
 0x2a9   : >> { %v11338_v21 = vpop.f32.mrb[82].mxu0  ;;  %v1421_v58 = vpop.f32.mrb[34].mxu1 }
 0x2aa   : >> { %v11341_v48 = vadd.f32 %v1421_v58, %v11131_v16  ;;  %v1229_v39 = vpop.f32.mrb[83].mxu0  ;;  %v1423_v26 = vpop.f32.mrb[35].mxu1  ;;  %2424 = vmatmul.mubr.f32.gmra.mrb[188].mxu0 %v1957_v38  ;;  %v8335_v38 = vld [vmem:[%s10083_s11 + $0x3a0] sm:$0xff] }
 0x2ab   : >> { %8285 = vmatprep.mubr.msk.f32.mxu0 %vm301_vm0, %v1718_v55  ;;  %v8336_v39 = vld [vmem:[%s10083_s11 + $0x3a8] sm:$0xff] }
 0x2ac   : >> { %13990 = vst [vmem:[#allocation18_spill] sm:$0xff] %v11341_v48  ;;  %v8805_v26 = vpack.c.bf16 %v8336_v39, %v8335_v38  ;;  %v11360_v48 = vpop.permute.xlu0 %2779 }
 0x2ad   : >> { %v11348_v24 = vpop.f32.mrb[84].mxu0  ;;  %v1426_v59 = vpop.f32.mrb[36].mxu1 }
 0x2ae   : >> { %13991 = vst [vmem:[#allocation28_spill] sm:$0xff] %v11348_v24  ;;  %v11351_v50 = vadd.f32 %v1426_v59, %v11141_v27  ;;  %v1234_v42 = vpop.f32.mrb[85].mxu0  ;;  %v1428_v16 = vpop.f32.mrb[37].mxu1  ;;  %2429 = vmatmul.mubr.f32.gmra.mrb[190].mxu0 %v1958_v0  ;;  %8806 = vmatpush1.bf16.msra.mxu1 %v8805_v26 }
 0x2af   : >> { %8807 = vmatprep.subr.bf16.mxu1 %v13989_v46 }
 0x2b1   : >> { %v11353_v61 = vpop.f32.mrb[86].mxu0  ;;  %v1431_v58 = vpop.f32.mrb[38].mxu1 }
 0x2b2   : >> { %v11358_v55 = vadd.f32 %v1431_v58, %v11146_v17  ;;  %v1239_v9 = vpop.f32.mrb[87].mxu0  ;;  %v1433_v62 = vpop.f32.mrb[39].mxu1 }
 0x2b3   : >> { %v11373_v9 = vpop.permute.xlu0 %2785 }
 0x2b5   : >> { %v11362_v24 = vpop.f32.mrb[88].mxu0  ;;  %v1436_v27 = vpop.f32.mrb[40].mxu1 }
 0x2b6   : >> { %13992 = vst [vmem:[#allocation19_spill] sm:$0xff] %v11362_v24  ;;  %v11366_v0 = vadd.f32 %v1436_v27, %v11155_v49  ;;  %v1244_v59 = vpop.f32.mrb[89].mxu0  ;;  %v1438_v42 = vpop.f32.mrb[41].mxu1  ;;  %v8338_v24 = vld [vmem:[%s10083_s11 + $0x3b8] sm:$0xff] }
 0x2b8   : >> { %13993 = vst [vmem:[#allocation20_spill] sm:$0xff] %v11366_v0  ;;  %v8337_v0 = vld [vmem:[%s10083_s11 + $0x3b0] sm:$0xff] }
 0x2b9   : >> { %v11368_v17 = vpop.f32.mrb[90].mxu0  ;;  %v1441_v16 = vpop.f32.mrb[42].mxu1 }
 0x2ba   : >> { %13994 = vst [vmem:[#allocation21_spill] sm:$0xff] %v11368_v17  ;;  %v11371_v58 = vadd.f32 %v1441_v16, %v11162_v2  ;;  %v1249_v38 = vpop.f32.mrb[91].mxu0  ;;  %v1443_v39 = vpop.f32.mrb[43].mxu1 }
 0x2bb   : >> { %v8808_v39 = vpack.c.bf16 %v8338_v24, %v8337_v0 }
 0x2bc   : >> { %13995 = vst [vmem:[#allocation22_spill] sm:$0xff] %v11371_v58  ;;  %v11388_v58 = vpop.permute.xlu0 %2788 }
 0x2bd   : >> { %v11375_v62 = vpop.f32.mrb[92].mxu0  ;;  %v1446_v26 = vpop.f32.mrb[44].mxu1  ;;  %8809 = vmatpush1.bf16.msra.mxu1 %v8808_v39 }
 0x2be   : >> { %13996 = vst [vmem:[#allocation23_spill] sm:$0xff] %v11375_v62  ;;  %v11378_v49 = vadd.f32 %v1446_v26, %v11167_v10  ;;  %v1254_v27 = vpop.f32.mrb[93].mxu0  ;;  %v1448_v59 = vpop.f32.mrb[45].mxu1  ;;  %8846 = vmatprep.subr.bf16.mxu1 %v13989_v46 }
 0x2bf   : >> { %v2732_v62 = vpop.permute.xlu1 %2731  ;;  %v11393_v27 = vld [vmem:[%s11390_s17] ss:$0 sm:$0xff] }
 0x2c0   : >> { %13997 = vst [vmem:[#allocation24_spill] sm:$0xff] %v11378_v49  ;;  %vm2874_vm8 = vcmp.eq.s32.totalorder %v2732_v62, 1 }
 0x2c1   : >> { %v11381_v42 = vpop.f32.mrb[94].mxu0  ;;  %v1451_v17 = vpop.f32.mrb[46].mxu1 }
 0x2c2   : >> { %13998 = vst [vmem:[#allocation25_spill] sm:$0xff] %v11381_v42  ;;  %v11386_v2 = vadd.f32 %v1451_v17, %v11173_v4  ;;  %v1259_v16 = vpop.f32.mrb[95].mxu0  ;;  %v1453_v38 = vpop.f32.mrb[47].mxu1 }
 0x2c4   : >> { %13999 = vst [vmem:[#allocation26_spill] sm:$0xff] %v11386_v2 }
 0x2c5   : >> { %v1456_v10 = vpop.f32.mrb[48].mxu1  ;;  %v2195_v26 = vpop.f32.mrb[96].mxu0 }
 0x2c6   : >> { %v11397_v59 = vadd.f32 %v1456_v10, %v11182_v47  ;;  %v2434_v4 = vadd.f32 %v2195_v26, %v11186_v5  ;;  %v1458_v17 = vpop.f32.mrb[49].mxu1  ;;  %v2197_v24 = vpop.f32.mrb[97].mxu0 }
 0x2c7   : >> { %v11405_v10 = vpop.permute.xlu0 %2791  ;;  %v2738_v5 = vpop.permute.xlu1 %2737  ;;  %v8289_v24 = vld [vmem:[%s10083_s11 + $0x240] sm:$0xff] }
 0x2c8   : >> { %v2490_v0 = vadd.f32 %v11393_v27, %v2434_v4  ;;  %vm2876_vm10 = vcmp.eq.s32.totalorder %v2738_v5, 1 }
 0x2c9   : >> { %v1461_v16 = vpop.f32.mrb[50].mxu1  ;;  %v2200_v38 = vpop.f32.mrb[98].mxu0 }
 0x2ca   : >> { %v2538_v39 = vmax.f32 %v2490_v0, 0.0  ;;  %v11402_v2 = vadd.f32 %v1461_v16, %v11190_v44  ;;  %v2435_v42 = vadd.f32 %v2200_v38, %v11193_v25  ;;  %v1463_v49 = vpop.f32.mrb[51].mxu1  ;;  %v2202_v47 = vpop.f32.mrb[99].mxu0  ;;  %v8290_v0 = vld [vmem:[%s10083_s11 + $0x248] sm:$0xff] }
 0x2cb   : >> { %v8811_v47 = vpack.c.bf16 %v8290_v0, %v8289_v24  ;;  %v2741_v24 = vpop.permute.xlu1 %2740 }
 0x2cc   : >> { %14000 = vst [vmem:[#allocation27_spill] sm:$0xff] %v11402_v2  ;;  %v2922_v26 = vsel %vm2874_vm8, %v2538_v39, 0.0  ;;  %v2491_v17 = vadd.f32 %v11393_v27, %v2435_v42  ;;  %vm2877_vm11 = vcmp.eq.s32.totalorder %v2741_v24, 1  ;;  %vm2888_vm8 = vcmp.eq.s32.totalorder %v11346_v53, 1 }
 0x2cd   : >> { %2970 = vst.msk [vmem:[#allocation3 + $0x20] sm:$0xff] %vm301_vm0, %v2922_v26  ;;  %v1466_v62 = vpop.f32.mrb[52].mxu1  ;;  %v2205_v4 = vpop.f32.mrb[100].mxu0  ;;  %8812 = vmatpush1.bf16.msra.mxu0 %v8811_v47 }
 0x2ce   : >> { %v2539_v44 = vmax.f32 %v2491_v17, 0.0  ;;  %v11413_v16 = vadd.f32 %v1466_v62, %v11200_v56  ;;  %v2436_v25 = vadd.f32 %v2205_v4, %v11203_v18  ;;  %v1468_v49 = vpop.f32.mrb[53].mxu1  ;;  %v2207_v38 = vpop.f32.mrb[101].mxu0  ;;  %8813 = vmatprep.subr.bf16.mxu0 %v13989_v46 }
 0x2cf   : >> { %v11423_v4 = vpop.permute.xlu0 %2794 }
 0x2d0   : >> { %v2923_v39 = vsel %vm2875_vm9, %v2539_v44, 0.0  ;;  %v2492_v42 = vadd.f32 %v11393_v27, %v2436_v25 }
 0x2d1   : >> { %2971 = vst.msk [vmem:[#allocation3 + $0x28] sm:$0xff] %vm301_vm0, %v2923_v39  ;;  %v1471_v37 = vpop.f32.mrb[54].mxu1  ;;  %v2210_v26 = vpop.f32.mrb[102].mxu0 }
 0x2d2   : >> { %v2540_v2 = vmax.f32 %v2492_v42, 0.0  ;;  %v11420_v17 = vadd.f32 %v1471_v37, %v11207_v34  ;;  %v2437_v56 = vadd.f32 %v2210_v26, %v11212_v13  ;;  %v1473_v18 = vpop.f32.mrb[55].mxu1  ;;  %v2212_v62 = vpop.f32.mrb[103].mxu0 }
 0x2d4   : >> { %v2924_v0 = vsel %vm2876_vm10, %v2540_v2, 0.0  ;;  %v2493_v44 = vadd.f32 %v11393_v27, %v2437_v56  ;;  %v3070_v25 = vld [vmem:[#allocation3 + $0x20] sm:$0xff]  ;;  %vm2890_vm10 = vcmp.eq.s32.totalorder %v11360_v48, 1 }
 0x2d5   : >> { %2972 = vst.msk [vmem:[#allocation3 + $0x30] sm:$0xff] %vm301_vm0, %v2924_v0  ;;  %v1476_v49 = vpop.f32.mrb[56].mxu1  ;;  %v2215_v38 = vpop.f32.mrb[104].mxu0  ;;  %3217 = vrot.lane.b32.xlu1 %v3070_v25, %s9754_s10 }
 0x2d6   : >> { %v2541_v34 = vmax.f32 %v2493_v44, 0.0  ;;  %v11429_v47 = vadd.f32 %v1476_v49, %v11219_v20  ;;  %v2438_v13 = vadd.f32 %v2215_v38, %v11223_v32  ;;  %v1478_v5 = vpop.f32.mrb[57].mxu1  ;;  %v2217_v39 = vpop.f32.mrb[105].mxu0 }
 0x2d7   : >> { %v11441_v44 = vpop.permute.xlu0 %2797  ;;  %v2747_v25 = vpop.permute.xlu1 %2746  ;;  %v8292_v39 = vld [vmem:[%s10083_s11 + $0x258] sm:$0xff] }
 0x2d8   : >> { %v2925_v42 = vsel %vm2877_vm11, %v2541_v34, 0.0  ;;  %v2494_v2 = vadd.f32 %v11393_v27, %v2438_v13  ;;  %v3118_v37 = vld [vmem:[#allocation3 + $0x21] sm:$0xff]  ;;  %vm2879_vm13 = vcmp.eq.s32.totalorder %v2747_v25, 1 }
 0x2d9   : >> { %v3071_v26 = vld [vmem:[#allocation3 + $0x28] sm:$0xff]  ;;  %2973 = vst.msk [vmem:[#allocation3 + $0x38] sm:$0xff] %vm301_vm0, %v2925_v42  ;;  %v1481_v56 = vpop.f32.mrb[58].mxu1  ;;  %v2220_v18 = vpop.f32.mrb[106].mxu0  ;;  %8339 = vmatprep.mubr.msk.f32.mxu1 %vm301_vm0, %v3118_v37 }
 0x2da   : >> { %3219 = vrot.lane.b32.xlu1 %v3071_v26, %s9754_s10  ;;  %v2542_v20 = vmax.f32 %v2494_v2, 0.0  ;;  %v11437_v32 = vadd.f32 %v1481_v56, %v11227_v33  ;;  %v2439_v62 = vadd.f32 %v2220_v18, %v11230_v12  ;;  %v1483_v24 = vpop.f32.mrb[59].mxu1  ;;  %v2222_v0 = vpop.f32.mrb[107].mxu0  ;;  %v8291_v33 = vld [vmem:[%s10083_s11 + $0x250] sm:$0xff] }
 0x2db   : >> { %v8814_v26 = vpack.c.bf16 %v8292_v39, %v8291_v33 }
 0x2dc   : >> { %v2926_v49 = vsel %vm2878_vm12, %v2542_v20, 0.0  ;;  %v2495_v38 = vadd.f32 %v11393_v27, %v2439_v62  ;;  %v3072_v34 = vld [vmem:[#allocation3 + $0x30] sm:$0xff]  ;;  %vm2892_vm12 = vcmp.eq.s32.totalorder %v11373_v9, 1 }
 0x2dd   : >> { %2974 = vst.msk [vmem:[#allocation3 + $0x40] sm:$0xff] %vm301_vm0, %v2926_v49  ;;  %v1486_v13 = vpop.f32.mrb[60].mxu1  ;;  %v2225_v5 = vpop.f32.mrb[108].mxu0  ;;  %8815 = vmatpush1.bf16.msra.mxu0 %v8814_v26 }
 0x2de   : >> { %3221 = vrot.lane.b32.xlu1 %v3072_v34, %s9754_s10  ;;  %v2543_v12 = vmax.f32 %v2495_v38, 0.0  ;;  %v11449_v42 = vadd.f32 %v1486_v13, %v11237_v57  ;;  %v2440_v1 = vadd.f32 %v2225_v5, %v11240_v45  ;;  %v1488_v2 = vpop.f32.mrb[61].mxu1  ;;  %v2227_v37 = vpop.f32.mrb[109].mxu0  ;;  %8816 = vmatprep.subr.bf16.mxu0 %v13989_v46 }
 0x2df   : >> { %v11461_v38 = vpop.permute.xlu0 %2800  ;;  %v2753_v34 = vpop.permute.xlu1 %2752 }
 0x2e0   : >> { %v2927_v56 = vsel %vm2879_vm13, %v2543_v12, 0.0  ;;  %v2496_v18 = vadd.f32 %v11393_v27, %v2440_v1  ;;  %v3073_v20 = vld [vmem:[#allocation3 + $0x38] sm:$0xff]  ;;  %vm2881_vm15 = vcmp.eq.s32.totalorder %v2753_v34, 1  ;;  %vm2893_vm13 = vcmp.eq.s32.totalorder %v11388_v58, 1 }
 0x2e1   : >> { %2975 = vst.msk [vmem:[#allocation3 + $0x48] sm:$0xff] %vm301_vm0, %v2927_v56  ;;  %v1491_v62 = vpop.f32.mrb[62].mxu1  ;;  %v2230_v24 = vpop.f32.mrb[110].mxu0 }
 0x2e2   : >> { %3223 = vrot.lane.b32.xlu1 %v3073_v20, %s9754_s10  ;;  %v2544_v57 = vmax.f32 %v2496_v18, 0.0  ;;  %v11457_v45 = vadd.f32 %v1491_v62, %v11244_v15  ;;  %v2441_v0 = vadd.f32 %v2230_v24, %v11249_v60  ;;  %v1493_v25 = vpop.f32.mrb[63].mxu1  ;;  %v2232_v49 = vpop.f32.mrb[111].mxu0 }
 0x2e3   : >> { %v2759_v25 = vpop.permute.xlu1 %2758 }
 0x2e4   : >> { %v2928_v13 = vsel %vm2880_vm14, %v2544_v57, 0.0  ;;  %v2497_v5 = vadd.f32 %v11393_v27, %v2441_v0  ;;  %v3074_v33 = vld [vmem:[#allocation3 + $0x40] sm:$0xff]  ;;  %v11478_v0 = vpop.permute.xlu0 %2803  ;;  %vm2883_vm3 = vcmp.eq.s32.totalorder %v2759_v25, 1  ;;  %vm2894_vm14 = vcmp.eq.s32.totalorder %v11405_v10, 1 }
 0x2e5   : >> { %2976 = vst.msk [vmem:[#allocation3 + $0x50] sm:$0xff] %vm301_vm0, %v2928_v13  ;;  %v1496_v39 = vpop.f32.mrb[64].mxu1  ;;  %v2235_v12 = vpop.f32.mrb[112].mxu0 }
 0x2e6   : >> { %3225 = vrot.lane.b32.xlu1 %v3074_v33, %s9754_s10  ;;  %v2545_v15 = vmax.f32 %v2497_v5, 0.0  ;;  %v11467_v60 = vadd.f32 %v1496_v39, %v11256_v11  ;;  %v2442_v1 = vadd.f32 %v2235_v12, %v11260_v41  ;;  %v1498_v30 = vpop.f32.mrb[65].mxu1  ;;  %v2237_v2 = vpop.f32.mrb[113].mxu0  ;;  %v8294_v39 = vld [vmem:[%s10083_s11 + $0x268] sm:$0xff] }
 0x2e8   : >> { %v2929_v37 = vsel %vm2881_vm15, %v2545_v15, 0.0  ;;  %v2498_v26 = vadd.f32 %v11393_v27, %v2442_v1  ;;  %v3075_v56 = vld [vmem:[#allocation3 + $0x48] sm:$0xff]  ;;  %vm2895_vm15 = vcmp.eq.s32.totalorder %v11423_v4, 1 }
 0x2e9   : >> { %2977 = vst.msk [vmem:[#allocation3 + $0x58] sm:$0xff] %vm301_vm0, %v2929_v37  ;;  %v1501_v18 = vpop.f32.mrb[66].mxu1  ;;  %v2240_v20 = vpop.f32.mrb[114].mxu0 }
 0x2ea   : >> { %3227 = vrot.lane.b32.xlu1 %v3075_v56, %s9754_s10  ;;  %v2546_v62 = vmax.f32 %v2498_v26, 0.0  ;;  %v11474_v11 = vadd.f32 %v1501_v18, %v11264_v14  ;;  %v2443_v41 = vadd.f32 %v2240_v20, %v11267_v36  ;;  %v1503_v24 = vpop.f32.mrb[67].mxu1  ;;  %v2242_v57 = vpop.f32.mrb[115].mxu0  ;;  %v8293_v14 = vld [vmem:[%s10083_s11 + $0x260] sm:$0xff] }
 0x2eb   : >> { %v8817_v30 = vpack.c.bf16 %v8294_v39, %v8293_v14  ;;  %v11498_v24 = vpop.permute.xlu0 %2806  ;;  %v2765_v57 = vpop.permute.xlu1 %2764 }
 0x2ec   : >> { %v2930_v49 = vsel %vm2882_vm2, %v2546_v62, 0.0  ;;  %v2499_v34 = vadd.f32 %v11393_v27, %v2443_v41  ;;  %v3076_v13 = vld [vmem:[#allocation3 + $0x50] sm:$0xff]  ;;  %vm2885_vm5 = vcmp.eq.s32.totalorder %v2765_v57, 1  ;;  %v8296_v57 = vld [vmem:[%s10083_s11 + $0x278] sm:$0xff]  ;;  %vm2896_vm2 = vcmp.eq.s32.totalorder %v11441_v44, 1 }
 0x2ed   : >> { %2978 = vst.msk [vmem:[#allocation3 + $0x60] sm:$0xff] %vm301_vm0, %v2930_v49  ;;  %v1506_v5 = vpop.f32.mrb[68].mxu1  ;;  %v2245_v33 = vpop.f32.mrb[116].mxu0  ;;  %8818 = vmatpush1.bf16.msra.mxu0 %v8817_v30 }
 0x2ee   : >> { %3229 = vrot.lane.b32.xlu1 %v3076_v13, %s9754_s10  ;;  %v2547_v36 = vmax.f32 %v2499_v34, 0.0  ;;  %v11486_v12 = vadd.f32 %v1506_v5, %v11274_v54  ;;  %v2444_v52 = vadd.f32 %v2245_v33, %v11277_v23  ;;  %v1508_v15 = vpop.f32.mrb[69].mxu1  ;;  %v2247_v1 = vpop.f32.mrb[117].mxu0  ;;  %8819 = vmatprep.subr.bf16.mxu0 %v13989_v46 }
 0x2f0   : >> { %v2931_v2 = vsel %vm2883_vm3, %v2547_v36, 0.0  ;;  %v2500_v37 = vadd.f32 %v11393_v27, %v2444_v52  ;;  %v3077_v26 = vld [vmem:[#allocation3 + $0x58] sm:$0xff]  ;;  %vm2897_vm3 = vcmp.eq.s32.totalorder %v11461_v38, 1 }
 0x2f1   : >> { %2979 = vst.msk [vmem:[#allocation3 + $0x68] sm:$0xff] %vm301_vm0, %v2931_v2  ;;  %v1511_v56 = vpop.f32.mrb[70].mxu1  ;;  %v2250_v18 = vpop.f32.mrb[118].mxu0 }
 0x2f2   : >> { %3231 = vrot.lane.b32.xlu1 %v3077_v26, %s9754_s10  ;;  %v2548_v54 = vmax.f32 %v2500_v37, 0.0  ;;  %v11494_v23 = vadd.f32 %v1511_v56, %v11281_v8  ;;  %v2445_v20 = vadd.f32 %v2250_v18, %v11286_v40  ;;  %v1513_v62 = vpop.f32.mrb[71].mxu1  ;;  %v2252_v41 = vpop.f32.mrb[119].mxu0 }
 0x2f3   : >> { %v11515_v26 = vpop.permute.xlu0 %2809  ;;  %v2771_v56 = vpop.permute.xlu1 %2770 }
 0x2f4   : >> { %v2932_v25 = vsel %vm2884_vm4, %v2548_v54, 0.0  ;;  %v2501_v49 = vadd.f32 %v11393_v27, %v2445_v20  ;;  %v3078_v34 = vld [vmem:[#allocation3 + $0x60] sm:$0xff]  ;;  %vm2887_vm7 = vcmp.eq.s32.totalorder %v2771_v56, 1  ;;  %vm2898_vm4 = vcmp.eq.s32.totalorder %v11478_v0, 1 }
 0x2f5   : >> { %2980 = vst.msk [vmem:[#allocation3 + $0x70] sm:$0xff] %vm301_vm0, %v2932_v25  ;;  %v1516_v13 = vpop.f32.mrb[72].mxu1  ;;  %v2255_v5 = vpop.f32.mrb[120].mxu0 }
 0x2f6   : >> { %3233 = vrot.lane.b32.xlu1 %v3078_v34, %s9754_s10  ;;  %v2549_v8 = vmax.f32 %v2501_v49, 0.0  ;;  %v11504_v40 = vadd.f32 %v1516_v13, %v11293_v22  ;;  %v2446_v33 = vadd.f32 %v2255_v5, %v11297_v28  ;;  %v1518_v63 = vpop.f32.mrb[73].mxu1  ;;  %v2257_v14 = vpop.f32.mrb[121].mxu0 }
 0x2f8   : >> { %v2933_v39 = vsel %vm2885_vm5, %v2549_v8, 0.0  ;;  %v2502_v36 = vadd.f32 %v11393_v27, %v2446_v33  ;;  %v3079_v52 = vld [vmem:[#allocation3 + $0x68] sm:$0xff]  ;;  %vm2899_vm5 = vcmp.eq.s32.totalorder %v11498_v24, 1 }
 0x2f9   : >> { %2981 = vst.msk [vmem:[#allocation3 + $0x78] sm:$0xff] %vm301_vm0, %v2933_v39  ;;  %v1521_v15 = vpop.f32.mrb[74].mxu1  ;;  %v2260_v1 = vpop.f32.mrb[122].mxu0 }
 0x2fa   : >> { %3235 = vrot.lane.b32.xlu1 %v3079_v52, %s9754_s10  ;;  %v2550_v30 = vmax.f32 %v2502_v36, 0.0  ;;  %v11511_v22 = vadd.f32 %v1521_v15, %v11301_v35  ;;  %v2447_v28 = vadd.f32 %v2260_v1, %v11304_v43  ;;  %v1523_v2 = vpop.f32.mrb[75].mxu1  ;;  %v2262_v37 = vpop.f32.mrb[123].mxu0  ;;  %v8295_v35 = vld [vmem:[%s10083_s11 + $0x270] sm:$0xff] }
 0x2fb   : >> { %v8820_v13 = vpack.c.bf16 %v8296_v57, %v8295_v35  ;;  %v11535_v15 = vpop.permute.xlu0 %2812  ;;  %v2777_v1 = vpop.permute.xlu1 %2776 }
 0x2fc   : >> { %v2934_v18 = vsel %vm2886_vm6, %v2550_v30, 0.0  ;;  %v2503_v54 = vadd.f32 %v11393_v27, %v2447_v28  ;;  %v3080_v20 = vld [vmem:[#allocation3 + $0x70] sm:$0xff]  ;;  %vm2889_vm9 = vcmp.eq.s32.totalorder %v2777_v1, 1  ;;  %v14002_v1 = vld [vmem:[#allocation28_spill] sm:$0xff]  ;;  %vm2900_vm6 = vcmp.eq.s32.totalorder %v11515_v26, 1 }
 0x2fd   : >> { %2982 = vst.msk [vmem:[#allocation3 + $0x80] sm:$0xff] %vm301_vm0, %v2934_v18  ;;  %v1526_v62 = vpop.f32.mrb[76].mxu1  ;;  %v2265_v41 = vpop.f32.mrb[124].mxu0  ;;  %8821 = vmatpush1.bf16.msra.mxu0 %v8820_v13 }
 0x2fe   : >> { %3237 = vrot.lane.b32.xlu1 %v3080_v20, %s9754_s10  ;;  %v2551_v43 = vmax.f32 %v2503_v54, 0.0  ;;  %v11523_v25 = vadd.f32 %v1526_v62, %v11311_v7  ;;  %v2448_v29 = vadd.f32 %v2265_v41, %v11314_v51  ;;  %v1528_v49 = vpop.f32.mrb[77].mxu1  ;;  %v2267_v34 = vpop.f32.mrb[125].mxu0  ;;  %8822 = vmatprep.subr.bf16.mxu0 %v13989_v46 }
 0x300   : >> { %v2935_v5 = vsel %vm2887_vm7, %v2551_v43, 0.0  ;;  %v2504_v8 = vadd.f32 %v11393_v27, %v2448_v29  ;;  %v3081_v33 = vld [vmem:[#allocation3 + $0x78] sm:$0xff]  ;;  %v8297_v43 = vld [vmem:[%s10083_s11 + $0x280] sm:$0xff]  ;;  %v8298_v29 = vld [vmem:[%s10083_s11 + $0x288] sm:$0xff]  ;;  %vm2901_vm7 = vcmp.eq.s32.totalorder %v11535_v15, 1 }
 0x301   : >> { %2983 = vst.msk [vmem:[#allocation3 + $0x88] sm:$0xff] %vm301_vm0, %v2935_v5  ;;  %v1531_v63 = vpop.f32.mrb[78].mxu1  ;;  %v2270_v14 = vpop.f32.mrb[126].mxu0 }
 0x302   : >> { %3239 = vrot.lane.b32.xlu1 %v3081_v33, %s9754_s10  ;;  %v2552_v7 = vmax.f32 %v2504_v8, 0.0  ;;  %v11531_v51 = vadd.f32 %v1531_v63, %v11318_v3  ;;  %v2449_v39 = vadd.f32 %v2270_v14, %v11323_v6  ;;  %v1533_v36 = vpop.f32.mrb[79].mxu1  ;;  %v2272_v52 = vpop.f32.mrb[127].mxu0  ;;  %v8823_v8 = vpack.c.bf16 %v8298_v29, %v8297_v43 }
 0x303   : >> { %v11554_v33 = vpop.permute.xlu0 %2815  ;;  %v2783_v63 = vpop.permute.xlu1 %2782 }
 0x304   : >> { %v2936_v30 = vsel %vm2888_vm8, %v2552_v7, 0.0  ;;  %v2505_v28 = vadd.f32 %v11393_v27, %v2449_v39  ;;  %v3082_v2 = vld [vmem:[#allocation3 + $0x80] sm:$0xff]  ;;  %8824 = vmatpush1.bf16.msra.mxu0 %v8823_v8  ;;  %vm2891_vm11 = vcmp.eq.s32.totalorder %v2783_v63, 1  ;;  %v8299_v63 = vld [vmem:[%s10083_s11 + $0x290] sm:$0xff]  ;;  %vm2902_vm8 = vcmp.eq.s32.totalorder %v11554_v33, 1 }
 0x305   : >> { %2984 = vst.msk [vmem:[#allocation3 + $0x90] sm:$0xff] %vm301_vm0, %v2936_v30  ;;  %v1536_v37 = vpop.f32.mrb[80].mxu1  ;;  %v2275_v56 = vpop.f32.mrb[128].mxu0  ;;  %8825 = vmatprep.subr.bf16.mxu0 %v13989_v46 }
 0x306   : >> { %3241 = vrot.lane.b32.xlu1 %v3082_v2, %s9754_s10  ;;  %v2553_v3 = vmax.f32 %v2505_v28, 0.0  ;;  %v11541_v6 = vadd.f32 %v1536_v37, %v11330_v19  ;;  %v2450_v53 = vadd.f32 %v2275_v56, %v11334_v31  ;;  %v1538_v18 = vpop.f32.mrb[81].mxu1  ;;  %v2277_v54 = vpop.f32.mrb[129].mxu0  ;;  %v14001_v31 = vld [vmem:[#allocation18_spill] sm:$0xff] }
 0x308   : >> { %v2937_v20 = vsel %vm2889_vm9, %v2553_v3, 0.0  ;;  %v2506_v62 = vadd.f32 %v11393_v27, %v2450_v53  ;;  %v3083_v41 = vld [vmem:[#allocation3 + $0x88] sm:$0xff] }
 0x309   : >> { %2985 = vst.msk [vmem:[#allocation3 + $0x98] sm:$0xff] %vm301_vm0, %v2937_v20  ;;  %v1541_v35 = vpop.f32.mrb[82].mxu1  ;;  %v2280_v57 = vpop.f32.mrb[130].mxu0 }
 0x30a   : >> { %3243 = vrot.lane.b32.xlu1 %v3083_v41, %s9754_s10  ;;  %v2554_v49 = vmax.f32 %v2506_v62, 0.0  ;;  %v11550_v19 = vadd.f32 %v1541_v35, %v11338_v21  ;;  %v2451_v34 = vadd.f32 %v2280_v57, %v14001_v31  ;;  %v1543_v13 = vpop.f32.mrb[83].mxu1  ;;  %v2282_v5 = vpop.f32.mrb[131].mxu0 }
 0x30b   : >> { %v11572_v35 = vpop.permute.xlu0 %2818  ;;  %v14004_v13 = vld [vmem:[#allocation20_spill] sm:$0xff] }
 0x30c   : >> { %v2938_v14 = vsel %vm2890_vm10, %v2554_v49, 0.0  ;;  %v2507_v7 = vadd.f32 %v11393_v27, %v2451_v34  ;;  %v3084_v39 = vld [vmem:[#allocation3 + $0x90] sm:$0xff]  ;;  %vm2903_vm9 = vcmp.eq.s32.totalorder %v11572_v35, 1  ;;  %v8438_v35 = vld [vmem:[%s10083_s11 + $0x3c8] sm:$0xff] }
 0x30d   : >> { %2986 = vst.msk [vmem:[#allocation3 + $0xa0] sm:$0xff] %vm301_vm0, %v2938_v14  ;;  %v1546_v36 = vpop.f32.mrb[84].mxu1  ;;  %v2285_v21 = vpop.f32.mrb[132].mxu0  ;;  %v8300_v14 = vld [vmem:[%s10083_s11 + $0x298] sm:$0xff] }
 0x30e   : >> { %3245 = vrot.lane.b32.xlu1 %v3084_v39, %s9754_s10  ;;  %v2555_v52 = vmax.f32 %v2507_v7, 0.0  ;;  %v11561_v30 = vadd.f32 %v1546_v36, %v14002_v1  ;;  %v2452_v48 = vadd.f32 %v2285_v21, %v11351_v50  ;;  %v1548_v28 = vpop.f32.mrb[85].mxu1  ;;  %v2287_v2 = vpop.f32.mrb[133].mxu0  ;;  %v8826_v21 = vpack.c.bf16 %v8300_v14, %v8299_v63  ;;  %v14009_v14 = vld [vmem:[#allocation25_spill] sm:$0xff] }
 0x30f   : >> { %v14005_v28 = vld [vmem:[#allocation21_spill] sm:$0xff] }
 0x310   : >> { %v2939_v37 = vsel %vm2891_vm11, %v2555_v52, 0.0  ;;  %v2508_v56 = vadd.f32 %v11393_v27, %v2452_v48  ;;  %v3085_v3 = vld [vmem:[#allocation3 + $0x98] sm:$0xff]  ;;  %8827 = vmatpush1.bf16.msra.mxu0 %v8826_v21 }
 0x311   : >> { %2987 = vst.msk [vmem:[#allocation3 + $0xa8] sm:$0xff] %vm301_vm0, %v2939_v37  ;;  %v1551_v53 = vpop.f32.mrb[86].mxu1  ;;  %v2290_v18 = vpop.f32.mrb[134].mxu0  ;;  %v14006_v37 = vld [vmem:[#allocation22_spill] sm:$0xff]  ;;  %8828 = vmatprep.subr.bf16.mxu0 %v13989_v46 }
 0x312   : >> { %3247 = vrot.lane.b32.xlu1 %v3085_v3, %s9754_s10  ;;  %v2556_v54 = vmax.f32 %v2508_v56, 0.0  ;;  %v11568_v20 = vadd.f32 %v1551_v53, %v11353_v61  ;;  %v2453_v62 = vadd.f32 %v2290_v18, %v11358_v55  ;;  %v1553_v50 = vpop.f32.mrb[87].mxu1  ;;  %v2292_v41 = vpop.f32.mrb[135].mxu0  ;;  %v14003_v55 = vld [vmem:[#allocation19_spill] sm:$0xff] }
 0x313   : >> { %v11593_v53 = vpop.permute.xlu0 %2821 }
 0x314   : >> { %v2940_v57 = vsel %vm2892_vm12, %v2556_v54, 0.0  ;;  %v2509_v43 = vadd.f32 %v11393_v27, %v2453_v62  ;;  %v3086_v29 = vld [vmem:[#allocation3 + $0xa0] sm:$0xff]  ;;  %vm2904_vm10 = vcmp.eq.s32.totalorder %v11593_v53, 1 }
 0x315   : >> { %2988 = vst.msk [vmem:[#allocation3 + $0xb0] sm:$0xff] %vm301_vm0, %v2940_v57  ;;  %v1556_v49 = vpop.f32.mrb[88].mxu1  ;;  %v2295_v31 = vpop.f32.mrb[136].mxu0 }
 0x316   : >> { %3249 = vrot.lane.b32.xlu1 %v3086_v29, %s9754_s10  ;;  %v2557_v61 = vmax.f32 %v2509_v43, 0.0  ;;  %v11578_v34 = vadd.f32 %v1556_v49, %v14003_v55  ;;  %v2454_v5 = vadd.f32 %v2295_v31, %v14004_v13  ;;  %v1558_v9 = vpop.f32.mrb[89].mxu1  ;;  %v2297_v8 = vpop.f32.mrb[137].mxu0  ;;  %v14007_v43 = vld [vmem:[#allocation23_spill] sm:$0xff]  ;;  %v14008_v49 = vld [vmem:[#allocation24_spill] sm:$0xff] }
 0x318   : >> { %v2941_v7 = vsel %vm2893_vm13, %v2557_v61, 0.0  ;;  %v2510_v39 = vadd.f32 %v11393_v27, %v2454_v5  ;;  %v3087_v36 = vld [vmem:[#allocation3 + $0xa8] sm:$0xff] }
 0x319   : >> { %2989 = vst.msk [vmem:[#allocation3 + $0xb8] sm:$0xff] %vm301_vm0, %v2941_v7  ;;  %v1561_v52 = vpop.f32.mrb[90].mxu1  ;;  %v2300_v1 = vpop.f32.mrb[138].mxu0 }
 0x31a   : >> { %3251 = vrot.lane.b32.xlu1 %v3087_v36, %s9754_s10  ;;  %v2558_v48 = vmax.f32 %v2510_v39, 0.0  ;;  %v11588_v2 = vadd.f32 %v1561_v52, %v14005_v28  ;;  %v2455_v56 = vadd.f32 %v2300_v1, %v14006_v37  ;;  %v1563_v58 = vpop.f32.mrb[91].mxu1  ;;  %v2302_v3 = vpop.f32.mrb[139].mxu0  ;;  %v14010_v39 = vld [vmem:[#allocation26_spill] sm:$0xff] }
 0x31b   : >> { %v11611_v52 = vpop.permute.xlu0 %2824 }
 0x31c   : >> { %v2942_v18 = vsel %vm2894_vm14, %v2558_v48, 0.0  ;;  %v2511_v54 = vadd.f32 %v11393_v27, %v2455_v56  ;;  %v3088_v62 = vld [vmem:[#allocation3 + $0xb0] sm:$0xff]  ;;  %vm2905_vm11 = vcmp.eq.s32.totalorder %v11611_v52, 1 }
 0x31d   : >> { %2990 = vst.msk [vmem:[#allocation3 + $0xc0] sm:$0xff] %vm301_vm0, %v2942_v18  ;;  %v1566_v50 = vpop.f32.mrb[92].mxu1  ;;  %v2305_v41 = vpop.f32.mrb[140].mxu0  ;;  %v8301_v18 = vld [vmem:[%s10083_s11 + $0x2a0] sm:$0xff] }
 0x31e   : >> { %3253 = vrot.lane.b32.xlu1 %v3088_v62, %s9754_s10  ;;  %v2559_v57 = vmax.f32 %v2511_v54, 0.0  ;;  %v11599_v29 = vadd.f32 %v1566_v50, %v14007_v43  ;;  %v2456_v10 = vadd.f32 %v2305_v41, %v14008_v49  ;;  %v1568_v31 = vpop.f32.mrb[93].mxu1  ;;  %v2307_v61 = vpop.f32.mrb[141].mxu0  ;;  %v8302_v54 = vld [vmem:[%s10083_s11 + $0x2a8] sm:$0xff] }
 0x31f   : >> { %v8829_v41 = vpack.c.bf16 %v8302_v54, %v8301_v18  ;;  %v11623_v43 = vpop.permute.xlu0 %2827  ;;  %v8304_v18 = vld [vmem:[%s10083_s11 + $0x2b8] sm:$0xff] }
 0x320   : >> { %v2943_v55 = vsel %vm2895_vm15, %v2559_v57, 0.0  ;;  %v2512_v13 = vadd.f32 %v11393_v27, %v2456_v10  ;;  %v3089_v5 = vld [vmem:[#allocation3 + $0xb8] sm:$0xff]  ;;  %v14011_v10 = vld [vmem:[#allocation27_spill] sm:$0xff]  ;;  %vm2906_vm12 = vcmp.eq.s32.totalorder %v11623_v43, 1 }
 0x321   : >> { %2991 = vst.msk [vmem:[#allocation3 + $0xc8] sm:$0xff] %vm301_vm0, %v2943_v55  ;;  %v1571_v9 = vpop.f32.mrb[94].mxu1  ;;  %v2310_v8 = vpop.f32.mrb[142].mxu0  ;;  %8830 = vmatpush1.bf16.msra.mxu0 %v8829_v41 }
 0x322   : >> { %3255 = vrot.lane.b32.xlu1 %v3089_v5, %s9754_s10  ;;  %v2560_v63 = vmax.f32 %v2512_v13, 0.0  ;;  %v11607_v7 = vadd.f32 %v1571_v9, %v14009_v14  ;;  %v2457_v36 = vadd.f32 %v2310_v8, %v14010_v39  ;;  %v1573_v21 = vpop.f32.mrb[95].mxu1  ;;  %v2312_v4 = vpop.f32.mrb[143].mxu0  ;;  %8831 = vmatprep.subr.bf16.mxu0 %v13989_v46 }
 0x324   : >> { %v2944_v1 = vsel %vm2896_vm2, %v2560_v63, 0.0  ;;  %v2513_v48 = vadd.f32 %v11393_v27, %v2457_v36  ;;  %v3090_v28 = vld [vmem:[#allocation3 + $0xc0] sm:$0xff]  ;;  %v11633_v63 = vpop.permute.xlu0 %2830 }
 0x325   : >> { %2992 = vst.msk [vmem:[#allocation3 + $0xd0] sm:$0xff] %vm301_vm0, %v2944_v1  ;;  %v2315_v37 = vpop.f32.mrb[144].mxu0  ;;  %vm2907_vm13 = vcmp.eq.s32.totalorder %v11633_v63, 1 }
 0x326   : >> { %3257 = vrot.lane.b32.xlu1 %v3090_v28, %s9754_s10  ;;  %v2561_v56 = vmax.f32 %v2513_v48, 0.0  ;;  %v2458_v58 = vadd.f32 %v2315_v37, %v11397_v59  ;;  %v2317_v3 = vpop.f32.mrb[145].mxu0 }
 0x328   : >> { %v2945_v44 = vsel %vm2897_vm3, %v2561_v56, 0.0  ;;  %v2514_v62 = vadd.f32 %v11393_v27, %v2458_v58  ;;  %v3091_v50 = vld [vmem:[#allocation3 + $0xc8] sm:$0xff]  ;;  %v11643_v37 = vpop.permute.xlu0 %2833 }
 0x329   : >> { %2993 = vst.msk [vmem:[#allocation3 + $0xd8] sm:$0xff] %vm301_vm0, %v2945_v44  ;;  %v2320_v57 = vpop.f32.mrb[146].mxu0  ;;  %vm2908_vm14 = vcmp.eq.s32.totalorder %v11643_v37, 1 }
 0x32a   : >> { %3259 = vrot.lane.b32.xlu1 %v3091_v50, %s9754_s10  ;;  %v2562_v49 = vmax.f32 %v2514_v62, 0.0  ;;  %v2459_v59 = vadd.f32 %v2320_v57, %v14011_v10  ;;  %v2322_v31 = vpop.f32.mrb[147].mxu0 }
 0x32c   : >> { %v2946_v38 = vsel %vm2898_vm4, %v2562_v49, 0.0  ;;  %v2515_v61 = vadd.f32 %v11393_v27, %v2459_v59  ;;  %v3092_v55 = vld [vmem:[#allocation3 + $0xd0] sm:$0xff] }
 0x32d   : >> { %2994 = vst.msk [vmem:[#allocation3 + $0xe0] sm:$0xff] %vm301_vm0, %v2946_v38  ;;  %v2325_v13 = vpop.f32.mrb[148].mxu0 }
 0x32e   : >> { %3261 = vrot.lane.b32.xlu1 %v3092_v55, %s9754_s10  ;;  %v2563_v5 = vmax.f32 %v2515_v61, 0.0  ;;  %v2460_v9 = vadd.f32 %v2325_v13, %v11413_v16  ;;  %v2327_v8 = vpop.f32.mrb[149].mxu0 }
 0x330   : >> { %v2947_v0 = vsel %vm2899_vm5, %v2563_v5, 0.0  ;;  %v2516_v14 = vadd.f32 %v11393_v27, %v2460_v9  ;;  %v3093_v39 = vld [vmem:[#allocation3 + $0xd8] sm:$0xff] }
 0x331   : >> { %2995 = vst.msk [vmem:[#allocation3 + $0xe8] sm:$0xff] %vm301_vm0, %v2947_v0  ;;  %v2330_v36 = vpop.f32.mrb[150].mxu0 }
 0x332   : >> { %3263 = vrot.lane.b32.xlu1 %v3093_v39, %s9754_s10  ;;  %v2564_v21 = vmax.f32 %v2516_v14, 0.0  ;;  %v2461_v4 = vadd.f32 %v2330_v36, %v11420_v17  ;;  %v2332_v16 = vpop.f32.mrb[151].mxu0  ;;  %v8303_v17 = vld [vmem:[%s10083_s11 + $0x2b0] sm:$0xff] }
 0x333   : >> { %v8832_v62 = vpack.c.bf16 %v8304_v18, %v8303_v17 }
 0x334   : >> { %v2948_v24 = vsel %vm2900_vm6, %v2564_v21, 0.0  ;;  %v2517_v1 = vadd.f32 %v11393_v27, %v2461_v4  ;;  %v3094_v48 = vld [vmem:[#allocation3 + $0xe0] sm:$0xff] }
 0x335   : >> { %2996 = vst.msk [vmem:[#allocation3 + $0xf0] sm:$0xff] %vm301_vm0, %v2948_v24  ;;  %v2335_v28 = vpop.f32.mrb[152].mxu0  ;;  %8833 = vmatpush1.bf16.msra.mxu0 %v8832_v62  ;;  %v3022_v24 = vld [vmem:[#allocation3 + $0x1f] sm:$0xff]  ;;  %v3119_v62 = vld [vmem:[#allocation3 + $0x29] sm:$0xff] }
 0x336   : >> { %3265 = vrot.lane.b32.xlu1 %v3094_v48, %s9754_s10  ;;  %v2565_v56 = vmax.f32 %v2517_v1, 0.0  ;;  %v2462_v58 = vadd.f32 %v2335_v28, %v11429_v47  ;;  %v2337_v3 = vpop.f32.mrb[153].mxu0  ;;  %8834 = vmatprep.subr.bf16.mxu0 %v13989_v46  ;;  %v11655_v47 = vpop.permute.xlu0 %2836  ;;  %v8439_v48 = vld [vmem:[%s10083_s11 + $0x3d0] sm:$0xff] }
 0x337   : >> { %v8306_v3 = vld [vmem:[%s10083_s11 + $0x2c8] sm:$0xff]  ;;  %vm2909_vm15 = vcmp.eq.s32.totalorder %v11655_v47, 1 }
 0x338   : >> { %v2949_v26 = vsel %vm2901_vm7, %v2565_v56, 0.0  ;;  %v2518_v54 = vadd.f32 %v11393_v27, %v2462_v58  ;;  %v3095_v44 = vld [vmem:[#allocation3 + $0xe8] sm:$0xff]  ;;  %v8440_v56 = vld [vmem:[%s10083_s11 + $0x3d8] sm:$0xff]  ;;  %v8305_v58 = vld [vmem:[%s10083_s11 + $0x2c0] sm:$0xff] }
 0x339   : >> { %2997 = vst.msk [vmem:[#allocation3 + $0xf8] sm:$0xff] %vm301_vm0, %v2949_v26  ;;  %v2340_v50 = vpop.f32.mrb[154].mxu0  ;;  %v3123_v47 = vld [vmem:[#allocation3 + $0x49] sm:$0xff] }
 0x33a   : >> { %3267 = vrot.lane.b32.xlu1 %v3095_v44, %s9754_s10  ;;  %v2566_v41 = vmax.f32 %v2518_v54, 0.0  ;;  %v2463_v57 = vadd.f32 %v2340_v50, %v11437_v32  ;;  %v2342_v49 = vpop.f32.mrb[155].mxu0  ;;  %v11665_v9 = vpop.permute.xlu0 %2839 }
 0x33b   : >> { %v8850_v49 = vpack.c.bf16 %v8440_v56, %v8439_v48  ;;  %v3025_v56 = vld [vmem:[#allocation3 + $0x37] sm:$0xff]  ;;  %vm2910_vm2 = vcmp.eq.s32.totalorder %v11665_v9, 1 }
 0x33c   : >> { %v2950_v15 = vsel %vm2902_vm8, %v2566_v41, 0.0  ;;  %v2519_v10 = vadd.f32 %v11393_v27, %v2463_v57  ;;  %v3096_v59 = vld [vmem:[#allocation3 + $0xf0] sm:$0xff] }
 0x33d   : >> { %2998 = vst.msk [vmem:[#allocation3 + $0x100] sm:$0xff] %vm301_vm0, %v2950_v15  ;;  %v2345_v31 = vpop.f32.mrb[156].mxu0 }
 0x33e   : >> { %3269 = vrot.lane.b32.xlu1 %v3096_v59, %s9754_s10  ;;  %v2567_v38 = vmax.f32 %v2519_v10, 0.0  ;;  %v2464_v32 = vadd.f32 %v2345_v31, %v11449_v42  ;;  %v2347_v61 = vpop.f32.mrb[157].mxu0  ;;  %v8437_v42 = vld [vmem:[%s10083_s11 + $0x3c0] sm:$0xff]  ;;  %v11683_v17 = vpop.permute.xlu0 %2842  ;;  %v8442_v31 = vld [vmem:[%s10083_s11 + $0x3e8] sm:$0xff] }
 0x33f   : >> { %v8847_v1 = vpack.c.bf16 %v8438_v35, %v8437_v42  ;;  %v3023_v10 = vld [vmem:[#allocation3 + $0x27] sm:$0xff]  ;;  %v8443_v42 = vld [vmem:[%s10083_s11 + $0x3f0] sm:$0xff]  ;;  %v8444_v35 = vld [vmem:[%s10083_s11 + $0x3f8] sm:$0xff]  ;;  %vm2911_vm3 = vcmp.eq.s32.totalorder %v11683_v17, 1 }
 0x340   : >> { %v2951_v33 = vsel %vm2903_vm9, %v2567_v38, 0.0  ;;  %v2520_v55 = vadd.f32 %v11393_v27, %v2464_v32  ;;  %v3097_v13 = vld [vmem:[#allocation3 + $0xf8] sm:$0xff]  ;;  %v8441_v59 = vld [vmem:[%s10083_s11 + $0x3e0] sm:$0xff]  ;;  %v8856_v48 = vpack.c.bf16 %v8444_v35, %v8443_v42 }
 0x341   : >> { %2999 = vst.msk [vmem:[#allocation3 + $0x108] sm:$0xff] %vm301_vm0, %v2951_v33  ;;  %v2350_v5 = vpop.f32.mrb[158].mxu0  ;;  %v3120_v33 = vld [vmem:[#allocation3 + $0x31] sm:$0xff] }
 0x342   : >> { %3271 = vrot.lane.b32.xlu1 %v3097_v13, %s9754_s10  ;;  %v2568_v8 = vmax.f32 %v2520_v55, 0.0  ;;  %v2465_v0 = vadd.f32 %v2350_v5, %v11457_v45  ;;  %v2352_v14 = vpop.f32.mrb[159].mxu0 }
 0x343   : >> { %v3024_v14 = vld [vmem:[#allocation3 + $0x2f] sm:$0xff] }
 0x344   : >> { %v2952_v39 = vsel %vm2904_vm10, %v2568_v8, 0.0  ;;  %v2521_v36 = vadd.f32 %v11393_v27, %v2465_v0  ;;  %v11672_v21 = vld [vmem:[#allocation3 + $0x100] sm:$0xff]  ;;  %v8853_v8 = vpack.c.bf16 %v8442_v31, %v8441_v59  ;;  %v8448_v31 = vld [vmem:[%s10083_s11 + $0x418] sm:$0xff] }
 0x345   : >> { %3000 = vst.msk [vmem:[#allocation3 + $0x110] sm:$0xff] %vm301_vm0, %v2952_v39  ;;  %v2355_v4 = vpop.f32.mrb[160].mxu0 }
 0x346   : >> { %3273 = vrot.lane.b32.xlu1 %v11672_v21, %s9754_s10  ;;  %v2569_v45 = vmax.f32 %v2521_v36, 0.0  ;;  %v2466_v16 = vadd.f32 %v2355_v4, %v11467_v60  ;;  %v2357_v53 = vpop.f32.mrb[161].mxu0  ;;  %v8835_v60 = vpack.c.bf16 %v8306_v3, %v8305_v58  ;;  %v11721_v36 = vld [vmem:[%s11390_s17] ss:$0 sm:$0xff]  ;;  %v8446_v3 = vld [vmem:[%s10083_s11 + $0x408] sm:$0xff] }
 0x347   : >> { %v3218_v28 = vpop.permute.xlu1 %3217  ;;  %v8445_v58 = vld [vmem:[%s10083_s11 + $0x400] sm:$0xff] }
 0x348   : >> { %v2953_v18 = vsel %vm2905_vm11, %v2569_v45, 0.0  ;;  %v2522_v26 = vadd.f32 %v11393_v27, %v2466_v16  ;;  %v11687_v54 = vsel %vm301_vm0, %v3022_v24, %v3218_v28  ;;  %v11689_v44 = vld [vmem:[#allocation3 + $0x108] sm:$0xff]  ;;  %8836 = vmatpush1.bf16.msra.mxu0 %v8835_v60  ;;  %v3121_v16 = vld [vmem:[#allocation3 + $0x39] sm:$0xff] }
 0x349   : >> { %3001 = vst.msk [vmem:[#allocation3 + $0x118] sm:$0xff] %vm301_vm0, %v2953_v18  ;;  %v2360_v52 = vpop.f32.mrb[162].mxu0  ;;  %3688 = vmatmul.mubr.f32.vlgmr.msra.gmra.mrb[96].mxu1 %v11687_v54  ;;  %8837 = vmatprep.subr.bf16.mxu0 %v13989_v46 }
 0x34a   : >> { %3275 = vrot.lane.b32.xlu1 %v11689_v44, %s9754_s10  ;;  %v2570_v50 = vmax.f32 %v2522_v26, 0.0  ;;  %v2467_v41 = vadd.f32 %v2360_v52, %v11474_v11  ;;  %8848 = vmatpush1.bf16.msra.mxu1 %v8847_v1  ;;  %v2362_v57 = vpop.f32.mrb[163].mxu0 }
 0x34b   : >> { %8340 = vmatprep.mubr.msk.f32.mxu1 %vm301_vm0, %v3119_v62  ;;  %8849 = vmatprep.subr.bf16.mxu1 %v13989_v46  ;;  %v3122_v62 = vld [vmem:[#allocation3 + $0x41] sm:$0xff] }
 0x34c   : >> { %v3220_v15 = vpop.permute.xlu1 %3219  ;;  %v2954_v38 = vsel %vm2906_vm12, %v2570_v50, 0.0  ;;  %v2523_v32 = vadd.f32 %v11393_v27, %v2467_v41  ;;  %v11702_v61 = vld [vmem:[#allocation3 + $0x110] sm:$0xff]  ;;  %v11712_v27 = vpop.permute.xlu0 %2845 }
 0x34d   : >> { %v11705_v11 = vsel %vm301_vm0, %v3023_v10, %v3220_v15  ;;  %3002 = vst.msk [vmem:[#allocation3 + $0x120] sm:$0xff] %vm301_vm0, %v2954_v38  ;;  %v2365_v43 = vpop.f32.mrb[164].mxu0  ;;  %3277 = vrot.lane.b32.xlu0 %v11702_v61, %s9754_s10  ;;  %v8859_v15 = vpack.c.bf16 %v8446_v3, %v8445_v58  ;;  %v8447_v10 = vld [vmem:[%s10083_s11 + $0x410] sm:$0xff]  ;;  %vm2912_vm4 = vcmp.eq.s32.totalorder %v11712_v27, 1  ;;  %v3126_v27 = vld [vmem:[#allocation3 + $0x61] sm:$0xff] }
 0x34e   : >> { %3693 = vmatmul.mubr.f32.gmra.mrb[98].mxu1 %v11705_v11  ;;  %v2571_v55 = vmax.f32 %v2523_v32, 0.0  ;;  %v2468_v13 = vadd.f32 %v2365_v43, %v11486_v12  ;;  %v2367_v5 = vpop.f32.mrb[165].mxu0  ;;  %v8307_v38 = vld [vmem:[%s10083_s11 + $0x2d0] sm:$0xff]  ;;  %v8308_v32 = vld [vmem:[%s10083_s11 + $0x2d8] sm:$0xff]  ;;  %v8862_v35 = vpack.c.bf16 %v8448_v31, %v8447_v10 }
 0x34f   : >> { %8341 = vmatprep.mubr.msk.f32.mxu1 %vm301_vm0, %v3120_v33  ;;  %8851 = vmatpush1.bf16.msra.mxu1 %v8850_v49  ;;  %v3026_v49 = vld [vmem:[#allocation3 + $0x3f] sm:$0xff] }
 0x350   : >> { %v3222_v0 = vpop.permute.xlu1 %3221  ;;  %8852 = vmatprep.subr.bf16.mxu1 %v13989_v46  ;;  %v2955_v39 = vsel %vm2907_vm13, %v2571_v55, 0.0  ;;  %v2524_v4 = vadd.f32 %v11721_v36, %v2468_v13  ;;  %v11724_v45 = vld [vmem:[#allocation3 + $0x118] sm:$0xff]  ;;  %v11739_v18 = vpop.permute.xlu0 %2848  ;;  %v8838_v13 = vpack.c.bf16 %v8308_v32, %v8307_v38 }
 0x351   : >> { %v11727_v12 = vsel %vm301_vm0, %v3024_v14, %v3222_v0  ;;  %3003 = vst.msk [vmem:[#allocation3 + $0x128] sm:$0xff] %vm301_vm0, %v2955_v39  ;;  %v2370_v63 = vpop.f32.mrb[166].mxu0  ;;  %3279 = vrot.lane.b32.xlu1 %v11724_v45, %s9754_s10  ;;  %vm2913_vm5 = vcmp.eq.s32.totalorder %v11739_v18, 1  ;;  %v3127_v18 = vld [vmem:[#allocation3 + $0x69] sm:$0xff] }
 0x352   : >> { %3698 = vmatmul.mubr.f32.gmra.mrb[100].mxu1 %v11727_v12  ;;  %v2572_v53 = vmax.f32 %v2524_v4, 0.0  ;;  %v2469_v24 = vadd.f32 %v2370_v63, %v11494_v23  ;;  %v2372_v1 = vpop.f32.mrb[167].mxu0  ;;  %v3027_v4 = vld [vmem:[#allocation3 + $0x47] sm:$0xff]  ;;  %8839 = vmatpush1.bf16.msra.mxu0 %v8838_v13 }
 0x353   : >> { %8342 = vmatprep.mubr.msk.f32.mxu1 %vm301_vm0, %v3121_v16  ;;  %8854 = vmatpush1.bf16.msra.mxu1 %v8853_v8  ;;  %v8449_v63 = vld [vmem:[%s10083_s11 + $0x420] sm:$0xff]  ;;  %v8450_v16 = vld [vmem:[%s10083_s11 + $0x428] sm:$0xff] }
 0x354   : >> { %v3224_v28 = vpop.permute.xlu1 %3223  ;;  %8855 = vmatprep.subr.bf16.mxu1 %v13989_v46  ;;  %v2956_v26 = vsel %vm2908_vm14, %v2572_v53, 0.0  ;;  %v2525_v60 = vadd.f32 %v11721_v36, %v2469_v24  ;;  %v11742_v23 = vld [vmem:[#allocation3 + $0x120] sm:$0xff]  ;;  %v11769_v8 = vpop.permute.xlu0 %2851  ;;  %8840 = vmatprep.subr.bf16.mxu0 %v13989_v46  ;;  %v8865_v3 = vpack.c.bf16 %v8450_v16, %v8449_v63  ;;  %v8454_v13 = vld [vmem:[%s10083_s11 + $0x448] sm:$0xff] }
 0x355   : >> { %v11745_v52 = vsel %vm301_vm0, %v3025_v56, %v3224_v28  ;;  %3004 = vst.msk [vmem:[#allocation3 + $0x130] sm:$0xff] %vm301_vm0, %v2956_v26  ;;  %v2375_v37 = vpop.f32.mrb[168].mxu0  ;;  %3281 = vrot.lane.b32.xlu0 %v11742_v23, %s9754_s10  ;;  %v3030_v63 = vld [vmem:[#allocation3 + $0x5f] sm:$0xff]  ;;  %vm2914_vm6 = vcmp.eq.s32.totalorder %v11769_v8, 1 }
 0x356   : >> { %3703 = vmatmul.mubr.f32.gmra.mrb[102].mxu1 %v11745_v52  ;;  %v2573_v50 = vmax.f32 %v2525_v60, 0.0  ;;  %v2470_v41 = vadd.f32 %v2375_v37, %v11504_v40  ;;  %v2377_v57 = vpop.f32.mrb[169].mxu0  ;;  %v3028_v60 = vld [vmem:[#allocation3 + $0x4f] sm:$0xff] }
 0x357   : >> { %8343 = vmatprep.mubr.msk.f32.mxu1 %vm301_vm0, %v3122_v62  ;;  %8857 = vmatpush1.bf16.msra.mxu1 %v8856_v48  ;;  %v3124_v48 = vld [vmem:[#allocation3 + $0x51] sm:$0xff] }
 0x358   : >> { %v3226_v59 = vpop.permute.xlu1 %3225  ;;  %8858 = vmatprep.subr.bf16.mxu1 %v13989_v46  ;;  %v2957_v43 = vsel %vm2909_vm15, %v2573_v50, 0.0  ;;  %v2526_v33 = vadd.f32 %v11721_v36, %v2470_v41  ;;  %v11760_v55 = vld [vmem:[#allocation3 + $0x128] sm:$0xff]  ;;  %v8451_v37 = vld [vmem:[%s10083_s11 + $0x430] sm:$0xff]  ;;  %v8452_v62 = vld [vmem:[%s10083_s11 + $0x438] sm:$0xff]  ;;  %v11794_v50 = vpop.permute.xlu0 %2854 }
 0x359   : >> { %v11763_v40 = vsel %vm301_vm0, %v3026_v49, %v3226_v59  ;;  %3005 = vst.msk [vmem:[#allocation3 + $0x138] sm:$0xff] %vm301_vm0, %v2957_v43  ;;  %v2380_v5 = vpop.f32.mrb[170].mxu0  ;;  %3283 = vrot.lane.b32.xlu1 %v11760_v55, %s9754_s10  ;;  %v8868_v38 = vpack.c.bf16 %v8452_v62, %v8451_v37  ;;  %v3029_v43 = vld [vmem:[#allocation3 + $0x57] sm:$0xff]  ;;  %vm2915_vm7 = vcmp.eq.s32.totalorder %v11794_v50, 1 }
 0x35a   : >> { %3708 = vmatmul.mubr.f32.gmra.mrb[104].mxu1 %v11763_v40  ;;  %v2574_v0 = vmax.f32 %v2526_v33, 0.0  ;;  %v2471_v14 = vadd.f32 %v2380_v5, %v11511_v22  ;;  %v2382_v42 = vpop.f32.mrb[171].mxu0  ;;  %v8453_v33 = vld [vmem:[%s10083_s11 + $0x440] sm:$0xff] }
 0x35b   : >> { %8344 = vmatprep.mubr.msk.f32.mxu1 %vm301_vm0, %v3123_v47  ;;  %8860 = vmatpush1.bf16.msra.mxu1 %v8859_v15  ;;  %v3125_v15 = vld [vmem:[#allocation3 + $0x59] sm:$0xff]  ;;  %v8871_v16 = vpack.c.bf16 %v8454_v13, %v8453_v33  ;;  %v3128_v33 = vld [vmem:[#allocation3 + $0x71] sm:$0xff] }
 0x35c   : >> { %v3228_v39 = vpop.permute.xlu1 %3227  ;;  %8861 = vmatprep.subr.bf16.mxu1 %v13989_v46  ;;  %v2958_v53 = vsel %vm2910_vm2, %v2574_v0, 0.0  ;;  %v2527_v24 = vadd.f32 %v11721_v36, %v2471_v14  ;;  %v11778_v1 = vld [vmem:[#allocation3 + $0x130] sm:$0xff]  ;;  %v11822_v42 = vpop.permute.xlu0 %2857  ;;  %v3129_v50 = vld [vmem:[#allocation3 + $0x79] sm:$0xff] }
 0x35d   : >> { %v11781_v22 = vsel %vm301_vm0, %v3027_v4, %v3228_v39  ;;  %3006 = vst.msk [vmem:[#allocation3 + $0x140] sm:$0xff] %vm301_vm0, %v2958_v53  ;;  %v2385_v9 = vpop.f32.mrb[172].mxu0  ;;  %3285 = vrot.lane.b32.xlu0 %v11778_v1, %s9754_s10  ;;  %v8455_v53 = vld [vmem:[%s10083_s11 + $0x450] sm:$0xff]  ;;  %vm2916_vm8 = vcmp.eq.s32.totalorder %v11822_v42, 1  ;;  %v3130_v42 = vld [vmem:[#allocation3 + $0x81] sm:$0xff] }
 0x35e   : >> { %3713 = vmatmul.mubr.f32.gmra.mrb[106].mxu1 %v11781_v22  ;;  %v2575_v28 = vmax.f32 %v2527_v24, 0.0  ;;  %v2472_v56 = vadd.f32 %v2385_v9, %v11523_v25  ;;  %v2387_v58 = vpop.f32.mrb[173].mxu0  ;;  %v8456_v9 = vld [vmem:[%s10083_s11 + $0x458] sm:$0xff] }
 0x35f   : >> { %8345 = vmatprep.mubr.msk.f32.mxu1 %vm301_vm0, %v3124_v48  ;;  %8863 = vmatpush1.bf16.msra.mxu1 %v8862_v35  ;;  %v8309_v48 = vld [vmem:[%s10083_s11 + $0x2e0] sm:$0xff] }
 0x360   : >> { %v3230_v26 = vpop.permute.xlu1 %3229  ;;  %8864 = vmatprep.subr.bf16.mxu1 %v13989_v46  ;;  %v2959_v41 = vsel %vm2911_vm3, %v2575_v28, 0.0  ;;  %v2528_v57 = vadd.f32 %v11721_v36, %v2472_v56  ;;  %v11797_v49 = vld [vmem:[#allocation3 + $0x138] sm:$0xff]  ;;  %v8310_v28 = vld [vmem:[%s10083_s11 + $0x2e8] sm:$0xff] }
 0x361   : >> { %v11800_v25 = vsel %vm301_vm0, %v3028_v60, %v3230_v26  ;;  %3007 = vst.msk [vmem:[#allocation3 + $0x148] sm:$0xff] %vm301_vm0, %v2959_v41  ;;  %v2390_v17 = vpop.f32.mrb[174].mxu0  ;;  %3287 = vrot.lane.b32.xlu1 %v11797_v49, %s9754_s10  ;;  %v8841_v26 = vpack.c.bf16 %v8310_v28, %v8309_v48 }
 0x362   : >> { %3718 = vmatmul.mubr.f32.gmra.mrb[108].mxu1 %v11800_v25  ;;  %v2576_v10 = vmax.f32 %v2528_v57, 0.0  ;;  %v2473_v59 = vadd.f32 %v2390_v17, %v11531_v51  ;;  %v2392_v31 = vpop.f32.mrb[175].mxu0  ;;  %v8874_v57 = vpack.c.bf16 %v8456_v9, %v8455_v53 }
 0x363   : >> { %8346 = vmatprep.mubr.msk.f32.mxu1 %vm301_vm0, %v3125_v15  ;;  %8866 = vmatpush1.bf16.msra.mxu1 %v8865_v3  ;;  %v3031_v15 = vld [vmem:[#allocation3 + $0x67] sm:$0xff]  ;;  %v2861_v31 = vpop.permute.xlu0 %2860 }
 0x364   : >> { %v3232_v32 = vpop.permute.xlu1 %3231  ;;  %8867 = vmatprep.subr.bf16.mxu1 %v13989_v46  ;;  %v2960_v5 = vsel %vm2912_vm4, %v2576_v10, 0.0  ;;  %v2529_v47 = vadd.f32 %v11721_v36, %v2473_v59  ;;  %v11813_v0 = vld [vmem:[#allocation3 + $0x140] sm:$0xff]  ;;  %8842 = vmatpush1.bf16.msra.mxu0 %v8841_v26  ;;  %v8458_v59 = vld [vmem:[%s10083_s11 + $0x468] sm:$0xff]  ;;  %vm2917_vm9 = vcmp.eq.s32.totalorder %v2861_v31, 1 }
 0x365   : >> { %v11816_v51 = vsel %vm301_vm0, %v3029_v43, %v3232_v32  ;;  %3008 = vst.msk [vmem:[#allocation3 + $0x150] sm:$0xff] %vm301_vm0, %v2960_v5  ;;  %v2395_v14 = vpop.f32.mrb[176].mxu0  ;;  %3289 = vrot.lane.b32.xlu0 %v11813_v0, %s9754_s10  ;;  %v8457_v10 = vld [vmem:[%s10083_s11 + $0x460] sm:$0xff]  ;;  %8843 = vmatprep.subr.bf16.mxu0 %v13989_v46  ;;  %v3131_v31 = vld [vmem:[#allocation3 + $0x89] sm:$0xff] }
 0x366   : >> { %3723 = vmatmul.mubr.f32.gmra.mrb[110].mxu1 %v11816_v51  ;;  %v2577_v35 = vmax.f32 %v2529_v47, 0.0  ;;  %v2474_v39 = vadd.f32 %v2395_v14, %v11541_v6  ;;  %v2397_v4 = vpop.f32.mrb[177].mxu0  ;;  %v8877_v14 = vpack.c.bf16 %v8458_v59, %v8457_v10 }
 0x367   : >> { %8347 = vmatprep.mubr.msk.f32.mxu1 %vm301_vm0, %v3126_v27  ;;  %8869 = vmatpush1.bf16.msra.mxu1 %v8868_v38  ;;  %v2864_v53 = vpop.permute.xlu0 %2863 }
 0x368   : >> { %v3234_v24 = vpop.permute.xlu1 %3233  ;;  %8870 = vmatprep.subr.bf16.mxu1 %v13989_v46  ;;  %v2961_v56 = vsel %vm2913_vm5, %v2577_v35, 0.0  ;;  %v2530_v58 = vadd.f32 %v11721_v36, %v2474_v39  ;;  %v11833_v3 = vld [vmem:[#allocation3 + $0x148] sm:$0xff]  ;;  %vm2918_vm10 = vcmp.eq.s32.totalorder %v2864_v53, 1  ;;  %v3132_v53 = vld [vmem:[#allocation3 + $0x91] sm:$0xff] }
 0x369   : >> { %v11836_v6 = vsel %vm301_vm0, %v3030_v63, %v3234_v24  ;;  %3009 = vst.msk [vmem:[#allocation3 + $0x158] sm:$0xff] %vm301_vm0, %v2961_v56  ;;  %v2400_v60 = vpop.f32.mrb[178].mxu0  ;;  %3291 = vrot.lane.b32.xlu1 %v11833_v3, %s9754_s10  ;;  %v3032_v35 = vld [vmem:[#allocation3 + $0x6f] sm:$0xff]  ;;  %v3033_v56 = vld [vmem:[#allocation3 + $0x77] sm:$0xff] }
 0x36a   : >> { %3728 = vmatmul.mubr.f32.gmra.mrb[112].mxu1 %v11836_v6  ;;  %v2578_v37 = vmax.f32 %v2530_v58, 0.0  ;;  %v2475_v62 = vadd.f32 %v2400_v60, %v11550_v19  ;;  %v2402_v41 = vpop.f32.mrb[179].mxu0 }
 0x36b   : >> { %8348 = vmatprep.mubr.msk.f32.mxu1 %vm301_vm0, %v3127_v18  ;;  %8872 = vmatpush1.bf16.msra.mxu1 %v8871_v16  ;;  %v2867_v10 = vpop.permute.xlu0 %2866 }
 0x36c   : >> { %v3236_v17 = vpop.permute.xlu1 %3235  ;;  %8873 = vmatprep.subr.bf16.mxu1 %v13989_v46  ;;  %v2962_v38 = vsel %vm2914_vm6, %v2578_v37, 0.0  ;;  %v2531_v32 = vadd.f32 %v11721_v36, %v2475_v62  ;;  %v11849_v43 = vld [vmem:[#allocation3 + $0x150] sm:$0xff]  ;;  %vm2919_vm11 = vcmp.eq.s32.totalorder %v2867_v10, 1 }
 0x36d   : >> { %v11852_v19 = vsel %vm301_vm0, %v3031_v15, %v3236_v17  ;;  %3010 = vst.msk [vmem:[#allocation3 + $0x160] sm:$0xff] %vm301_vm0, %v2962_v38  ;;  %v2405_v8 = vpop.f32.mrb[180].mxu0  ;;  %3293 = vrot.lane.b32.xlu0 %v11849_v43, %s9754_s10  ;;  %v8311_v17 = vld [vmem:[%s10083_s11 + $0x2f0] sm:$0xff]  ;;  %v8312_v15 = vld [vmem:[%s10083_s11 + $0x2f8] sm:$0xff] }
 0x36e   : >> { %3733 = vmatmul.mubr.f32.gmra.mrb[114].mxu1 %v11852_v19  ;;  %v2579_v13 = vmax.f32 %v2531_v32, 0.0  ;;  %v2476_v5 = vadd.f32 %v2405_v8, %v11561_v30  ;;  %v2407_v47 = vpop.f32.mrb[181].mxu0 }
 0x36f   : >> { %8349 = vmatprep.mubr.msk.f32.mxu1 %vm301_vm0, %v3128_v33  ;;  %8875 = vmatpush1.bf16.msra.mxu1 %v8874_v57  ;;  %v3034_v57 = vld [vmem:[#allocation3 + $0x7f] sm:$0xff] }
 0x370   : >> { %v3238_v27 = vpop.permute.xlu1 %3237  ;;  %8876 = vmatprep.subr.bf16.mxu1 %v13989_v46  ;;  %v2963_v39 = vsel %vm2915_vm7, %v2579_v13, 0.0  ;;  %v2532_v4 = vadd.f32 %v11721_v36, %v2476_v5  ;;  %v11864_v63 = vld [vmem:[#allocation3 + $0x158] sm:$0xff] }
 0x371   : >> { %v11867_v16 = vsel %vm301_vm0, %v3032_v35, %v3238_v27  ;;  %3011 = vst.msk [vmem:[#allocation3 + $0x168] sm:$0xff] %vm301_vm0, %v2963_v39  ;;  %v2410_v30 = vpop.f32.mrb[182].mxu0  ;;  %3295 = vrot.lane.b32.xlu1 %v11864_v63, %s9754_s10  ;;  %v8460_v27 = vld [vmem:[%s10083_s11 + $0x478] sm:$0xff]  ;;  %v3035_v39 = vld [vmem:[#allocation3 + $0x87] sm:$0xff] }
 0x372   : >> { %3738 = vmatmul.mubr.f32.gmra.mrb[116].mxu1 %v11867_v16  ;;  %v2580_v24 = vmax.f32 %v2532_v4, 0.0  ;;  %v2477_v9 = vadd.f32 %v2410_v30, %v11568_v20  ;;  %v2412_v48 = vpop.f32.mrb[183].mxu0 }
 0x373   : >> { %8350 = vmatprep.mubr.msk.f32.mxu1 %vm301_vm0, %v3129_v50  ;;  %8878 = vmatpush1.bf16.msra.mxu1 %v8877_v14  ;;  %v8459_v14 = vld [vmem:[%s10083_s11 + $0x470] sm:$0xff]  ;;  %v2870_v48 = vpop.permute.xlu0 %2869 }
 0x374   : >> { %v3240_v28 = vpop.permute.xlu1 %3239  ;;  %8879 = vmatprep.subr.bf16.mxu1 %v13989_v46  ;;  %v2964_v58 = vsel %vm2916_vm8, %v2580_v24, 0.0  ;;  %v2533_v26 = vadd.f32 %v11721_v36, %v2477_v9  ;;  %v11878_v60 = vld [vmem:[#allocation3 + $0x160] sm:$0xff]  ;;  %v8880_v4 = vpack.c.bf16 %v8460_v27, %v8459_v14  ;;  %vm2920_vm12 = vcmp.eq.s32.totalorder %v2870_v48, 1  ;;  %v3136_v48 = vld [vmem:[#allocation3 + $0xb1] sm:$0xff] }
 0x375   : >> { %v11881_v18 = vsel %vm301_vm0, %v3033_v56, %v3240_v28  ;;  %3012 = vst.msk [vmem:[#allocation3 + $0x170] sm:$0xff] %vm301_vm0, %v2964_v58  ;;  %v2415_v20 = vpop.f32.mrb[184].mxu0  ;;  %3297 = vrot.lane.b32.xlu0 %v11878_v60, %s9754_s10  ;;  %v3038_v14 = vld [vmem:[#allocation3 + $0x9f] sm:$0xff] }
 0x376   : >> { %3743 = vmatmul.mubr.f32.gmra.mrb[118].mxu1 %v11881_v18  ;;  %v2581_v46 = vmax.f32 %v2533_v26, 0.0  ;;  %v2478_v37 = vadd.f32 %v2415_v20, %v11578_v34  ;;  %v2417_v62 = vpop.f32.mrb[185].mxu0  ;;  %v8844_v34 = vpack.c.bf16 %v8312_v15, %v8311_v17  ;;  %v3036_v20 = vld [vmem:[#allocation3 + $0x8f] sm:$0xff] }
 0x377   : >> { %8351 = vmatprep.mubr.msk.f32.mxu1 %vm301_vm0, %v3130_v42  ;;  %8881 = vmatpush1.bf16.msra.mxu1 %v8880_v4  ;;  %v3135_v4 = vld [vmem:[#allocation3 + $0xa9] sm:$0xff] }
 0x378   : >> { %v3242_v41 = vpop.permute.xlu1 %3241  ;;  %v2965_v59 = vsel %vm2917_vm9, %v2581_v46, 0.0  ;;  %v2534_v38 = vadd.f32 %v11721_v36, %v2478_v37  ;;  %v11892_v32 = vld [vmem:[#allocation3 + $0x168] sm:$0xff]  ;;  %8845 = vmatpush1.bf16.msra.mxu0 %v8844_v34 }
 0x379   : >> { %v11895_v8 = vsel %vm301_vm0, %v3034_v57, %v3242_v41  ;;  %3013 = vst.msk [vmem:[#allocation3 + $0x178] sm:$0xff] %vm301_vm0, %v2965_v59  ;;  %v2420_v33 = vpop.f32.mrb[186].mxu0  ;;  %3299 = vrot.lane.b32.xlu1 %v11892_v32, %s9754_s10  ;;  %v3037_v59 = vld [vmem:[#allocation3 + $0x97] sm:$0xff] }
 0x37a   : >> { %3748 = vmatmul.mubr.f32.gmra.mrb[120].mxu1 %v11895_v8  ;;  %v2582_v13 = vmax.f32 %v2534_v38, 0.0  ;;  %v2479_v5 = vadd.f32 %v2420_v33, %v11588_v2  ;;  %v2422_v47 = vpop.f32.mrb[187].mxu0  ;;  %v2873_v38 = vpop.permute.xlu0 %2872 }
 0x37b   : >> { %8352 = vmatprep.mubr.msk.f32.mxu1 %vm301_vm0, %v3131_v31  ;;  %vm2921_vm13 = vcmp.eq.s32.totalorder %v2873_v38, 1  ;;  %v3042_v38 = vld [vmem:[#allocation3 + $0xbf] sm:$0xff] }
 0x37c   : >> { %v3244_v35 = vpop.permute.xlu1 %3243  ;;  %v2966_v30 = vsel %vm2918_vm10, %v2582_v13, 0.0  ;;  %v2535_v50 = vadd.f32 %v11721_v36, %v2479_v5  ;;  %v11906_v24 = vld [vmem:[#allocation3 + $0x170] sm:$0xff] }
 0x37d   : >> { %v11909_v9 = vsel %vm301_vm0, %v3035_v39, %v3244_v35  ;;  %3014 = vst.msk [vmem:[#allocation3 + $0x180] sm:$0xff] %vm301_vm0, %v2966_v30  ;;  %v2425_v2 = vpop.f32.mrb[188].mxu0  ;;  %3301 = vrot.lane.b32.xlu0 %v11906_v24, %s9754_s10  ;;  %v3115_v5 = vld [vmem:[#allocation3 + $0x9] sm:$0xff] }
 0x37e   : >> { %3753 = vmatmul.mubr.f32.gmra.mrb[122].mxu1 %v11909_v9  ;;  %v2583_v28 = vmax.f32 %v2535_v50, 0.0  ;;  %v2480_v56 = vadd.f32 %v2425_v2, %v11599_v29  ;;  %v2427_v58 = vpop.f32.mrb[189].mxu0  ;;  %v3133_v29 = vld [vmem:[#allocation3 + $0x99] sm:$0xff]  ;;  %8387 = vmatprep.mubr.msk.f32.mxu0 %vm301_vm0, %v3115_v5  ;;  %v3039_v50 = vld [vmem:[#allocation3 + $0xa7] sm:$0xff] }
 0x37f   : >> { %8353 = vmatprep.mubr.msk.f32.mxu1 %vm301_vm0, %v3132_v53  ;;  %v3040_v58 = vld [vmem:[#allocation3 + $0xaf] sm:$0xff] }
 0x380   : >> { %v3246_v26 = vpop.permute.xlu1 %3245  ;;  %v2967_v42 = vsel %vm2919_vm11, %v2583_v28, 0.0  ;;  %v2536_v46 = vadd.f32 %v11721_v36, %v2480_v56  ;;  %v11918_v37 = vld [vmem:[#allocation3 + $0x178] sm:$0xff]  ;;  %v3067_v28 = vld [vmem:[#allocation3 + $0x8] sm:$0xff] }
 0x381   : >> { %v11921_v62 = vsel %vm301_vm0, %v3036_v20, %v3246_v26  ;;  %3015 = vst.msk [vmem:[#allocation3 + $0x188] sm:$0xff] %vm301_vm0, %v2967_v42  ;;  %v2430_v41 = vpop.f32.mrb[190].mxu0  ;;  %3303 = vrot.lane.b32.xlu1 %v11918_v37, %s9754_s10  ;;  %v3137_v42 = vld [vmem:[#allocation3 + $0xb9] sm:$0xff] }
 0x382   : >> { %3758 = vmatmul.mubr.f32.gmra.mrb[124].mxu1 %v11921_v62  ;;  %v2584_v57 = vmax.f32 %v2536_v46, 0.0  ;;  %v2481_v17 = vadd.f32 %v2430_v41, %v11607_v7  ;;  %v2432_v15 = vpop.f32.mrb[191].mxu0  ;;  %v3134_v7 = vld [vmem:[#allocation3 + $0xa1] sm:$0xff]  ;;  %v3068_v46 = vld [vmem:[#allocation3 + $0x10] sm:$0xff] }
 0x383   : >> { %8354 = vmatprep.mubr.msk.f32.mxu1 %vm301_vm0, %v3133_v29  ;;  %v3041_v29 = vld [vmem:[#allocation3 + $0xb7] sm:$0xff]  ;;  %v3138_v15 = vld [vmem:[#allocation3 + $0xc1] sm:$0xff] }
 0x384   : >> { %v3248_v10 = vpop.permute.xlu1 %3247  ;;  %v2968_v34 = vsel %vm2920_vm12, %v2584_v57, 0.0  ;;  %v2537_v33 = vadd.f32 %v11721_v36, %v2481_v17  ;;  %v11930_v31 = vld [vmem:[#allocation3 + $0x180] sm:$0xff]  ;;  %v4290_v57 = vld [vmem:[#allocation3 + $0x38] sm:$0xff] }
 0x385   : >> { %v11933_v13 = vsel %vm301_vm0, %v3037_v59, %v3248_v10  ;;  %3016 = vst.msk [vmem:[#allocation3 + $0x190] sm:$0xff] %vm301_vm0, %v2968_v34  ;;  %3305 = vrot.lane.b32.xlu0 %v11930_v31, %s9754_s10  ;;  %v3069_v10 = vld [vmem:[#allocation3 + $0x18] sm:$0xff]  ;;  %v4291_v34 = vld [vmem:[#allocation3 + $0x40] sm:$0xff] }
 0x386   : >> { %3763 = vmatmul.mubr.f32.gmra.mrb[126].mxu1 %v11933_v13  ;;  %v2585_v47 = vmax.f32 %v2537_v33, 0.0 }
 0x387   : >> { %8355 = vmatprep.mubr.msk.f32.mxu1 %vm301_vm0, %v3134_v7  ;;  %v3139_v7 = vld [vmem:[#allocation3 + $0xc9] sm:$0xff] }
 0x388   : >> { %v3250_v36 = vpop.permute.xlu1 %3249  ;;  %v2969_v27 = vsel %vm2921_vm13, %v2585_v47, 0.0  ;;  %v11941_v35 = vld [vmem:[#allocation3 + $0x188] sm:$0xff] }
 0x389   : >> { %v11944_v39 = vsel %vm301_vm0, %v3038_v14, %v3250_v36  ;;  %3017 = vst.msk [vmem:[#allocation3 + $0x198] sm:$0xff] %vm301_vm0, %v2969_v27  ;;  %3441 = vrot.lane.b32.xlu1 %v11941_v35, %s9754_s10  ;;  %v3043_v47 = vld [vmem:[#allocation3 + $0xc7] sm:$0xff]  ;;  %v4293_v36 = vld [vmem:[#allocation3 + $0x50] sm:$0xff] }
 0x38a   : >> { %3768 = vmatmul.mubr.f32.gmra.mrb[128].mxu1 %v11944_v39  ;;  %v4292_v14 = vld [vmem:[#allocation3 + $0x48] sm:$0xff] }
 0x38b   : >> { %8356 = vmatprep.mubr.msk.f32.mxu1 %vm301_vm0, %v3135_v4  ;;  %v3140_v4 = vld [vmem:[#allocation3 + $0xd1] sm:$0xff] }
 0x38c   : >> { %v3252_v30 = vpop.permute.xlu1 %3251  ;;  %v11951_v2 = vld [vmem:[#allocation3 + $0x190] sm:$0xff] }
 0x38d   : >> { %v11954_v53 = vsel %vm301_vm0, %v3039_v50, %v3252_v30  ;;  %3443 = vrot.lane.b32.xlu0 %v11951_v2, %s9754_s10  ;;  %v3044_v50 = vld [vmem:[#allocation3 + $0xcf] sm:$0xff] }
 0x38e   : >> { %3773 = vmatmul.mubr.f32.gmra.mrb[130].mxu1 %v11954_v53 }
 0x38f   : >> { %8357 = vmatprep.mubr.msk.f32.mxu1 %vm301_vm0, %v3136_v48  ;;  %v4295_v48 = vld [vmem:[#allocation3 + $0x60] sm:$0xff] }
 0x390   : >> { %v3254_v56 = vpop.permute.xlu1 %3253  ;;  %v11960_v26 = vld [vmem:[#allocation3 + $0x198] sm:$0xff] }
 0x391   : >> { %v11963_v20 = vsel %vm301_vm0, %v3040_v58, %v3254_v56  ;;  %3211 = vrot.lane.b32.xlu0 %v3067_v28, %s9754_s10  ;;  %3445 = vrot.lane.b32.xlu1 %v11960_v26, %s9754_s10  ;;  %v4294_v28 = vld [vmem:[#allocation3 + $0x58] sm:$0xff] }
 0x392   : >> { %3778 = vmatmul.mubr.f32.gmra.mrb[132].mxu1 %v11963_v20  ;;  %v3141_v58 = vld [vmem:[#allocation3 + $0xd9] sm:$0xff] }
 0x393   : >> { %8358 = vmatprep.mubr.msk.f32.mxu1 %vm301_vm0, %v3137_v42 }
 0x394   : >> { %v3256_v41 = vpop.permute.xlu1 %3255 }
 0x395   : >> { %v11971_v17 = vsel %vm301_vm0, %v3041_v29, %v3256_v41  ;;  %3213 = vrot.lane.b32.xlu0 %v3068_v46, %s9754_s10  ;;  %4434 = vrot.lane.b32.xlu1 %v4290_v57, %s9754_s10  ;;  %v3045_v46 = vld [vmem:[#allocation3 + $0xd7] sm:$0xff]  ;;  %v4296_v29 = vld [vmem:[#allocation3 + $0x68] sm:$0xff] }
 0x396   : >> { %3783 = vmatmul.mubr.f32.gmra.mrb[134].mxu1 %v11971_v17  ;;  %v4297_v41 = vld [vmem:[#allocation3 + $0x70] sm:$0xff] }
 0x397   : >> { %8359 = vmatprep.mubr.msk.f32.mxu1 %vm301_vm0, %v3138_v15  ;;  %v3142_v15 = vld [vmem:[#allocation3 + $0xe1] sm:$0xff] }
 0x398   : >> { %v3258_v59 = vpop.permute.xlu1 %3257 }
 0x399   : >> { %v11978_v33 = vsel %vm301_vm0, %v3042_v38, %v3258_v59  ;;  %3215 = vrot.lane.b32.xlu0 %v3069_v10, %s9754_s10  ;;  %4436 = vrot.lane.b32.xlu1 %v4291_v34, %s9754_s10  ;;  %v3046_v59 = vld [vmem:[#allocation3 + $0xdf] sm:$0xff] }
 0x39a   : >> { %3788 = vmatmul.mubr.f32.gmra.mrb[136].mxu1 %v11978_v33  ;;  %v4299_v38 = vld [vmem:[#allocation3 + $0x80] sm:$0xff]  ;;  %v4298_v34 = vld [vmem:[#allocation3 + $0x78] sm:$0xff] }
 0x39b   : >> { %8360 = vmatprep.mubr.msk.f32.mxu1 %vm301_vm0, %v3139_v7 }
 0x39c   : >> { %v3260_v5 = vpop.permute.xlu1 %3259 }
 0x39d   : >> { %v11985_v27 = vsel %vm301_vm0, %v3043_v47, %v3260_v5  ;;  %4440 = vrot.lane.b32.xlu0 %v4293_v36, %s9754_s10  ;;  %4438 = vrot.lane.b32.xlu1 %v4292_v14, %s9754_s10  ;;  %v3143_v5 = vld [vmem:[#allocation3 + $0xe9] sm:$0xff] }
 0x39e   : >> { %3793 = vmatmul.mubr.f32.gmra.mrb[138].mxu1 %v11985_v27  ;;  %v3047_v36 = vld [vmem:[#allocation3 + $0xe7] sm:$0xff]  ;;  %v4301_v14 = vld [vmem:[#allocation3 + $0x90] sm:$0xff] }
 0x39f   : >> { %8361 = vmatprep.mubr.msk.f32.mxu1 %vm301_vm0, %v3140_v4  ;;  %v4300_v4 = vld [vmem:[#allocation3 + $0x88] sm:$0xff] }
 0x3a0   : >> { %v3262_v30 = vpop.permute.xlu1 %3261 }
 0x3a1   : >> { %v11992_v56 = vsel %vm301_vm0, %v3044_v50, %v3262_v30  ;;  %4444 = vrot.lane.b32.xlu0 %v4295_v48, %s9754_s10  ;;  %4442 = vrot.lane.b32.xlu1 %v4294_v28, %s9754_s10  ;;  %v3144_v50 = vld [vmem:[#allocation3 + $0xf1] sm:$0xff] }
 0x3a2   : >> { %3798 = vmatmul.mubr.f32.gmra.mrb[140].mxu1 %v11992_v56  ;;  %v3048_v28 = vld [vmem:[#allocation3 + $0xef] sm:$0xff] }
 0x3a3   : >> { %8362 = vmatprep.mubr.msk.f32.mxu1 %vm301_vm0, %v3141_v58  ;;  %v4303_v58 = vld [vmem:[#allocation3 + $0xa0] sm:$0xff] }
 0x3a4   : >> { %v3264_v42 = vpop.permute.xlu1 %3263 }
 0x3a5   : >> { %v11999_v57 = vsel %vm301_vm0, %v3045_v46, %v3264_v42  ;;  %4448 = vrot.lane.b32.xlu0 %v4297_v41, %s9754_s10  ;;  %4446 = vrot.lane.b32.xlu1 %v4296_v29, %s9754_s10  ;;  %v4302_v42 = vld [vmem:[#allocation3 + $0x98] sm:$0xff] }
 0x3a6   : >> { %3803 = vmatmul.mubr.f32.gmra.mrb[142].mxu1 %v11999_v57  ;;  %v3145_v41 = vld [vmem:[#allocation3 + $0xf9] sm:$0xff] }
 0x3a7   : >> { %8363 = vmatprep.mubr.msk.f32.mxu1 %vm301_vm0, %v3142_v15  ;;  %v3049_v15 = vld [vmem:[#allocation3 + $0xf7] sm:$0xff] }
 0x3a8   : >> { %v3266_v10 = vpop.permute.xlu1 %3265 }
 0x3a9   : >> { %v12006_v7 = vsel %vm301_vm0, %v3046_v59, %v3266_v10  ;;  %4452 = vrot.lane.b32.xlu0 %v4299_v38, %s9754_s10  ;;  %4450 = vrot.lane.b32.xlu1 %v4298_v34, %s9754_s10  ;;  %v4305_v10 = vld [vmem:[#allocation3 + $0xb0] sm:$0xff]  ;;  %v4304_v59 = vld [vmem:[#allocation3 + $0xa8] sm:$0xff] }
 0x3aa   : >> { %3808 = vmatmul.mubr.f32.gmra.mrb[144].mxu1 %v12006_v7  ;;  %v3146_v34 = vld [vmem:[#allocation3 + $0x101] sm:$0xff] }
 0x3ab   : >> { %8364 = vmatprep.mubr.msk.f32.mxu1 %vm301_vm0, %v3143_v5 }
 0x3ac   : >> { %v3268_v47 = vpop.permute.xlu1 %3267 }
 0x3ad   : >> { %v12013_v30 = vsel %vm301_vm0, %v3047_v36, %v3268_v47  ;;  %4456 = vrot.lane.b32.xlu0 %v4301_v14, %s9754_s10  ;;  %4454 = vrot.lane.b32.xlu1 %v4300_v4, %s9754_s10  ;;  %v3050_v47 = vld [vmem:[#allocation3 + $0xff] sm:$0xff] }
 0x3ae   : >> { %3813 = vmatmul.mubr.f32.gmra.mrb[146].mxu1 %v12013_v30  ;;  %v4306_v36 = vld [vmem:[#allocation3 + $0xb8] sm:$0xff]  ;;  %v9295_v4 = vld [vmem:[#allocation3 + $0xc0] sm:$0xff] }
 0x3af   : >> { %8365 = vmatprep.mubr.msk.f32.mxu1 %vm301_vm0, %v3144_v50  ;;  %v3147_v50 = vld [vmem:[#allocation3 + $0x109] sm:$0xff] }
 0x3b0   : >> { %v3270_v48 = vpop.permute.xlu1 %3269 }
 0x3b1   : >> { %v12020_v46 = vsel %vm301_vm0, %v3048_v28, %v3270_v48  ;;  %4460 = vrot.lane.b32.xlu0 %v4303_v58, %s9754_s10  ;;  %4458 = vrot.lane.b32.xlu1 %v4302_v42, %s9754_s10  ;;  %v3051_v28 = vld [vmem:[#allocation3 + $0x107] sm:$0xff] }
 0x3b2   : >> { %3818 = vmatmul.mubr.f32.gmra.mrb[148].mxu1 %v12020_v46  ;;  %v4308_v58 = vld [vmem:[#allocation3 + $0xc8] sm:$0xff] }
 0x3b3   : >> { %8366 = vmatprep.mubr.msk.f32.mxu1 %vm301_vm0, %v3145_v41  ;;  %v9296_v41 = vld [vmem:[#allocation3 + $0xd0] sm:$0xff] }
 0x3b4   : >> { %v3272_v29 = vpop.permute.xlu1 %3271 }
 0x3b5   : >> { %v12027_v38 = vsel %vm301_vm0, %v3049_v15, %v3272_v29  ;;  %4464 = vrot.lane.b32.xlu0 %v4305_v10, %s9754_s10  ;;  %4462 = vrot.lane.b32.xlu1 %v4304_v59, %s9754_s10  ;;  %v3148_v29 = vld [vmem:[#allocation3 + $0x111] sm:$0xff] }
 0x3b6   : >> { %3823 = vmatmul.mubr.f32.gmra.mrb[150].mxu1 %v12027_v38  ;;  %v3052_v10 = vld [vmem:[#allocation3 + $0x10f] sm:$0xff] }
 0x3b7   : >> { %8367 = vmatprep.mubr.msk.f32.mxu1 %vm301_vm0, %v3146_v34  ;;  %v9297_v34 = vld [vmem:[#allocation3 + $0xe0] sm:$0xff] }
 0x3b8   : >> { %v3274_v5 = vpop.permute.xlu1 %3273 }
 0x3b9   : >> { %v12034_v14 = vsel %vm301_vm0, %v3050_v47, %v3274_v5  ;;  %4468 = vrot.lane.b32.xlu0 %v9295_v4, %s9754_s10  ;;  %4466 = vrot.lane.b32.xlu1 %v4306_v36, %s9754_s10  ;;  %v9298_v5 = vld [vmem:[#allocation3 + $0xd8] sm:$0xff] }
 0x3ba   : >> { %3828 = vmatmul.mubr.f32.gmra.mrb[152].mxu1 %v12034_v14  ;;  %v3149_v47 = vld [vmem:[#allocation3 + $0x119] sm:$0xff] }
 0x3bb   : >> { %8368 = vmatprep.mubr.msk.f32.mxu1 %vm301_vm0, %v3147_v50  ;;  %v3053_v4 = vld [vmem:[#allocation3 + $0x117] sm:$0xff] }
 0x3bc   : >> { %v3276_v48 = vpop.permute.xlu1 %3275 }
 0x3bd   : >> { %v12041_v42 = vsel %vm301_vm0, %v3051_v28, %v3276_v48  ;;  %4472 = vrot.lane.b32.xlu0 %v9296_v41, %s9754_s10  ;;  %4470 = vrot.lane.b32.xlu1 %v4308_v58, %s9754_s10  ;;  %v9299_v48 = vld [vmem:[#allocation3 + $0xf0] sm:$0xff]  ;;  %v9300_v28 = vld [vmem:[#allocation3 + $0xe8] sm:$0xff] }
 0x3be   : >> { %3833 = vmatmul.mubr.f32.gmra.mrb[154].mxu1 %v12041_v42  ;;  %v3150_v58 = vld [vmem:[#allocation3 + $0x121] sm:$0xff] }
 0x3bf   : >> { %8369 = vmatprep.mubr.msk.f32.mxu1 %vm301_vm0, %v3148_v29  ;;  %v3278_v15 = vpop.permute.xlu0 %3277  ;;  %v3054_v29 = vld [vmem:[#allocation3 + $0x11f] sm:$0xff] }
 0x3c0   : >> { %v12048_v59 = vsel %vm301_vm0, %v3052_v10, %v3278_v15  ;;  %v9301_v10 = vld [vmem:[#allocation3 + $0xf8] sm:$0xff] }
 0x3c1   : >> { %4476 = vrot.lane.b32.xlu0 %v9297_v34, %s9754_s10  ;;  %4474 = vrot.lane.b32.xlu1 %v9298_v5, %s9754_s10  ;;  %v3151_v34 = vld [vmem:[#allocation3 + $0x129] sm:$0xff] }
 0x3c2   : >> { %3838 = vmatmul.mubr.f32.gmra.mrb[156].mxu1 %v12048_v59 }
 0x3c3   : >> { %8370 = vmatprep.mubr.msk.f32.mxu1 %vm301_vm0, %v3149_v47  ;;  %v3280_v36 = vpop.permute.xlu1 %3279  ;;  %v3055_v47 = vld [vmem:[#allocation3 + $0x127] sm:$0xff] }
 0x3c4   : >> { %v12055_v50 = vsel %vm301_vm0, %v3053_v4, %v3280_v36 }
 0x3c5   : >> { %4480 = vrot.lane.b32.xlu0 %v9299_v48, %s9754_s10  ;;  %4478 = vrot.lane.b32.xlu1 %v9300_v28, %s9754_s10  ;;  %v3056_v48 = vld [vmem:[#allocation3 + $0x12f] sm:$0xff] }
 0x3c6   : >> { %3843 = vmatmul.mubr.f32.gmra.mrb[158].mxu1 %v12055_v50 }
 0x3c7   : >> { %8371 = vmatprep.mubr.msk.f32.mxu1 %vm301_vm0, %v3150_v58  ;;  %v3282_v41 = vpop.permute.xlu0 %3281  ;;  %v3057_v58 = vld [vmem:[#allocation3 + $0x137] sm:$0xff] }
 0x3c8   : >> { %v12062_v15 = vsel %vm301_vm0, %v3054_v29, %v3282_v41  ;;  %v3058_v29 = vld [vmem:[#allocation3 + $0x13f] sm:$0xff] }
 0x3c9   : >> { %4484 = vrot.lane.b32.xlu0 %v11672_v21, %s9754_s10  ;;  %4482 = vrot.lane.b32.xlu1 %v9301_v10, %s9754_s10  ;;  %v3152_v21 = vld [vmem:[#allocation3 + $0x131] sm:$0xff] }
 0x3ca   : >> { %3848 = vmatmul.mubr.f32.gmra.mrb[160].mxu1 %v12062_v15 }
 0x3cb   : >> { %8372 = vmatprep.mubr.msk.f32.mxu1 %vm301_vm0, %v3151_v34  ;;  %v3284_v5 = vpop.permute.xlu1 %3283  ;;  %v3059_v34 = vld [vmem:[#allocation3 + $0x147] sm:$0xff] }
 0x3cc   : >> { %v12070_v36 = vsel %vm301_vm0, %v3055_v47, %v3284_v5  ;;  %v3060_v47 = vld [vmem:[#allocation3 + $0x14f] sm:$0xff] }
 0x3cd   : >> { %4488 = vrot.lane.b32.xlu0 %v11702_v61, %s9754_s10  ;;  %4486 = vrot.lane.b32.xlu1 %v11689_v44, %s9754_s10  ;;  %v3153_v61 = vld [vmem:[#allocation3 + $0x139] sm:$0xff] }
 0x3ce   : >> { %3853 = vmatmul.mubr.f32.gmra.mrb[162].mxu1 %v12070_v36 }
 0x3cf   : >> { %8373 = vmatprep.mubr.msk.f32.mxu1 %vm301_vm0, %v3152_v21  ;;  %v3286_v4 = vpop.permute.xlu0 %3285 }
 0x3d0   : >> { %v12079_v28 = vsel %vm301_vm0, %v3056_v48, %v3286_v4  ;;  %v3061_v4 = vld [vmem:[#allocation3 + $0x157] sm:$0xff] }
 0x3d1   : >> { %4492 = vrot.lane.b32.xlu0 %v11742_v23, %s9754_s10  ;;  %4490 = vrot.lane.b32.xlu1 %v11724_v45, %s9754_s10  ;;  %v3154_v23 = vld [vmem:[#allocation3 + $0x141] sm:$0xff] }
 0x3d2   : >> { %3858 = vmatmul.mubr.f32.gmra.mrb[164].mxu1 %v12079_v28 }
 0x3d3   : >> { %8374 = vmatprep.mubr.msk.f32.mxu1 %vm301_vm0, %v3153_v61  ;;  %v3288_v44 = vpop.permute.xlu1 %3287  ;;  %v3062_v61 = vld [vmem:[#allocation3 + $0x15f] sm:$0xff] }
 0x3d4   : >> { %v12088_v41 = vsel %vm301_vm0, %v3057_v58, %v3288_v44  ;;  %v3063_v58 = vld [vmem:[#allocation3 + $0x167] sm:$0xff] }
 0x3d5   : >> { %4496 = vrot.lane.b32.xlu0 %v11778_v1, %s9754_s10  ;;  %4494 = vrot.lane.b32.xlu1 %v11760_v55, %s9754_s10  ;;  %v3155_v1 = vld [vmem:[#allocation3 + $0x149] sm:$0xff] }
 0x3d6   : >> { %3863 = vmatmul.mubr.f32.gmra.mrb[166].mxu1 %v12088_v41 }
 0x3d7   : >> { %8375 = vmatprep.mubr.msk.f32.mxu1 %vm301_vm0, %v3154_v23  ;;  %v3290_v45 = vpop.permute.xlu0 %3289 }
 0x3d8   : >> { %v12097_v10 = vsel %vm301_vm0, %v3058_v29, %v3290_v45  ;;  %v3064_v29 = vld [vmem:[#allocation3 + $0x16f] sm:$0xff] }
 0x3d9   : >> { %4500 = vrot.lane.b32.xlu0 %v11813_v0, %s9754_s10  ;;  %4498 = vrot.lane.b32.xlu1 %v11797_v49, %s9754_s10  ;;  %v3156_v0 = vld [vmem:[#allocation3 + $0x151] sm:$0xff] }
 0x3da   : >> { %3868 = vmatmul.mubr.f32.gmra.mrb[168].mxu1 %v12097_v10 }
 0x3db   : >> { %8376 = vmatprep.mubr.msk.f32.mxu1 %vm301_vm0, %v3155_v1  ;;  %v3292_v55 = vpop.permute.xlu1 %3291 }
 0x3dc   : >> { %v12106_v5 = vsel %vm301_vm0, %v3059_v34, %v3292_v55  ;;  %v5254_v55 = vld [vmem:[#allocation7 + $0x8] sm:$0xff]  ;;  %v5253_v34 = vld [vmem:[#allocation7] sm:$0xff] }
 0x3dd   : >> { %4504 = vrot.lane.b32.xlu0 %v11849_v43, %s9754_s10  ;;  %4502 = vrot.lane.b32.xlu1 %v11833_v3, %s9754_s10  ;;  %v3157_v43 = vld [vmem:[#allocation3 + $0x159] sm:$0xff]  ;;  %vm5302_vm14 = vcmp.ne.f32.partialorder %v5254_v55, 0.0  ;;  %vm5301_vm15 = vcmp.ne.f32.partialorder %v5253_v34, 0.0 }
 0x3de   : >> { %3873 = vmatmul.mubr.f32.gmra.mrb[170].mxu1 %v12106_v5 }
 0x3df   : >> { %8377 = vmatprep.mubr.msk.f32.mxu1 %vm301_vm0, %v3156_v0  ;;  %v3294_v49 = vpop.permute.xlu0 %3293  ;;  %v4336_v0 = vld [vmem:[#allocation3 + $0x1a8] sm:$0xff] }
 0x3e0   : >> { %v12115_v21 = vsel %vm301_vm0, %v3060_v47, %v3294_v49  ;;  %v3065_v47 = vld [vmem:[#allocation3 + $0x177] sm:$0xff] }
 0x3e1   : >> { %4508 = vrot.lane.b32.xlu0 %v11878_v60, %s9754_s10  ;;  %4506 = vrot.lane.b32.xlu1 %v11864_v63, %s9754_s10  ;;  %v3158_v60 = vld [vmem:[#allocation3 + $0x161] sm:$0xff] }
 0x3e2   : >> { %3878 = vmatmul.mubr.f32.gmra.mrb[172].mxu1 %v12115_v21 }
 0x3e3   : >> { %8378 = vmatprep.mubr.msk.f32.mxu1 %vm301_vm0, %v3157_v43  ;;  %v3296_v3 = vpop.permute.xlu1 %3295 }
 0x3e4   : >> { %v12124_v48 = vsel %vm301_vm0, %v3061_v4, %v3296_v3  ;;  %v5256_v3 = vld [vmem:[#allocation7 + $0x18] sm:$0xff]  ;;  %v5255_v4 = vld [vmem:[#allocation7 + $0x10] sm:$0xff] }
 0x3e5   : >> { %4512 = vrot.lane.b32.xlu0 %v11906_v24, %s9754_s10  ;;  %4510 = vrot.lane.b32.xlu1 %v11892_v32, %s9754_s10  ;;  %v3159_v24 = vld [vmem:[#allocation3 + $0x169] sm:$0xff]  ;;  %vm5304_vm2 = vcmp.ne.f32.partialorder %v5256_v3, 0.0  ;;  %vm5303_vm3 = vcmp.ne.f32.partialorder %v5255_v4, 0.0 }
 0x3e6   : >> { %3883 = vmatmul.mubr.f32.gmra.mrb[174].mxu1 %v12124_v48 }
 0x3e7   : >> { %8379 = vmatprep.mubr.msk.f32.mxu1 %vm301_vm0, %v3158_v60  ;;  %v3298_v63 = vpop.permute.xlu0 %3297  ;;  %v14012_v60 = vmov 0  }
 0x3e8   : >> { %v12133_v44 = vsel %vm301_vm0, %v3062_v61, %v3298_v63  ;;  %v5350_v63 = vsel %vm5302_vm14, 1, %v14012_v60  ;;  %v5349_v61 = vsel %vm5301_vm15, 1, %v14012_v60  ;;  %v5351_v55 = vsel %vm5303_vm3, 1, %v14012_v60 }
 0x3e9   : >> { %4516 = vrot.lane.b32.xlu0 %v11930_v31, %s9754_s10  ;;  %4514 = vrot.lane.b32.xlu1 %v11918_v37, %s9754_s10  ;;  %v3160_v31 = vld [vmem:[#allocation3 + $0x171] sm:$0xff]  ;;  %v4335_v37 = vld [vmem:[#allocation3 + $0x1a0] sm:$0xff] }
 0x3ea   : >> { %3888 = vmatmul.mubr.f32.gmra.mrb[176].mxu1 %v12133_v44 }
 0x3eb   : >> { %8380 = vmatprep.mubr.msk.f32.mxu1 %vm301_vm0, %v3159_v24  ;;  %v3300_v32 = vpop.permute.xlu1 %3299 }
 0x3ec   : >> { %v12142_v23 = vsel %vm301_vm0, %v3063_v58, %v3300_v32  ;;  %v3066_v32 = vld [vmem:[#allocation3 + $0x17f] sm:$0xff] }
 0x3ed   : >> { %4520 = vrot.lane.b32.xlu0 %v11951_v2, %s9754_s10  ;;  %4518 = vrot.lane.b32.xlu1 %v11941_v35, %s9754_s10  ;;  %v3161_v35 = vld [vmem:[#allocation3 + $0x179] sm:$0xff]  ;;  %v4337_v2 = vld [vmem:[#allocation3 + $0x1b0] sm:$0xff] }
 0x3ee   : >> { %3893 = vmatmul.mubr.f32.gmra.mrb[178].mxu1 %v12142_v23 }
 0x3ef   : >> { %8381 = vmatprep.mubr.msk.f32.mxu1 %vm301_vm0, %v3160_v31  ;;  %v3302_v45 = vpop.permute.xlu0 %3301  ;;  %v5258_v31 = vld [vmem:[#allocation7 + $0x28] sm:$0xff] }
 0x3f0   : >> { %v12151_v1 = vsel %vm301_vm0, %v3064_v29, %v3302_v45  ;;  %v3435_v45 = vld [vmem:[#allocation3 + $0x189] sm:$0xff]  ;;  %v5352_v29 = vsel %vm5304_vm2, 1, %v14012_v60  ;;  %vm5306_vm4 = vcmp.ne.f32.partialorder %v5258_v31, 0.0  ;;  %v5261_v31 = vld [vmem:[#allocation7 + $0x40] sm:$0xff] }
 0x3f1   : >> { %4524 = vrot.lane.b32.xlu0 %v4335_v37, %s9754_s10  ;;  %4522 = vrot.lane.b32.xlu1 %v11960_v26, %s9754_s10  ;;  %v3162_v26 = vld [vmem:[#allocation3 + $0x181] sm:$0xff]  ;;  %v5354_v3 = vsel %vm5306_vm4, 1, %v14012_v60  ;;  %vm5309_vm9 = vcmp.ne.f32.partialorder %v5261_v31, 0.0 }
 0x3f2   : >> { %3898 = vmatmul.mubr.f32.gmra.mrb[180].mxu1 %v12151_v1  ;;  %v5257_v37 = vld [vmem:[#allocation7 + $0x20] sm:$0xff] }
 0x3f3   : >> { %8382 = vmatprep.mubr.msk.f32.mxu1 %vm301_vm0, %v3161_v35  ;;  %v3304_v49 = vpop.permute.xlu1 %3303  ;;  %v3429_v35 = vld [vmem:[#allocation3 + $0x187] sm:$0xff]  ;;  %vm5305_vm5 = vcmp.ne.f32.partialorder %v5257_v37, 0.0  ;;  %v3437_v37 = vld [vmem:[#allocation3 + $0x199] sm:$0xff] }
 0x3f4   : >> { %v12159_v43 = vsel %vm301_vm0, %v3065_v47, %v3304_v49  ;;  %v5259_v49 = vld [vmem:[#allocation7 + $0x30] sm:$0xff]  ;;  %v5353_v4 = vsel %vm5305_vm5, 1, %v14012_v60 }
 0x3f5   : >> { %4528 = vrot.lane.b32.xlu0 %v4337_v2, %s9754_s10  ;;  %4526 = vrot.lane.b32.xlu1 %v4336_v0, %s9754_s10  ;;  %v5260_v0 = vld [vmem:[#allocation7 + $0x38] sm:$0xff]  ;;  %vm5307_vm7 = vcmp.ne.f32.partialorder %v5259_v49, 0.0 }
 0x3f6   : >> { %3903 = vmatmul.mubr.f32.gmra.mrb[182].mxu1 %v12159_v43  ;;  %v3436_v47 = vld [vmem:[#allocation3 + $0x191] sm:$0xff]  ;;  %vm5308_vm6 = vcmp.ne.f32.partialorder %v5260_v0, 0.0 }
 0x3f7   : >> { %8383 = vmatprep.mubr.msk.f32.mxu1 %vm301_vm0, %v3162_v26  ;;  %v3306_v24 = vpop.permute.xlu0 %3305  ;;  %v3116_v49 = vld [vmem:[#allocation3 + $0x11] sm:$0xff] }
 0x3f8   : >> { %v12168_v58 = vsel %vm301_vm0, %v3066_v32, %v3306_v24  ;;  %v5262_v24 = vld [vmem:[#allocation7 + $0x48] sm:$0xff] }
 0x3f9   : >> { %5401 = vperm.xlu0 %9292, %v5350_v63   ;;  %5398 = vperm.xlu1 %9291, %v5349_v61   ;;  %v3430_v63 = vld [vmem:[#allocation3 + $0x18f] sm:$0xff]  ;;  %v3019_v32 = vld [vmem:[#allocation3 + $0x7] sm:$0xff]  ;;  %vm5310_vm8 = vcmp.ne.f32.partialorder %v5262_v24, 0.0  ;;  %v4242_v24 = vld [vmem:[#allocation3 + $0x37] sm:$0xff] }
 0x3fa   : >> { %3908 = vmatmul.mubr.f32.gmra.mrb[184].mxu1 %v12168_v58 }
 0x3fb   : >> { %8384 = vmatprep.mubr.msk.f32.mxu1 %vm301_vm0, %v3435_v45  ;;  %v3442_v34 = vpop.permute.xlu1 %3441  ;;  %v5356_v45 = vsel %vm5308_vm6, 1, %v14012_v60 }
 0x3fc   : >> { %v3450_v2 = vsel %vm301_vm0, %v3429_v35, %v3442_v34  ;;  %v5355_v34 = vsel %vm5307_vm7, 1, %v14012_v60  ;;  %v3431_v35 = vld [vmem:[#allocation3 + $0x197] sm:$0xff] }
 0x3fd   : >> { %5407 = vperm.xlu0 %9292, %v5352_v29   ;;  %5404 = vperm.xlu1 %9291, %v5351_v55  }
 0x3fe   : >> { %3913 = vmatmul.mubr.f32.gmra.mrb[186].mxu1 %v3450_v2 }
 0x3ff   : >> { %8385 = vmatprep.mubr.msk.f32.mxu1 %vm301_vm0, %v3436_v47  ;;  %v3444_v26 = vpop.permute.xlu0 %3443  ;;  %v5264_v47 = vld [vmem:[#allocation7 + $0x58] sm:$0xff] }
 0x400   : >> { %v3451_v61 = vsel %vm301_vm0, %v3430_v63, %v3444_v26  ;;  %v4338_v26 = vld [vmem:[#allocation3 + $0x39] sm:$0xff]  ;;  %v5358_v63 = vsel %vm5310_vm8, 1, %v14012_v60  ;;  %vm5312_vm10 = vcmp.ne.f32.partialorder %v5264_v47, 0.0 }
 0x401   : >> { %5413 = vperm.xlu0 %9292, %v5354_v3   ;;  %5410 = vperm.xlu1 %9291, %v5353_v4   ;;  %v3020_v3 = vld [vmem:[#allocation3 + $0xf] sm:$0xff]  ;;  %v4243_v47 = vld [vmem:[#allocation3 + $0x3f] sm:$0xff] }
 0x402   : >> { %3918 = vmatmul.mubr.f32.gmra.mrb[188].mxu1 %v3451_v61  ;;  %v5263_v4 = vld [vmem:[#allocation7 + $0x50] sm:$0xff] }
 0x403   : >> { %8386 = vmatprep.mubr.msk.f32.mxu1 %vm301_vm0, %v3437_v37  ;;  %v3212_v29 = vpop.permute.xlu0 %3211  ;;  %v3446_v55 = vpop.permute.xlu1 %3445  ;;  %vm5311_vm11 = vcmp.ne.f32.partialorder %v5263_v4, 0.0  ;;  %v4244_v4 = vld [vmem:[#allocation3 + $0x47] sm:$0xff] }
 0x404   : >> { %v3355_v2 = vsel %vm301_vm0, %v3019_v32, %v3212_v29  ;;  %v3452_v0 = vsel %vm301_vm0, %v3431_v35, %v3446_v55  ;;  %v5357_v32 = vsel %vm5309_vm9, 1, %v14012_v60  ;;  %v5266_v29 = vld [vmem:[#allocation7 + $0x68] sm:$0xff]  ;;  %v3021_v55 = vld [vmem:[#allocation3 + $0x17] sm:$0xff] }
 0x405   : >> { %4002 = vmatmul.mubr.f32.vlgmr.msra.gmra.mrb[192].mxu0 %v3355_v2  ;;  %5419 = vperm.xlu0 %9292, %v5356_v45   ;;  %v3117_v35 = vld [vmem:[#allocation3 + $0x19] sm:$0xff]  ;;  %v4339_v2 = vld [vmem:[#allocation3 + $0x41] sm:$0xff]  ;;  %vm5314_vm12 = vcmp.ne.f32.partialorder %v5266_v29, 0.0 }
 0x406   : >> { %5416 = vperm.xlu1 %9291, %v5355_v34   ;;  %3923 = vmatmul.mubr.f32.gmra.mrb[190].mxu1 %v3452_v0  ;;  %v5265_v34 = vld [vmem:[#allocation7 + $0x60] sm:$0xff]  ;;  %v5360_v0 = vsel %vm5312_vm10, 1, %v14012_v60 }
 0x407   : >> { %8461 = vmatprep.mubr.msk.f32.mxu1 %vm301_vm0, %v4338_v26  ;;  %v3214_v61 = vpop.permute.xlu0 %3213  ;;  %v4435_v37 = vpop.permute.xlu1 %4434  ;;  %8388 = vmatprep.mubr.msk.f32.mxu0 %vm301_vm0, %v3116_v49  ;;  %v5359_v26 = vsel %vm5311_vm11, 1, %v14012_v60  ;;  %vm5313_vm13 = vcmp.ne.f32.partialorder %v5265_v34, 0.0 }
 0x408   : >> { %v3356_v31 = vsel %vm301_vm0, %v3020_v3, %v3214_v61  ;;  %v4578_v45 = vsel %vm301_vm0, %v4242_v24, %v4435_v37  ;;  %v5268_v24 = vld [vmem:[#allocation7 + $0x78] sm:$0xff]  ;;  %v5267_v37 = vld [vmem:[#allocation7 + $0x70] sm:$0xff] }
 0x409   : >> { %4007 = vmatmul.mubr.f32.gmra.mrb[194].mxu0 %v3356_v31  ;;  %5425 = vperm.xlu0 %9292, %v5358_v63   ;;  %v5362_v31 = vsel %vm5314_vm12, 1, %v14012_v60  ;;  %vm5316_vm14 = vcmp.ne.f32.partialorder %v5268_v24, 0.0  ;;  %vm5315_vm15 = vcmp.ne.f32.partialorder %v5267_v37, 0.0  ;;  %v5271_v24 = vld [vmem:[#allocation7 + $0x90] sm:$0xff] }
 0x40a   : >> { %5422 = vperm.xlu1 %9291, %v5357_v32   ;;  %4861 = vmatmul.mubr.f32.vlgmr.msra.gmra.mrb[192].mxu1 %v4578_v45  ;;  %v4340_v32 = vld [vmem:[#allocation3 + $0x49] sm:$0xff]  ;;  %v9302_v45 = vld [vmem:[#allocation3 + $0x21] sm:$0xff]  ;;  %vm5319_vm5 = vcmp.ne.f32.partialorder %v5271_v24, 0.0 }
 0x40b   : >> { %8389 = vmatprep.mubr.msk.f32.mxu0 %vm301_vm0, %v3117_v35  ;;  %8462 = vmatprep.mubr.msk.f32.mxu1 %vm301_vm0, %v4339_v2  ;;  %v3216_v49 = vpop.permute.xlu0 %3215  ;;  %v4437_v3 = vpop.permute.xlu1 %4436  ;;  %v5270_v35 = vld [vmem:[#allocation7 + $0x88] sm:$0xff]  ;;  %v5269_v2 = vld [vmem:[#allocation7 + $0x80] sm:$0xff] }
 0x40c   : >> { %v3357_v63 = vsel %vm301_vm0, %v3021_v55, %v3216_v49  ;;  %v4579_v61 = vsel %vm301_vm0, %v4243_v47, %v4437_v3  ;;  %v5361_v55 = vsel %vm5313_vm13, 1, %v14012_v60  ;;  %v4341_v49 = vld [vmem:[#allocation3 + $0x51] sm:$0xff]  ;;  %v5364_v47 = vsel %vm5316_vm14, 1, %v14012_v60  ;;  %v9303_v3 = vld [vmem:[#allocation3 + $0x29] sm:$0xff] }
 0x40d   : >> { %5431 = vperm.xlu0 %9292, %v5360_v0   ;;  %4012 = vmatmul.mubr.f32.gmra.mrb[196].mxu0 %v3357_v63  ;;  %vm5318_vm2 = vcmp.ne.f32.partialorder %v5270_v35, 0.0  ;;  %v4245_v63 = vld [vmem:[#allocation3 + $0x4f] sm:$0xff]  ;;  %vm5317_vm3 = vcmp.ne.f32.partialorder %v5269_v2, 0.0  ;;  %v4343_v2 = vld [vmem:[#allocation3 + $0x61] sm:$0xff] }
 0x40e   : >> { %5428 = vperm.xlu1 %9291, %v5359_v26   ;;  %4866 = vmatmul.mubr.f32.gmra.mrb[194].mxu1 %v4579_v61  ;;  %v5363_v26 = vsel %vm5315_vm15, 1, %v14012_v60  ;;  %v5272_v61 = vld [vmem:[#allocation7 + $0x98] sm:$0xff] }
 0x40f   : >> { %8390 = vmatprep.mubr.msk.f32.mxu0 %vm301_vm0, %v9302_v45  ;;  %8463 = vmatprep.mubr.msk.f32.mxu1 %vm301_vm0, %v4340_v32  ;;  %v4439_v29 = vpop.permute.xlu1 %4438  ;;  %v4441_v0 = vpop.permute.xlu0 %4440  ;;  %v4342_v32 = vld [vmem:[#allocation3 + $0x59] sm:$0xff]  ;;  %v9304_v45 = vld [vmem:[#allocation3 + $0x31] sm:$0xff]  ;;  %vm5320_vm4 = vcmp.ne.f32.partialorder %v5272_v61, 0.0 }
 0x410   : >> { %v4580_v34 = vsel %vm301_vm0, %v4244_v4, %v4439_v29  ;;  %v5365_v4 = vsel %vm5317_vm3, 1, %v14012_v60  ;;  %v4246_v29 = vld [vmem:[#allocation3 + $0x57] sm:$0xff] }
 0x411   : >> { %5437 = vperm.xlu0 %9292, %v5362_v31   ;;  %4017 = vmatmul.mubr.f32.gmra.mrb[198].mxu0 %v11687_v54  ;;  %v4581_v54 = vsel %vm301_vm0, %v4245_v63, %v4441_v0  ;;  %v5366_v31 = vsel %vm5318_vm2, 1, %v14012_v60  ;;  %v5368_v0 = vsel %vm5320_vm4, 1, %v14012_v60 }
 0x412   : >> { %5434 = vperm.xlu1 %9291, %v5361_v55   ;;  %4871 = vmatmul.mubr.f32.gmra.mrb[196].mxu1 %v4580_v34  ;;  %v5274_v55 = vld [vmem:[#allocation7 + $0xa8] sm:$0xff]  ;;  %v5273_v34 = vld [vmem:[#allocation7 + $0xa0] sm:$0xff] }
 0x413   : >> { %8391 = vmatprep.mubr.msk.f32.mxu0 %vm301_vm0, %v9303_v3  ;;  %8464 = vmatprep.mubr.msk.f32.mxu1 %vm301_vm0, %v4341_v49  ;;  %v4443_v37 = vpop.permute.xlu1 %4442  ;;  %v4445_v35 = vpop.permute.xlu0 %4444  ;;  %v9305_v49 = vld [vmem:[#allocation3 + $0x39] sm:$0xff]  ;;  %vm5322_vm6 = vcmp.ne.f32.partialorder %v5274_v55, 0.0  ;;  %vm5321_vm7 = vcmp.ne.f32.partialorder %v5273_v34, 0.0 }
 0x414   : >> { %v4247_v3 = vld [vmem:[#allocation3 + $0x5f] sm:$0xff] }
 0x415   : >> { %5443 = vperm.xlu0 %9292, %v5364_v47   ;;  %4022 = vmatmul.mubr.f32.gmra.mrb[200].mxu0 %v11705_v11  ;;  %v4582_v11 = vsel %vm301_vm0, %v4246_v29, %v4443_v37  ;;  %v5367_v47 = vsel %vm5319_vm5, 1, %v14012_v60  ;;  %v4583_v63 = vsel %vm301_vm0, %v4247_v3, %v4445_v35  ;;  %v4344_v37 = vld [vmem:[#allocation3 + $0x69] sm:$0xff]  ;;  %v5277_v34 = vld [vmem:[#allocation7 + $0xc0] sm:$0xff] }
 0x416   : >> { %5440 = vperm.xlu1 %9291, %v5363_v26   ;;  %4876 = vmatmul.mubr.f32.gmra.mrb[198].mxu1 %v4581_v54  ;;  %v5275_v54 = vld [vmem:[#allocation7 + $0xb0] sm:$0xff]  ;;  %vm5325_vm11 = vcmp.ne.f32.partialorder %v5277_v34, 0.0  ;;  %v5281_v34 = vld [vmem:[#allocation7 + $0xe0] sm:$0xff] }
 0x417   : >> { %8392 = vmatprep.mubr.msk.f32.mxu0 %vm301_vm0, %v9304_v45  ;;  %8465 = vmatprep.mubr.msk.f32.mxu1 %vm301_vm0, %v4342_v32  ;;  %v4447_v24 = vpop.permute.xlu1 %4446  ;;  %v5370_v32 = vsel %vm5322_vm6, 1, %v14012_v60  ;;  %v5369_v45 = vsel %vm5321_vm7, 1, %v14012_v60  ;;  %vm5323_vm9 = vcmp.ne.f32.partialorder %v5275_v54, 0.0  ;;  %v4449_v35 = vpop.permute.xlu0 %4448  ;;  %v4249_v3 = vld [vmem:[#allocation3 + $0x6f] sm:$0xff]  ;;  %vm5329_vm15 = vcmp.ne.f32.partialorder %v5281_v34, 0.0  ;;  %v5285_v34 = vld [vmem:[#allocation7 + $0x100] sm:$0xff] }
 0x418   : >> { %v5279_v54 = vld [vmem:[#allocation7 + $0xd0] sm:$0xff]  ;;  %vm5333_vm5 = vcmp.ne.f32.partialorder %v5285_v34, 0.0  ;;  %v5289_v34 = vld [vmem:[#allocation7 + $0x120] sm:$0xff] }
 0x419   : >> { %5449 = vperm.xlu0 %9292, %v5366_v31   ;;  %4027 = vmatmul.mubr.f32.gmra.mrb[202].mxu0 %v11727_v12  ;;  %v5276_v12 = vld [vmem:[#allocation7 + $0xb8] sm:$0xff]  ;;  %v9306_v31 = vld [vmem:[#allocation3 + $0x41] sm:$0xff]  ;;  %vm5327_vm13 = vcmp.ne.f32.partialorder %v5279_v54, 0.0  ;;  %v5283_v54 = vld [vmem:[#allocation7 + $0xf0] sm:$0xff] }
 0x41a   : >> { %5446 = vperm.xlu1 %9291, %v5365_v4   ;;  %4881 = vmatmul.mubr.f32.gmra.mrb[200].mxu1 %v4582_v11  ;;  %vm5324_vm8 = vcmp.ne.f32.partialorder %v5276_v12, 0.0  ;;  %v4248_v4 = vld [vmem:[#allocation3 + $0x67] sm:$0xff]  ;;  %vm5331_vm3 = vcmp.ne.f32.partialorder %v5283_v54, 0.0  ;;  %v5287_v54 = vld [vmem:[#allocation7 + $0x110] sm:$0xff] }
 0x41b   : >> { %8393 = vmatprep.mubr.msk.f32.mxu0 %vm301_vm0, %v9305_v49  ;;  %8466 = vmatprep.mubr.msk.f32.mxu1 %vm301_vm0, %v4343_v2  ;;  %v4584_v55 = vsel %vm301_vm0, %v4248_v4, %v4447_v24  ;;  %v4345_v2 = vld [vmem:[#allocation3 + $0x71] sm:$0xff]  ;;  %v9307_v49 = vld [vmem:[#allocation3 + $0x49] sm:$0xff]  ;;  %v4451_v24 = vpop.permute.xlu1 %4450  ;;  %vm5335_vm7 = vcmp.ne.f32.partialorder %v5287_v54, 0.0 }
 0x41c   : >> { %v12219_v26 = vpop.f32.mrb[96].mxu1  ;;  %v4250_v4 = vld [vmem:[#allocation3 + $0x77] sm:$0xff] }
 0x41d   : >> { %5455 = vperm.xlu0 %9292, %v5368_v0   ;;  %v3691_v61 = vpop.f32.mrb[97].mxu1  ;;  %4032 = vmatmul.mubr.f32.gmra.mrb[204].mxu0 %v11745_v52  ;;  %v5278_v52 = vld [vmem:[#allocation7 + $0xc8] sm:$0xff]  ;;  %v5372_v0 = vsel %vm5324_vm8, 1, %v14012_v60  ;;  %v5291_v54 = vld [vmem:[#allocation7 + $0x130] sm:$0xff] }
 0x41e   : >> { %5452 = vperm.xlu1 %9291, %v5367_v47   ;;  %4886 = vmatmul.mubr.f32.gmra.mrb[202].mxu1 %v4583_v63  ;;  %v5371_v47 = vsel %vm5323_vm9, 1, %v14012_v60  ;;  %vm5326_vm10 = vcmp.ne.f32.partialorder %v5278_v52, 0.0  ;;  %v4585_v63 = vsel %vm301_vm0, %v4249_v3, %v4449_v35  ;;  %v4453_v35 = vpop.permute.xlu0 %4452  ;;  %v4251_v3 = vld [vmem:[#allocation3 + $0x7f] sm:$0xff]  ;;  %vm5337_vm9 = vcmp.ne.f32.partialorder %v5289_v34, 0.0 }
 0x41f   : >> { %8394 = vmatprep.mubr.msk.f32.mxu0 %vm301_vm0, %v9306_v31  ;;  %8467 = vmatprep.mubr.msk.f32.mxu1 %vm301_vm0, %v4344_v37  ;;  %v4346_v37 = vld [vmem:[#allocation3 + $0x79] sm:$0xff]  ;;  %v9308_v31 = vld [vmem:[#allocation3 + $0x51] sm:$0xff] }
 0x420   : >> { %v5293_v34 = vld [vmem:[#allocation7 + $0x140] sm:$0xff] }
 0x421   : >> { %v12227_v29 = vpop.f32.mrb[98].mxu1  ;;  %5461 = vperm.xlu0 %9292, %v5370_v32   ;;  %4037 = vmatmul.mubr.f32.gmra.mrb[206].mxu0 %v11763_v40  ;;  %v5280_v40 = vld [vmem:[#allocation7 + $0xd8] sm:$0xff]  ;;  %v5374_v32 = vsel %vm5326_vm10, 1, %v14012_v60 }
 0x422   : >> { %v3696_v11 = vpop.f32.mrb[99].mxu1  ;;  %5458 = vperm.xlu1 %9291, %v5369_v45   ;;  %4891 = vmatmul.mubr.f32.gmra.mrb[204].mxu1 %v4584_v55  ;;  %v5373_v45 = vsel %vm5325_vm11, 1, %v14012_v60  ;;  %vm5328_vm12 = vcmp.ne.f32.partialorder %v5280_v40, 0.0  ;;  %v4586_v55 = vsel %vm301_vm0, %v4250_v4, %v4451_v24  ;;  %v4455_v24 = vpop.permute.xlu1 %4454  ;;  %v4252_v4 = vld [vmem:[#allocation3 + $0x87] sm:$0xff]  ;;  %vm5339_vm11 = vcmp.ne.f32.partialorder %v5291_v54, 0.0  ;;  %v5295_v54 = vld [vmem:[#allocation7 + $0x150] sm:$0xff] }
 0x423   : >> { %8395 = vmatprep.mubr.msk.f32.mxu0 %vm301_vm0, %v9307_v49  ;;  %8468 = vmatprep.mubr.msk.f32.mxu1 %vm301_vm0, %v4345_v2  ;;  %v4347_v2 = vld [vmem:[#allocation3 + $0x81] sm:$0xff]  ;;  %v9309_v49 = vld [vmem:[#allocation3 + $0x59] sm:$0xff] }
 0x425   : >> { %v12235_v12 = vpop.f32.mrb[100].mxu1  ;;  %5467 = vperm.xlu0 %9292, %v5372_v0   ;;  %4042 = vmatmul.mubr.f32.gmra.mrb[208].mxu0 %v11781_v22  ;;  %v5282_v22 = vld [vmem:[#allocation7 + $0xe8] sm:$0xff]  ;;  %v5376_v0 = vsel %vm5328_vm12, 1, %v14012_v60 }
 0x426   : >> { %v3701_v61 = vpop.f32.mrb[101].mxu1  ;;  %5464 = vperm.xlu1 %9291, %v5371_v47   ;;  %4896 = vmatmul.mubr.f32.gmra.mrb[206].mxu1 %v4585_v63  ;;  %v5375_v47 = vsel %vm5327_vm13, 1, %v14012_v60  ;;  %vm5330_vm14 = vcmp.ne.f32.partialorder %v5282_v22, 0.0  ;;  %v4587_v63 = vsel %vm301_vm0, %v4251_v3, %v4453_v35  ;;  %v4457_v35 = vpop.permute.xlu0 %4456  ;;  %v4253_v3 = vld [vmem:[#allocation3 + $0x8f] sm:$0xff]  ;;  %vm5341_vm13 = vcmp.ne.f32.partialorder %v5293_v34, 0.0  ;;  %v5297_v34 = vld [vmem:[#allocation7 + $0x160] sm:$0xff] }
 0x427   : >> { %8396 = vmatprep.mubr.msk.f32.mxu0 %vm301_vm0, %v9308_v31  ;;  %8469 = vmatprep.mubr.msk.f32.mxu1 %vm301_vm0, %v4346_v37  ;;  %v4348_v37 = vld [vmem:[#allocation3 + $0x89] sm:$0xff]  ;;  %v9310_v31 = vld [vmem:[#allocation3 + $0x61] sm:$0xff] }
 0x429   : >> { %v12243_v52 = vpop.f32.mrb[102].mxu1  ;;  %5473 = vperm.xlu0 %9292, %v5374_v32   ;;  %4047 = vmatmul.mubr.f32.gmra.mrb[210].mxu0 %v11800_v25  ;;  %v5284_v25 = vld [vmem:[#allocation7 + $0xf8] sm:$0xff]  ;;  %v5378_v32 = vsel %vm5330_vm14, 1, %v14012_v60 }
 0x42a   : >> { %v3706_v11 = vpop.f32.mrb[103].mxu1  ;;  %5470 = vperm.xlu1 %9291, %v5373_v45   ;;  %4901 = vmatmul.mubr.f32.gmra.mrb[208].mxu1 %v4586_v55  ;;  %v5377_v45 = vsel %vm5329_vm15, 1, %v14012_v60  ;;  %vm5332_vm2 = vcmp.ne.f32.partialorder %v5284_v25, 0.0  ;;  %v4588_v55 = vsel %vm301_vm0, %v4252_v4, %v4455_v24  ;;  %v4459_v24 = vpop.permute.xlu1 %4458  ;;  %v4254_v4 = vld [vmem:[#allocation3 + $0x97] sm:$0xff]  ;;  %vm5343_vm15 = vcmp.ne.f32.partialorder %v5295_v54, 0.0 }
 0x42b   : >> { %8397 = vmatprep.mubr.msk.f32.mxu0 %vm301_vm0, %v9309_v49  ;;  %8470 = vmatprep.mubr.msk.f32.mxu1 %vm301_vm0, %v4347_v2  ;;  %v4349_v2 = vld [vmem:[#allocation3 + $0x91] sm:$0xff]  ;;  %v9311_v49 = vld [vmem:[#allocation3 + $0x69] sm:$0xff] }
 0x42c   : >> { %v5299_v54 = vld [vmem:[#allocation7 + $0x170] sm:$0xff] }
 0x42d   : >> { %v12251_v40 = vpop.f32.mrb[104].mxu1  ;;  %5479 = vperm.xlu0 %9292, %v5376_v0   ;;  %4052 = vmatmul.mubr.f32.gmra.mrb[212].mxu0 %v11816_v51  ;;  %v5286_v51 = vld [vmem:[#allocation7 + $0x108] sm:$0xff]  ;;  %v5380_v0 = vsel %vm5332_vm2, 1, %v14012_v60 }
 0x42e   : >> { %v3711_v61 = vpop.f32.mrb[105].mxu1  ;;  %5476 = vperm.xlu1 %9291, %v5375_v47   ;;  %4906 = vmatmul.mubr.f32.gmra.mrb[210].mxu1 %v4587_v63  ;;  %v5379_v47 = vsel %vm5331_vm3, 1, %v14012_v60  ;;  %vm5334_vm4 = vcmp.ne.f32.partialorder %v5286_v51, 0.0  ;;  %v4589_v63 = vsel %vm301_vm0, %v4253_v3, %v4457_v35  ;;  %v4461_v35 = vpop.permute.xlu0 %4460  ;;  %v4255_v3 = vld [vmem:[#allocation3 + $0x9f] sm:$0xff]  ;;  %vm5345_vm3 = vcmp.ne.f32.partialorder %v5297_v34, 0.0  ;;  %v4357_v34 = vld [vmem:[#allocation3 + $0xd1] sm:$0xff] }
 0x42f   : >> { %8398 = vmatprep.mubr.msk.f32.mxu0 %vm301_vm0, %v9310_v31  ;;  %8471 = vmatprep.mubr.msk.f32.mxu1 %vm301_vm0, %v4348_v37  ;;  %v4350_v37 = vld [vmem:[#allocation3 + $0x99] sm:$0xff]  ;;  %v9312_v31 = vld [vmem:[#allocation3 + $0x71] sm:$0xff] }
 0x431   : >> { %v12259_v22 = vpop.f32.mrb[106].mxu1  ;;  %5485 = vperm.xlu0 %9292, %v5378_v32   ;;  %4057 = vmatmul.mubr.f32.gmra.mrb[214].mxu0 %v11836_v6  ;;  %v5288_v6 = vld [vmem:[#allocation7 + $0x118] sm:$0xff]  ;;  %v5382_v32 = vsel %vm5334_vm4, 1, %v14012_v60 }
 0x432   : >> { %v3716_v11 = vpop.f32.mrb[107].mxu1  ;;  %5482 = vperm.xlu1 %9291, %v5377_v45   ;;  %4911 = vmatmul.mubr.f32.gmra.mrb[212].mxu1 %v4588_v55  ;;  %v5381_v45 = vsel %vm5333_vm5, 1, %v14012_v60  ;;  %vm5336_vm6 = vcmp.ne.f32.partialorder %v5288_v6, 0.0  ;;  %v4590_v55 = vsel %vm301_vm0, %v4254_v4, %v4459_v24  ;;  %v4463_v24 = vpop.permute.xlu1 %4462  ;;  %v4256_v4 = vld [vmem:[#allocation3 + $0xa7] sm:$0xff]  ;;  %vm5347_vm5 = vcmp.ne.f32.partialorder %v5299_v54, 0.0  ;;  %v4262_v54 = vld [vmem:[#allocation3 + $0xd7] sm:$0xff] }
 0x433   : >> { %8399 = vmatprep.mubr.msk.f32.mxu0 %vm301_vm0, %v9311_v49  ;;  %8472 = vmatprep.mubr.msk.f32.mxu1 %vm301_vm0, %v4349_v2  ;;  %v4351_v2 = vld [vmem:[#allocation3 + $0xa1] sm:$0xff]  ;;  %v9313_v49 = vld [vmem:[#allocation3 + $0x79] sm:$0xff] }
 0x435   : >> { %v12267_v25 = vpop.f32.mrb[108].mxu1  ;;  %5491 = vperm.xlu0 %9292, %v5380_v0   ;;  %4062 = vmatmul.mubr.f32.gmra.mrb[216].mxu0 %v11852_v19  ;;  %v5290_v19 = vld [vmem:[#allocation7 + $0x128] sm:$0xff]  ;;  %v5384_v0 = vsel %vm5336_vm6, 1, %v14012_v60 }
 0x436   : >> { %v3721_v61 = vpop.f32.mrb[109].mxu1  ;;  %5488 = vperm.xlu1 %9291, %v5379_v47   ;;  %4916 = vmatmul.mubr.f32.gmra.mrb[214].mxu1 %v4589_v63  ;;  %v5383_v47 = vsel %vm5335_vm7, 1, %v14012_v60  ;;  %vm5338_vm8 = vcmp.ne.f32.partialorder %v5290_v19, 0.0  ;;  %v4591_v63 = vsel %vm301_vm0, %v4255_v3, %v4461_v35  ;;  %v4465_v35 = vpop.permute.xlu0 %4464  ;;  %v4257_v3 = vld [vmem:[#allocation3 + $0xaf] sm:$0xff] }
 0x437   : >> { %8400 = vmatprep.mubr.msk.f32.mxu0 %vm301_vm0, %v9312_v31  ;;  %8473 = vmatprep.mubr.msk.f32.mxu1 %vm301_vm0, %v4350_v37  ;;  %v4352_v37 = vld [vmem:[#allocation3 + $0xa9] sm:$0xff]  ;;  %v9314_v31 = vld [vmem:[#allocation3 + $0x81] sm:$0xff] }
 0x439   : >> { %v12275_v51 = vpop.f32.mrb[110].mxu1  ;;  %5497 = vperm.xlu0 %9292, %v5382_v32   ;;  %4067 = vmatmul.mubr.f32.gmra.mrb[218].mxu0 %v11867_v16  ;;  %v5292_v16 = vld [vmem:[#allocation7 + $0x138] sm:$0xff]  ;;  %v5386_v32 = vsel %vm5338_vm8, 1, %v14012_v60 }
 0x43a   : >> { %v3726_v11 = vpop.f32.mrb[111].mxu1  ;;  %5494 = vperm.xlu1 %9291, %v5381_v45   ;;  %4921 = vmatmul.mubr.f32.gmra.mrb[216].mxu1 %v4590_v55  ;;  %v5385_v45 = vsel %vm5337_vm9, 1, %v14012_v60  ;;  %vm5340_vm10 = vcmp.ne.f32.partialorder %v5292_v16, 0.0  ;;  %v4592_v55 = vsel %vm301_vm0, %v4256_v4, %v4463_v24  ;;  %v4467_v24 = vpop.permute.xlu1 %4466  ;;  %v4258_v4 = vld [vmem:[#allocation3 + $0xb7] sm:$0xff] }
 0x43b   : >> { %8401 = vmatprep.mubr.msk.f32.mxu0 %vm301_vm0, %v9313_v49  ;;  %8474 = vmatprep.mubr.msk.f32.mxu1 %vm301_vm0, %v4351_v2  ;;  %v4353_v2 = vld [vmem:[#allocation3 + $0xb1] sm:$0xff]  ;;  %v9315_v49 = vld [vmem:[#allocation3 + $0x89] sm:$0xff] }
 0x43d   : >> { %v12283_v6 = vpop.f32.mrb[112].mxu1  ;;  %5503 = vperm.xlu0 %9292, %v5384_v0   ;;  %4072 = vmatmul.mubr.f32.gmra.mrb[220].mxu0 %v11881_v18  ;;  %v5294_v18 = vld [vmem:[#allocation7 + $0x148] sm:$0xff]  ;;  %v5388_v0 = vsel %vm5340_vm10, 1, %v14012_v60 }
 0x43e   : >> { %v3731_v61 = vpop.f32.mrb[113].mxu1  ;;  %5500 = vperm.xlu1 %9291, %v5383_v47   ;;  %4926 = vmatmul.mubr.f32.gmra.mrb[218].mxu1 %v4591_v63  ;;  %v5387_v47 = vsel %vm5339_vm11, 1, %v14012_v60  ;;  %vm5342_vm12 = vcmp.ne.f32.partialorder %v5294_v18, 0.0  ;;  %v4593_v63 = vsel %vm301_vm0, %v4257_v3, %v4465_v35  ;;  %v4469_v35 = vpop.permute.xlu0 %4468  ;;  %v4259_v3 = vld [vmem:[#allocation3 + $0xbf] sm:$0xff] }
 0x43f   : >> { %8402 = vmatprep.mubr.msk.f32.mxu0 %vm301_vm0, %v9314_v31  ;;  %8475 = vmatprep.mubr.msk.f32.mxu1 %vm301_vm0, %v4352_v37  ;;  %v4354_v37 = vld [vmem:[#allocation3 + $0xb9] sm:$0xff]  ;;  %v9316_v31 = vld [vmem:[#allocation3 + $0x91] sm:$0xff] }
 0x441   : >> { %v12291_v19 = vpop.f32.mrb[114].mxu1  ;;  %5509 = vperm.xlu0 %9292, %v5386_v32   ;;  %4077 = vmatmul.mubr.f32.gmra.mrb[222].mxu0 %v11895_v8  ;;  %v5296_v8 = vld [vmem:[#allocation7 + $0x158] sm:$0xff]  ;;  %v5390_v32 = vsel %vm5342_vm12, 1, %v14012_v60 }
 0x442   : >> { %v3736_v11 = vpop.f32.mrb[115].mxu1  ;;  %5506 = vperm.xlu1 %9291, %v5385_v45   ;;  %4931 = vmatmul.mubr.f32.gmra.mrb[220].mxu1 %v4592_v55  ;;  %v5389_v45 = vsel %vm5341_vm13, 1, %v14012_v60  ;;  %vm5344_vm14 = vcmp.ne.f32.partialorder %v5296_v8, 0.0  ;;  %v4594_v55 = vsel %vm301_vm0, %v4258_v4, %v4467_v24  ;;  %v4471_v24 = vpop.permute.xlu1 %4470  ;;  %v4260_v4 = vld [vmem:[#allocation3 + $0xc7] sm:$0xff] }
 0x443   : >> { %8403 = vmatprep.mubr.msk.f32.mxu0 %vm301_vm0, %v9315_v49  ;;  %8476 = vmatprep.mubr.msk.f32.mxu1 %vm301_vm0, %v4353_v2  ;;  %v4355_v2 = vld [vmem:[#allocation3 + $0xc1] sm:$0xff]  ;;  %v9317_v49 = vld [vmem:[#allocation3 + $0x99] sm:$0xff] }
 0x445   : >> { %v12299_v16 = vpop.f32.mrb[116].mxu1  ;;  %5515 = vperm.xlu0 %9292, %v5388_v0   ;;  %4082 = vmatmul.mubr.f32.gmra.mrb[224].mxu0 %v11909_v9  ;;  %v5298_v9 = vld [vmem:[#allocation7 + $0x168] sm:$0xff]  ;;  %v5392_v0 = vsel %vm5344_vm14, 1, %v14012_v60 }
 0x446   : >> { %v3741_v61 = vpop.f32.mrb[117].mxu1  ;;  %5512 = vperm.xlu1 %9291, %v5387_v47   ;;  %4936 = vmatmul.mubr.f32.gmra.mrb[222].mxu1 %v4593_v63  ;;  %v5391_v47 = vsel %vm5343_vm15, 1, %v14012_v60  ;;  %vm5346_vm2 = vcmp.ne.f32.partialorder %v5298_v9, 0.0  ;;  %v4595_v63 = vsel %vm301_vm0, %v4259_v3, %v4469_v35 }
 0x447   : >> { %8404 = vmatprep.mubr.msk.f32.mxu0 %vm301_vm0, %v9316_v31  ;;  %8477 = vmatprep.mubr.msk.f32.mxu1 %vm301_vm0, %v4354_v37  ;;  %v4356_v37 = vld [vmem:[#allocation3 + $0xc9] sm:$0xff]  ;;  %v9318_v31 = vld [vmem:[#allocation3 + $0xa1] sm:$0xff] }
 0x449   : >> { %v12307_v18 = vpop.f32.mrb[118].mxu1  ;;  %5521 = vperm.xlu0 %9292, %v5390_v32   ;;  %4087 = vmatmul.mubr.f32.gmra.mrb[226].mxu0 %v11921_v62  ;;  %v5300_v62 = vld [vmem:[#allocation7 + $0x178] sm:$0xff]  ;;  %v5394_v32 = vsel %vm5346_vm2, 1, %v14012_v60 }
 0x44a   : >> { %v3746_v11 = vpop.f32.mrb[119].mxu1  ;;  %5518 = vperm.xlu1 %9291, %v5389_v45   ;;  %4941 = vmatmul.mubr.f32.gmra.mrb[224].mxu1 %v4594_v55  ;;  %v5393_v45 = vsel %vm5345_vm3, 1, %v14012_v60  ;;  %vm5348_vm4 = vcmp.ne.f32.partialorder %v5300_v62, 0.0  ;;  %v4475_v62 = vpop.permute.xlu1 %4474 }
 0x44b   : >> { %8405 = vmatprep.mubr.msk.f32.mxu0 %vm301_vm0, %v9317_v49  ;;  %8478 = vmatprep.mubr.msk.f32.mxu1 %vm301_vm0, %v4355_v2  ;;  %v4473_v11 = vpop.permute.xlu0 %4472  ;;  %v5396_v35 = vsel %vm5348_vm4, 1, %v14012_v60  ;;  %v9319_v2 = vld [vmem:[#allocation3 + $0xa9] sm:$0xff] }
 0x44c   : >> { %v4261_v49 = vld [vmem:[#allocation3 + $0xcf] sm:$0xff] }
 0x44d   : >> { %v12315_v8 = vpop.f32.mrb[120].mxu1  ;;  %5527 = vperm.xlu0 %9292, %v5392_v0   ;;  %4092 = vmatmul.mubr.f32.gmra.mrb[228].mxu0 %v11933_v13  ;;  %v4596_v13 = vsel %vm301_vm0, %v4260_v4, %v4471_v24  ;;  %v5395_v0 = vsel %vm5347_vm5, 1, %v14012_v60  ;;  %v4597_v3 = vsel %vm301_vm0, %v4261_v49, %v4473_v11  ;;  %v4598_v24 = vsel %vm301_vm0, %v4262_v54, %v4475_v62  ;;  %v4265_v62 = vld [vmem:[#allocation3 + $0xef] sm:$0xff] }
 0x44e   : >> { %v3751_v61 = vpop.f32.mrb[121].mxu1  ;;  %5524 = vperm.xlu1 %9291, %v5391_v47   ;;  %4946 = vmatmul.mubr.f32.gmra.mrb[226].mxu1 %v4595_v63  ;;  %v4358_v63 = vld [vmem:[#allocation3 + $0xd9] sm:$0xff]  ;;  %v4479_v11 = vpop.permute.xlu1 %4478 }
 0x44f   : >> { %8406 = vmatprep.mubr.msk.f32.mxu0 %vm301_vm0, %v9318_v31  ;;  %8479 = vmatprep.mubr.msk.f32.mxu1 %vm301_vm0, %v4356_v37  ;;  %v9320_v61 = vld [vmem:[#allocation3 + $0xb1] sm:$0xff]  ;;  %v4359_v31 = vld [vmem:[#allocation3 + $0xe1] sm:$0xff] }
 0x451   : >> { %v12323_v9 = vpop.f32.mrb[122].mxu1  ;;  %5533 = vperm.xlu0 %9292, %v5394_v32   ;;  %4097 = vmatmul.mubr.f32.gmra.mrb[230].mxu0 %v11944_v39  ;;  %v4477_v32 = vpop.permute.xlu0 %4476 }
 0x452   : >> { %v3756_v55 = vpop.f32.mrb[123].mxu1  ;;  %5530 = vperm.xlu1 %9291, %v5393_v45   ;;  %4951 = vmatmul.mubr.f32.gmra.mrb[228].mxu1 %v4596_v13  ;;  %v4263_v45 = vld [vmem:[#allocation3 + $0xdf] sm:$0xff]  ;;  %v4483_v54 = vpop.permute.xlu1 %4482 }
 0x453   : >> { %8407 = vmatprep.mubr.msk.f32.mxu0 %vm301_vm0, %v9319_v2  ;;  %8480 = vmatprep.mubr.msk.f32.mxu1 %vm301_vm0, %v4357_v34  ;;  %v4599_v13 = vsel %vm301_vm0, %v4263_v45, %v4477_v32  ;;  %v9322_v34 = vld [vmem:[#allocation3 + $0xc1] sm:$0xff]  ;;  %v4266_v32 = vld [vmem:[#allocation3 + $0xf7] sm:$0xff] }
 0x455   : >> { %v12331_v47 = vpop.f32.mrb[124].mxu1  ;;  %5539 = vperm.xlu0 %9292, %v5396_v35   ;;  %4102 = vmatmul.mubr.f32.gmra.mrb[232].mxu0 %v11954_v53  ;;  %v9321_v53 = vld [vmem:[#allocation3 + $0xb9] sm:$0xff]  ;;  %v4264_v35 = vld [vmem:[#allocation3 + $0xe7] sm:$0xff] }
 0x456   : >> { %v3761_v39 = vpop.f32.mrb[125].mxu1  ;;  %5536 = vperm.xlu1 %9291, %v5395_v0   ;;  %4956 = vmatmul.mubr.f32.gmra.mrb[230].mxu1 %v4597_v3  ;;  %v4600_v0 = vsel %vm301_vm0, %v4264_v35, %v4479_v11  ;;  %v4481_v3 = vpop.permute.xlu0 %4480  ;;  %v4267_v11 = vld [vmem:[#allocation3 + $0xff] sm:$0xff] }
 0x457   : >> { %8408 = vmatprep.mubr.msk.f32.mxu0 %vm301_vm0, %v9320_v61  ;;  %8481 = vmatprep.mubr.msk.f32.mxu1 %vm301_vm0, %v4358_v63  ;;  %v9323_v39 = vld [vmem:[#allocation3 + $0xc9] sm:$0xff]  ;;  %v4601_v63 = vsel %vm301_vm0, %v4265_v62, %v4481_v3  ;;  %v4487_v35 = vpop.permute.xlu1 %4486 }
 0x458   : >> { %v4268_v3 = vld [vmem:[#allocation3 + $0x107] sm:$0xff] }
 0x459   : >> { %v12337_v60 = vpop.f32.mrb[126].mxu1  ;;  %4107 = vmatmul.mubr.f32.gmra.mrb[234].mxu0 %v11963_v20  ;;  %v4360_v20 = vld [vmem:[#allocation3 + $0xe9] sm:$0xff] }
 0x45a   : >> { %v3766_v37 = vpop.f32.mrb[127].mxu1  ;;  %4961 = vmatmul.mubr.f32.gmra.mrb[232].mxu1 %v4598_v24  ;;  %8409 = vmatprep.mubr.msk.f32.mxu0 %vm301_vm0, %v9321_v53  ;;  %v4602_v53 = vsel %vm301_vm0, %v4266_v32, %v4483_v54  ;;  %v4485_v45 = vpop.permute.xlu0 %4484  ;;  %v4365_v54 = vld [vmem:[#allocation3 + $0x111] sm:$0xff] }
 0x45b   : >> { %8482 = vmatprep.mubr.msk.f32.mxu1 %vm301_vm0, %v4359_v31  ;;  %v9324_v37 = vld [vmem:[#allocation3 + $0xd1] sm:$0xff]  ;;  %v4491_v32 = vpop.permute.xlu1 %4490 }
 0x45d   : >> { %v12343_v4 = vpop.f32.mrb[128].mxu1  ;;  %4112 = vmatmul.mubr.f32.gmra.mrb[236].mxu0 %v11971_v17  ;;  %v4361_v17 = vld [vmem:[#allocation3 + $0xf1] sm:$0xff] }
 0x45e   : >> { %v3771_v55 = vpop.f32.mrb[129].mxu1  ;;  %4966 = vmatmul.mubr.f32.gmra.mrb[234].mxu1 %v4599_v13  ;;  %8410 = vmatprep.mubr.msk.f32.mxu0 %vm301_vm0, %v9322_v34  ;;  %v4603_v34 = vsel %vm301_vm0, %v4267_v11, %v4485_v45  ;;  %v4489_v62 = vpop.permute.xlu0 %4488  ;;  %v4366_v45 = vld [vmem:[#allocation3 + $0x119] sm:$0xff] }
 0x45f   : >> { %8483 = vmatprep.mubr.msk.f32.mxu1 %vm301_vm0, %v4360_v20  ;;  %v4363_v55 = vld [vmem:[#allocation3 + $0x101] sm:$0xff] }
 0x461   : >> { %v12349_v2 = vpop.f32.mrb[130].mxu1  ;;  %4117 = vmatmul.mubr.f32.gmra.mrb[238].mxu0 %v11978_v33  ;;  %v4362_v33 = vld [vmem:[#allocation3 + $0xf9] sm:$0xff] }
 0x462   : >> { %v3776_v49 = vpop.f32.mrb[131].mxu1  ;;  %4971 = vmatmul.mubr.f32.gmra.mrb[236].mxu1 %v4600_v0  ;;  %8411 = vmatprep.mubr.msk.f32.mxu0 %vm301_vm0, %v9323_v39  ;;  %v4604_v39 = vsel %vm301_vm0, %v4268_v3, %v4487_v35  ;;  %v4493_v11 = vpop.permute.xlu0 %4492  ;;  %v4367_v35 = vld [vmem:[#allocation3 + $0x121] sm:$0xff] }
 0x463   : >> { %8484 = vmatprep.mubr.msk.f32.mxu1 %vm301_vm0, %v4361_v17  ;;  %v4364_v49 = vld [vmem:[#allocation3 + $0x109] sm:$0xff]  ;;  %v4495_v3 = vpop.permute.xlu1 %4494 }
 0x465   : >> { %v12356_v61 = vpop.f32.mrb[132].mxu1  ;;  %4122 = vmatmul.mubr.f32.gmra.mrb[240].mxu0 %v11985_v27  ;;  %v9325_v27 = vld [vmem:[#allocation3 + $0xd9] sm:$0xff] }
 0x466   : >> { %v3781_v24 = vpop.f32.mrb[133].mxu1  ;;  %4976 = vmatmul.mubr.f32.gmra.mrb[238].mxu1 %v4601_v63  ;;  %8412 = vmatprep.mubr.msk.f32.mxu0 %vm301_vm0, %v9324_v37 }
 0x467   : >> { %8485 = vmatprep.mubr.msk.f32.mxu1 %vm301_vm0, %v4362_v33  ;;  %v4269_v24 = vld [vmem:[#allocation3 + $0x10f] sm:$0xff] }
 0x468   : >> { %v4605_v37 = vsel %vm301_vm0, %v4269_v24, %v4489_v62  ;;  %v4368_v62 = vld [vmem:[#allocation3 + $0x129] sm:$0xff]  ;;  %v4497_v24 = vpop.permute.xlu0 %4496 }
 0x469   : >> { %v12362_v31 = vpop.f32.mrb[134].mxu1  ;;  %4127 = vmatmul.mubr.f32.gmra.mrb[242].mxu0 %v11992_v56  ;;  %v9326_v56 = vld [vmem:[#allocation3 + $0xe1] sm:$0xff] }
 0x46a   : >> { %v3786_v13 = vpop.f32.mrb[135].mxu1  ;;  %4981 = vmatmul.mubr.f32.gmra.mrb[240].mxu1 %v4602_v53  ;;  %8413 = vmatprep.mubr.msk.f32.mxu0 %vm301_vm0, %v9325_v27 }
 0x46b   : >> { %8486 = vmatprep.mubr.msk.f32.mxu1 %vm301_vm0, %v4363_v55  ;;  %v4270_v13 = vld [vmem:[#allocation3 + $0x117] sm:$0xff] }
 0x46c   : >> { %v4606_v27 = vsel %vm301_vm0, %v4270_v13, %v4491_v32  ;;  %v4369_v32 = vld [vmem:[#allocation3 + $0x131] sm:$0xff]  ;;  %v4499_v13 = vpop.permute.xlu1 %4498 }
 0x46d   : >> { %v12368_v20 = vpop.f32.mrb[136].mxu1  ;;  %4132 = vmatmul.mubr.f32.gmra.mrb[244].mxu0 %v11999_v57  ;;  %v9327_v57 = vld [vmem:[#allocation3 + $0xe9] sm:$0xff] }
 0x46e   : >> { %v3791_v0 = vpop.f32.mrb[137].mxu1  ;;  %4986 = vmatmul.mubr.f32.gmra.mrb[242].mxu1 %v4603_v34  ;;  %8414 = vmatprep.mubr.msk.f32.mxu0 %vm301_vm0, %v9326_v56 }
 0x46f   : >> { %8487 = vmatprep.mubr.msk.f32.mxu1 %vm301_vm0, %v4364_v49  ;;  %v4271_v0 = vld [vmem:[#allocation3 + $0x11f] sm:$0xff] }
 0x470   : >> { %v4607_v56 = vsel %vm301_vm0, %v4271_v0, %v4493_v11  ;;  %v4370_v11 = vld [vmem:[#allocation3 + $0x139] sm:$0xff]  ;;  %v4501_v0 = vpop.permute.xlu0 %4500 }
 0x471   : >> { %v12374_v17 = vpop.f32.mrb[138].mxu1  ;;  %4137 = vmatmul.mubr.f32.gmra.mrb[246].mxu0 %v12006_v7  ;;  %v9328_v7 = vld [vmem:[#allocation3 + $0xf1] sm:$0xff] }
 0x472   : >> { %v3796_v63 = vpop.f32.mrb[139].mxu1  ;;  %4991 = vmatmul.mubr.f32.gmra.mrb[244].mxu1 %v4604_v39  ;;  %8415 = vmatprep.mubr.msk.f32.mxu0 %vm301_vm0, %v9327_v57 }
 0x473   : >> { %8488 = vmatprep.mubr.msk.f32.mxu1 %vm301_vm0, %v4365_v54  ;;  %v4272_v63 = vld [vmem:[#allocation3 + $0x127] sm:$0xff] }
 0x474   : >> { %v4608_v57 = vsel %vm301_vm0, %v4272_v63, %v4495_v3  ;;  %v4371_v3 = vld [vmem:[#allocation3 + $0x141] sm:$0xff]  ;;  %v4503_v63 = vpop.permute.xlu1 %4502 }
 0x475   : >> { %v12380_v33 = vpop.f32.mrb[140].mxu1  ;;  %4142 = vmatmul.mubr.f32.gmra.mrb[248].mxu0 %v12013_v30  ;;  %v9329_v30 = vld [vmem:[#allocation3 + $0xf9] sm:$0xff] }
 0x476   : >> { %v3801_v53 = vpop.f32.mrb[141].mxu1  ;;  %4996 = vmatmul.mubr.f32.gmra.mrb[246].mxu1 %v4605_v37  ;;  %8416 = vmatprep.mubr.msk.f32.mxu0 %vm301_vm0, %v9328_v7 }
 0x477   : >> { %8489 = vmatprep.mubr.msk.f32.mxu1 %vm301_vm0, %v4366_v45  ;;  %v4273_v53 = vld [vmem:[#allocation3 + $0x12f] sm:$0xff] }
 0x478   : >> { %v4609_v7 = vsel %vm301_vm0, %v4273_v53, %v4497_v24  ;;  %v4372_v24 = vld [vmem:[#allocation3 + $0x149] sm:$0xff]  ;;  %v4505_v53 = vpop.permute.xlu0 %4504 }
 0x479   : >> { %v12386_v55 = vpop.f32.mrb[142].mxu1  ;;  %4147 = vmatmul.mubr.f32.gmra.mrb[250].mxu0 %v12020_v46  ;;  %v9330_v46 = vld [vmem:[#allocation3 + $0x101] sm:$0xff] }
 0x47a   : >> { %v3806_v34 = vpop.f32.mrb[143].mxu1  ;;  %5001 = vmatmul.mubr.f32.gmra.mrb[248].mxu1 %v4606_v27  ;;  %8417 = vmatprep.mubr.msk.f32.mxu0 %vm301_vm0, %v9329_v30 }
 0x47b   : >> { %8490 = vmatprep.mubr.msk.f32.mxu1 %vm301_vm0, %v4367_v35  ;;  %v4274_v34 = vld [vmem:[#allocation3 + $0x137] sm:$0xff] }
 0x47c   : >> { %v4610_v30 = vsel %vm301_vm0, %v4274_v34, %v4499_v13  ;;  %v4373_v13 = vld [vmem:[#allocation3 + $0x151] sm:$0xff]  ;;  %v4507_v34 = vpop.permute.xlu1 %4506 }
 0x47d   : >> { %v12392_v49 = vpop.f32.mrb[144].mxu1  ;;  %4152 = vmatmul.mubr.f32.gmra.mrb[252].mxu0 %v12027_v38  ;;  %v9331_v38 = vld [vmem:[#allocation3 + $0x109] sm:$0xff] }
 0x47e   : >> { %v3811_v39 = vpop.f32.mrb[145].mxu1  ;;  %5006 = vmatmul.mubr.f32.gmra.mrb[250].mxu1 %v4607_v56  ;;  %8418 = vmatprep.mubr.msk.f32.mxu0 %vm301_vm0, %v9330_v46 }
 0x47f   : >> { %8491 = vmatprep.mubr.msk.f32.mxu1 %vm301_vm0, %v4368_v62  ;;  %v9334_v39 = vld [vmem:[#allocation3 + $0x13f] sm:$0xff] }
 0x480   : >> { %v4611_v46 = vsel %vm301_vm0, %v9334_v39, %v4501_v0  ;;  %v4374_v0 = vld [vmem:[#allocation3 + $0x159] sm:$0xff]  ;;  %v4509_v39 = vpop.permute.xlu0 %4508 }
 0x481   : >> { %v12398_v54 = vpop.f32.mrb[146].mxu1  ;;  %4157 = vmatmul.mubr.f32.gmra.mrb[254].mxu0 %v12034_v14  ;;  %v9332_v14 = vld [vmem:[#allocation3 + $0x111] sm:$0xff] }
 0x482   : >> { %v3816_v37 = vpop.f32.mrb[147].mxu1  ;;  %5011 = vmatmul.mubr.f32.gmra.mrb[252].mxu1 %v4608_v57  ;;  %8419 = vmatprep.mubr.msk.f32.mxu0 %vm301_vm0, %v9331_v38 }
 0x483   : >> { %8492 = vmatprep.mubr.msk.f32.mxu1 %vm301_vm0, %v4369_v32  ;;  %v4276_v37 = vld [vmem:[#allocation3 + $0x147] sm:$0xff] }
 0x484   : >> { %v4612_v38 = vsel %vm301_vm0, %v4276_v37, %v4503_v63  ;;  %v4375_v63 = vld [vmem:[#allocation3 + $0x161] sm:$0xff]  ;;  %v4511_v37 = vpop.permute.xlu1 %4510 }
 0x485   : >> { %v12404_v45 = vpop.f32.mrb[148].mxu1  ;;  %4162 = vmatmul.mubr.f32.gmra.mrb[0].mxu0 %v12041_v42  ;;  %v9333_v42 = vld [vmem:[#allocation3 + $0x119] sm:$0xff] }
 0x486   : >> { %v3821_v27 = vpop.f32.mrb[149].mxu1  ;;  %5016 = vmatmul.mubr.f32.gmra.mrb[254].mxu1 %v4609_v7  ;;  %8420 = vmatprep.mubr.msk.f32.mxu0 %vm301_vm0, %v9332_v14 }
 0x487   : >> { %8493 = vmatprep.mubr.msk.f32.mxu1 %vm301_vm0, %v4370_v11  ;;  %v9337_v27 = vld [vmem:[#allocation3 + $0x14f] sm:$0xff] }
 0x488   : >> { %v4613_v14 = vsel %vm301_vm0, %v9337_v27, %v4505_v53  ;;  %v4376_v53 = vld [vmem:[#allocation3 + $0x169] sm:$0xff]  ;;  %v4513_v27 = vpop.permute.xlu0 %4512 }
 0x489   : >> { %v12410_v35 = vpop.f32.mrb[150].mxu1  ;;  %4167 = vmatmul.mubr.f32.gmra.mrb[2].mxu0 %v12048_v59  ;;  %v9335_v59 = vld [vmem:[#allocation3 + $0x121] sm:$0xff] }
 0x48a   : >> { %v3826_v56 = vpop.f32.mrb[151].mxu1  ;;  %5021 = vmatmul.mubr.f32.gmra.mrb[0].mxu1 %v4610_v30  ;;  %8421 = vmatprep.mubr.msk.f32.mxu0 %vm301_vm0, %v9333_v42 }
 0x48b   : >> { %8494 = vmatprep.mubr.msk.f32.mxu1 %vm301_vm0, %v4371_v3  ;;  %v4278_v56 = vld [vmem:[#allocation3 + $0x157] sm:$0xff] }
 0x48c   : >> { %v4614_v42 = vsel %vm301_vm0, %v4278_v56, %v4507_v34  ;;  %v4377_v34 = vld [vmem:[#allocation3 + $0x171] sm:$0xff]  ;;  %v4515_v56 = vpop.permute.xlu1 %4514 }
 0x48d   : >> { %v12416_v62 = vpop.f32.mrb[152].mxu1  ;;  %4172 = vmatmul.mubr.f32.gmra.mrb[4].mxu0 %v12055_v50  ;;  %v9336_v50 = vld [vmem:[#allocation3 + $0x129] sm:$0xff] }
 0x48e   : >> { %v3831_v57 = vpop.f32.mrb[153].mxu1  ;;  %5026 = vmatmul.mubr.f32.gmra.mrb[2].mxu1 %v4611_v46  ;;  %8422 = vmatprep.mubr.msk.f32.mxu0 %vm301_vm0, %v9335_v59 }
 0x48f   : >> { %8495 = vmatprep.mubr.msk.f32.mxu1 %vm301_vm0, %v4372_v24  ;;  %v9340_v57 = vld [vmem:[#allocation3 + $0x15f] sm:$0xff] }
 0x490   : >> { %v4615_v59 = vsel %vm301_vm0, %v9340_v57, %v4509_v39  ;;  %v4378_v39 = vld [vmem:[#allocation3 + $0x179] sm:$0xff]  ;;  %v4517_v57 = vpop.permute.xlu0 %4516 }
 0x491   : >> { %v12422_v32 = vpop.f32.mrb[154].mxu1  ;;  %4177 = vmatmul.mubr.f32.gmra.mrb[6].mxu0 %v12062_v15  ;;  %v9338_v15 = vld [vmem:[#allocation3 + $0x131] sm:$0xff] }
 0x492   : >> { %v3836_v7 = vpop.f32.mrb[155].mxu1  ;;  %5031 = vmatmul.mubr.f32.gmra.mrb[4].mxu1 %v4612_v38  ;;  %8423 = vmatprep.mubr.msk.f32.mxu0 %vm301_vm0, %v9336_v50 }
 0x493   : >> { %8496 = vmatprep.mubr.msk.f32.mxu1 %vm301_vm0, %v4373_v13  ;;  %v4280_v7 = vld [vmem:[#allocation3 + $0x167] sm:$0xff] }
 0x494   : >> { %v4616_v50 = vsel %vm301_vm0, %v4280_v7, %v4511_v37  ;;  %v4379_v37 = vld [vmem:[#allocation3 + $0x181] sm:$0xff]  ;;  %v4519_v7 = vpop.permute.xlu1 %4518 }
 0x495   : >> { %v12428_v11 = vpop.f32.mrb[156].mxu1  ;;  %4182 = vmatmul.mubr.f32.gmra.mrb[8].mxu0 %v12070_v36  ;;  %v9339_v36 = vld [vmem:[#allocation3 + $0x139] sm:$0xff] }
 0x496   : >> { %v3841_v30 = vpop.f32.mrb[157].mxu1  ;;  %5036 = vmatmul.mubr.f32.gmra.mrb[6].mxu1 %v4613_v14  ;;  %8424 = vmatprep.mubr.msk.f32.mxu0 %vm301_vm0, %v9338_v15 }
 0x497   : >> { %8497 = vmatprep.mubr.msk.f32.mxu1 %vm301_vm0, %v4374_v0  ;;  %v9343_v30 = vld [vmem:[#allocation3 + $0x16f] sm:$0xff] }
 0x498   : >> { %v4617_v15 = vsel %vm301_vm0, %v9343_v30, %v4513_v27  ;;  %v4380_v27 = vld [vmem:[#allocation3 + $0x189] sm:$0xff]  ;;  %v4521_v30 = vpop.permute.xlu0 %4520 }
 0x499   : >> { %v12434_v3 = vpop.f32.mrb[158].mxu1  ;;  %4187 = vmatmul.mubr.f32.gmra.mrb[10].mxu0 %v12079_v28  ;;  %v9341_v28 = vld [vmem:[#allocation3 + $0x141] sm:$0xff] }
 0x49a   : >> { %v3846_v46 = vpop.f32.mrb[159].mxu1  ;;  %5041 = vmatmul.mubr.f32.gmra.mrb[8].mxu1 %v4614_v42  ;;  %8425 = vmatprep.mubr.msk.f32.mxu0 %vm301_vm0, %v9339_v36 }
 0x49b   : >> { %8498 = vmatprep.mubr.msk.f32.mxu1 %vm301_vm0, %v4375_v63  ;;  %v9345_v46 = vld [vmem:[#allocation3 + $0x177] sm:$0xff] }
 0x49c   : >> { %v4618_v36 = vsel %vm301_vm0, %v9345_v46, %v4515_v56  ;;  %v4381_v56 = vld [vmem:[#allocation3 + $0x191] sm:$0xff]  ;;  %v4523_v46 = vpop.permute.xlu1 %4522 }
 0x49d   : >> { %v12440_v24 = vpop.f32.mrb[160].mxu1  ;;  %4192 = vmatmul.mubr.f32.gmra.mrb[12].mxu0 %v12088_v41  ;;  %v9342_v41 = vld [vmem:[#allocation3 + $0x149] sm:$0xff] }
 0x49e   : >> { %v3851_v38 = vpop.f32.mrb[161].mxu1  ;;  %5046 = vmatmul.mubr.f32.gmra.mrb[10].mxu1 %v4615_v59  ;;  %8426 = vmatprep.mubr.msk.f32.mxu0 %vm301_vm0, %v9341_v28 }
 0x49f   : >> { %8499 = vmatprep.mubr.msk.f32.mxu1 %vm301_vm0, %v4376_v53  ;;  %v9347_v38 = vld [vmem:[#allocation3 + $0x17f] sm:$0xff] }
 0x4a0   : >> { %v4619_v28 = vsel %vm301_vm0, %v9347_v38, %v4517_v57  ;;  %v4382_v57 = vld [vmem:[#allocation3 + $0x199] sm:$0xff] }
 0x4a1   : >> { %v12446_v13 = vpop.f32.mrb[162].mxu1  ;;  %4197 = vmatmul.mubr.f32.gmra.mrb[14].mxu0 %v12097_v10  ;;  %v9344_v10 = vld [vmem:[#allocation3 + $0x151] sm:$0xff] }
 0x4a2   : >> { %v3856_v14 = vpop.f32.mrb[163].mxu1  ;;  %5051 = vmatmul.mubr.f32.gmra.mrb[12].mxu1 %v4616_v50  ;;  %8427 = vmatprep.mubr.msk.f32.mxu0 %vm301_vm0, %v9342_v41 }
 0x4a3   : >> { %8500 = vmatprep.mubr.msk.f32.mxu1 %vm301_vm0, %v4377_v34  ;;  %v9349_v14 = vld [vmem:[#allocation3 + $0x187] sm:$0xff] }
 0x4a4   : >> { %v4620_v41 = vsel %vm301_vm0, %v9349_v14, %v4519_v7 }
 0x4a5   : >> { %v12452_v0 = vpop.f32.mrb[164].mxu1  ;;  %4202 = vmatmul.mubr.f32.gmra.mrb[16].mxu0 %v12106_v5  ;;  %v9346_v5 = vld [vmem:[#allocation3 + $0x159] sm:$0xff] }
 0x4a6   : >> { %v3861_v42 = vpop.f32.mrb[165].mxu1  ;;  %5056 = vmatmul.mubr.f32.gmra.mrb[14].mxu1 %v4617_v15  ;;  %8428 = vmatprep.mubr.msk.f32.mxu0 %vm301_vm0, %v9344_v10 }
 0x4a7   : >> { %8501 = vmatprep.mubr.msk.f32.mxu1 %vm301_vm0, %v4378_v39  ;;  %v9351_v42 = vld [vmem:[#allocation3 + $0x18f] sm:$0xff] }
 0x4a8   : >> { %v4621_v10 = vsel %vm301_vm0, %v9351_v42, %v4521_v30  ;;  %v4527_v30 = vpop.permute.xlu1 %4526  ;;  %v4385_v42 = vld [vmem:[#allocation3 + $0x1b1] sm:$0xff] }
 0x4a9   : >> { %v12458_v63 = vpop.f32.mrb[166].mxu1  ;;  %4207 = vmatmul.mubr.f32.gmra.mrb[18].mxu0 %v12115_v21  ;;  %v9348_v21 = vld [vmem:[#allocation3 + $0x161] sm:$0xff] }
 0x4aa   : >> { %v3866_v59 = vpop.f32.mrb[167].mxu1  ;;  %5061 = vmatmul.mubr.f32.gmra.mrb[16].mxu1 %v4618_v36  ;;  %8429 = vmatprep.mubr.msk.f32.mxu0 %vm301_vm0, %v9346_v5  ;;  %v9353_v5 = vld [vmem:[#allocation3 + $0x197] sm:$0xff] }
 0x4ab   : >> { %8502 = vmatprep.mubr.msk.f32.mxu1 %vm301_vm0, %v4379_v37  ;;  %v4383_v59 = vld [vmem:[#allocation3 + $0x1a1] sm:$0xff]  ;;  %v4622_v37 = vsel %vm301_vm0, %v9353_v5, %v4523_v46 }
 0x4ad   : >> { %v12464_v53 = vpop.f32.mrb[168].mxu1  ;;  %4212 = vmatmul.mubr.f32.gmra.mrb[20].mxu0 %v12124_v48  ;;  %v9350_v48 = vld [vmem:[#allocation3 + $0x169] sm:$0xff] }
 0x4ae   : >> { %v3871_v50 = vpop.f32.mrb[169].mxu1  ;;  %5066 = vmatmul.mubr.f32.gmra.mrb[18].mxu1 %v4619_v28  ;;  %8430 = vmatprep.mubr.msk.f32.mxu0 %vm301_vm0, %v9348_v21  ;;  %v4525_v28 = vpop.permute.xlu0 %4524  ;;  %v4288_v21 = vld [vmem:[#allocation3 + $0x1a7] sm:$0xff] }
 0x4af   : >> { %8503 = vmatprep.mubr.msk.f32.mxu1 %vm301_vm0, %v4380_v27  ;;  %v4287_v50 = vld [vmem:[#allocation3 + $0x19f] sm:$0xff]  ;;  %v4384_v27 = vld [vmem:[#allocation3 + $0x1a9] sm:$0xff] }
 0x4b0   : >> { %v4623_v14 = vsel %vm301_vm0, %v4287_v50, %v4525_v28 }
 0x4b1   : >> { %v12470_v34 = vpop.f32.mrb[170].mxu1  ;;  %4217 = vmatmul.mubr.f32.gmra.mrb[22].mxu0 %v12133_v44  ;;  %v9352_v44 = vld [vmem:[#allocation3 + $0x171] sm:$0xff] }
 0x4b2   : >> { %v3876_v15 = vpop.f32.mrb[171].mxu1  ;;  %5071 = vmatmul.mubr.f32.gmra.mrb[20].mxu1 %v4620_v41  ;;  %8431 = vmatprep.mubr.msk.f32.mxu0 %vm301_vm0, %v9350_v48  ;;  %v4624_v48 = vsel %vm301_vm0, %v4288_v21, %v4527_v30  ;;  %v4529_v46 = vpop.permute.xlu0 %4528 }
 0x4b3   : >> { %8504 = vmatprep.mubr.msk.f32.mxu1 %vm301_vm0, %v4381_v56  ;;  %v4289_v56 = vld [vmem:[#allocation3 + $0x1af] sm:$0xff] }
 0x4b5   : >> { %v12476_v39 = vpop.f32.mrb[172].mxu1  ;;  %4222 = vmatmul.mubr.f32.gmra.mrb[24].mxu0 %v12142_v23  ;;  %v9354_v23 = vld [vmem:[#allocation3 + $0x179] sm:$0xff] }
 0x4b6   : >> { %v3881_v36 = vpop.f32.mrb[173].mxu1  ;;  %5076 = vmatmul.mubr.f32.gmra.mrb[22].mxu1 %v4621_v10  ;;  %8432 = vmatprep.mubr.msk.f32.mxu0 %vm301_vm0, %v9352_v44 }
 0x4b7   : >> { %8505 = vmatprep.mubr.msk.f32.mxu1 %vm301_vm0, %v4382_v57 }
 0x4b9   : >> { %v12482_v38 = vpop.f32.mrb[174].mxu1  ;;  %4227 = vmatmul.mubr.f32.gmra.mrb[26].mxu0 %v12151_v1  ;;  %v9355_v1 = vld [vmem:[#allocation3 + $0x181] sm:$0xff] }
 0x4ba   : >> { %v3886_v7 = vpop.f32.mrb[175].mxu1  ;;  %5081 = vmatmul.mubr.f32.gmra.mrb[24].mxu1 %v4622_v37  ;;  %8433 = vmatprep.mubr.msk.f32.mxu0 %vm301_vm0, %v9354_v23 }
 0x4bb   : >> { %8506 = vmatprep.mubr.msk.f32.mxu1 %vm301_vm0, %v4383_v59 }
 0x4bd   : >> { %v12488_v41 = vpop.f32.mrb[176].mxu1  ;;  %4232 = vmatmul.mubr.f32.gmra.mrb[28].mxu0 %v12159_v43  ;;  %v4625_v43 = vsel %vm301_vm0, %v4289_v56, %v4529_v46 }
 0x4be   : >> { %v3891_v15 = vpop.f32.mrb[177].mxu1  ;;  %5086 = vmatmul.mubr.f32.gmra.mrb[26].mxu1 %v4623_v14  ;;  %8434 = vmatprep.mubr.msk.f32.mxu0 %vm301_vm0, %v9355_v1 }
 0x4bf   : >> { %8507 = vmatprep.mubr.msk.f32.mxu1 %vm301_vm0, %v4384_v27 }
 0x4c1   : >> { %v12494_v10 = vpop.f32.mrb[178].mxu1  ;;  %4237 = vmatmul.mubr.f32.gmra.mrb[30].mxu0 %v12168_v58 }
 0x4c2   : >> { %v3896_v36 = vpop.f32.mrb[179].mxu1  ;;  %5091 = vmatmul.mubr.f32.gmra.mrb[28].mxu1 %v4624_v48 }
 0x4c3   : >> { %8508 = vmatprep.mubr.msk.f32.mxu1 %vm301_vm0, %v4385_v42  ;;  %v12514_v42 = vld [vmem:[%s11390_s17 + $0x1] ss:$0 sm:$0xff] }
 0x4c5   : >> { %v12499_v44 = vpop.f32.mrb[180].mxu1 }
 0x4c6   : >> { %v3901_v57 = vpop.f32.mrb[181].mxu1  ;;  %5096 = vmatmul.mubr.f32.gmra.mrb[30].mxu1 %v4625_v43 }
 0x4c7   : >> { %v5399_v57 = vpop.permute.xlu1 %5398 }
 0x4c8   : >> { %vm5541_vm6 = vcmp.eq.s32.totalorder %v5399_v57, 1 }
 0x4c9   : >> { %v12501_v59 = vpop.f32.mrb[182].mxu1 }
 0x4ca   : >> { %v3906_v5 = vpop.f32.mrb[183].mxu1 }
 0x4cd   : >> { %v12503_v37 = vpop.f32.mrb[184].mxu1 }
 0x4ce   : >> { %v3911_v28 = vpop.f32.mrb[185].mxu1 }
 0x4d1   : >> { %v12505_v7 = vpop.f32.mrb[186].mxu1 }
 0x4d2   : >> { %v3916_v58 = vpop.f32.mrb[187].mxu1 }
 0x4d5   : >> { %v12507_v23 = vpop.f32.mrb[188].mxu1 }
 0x4d6   : >> { %14013 = vst [vmem:[#allocation29_spill] sm:$0xff] %v12507_v23  ;;  %v3921_v50 = vpop.f32.mrb[189].mxu1 }
 0x4d8   : >> { %v4003_v21 = vpop.f32.mrb[192].mxu0 }
 0x4d9   : >> { %v12509_v27 = vpop.f32.mrb[190].mxu1  ;;  %v4004_v14 = vadd.f32 %v4003_v21, %v12219_v26  ;;  %v4005_v30 = vpop.f32.mrb[193].mxu0 }
 0x4da   : >> { %14014 = vst [vmem:[#allocation30_spill] sm:$0xff] %v12509_v27  ;;  %v3926_v15 = vpop.f32.mrb[191].mxu1 }
 0x4db   : >> { %v5402_v15 = vpop.permute.xlu0 %5401 }
 0x4dc   : >> { %v4008_v1 = vpop.f32.mrb[194].mxu0  ;;  %vm5542_vm7 = vcmp.eq.s32.totalorder %v5402_v15, 1 }
 0x4dd   : >> { %v4009_v48 = vadd.f32 %v4008_v1, %v12227_v29  ;;  %v4862_v56 = vpop.f32.mrb[192].mxu1  ;;  %v4010_v46 = vpop.f32.mrb[195].mxu0 }
 0x4de   : >> { %v5101_v36 = vadd.f32 %v4862_v56, %v4004_v14  ;;  %v4864_v43 = vpop.f32.mrb[193].mxu1 }
 0x4e0   : >> { %v5157_v5 = vadd.f32 %v12514_v42, %v5101_v36  ;;  %v4013_v28 = vpop.f32.mrb[196].mxu0 }
 0x4e1   : >> { %v4014_v58 = vadd.f32 %v4013_v28, %v12235_v12  ;;  %v4867_v50 = vpop.f32.mrb[194].mxu1  ;;  %v4015_v27 = vpop.f32.mrb[197].mxu0 }
 0x4e2   : >> { %v5205_v26 = vmax.f32 %v5157_v5, 0.0  ;;  %v5102_v21 = vadd.f32 %v4867_v50, %v4009_v48  ;;  %v4869_v30 = vpop.f32.mrb[195].mxu1  ;;  %v5405_v27 = vpop.permute.xlu1 %5404 }
 0x4e3   : >> { %vm5543_vm8 = vcmp.eq.s32.totalorder %v5405_v27, 1 }
 0x4e4   : >> { %v5589_v29 = vsel %vm5541_vm6, %v5205_v26, 0.0  ;;  %v5158_v1 = vadd.f32 %v12514_v42, %v5102_v21  ;;  %v4018_v23 = vpop.f32.mrb[198].mxu0 }
 0x4e5   : >> { %5637 = vst.msk [vmem:[#allocation2 + $0x20] sm:$0xff] %vm301_vm0, %v5589_v29  ;;  %v4019_v14 = vadd.f32 %v4018_v23, %v12243_v52  ;;  %v4872_v56 = vpop.f32.mrb[196].mxu1  ;;  %v4020_v46 = vpop.f32.mrb[199].mxu0 }
 0x4e6   : >> { %v5206_v36 = vmax.f32 %v5158_v1, 0.0  ;;  %v5103_v43 = vadd.f32 %v4872_v56, %v4014_v58  ;;  %v4874_v12 = vpop.f32.mrb[197].mxu1  ;;  %v5408_v23 = vpop.permute.xlu0 %5407 }
 0x4e7   : >> { %vm5544_vm9 = vcmp.eq.s32.totalorder %v5408_v23, 1  ;;  %v5411_v12 = vpop.permute.xlu1 %5410 }
 0x4e8   : >> { %v5590_v5 = vsel %vm5542_vm7, %v5206_v36, 0.0  ;;  %v5159_v48 = vadd.f32 %v12514_v42, %v5103_v43  ;;  %v4023_v57 = vpop.f32.mrb[200].mxu0  ;;  %vm5545_vm10 = vcmp.eq.s32.totalorder %v5411_v12, 1 }
 0x4e9   : >> { %5638 = vst.msk [vmem:[#allocation2 + $0x28] sm:$0xff] %vm301_vm0, %v5590_v5  ;;  %v4024_v28 = vadd.f32 %v4023_v57, %v12251_v40  ;;  %v4877_v50 = vpop.f32.mrb[198].mxu1  ;;  %v4025_v26 = vpop.f32.mrb[201].mxu0 }
 0x4ea   : >> { %v5207_v21 = vmax.f32 %v5159_v48, 0.0  ;;  %v5104_v30 = vadd.f32 %v4877_v50, %v4019_v14  ;;  %v4879_v52 = vpop.f32.mrb[199].mxu1 }
 0x4ec   : >> { %v5591_v29 = vsel %vm5543_vm8, %v5207_v21, 0.0  ;;  %v5160_v58 = vadd.f32 %v12514_v42, %v5104_v30  ;;  %v4028_v15 = vpop.f32.mrb[202].mxu0  ;;  %v5414_v30 = vpop.permute.xlu0 %5413 }
 0x4ed   : >> { %5639 = vst.msk [vmem:[#allocation2 + $0x30] sm:$0xff] %vm301_vm0, %v5591_v29  ;;  %v4029_v1 = vadd.f32 %v4028_v15, %v12259_v22  ;;  %v4882_v56 = vpop.f32.mrb[200].mxu1  ;;  %v4030_v46 = vpop.f32.mrb[203].mxu0  ;;  %vm5546_vm11 = vcmp.eq.s32.totalorder %v5414_v30, 1 }
 0x4ee   : >> { %v5208_v36 = vmax.f32 %v5160_v58, 0.0  ;;  %v5105_v43 = vadd.f32 %v4882_v56, %v4024_v28  ;;  %v4884_v40 = vpop.f32.mrb[201].mxu1 }
 0x4f0   : >> { %v5592_v5 = vsel %vm5544_vm9, %v5208_v36, 0.0  ;;  %v5161_v14 = vadd.f32 %v12514_v42, %v5105_v43  ;;  %v4033_v27 = vpop.f32.mrb[204].mxu0  ;;  %v5417_v36 = vpop.permute.xlu1 %5416 }
 0x4f1   : >> { %5640 = vst.msk [vmem:[#allocation2 + $0x38] sm:$0xff] %vm301_vm0, %v5592_v5  ;;  %v4034_v48 = vadd.f32 %v4033_v27, %v12267_v25  ;;  %v4887_v57 = vpop.f32.mrb[202].mxu1  ;;  %v4035_v50 = vpop.f32.mrb[205].mxu0  ;;  %vm5547_vm12 = vcmp.eq.s32.totalorder %v5417_v36, 1 }
 0x4f2   : >> { %v5209_v26 = vmax.f32 %v5161_v14, 0.0  ;;  %v5106_v21 = vadd.f32 %v4887_v57, %v4029_v1  ;;  %v4889_v22 = vpop.f32.mrb[203].mxu1  ;;  %v5420_v50 = vpop.permute.xlu0 %5419 }
 0x4f3   : >> { %vm5548_vm13 = vcmp.eq.s32.totalorder %v5420_v50, 1 }
 0x4f4   : >> { %v5593_v52 = vsel %vm5545_vm10, %v5209_v26, 0.0  ;;  %v5162_v28 = vadd.f32 %v12514_v42, %v5106_v21  ;;  %v4038_v23 = vpop.f32.mrb[206].mxu0 }
 0x4f5   : >> { %5641 = vst.msk [vmem:[#allocation2 + $0x40] sm:$0xff] %vm301_vm0, %v5593_v52  ;;  %v4039_v29 = vadd.f32 %v4038_v23, %v12275_v51  ;;  %v4892_v58 = vpop.f32.mrb[204].mxu1  ;;  %v4040_v15 = vpop.f32.mrb[207].mxu0 }
 0x4f6   : >> { %v5210_v56 = vmax.f32 %v5162_v28, 0.0  ;;  %v5107_v46 = vadd.f32 %v4892_v58, %v4034_v48  ;;  %v4894_v25 = vpop.f32.mrb[205].mxu1  ;;  %v5423_v58 = vpop.permute.xlu1 %5422 }
 0x4f7   : >> { %vm5549_vm14 = vcmp.eq.s32.totalorder %v5423_v58, 1 }
 0x4f8   : >> { %v5594_v43 = vsel %vm5546_vm11, %v5210_v56, 0.0  ;;  %v5163_v1 = vadd.f32 %v12514_v42, %v5107_v46  ;;  %v4043_v40 = vpop.f32.mrb[208].mxu0 }
 0x4f9   : >> { %5642 = vst.msk [vmem:[#allocation2 + $0x48] sm:$0xff] %vm301_vm0, %v5594_v43  ;;  %v4044_v12 = vadd.f32 %v4043_v40, %v12283_v6  ;;  %v4897_v5 = vpop.f32.mrb[206].mxu1  ;;  %v4045_v14 = vpop.f32.mrb[209].mxu0 }
 0x4fa   : >> { %v5211_v27 = vmax.f32 %v5163_v1, 0.0  ;;  %v5108_v57 = vadd.f32 %v4897_v5, %v4039_v29  ;;  %v4899_v51 = vpop.f32.mrb[207].mxu1  ;;  %v5426_v40 = vpop.permute.xlu0 %5425 }
 0x4fb   : >> { %vm5550_vm15 = vcmp.eq.s32.totalorder %v5426_v40, 1 }
 0x4fc   : >> { %v5595_v26 = vsel %vm5547_vm12, %v5211_v27, 0.0  ;;  %v5164_v48 = vadd.f32 %v12514_v42, %v5108_v57  ;;  %v4048_v21 = vpop.f32.mrb[210].mxu0 }
 0x4fd   : >> { %5643 = vst.msk [vmem:[#allocation2 + $0x50] sm:$0xff] %vm301_vm0, %v5595_v26  ;;  %v4049_v22 = vadd.f32 %v4048_v21, %v12291_v19  ;;  %v4902_v30 = vpop.f32.mrb[208].mxu1  ;;  %v4050_v52 = vpop.f32.mrb[211].mxu0 }
 0x4fe   : >> { %v5212_v28 = vmax.f32 %v5164_v48, 0.0  ;;  %v5109_v23 = vadd.f32 %v4902_v30, %v4044_v12  ;;  %v4904_v6 = vpop.f32.mrb[209].mxu1  ;;  %v5429_v48 = vpop.permute.xlu1 %5428 }
 0x4ff   : >> { %vm5551_vm2 = vcmp.eq.s32.totalorder %v5429_v48, 1 }
 0x500   : >> { %v5596_v15 = vsel %vm5548_vm13, %v5212_v28, 0.0  ;;  %v5165_v29 = vadd.f32 %v12514_v42, %v5109_v23  ;;  %v4053_v56 = vpop.f32.mrb[212].mxu0 }
 0x501   : >> { %5644 = vst.msk [vmem:[#allocation2 + $0x58] sm:$0xff] %vm301_vm0, %v5596_v15  ;;  %v4054_v46 = vadd.f32 %v4053_v56, %v12299_v16  ;;  %v4907_v25 = vpop.f32.mrb[210].mxu1  ;;  %v4055_v36 = vpop.f32.mrb[213].mxu0 }
 0x502   : >> { %v5213_v43 = vmax.f32 %v5165_v29, 0.0  ;;  %v5110_v1 = vadd.f32 %v4907_v25, %v4049_v22  ;;  %v4909_v19 = vpop.f32.mrb[211].mxu1  ;;  %v5432_v15 = vpop.permute.xlu0 %5431 }
 0x503   : >> { %vm5552_vm3 = vcmp.eq.s32.totalorder %v5432_v15, 1  ;;  %v5435_v40 = vpop.permute.xlu1 %5434 }
 0x504   : >> { %v5597_v5 = vsel %vm5549_vm14, %v5213_v43, 0.0  ;;  %v5166_v12 = vadd.f32 %v12514_v42, %v5110_v1  ;;  %v4058_v14 = vpop.f32.mrb[214].mxu0  ;;  %vm5553_vm4 = vcmp.eq.s32.totalorder %v5435_v40, 1 }
 0x505   : >> { %5645 = vst.msk [vmem:[#allocation2 + $0x60] sm:$0xff] %vm301_vm0, %v5597_v5  ;;  %v4059_v27 = vadd.f32 %v4058_v14, %v12307_v18  ;;  %v4912_v57 = vpop.f32.mrb[212].mxu1  ;;  %v4060_v51 = vpop.f32.mrb[215].mxu0 }
 0x506   : >> { %v5214_v50 = vmax.f32 %v5166_v12, 0.0  ;;  %v5111_v26 = vadd.f32 %v4912_v57, %v4054_v46  ;;  %v4914_v16 = vpop.f32.mrb[213].mxu1 }
 0x507   : >> { %v5438_v16 = vpop.permute.xlu0 %5437 }
 0x508   : >> { %v5598_v21 = vsel %vm5550_vm15, %v5214_v50, 0.0  ;;  %v5167_v22 = vadd.f32 %v12514_v42, %v5111_v26  ;;  %v4063_v30 = vpop.f32.mrb[216].mxu0  ;;  %vm5554_vm5 = vcmp.eq.s32.totalorder %v5438_v16, 1 }
 0x509   : >> { %5646 = vst.msk [vmem:[#allocation2 + $0x68] sm:$0xff] %vm301_vm0, %v5598_v21  ;;  %v4064_v52 = vadd.f32 %v4063_v30, %v12315_v8  ;;  %v4917_v28 = vpop.f32.mrb[214].mxu1  ;;  %v4065_v23 = vpop.f32.mrb[217].mxu0 }
 0x50a   : >> { %v5215_v6 = vmax.f32 %v5167_v22, 0.0  ;;  %v5112_v58 = vadd.f32 %v4917_v28, %v4059_v27  ;;  %v4919_v18 = vpop.f32.mrb[215].mxu1 }
 0x50c   : >> { %v5599_v29 = vsel %vm5551_vm2, %v5215_v6, 0.0  ;;  %v5168_v56 = vadd.f32 %v12514_v42, %v5112_v58  ;;  %v4068_v46 = vpop.f32.mrb[218].mxu0  ;;  %v5441_v58 = vpop.permute.xlu1 %5440 }
 0x50d   : >> { %5647 = vst.msk [vmem:[#allocation2 + $0x70] sm:$0xff] %vm301_vm0, %v5599_v29  ;;  %v4069_v25 = vadd.f32 %v4068_v46, %v12323_v9  ;;  %v4922_v36 = vpop.f32.mrb[216].mxu1  ;;  %v4070_v43 = vpop.f32.mrb[219].mxu0  ;;  %vm5555_vm6 = vcmp.eq.s32.totalorder %v5441_v58, 1 }
 0x50e   : >> { %v5216_v1 = vmax.f32 %v5168_v56, 0.0  ;;  %v5113_v19 = vadd.f32 %v4922_v36, %v4064_v52  ;;  %v4924_v8 = vpop.f32.mrb[217].mxu1 }
 0x510   : >> { %v5600_v5 = vsel %vm5552_vm3, %v5216_v1, 0.0  ;;  %v5169_v12 = vadd.f32 %v12514_v42, %v5113_v19  ;;  %v4073_v14 = vpop.f32.mrb[220].mxu0  ;;  %v5444_v1 = vpop.permute.xlu0 %5443 }
 0x511   : >> { %5648 = vst.msk [vmem:[#allocation2 + $0x78] sm:$0xff] %vm301_vm0, %v5600_v5  ;;  %v4074_v27 = vadd.f32 %v4073_v14, %v12331_v47  ;;  %v4927_v57 = vpop.f32.mrb[218].mxu1  ;;  %v4075_v51 = vpop.f32.mrb[221].mxu0  ;;  %vm5556_vm7 = vcmp.eq.s32.totalorder %v5444_v1, 1 }
 0x512   : >> { %v5217_v50 = vmax.f32 %v5169_v12, 0.0  ;;  %v5114_v26 = vadd.f32 %v4927_v57, %v4069_v25  ;;  %v4929_v9 = vpop.f32.mrb[219].mxu1  ;;  %v5447_v51 = vpop.permute.xlu1 %5446 }
 0x513   : >> { %vm5557_vm8 = vcmp.eq.s32.totalorder %v5447_v51, 1 }
 0x514   : >> { %v5601_v48 = vsel %vm5553_vm4, %v5217_v50, 0.0  ;;  %v5170_v21 = vadd.f32 %v12514_v42, %v5114_v26  ;;  %v4078_v22 = vpop.f32.mrb[222].mxu0 }
 0x515   : >> { %5649 = vst.msk [vmem:[#allocation2 + $0x80] sm:$0xff] %vm301_vm0, %v5601_v48  ;;  %v4079_v30 = vadd.f32 %v4078_v22, %v12337_v60  ;;  %v4932_v52 = vpop.f32.mrb[220].mxu1  ;;  %v4080_v28 = vpop.f32.mrb[223].mxu0 }
 0x516   : >> { %v5218_v23 = vmax.f32 %v5170_v21, 0.0  ;;  %v5115_v6 = vadd.f32 %v4932_v52, %v4074_v27  ;;  %v4934_v47 = vpop.f32.mrb[221].mxu1  ;;  %v5450_v52 = vpop.permute.xlu0 %5449 }
 0x517   : >> { %vm5558_vm9 = vcmp.eq.s32.totalorder %v5450_v52, 1 }
 0x518   : >> { %v5602_v18 = vsel %vm5554_vm5, %v5218_v23, 0.0  ;;  %v5171_v15 = vadd.f32 %v12514_v42, %v5115_v6  ;;  %v4083_v29 = vpop.f32.mrb[224].mxu0 }
 0x519   : >> { %5650 = vst.msk [vmem:[#allocation2 + $0x88] sm:$0xff] %vm301_vm0, %v5602_v18  ;;  %v4084_v56 = vadd.f32 %v4083_v29, %v12343_v4  ;;  %v4937_v46 = vpop.f32.mrb[222].mxu1  ;;  %v4085_v25 = vpop.f32.mrb[225].mxu0 }
 0x51a   : >> { %v5219_v36 = vmax.f32 %v5171_v15, 0.0  ;;  %v5116_v43 = vadd.f32 %v4937_v46, %v4079_v30  ;;  %v4939_v60 = vpop.f32.mrb[223].mxu1 }
 0x51c   : >> { %v5603_v19 = vsel %vm5555_vm6, %v5219_v36, 0.0  ;;  %v5172_v8 = vadd.f32 %v12514_v42, %v5116_v43  ;;  %v4088_v40 = vpop.f32.mrb[226].mxu0 }
 0x51d   : >> { %5651 = vst.msk [vmem:[#allocation2 + $0x90] sm:$0xff] %vm301_vm0, %v5603_v19  ;;  %v4089_v5 = vadd.f32 %v4088_v40, %v12349_v2  ;;  %v4942_v12 = vpop.f32.mrb[224].mxu1  ;;  %v4090_v14 = vpop.f32.mrb[227].mxu0 }
 0x51e   : >> { %v5220_v27 = vmax.f32 %v5172_v8, 0.0  ;;  %v5117_v57 = vadd.f32 %v4942_v12, %v4084_v56  ;;  %v4944_v4 = vpop.f32.mrb[225].mxu1  ;;  %v5453_v56 = vpop.permute.xlu1 %5452 }
 0x51f   : >> { %vm5559_vm10 = vcmp.eq.s32.totalorder %v5453_v56, 1  ;;  %v5456_v40 = vpop.permute.xlu0 %5455 }
 0x520   : >> { %v5604_v50 = vsel %vm5556_vm7, %v5220_v27, 0.0  ;;  %v5173_v26 = vadd.f32 %v12514_v42, %v5117_v57  ;;  %v4093_v9 = vpop.f32.mrb[228].mxu0  ;;  %vm5560_vm11 = vcmp.eq.s32.totalorder %v5456_v40, 1 }
 0x521   : >> { %5652 = vst.msk [vmem:[#allocation2 + $0x98] sm:$0xff] %vm301_vm0, %v5604_v50  ;;  %v4094_v16 = vadd.f32 %v4093_v9, %v12356_v61  ;;  %v4947_v48 = vpop.f32.mrb[226].mxu1  ;;  %v4095_v21 = vpop.f32.mrb[229].mxu0 }
 0x522   : >> { %v5221_v22 = vmax.f32 %v5173_v26, 0.0  ;;  %v5118_v30 = vadd.f32 %v4947_v48, %v4089_v5  ;;  %v4949_v2 = vpop.f32.mrb[227].mxu1  ;;  %v5459_v26 = vpop.permute.xlu1 %5458 }
 0x523   : >> { %vm5561_vm12 = vcmp.eq.s32.totalorder %v5459_v26, 1 }
 0x524   : >> { %v5605_v28 = vsel %vm5557_vm8, %v5221_v22, 0.0  ;;  %v5174_v23 = vadd.f32 %v12514_v42, %v5118_v30  ;;  %v4098_v6 = vpop.f32.mrb[230].mxu0 }
 0x525   : >> { %5653 = vst.msk [vmem:[#allocation2 + $0xa0] sm:$0xff] %vm301_vm0, %v5605_v28  ;;  %v4099_v47 = vadd.f32 %v4098_v6, %v12362_v31  ;;  %v4952_v58 = vpop.f32.mrb[228].mxu1  ;;  %v4100_v18 = vpop.f32.mrb[231].mxu0 }
 0x526   : >> { %v5222_v15 = vmax.f32 %v5174_v23, 0.0  ;;  %v5119_v29 = vadd.f32 %v4952_v58, %v4094_v16  ;;  %v4954_v61 = vpop.f32.mrb[229].mxu1  ;;  %v5462_v28 = vpop.permute.xlu0 %5461 }
 0x527   : >> { %vm5562_vm13 = vcmp.eq.s32.totalorder %v5462_v28, 1  ;;  %v5465_v56 = vpop.permute.xlu1 %5464 }
 0x528   : >> { %v5606_v46 = vsel %vm5558_vm9, %v5222_v15, 0.0  ;;  %v5175_v25 = vadd.f32 %v12514_v42, %v5119_v29  ;;  %v4103_v36 = vpop.f32.mrb[232].mxu0  ;;  %vm5563_vm14 = vcmp.eq.s32.totalorder %v5465_v56, 1 }
 0x529   : >> { %5654 = vst.msk [vmem:[#allocation2 + $0xa8] sm:$0xff] %vm301_vm0, %v5606_v46  ;;  %v4104_v43 = vadd.f32 %v4103_v36, %v12368_v20  ;;  %v4957_v60 = vpop.f32.mrb[230].mxu1  ;;  %v4105_v1 = vpop.f32.mrb[233].mxu0 }
 0x52a   : >> { %v5223_v19 = vmax.f32 %v5175_v25, 0.0  ;;  %v5120_v8 = vadd.f32 %v4957_v60, %v4099_v47  ;;  %v4959_v31 = vpop.f32.mrb[231].mxu1 }
 0x52b   : >> { %v5468_v31 = vpop.permute.xlu0 %5467 }
 0x52c   : >> { %v5607_v5 = vsel %vm5559_vm10, %v5223_v19, 0.0  ;;  %v5176_v12 = vadd.f32 %v12514_v42, %v5120_v8  ;;  %v4108_v14 = vpop.f32.mrb[234].mxu0  ;;  %vm5564_vm15 = vcmp.eq.s32.totalorder %v5468_v31, 1 }
 0x52d   : >> { %5655 = vst.msk [vmem:[#allocation2 + $0xb0] sm:$0xff] %vm301_vm0, %v5607_v5  ;;  %v4109_v27 = vadd.f32 %v4108_v14, %v12374_v17  ;;  %v4962_v57 = vpop.f32.mrb[232].mxu1  ;;  %v4110_v4 = vpop.f32.mrb[235].mxu0 }
 0x52e   : >> { %v5224_v51 = vmax.f32 %v5176_v12, 0.0  ;;  %v5121_v50 = vadd.f32 %v4962_v57, %v4104_v43  ;;  %v4964_v20 = vpop.f32.mrb[233].mxu1 }
 0x530   : >> { %v5608_v9 = vsel %vm5560_vm11, %v5224_v51, 0.0  ;;  %v5177_v16 = vadd.f32 %v12514_v42, %v5121_v50  ;;  %v4113_v48 = vpop.f32.mrb[236].mxu0  ;;  %v5471_v50 = vpop.permute.xlu1 %5470 }
 0x531   : >> { %5656 = vst.msk [vmem:[#allocation2 + $0xb8] sm:$0xff] %vm301_vm0, %v5608_v9  ;;  %v4114_v21 = vadd.f32 %v4113_v48, %v12380_v33  ;;  %v4967_v22 = vpop.f32.mrb[234].mxu1  ;;  %v4115_v30 = vpop.f32.mrb[237].mxu0  ;;  %vm5565_vm2 = vcmp.eq.s32.totalorder %v5471_v50, 1 }
 0x532   : >> { %v5225_v2 = vmax.f32 %v5177_v16, 0.0  ;;  %v5122_v52 = vadd.f32 %v4967_v22, %v4109_v27  ;;  %v4969_v17 = vpop.f32.mrb[235].mxu1 }
 0x534   : >> { %v5609_v23 = vsel %vm5561_vm12, %v5225_v2, 0.0  ;;  %v5178_v6 = vadd.f32 %v12514_v42, %v5122_v52  ;;  %v4118_v47 = vpop.f32.mrb[238].mxu0  ;;  %v5474_v2 = vpop.permute.xlu0 %5473 }
 0x535   : >> { %5657 = vst.msk [vmem:[#allocation2 + $0xc0] sm:$0xff] %vm301_vm0, %v5609_v23  ;;  %v4119_v58 = vadd.f32 %v4118_v47, %v12386_v55  ;;  %v4972_v18 = vpop.f32.mrb[236].mxu1  ;;  %v4120_v15 = vpop.f32.mrb[239].mxu0  ;;  %vm5566_vm3 = vcmp.eq.s32.totalorder %v5474_v2, 1 }
 0x536   : >> { %v5226_v29 = vmax.f32 %v5178_v6, 0.0  ;;  %v5123_v61 = vadd.f32 %v4972_v18, %v4114_v21  ;;  %v4974_v33 = vpop.f32.mrb[237].mxu1  ;;  %v5477_v15 = vpop.permute.xlu1 %5476 }
 0x537   : >> { %vm5567_vm4 = vcmp.eq.s32.totalorder %v5477_v15, 1 }
 0x538   : >> { %v5610_v46 = vsel %vm5562_vm13, %v5226_v29, 0.0  ;;  %v5179_v25 = vadd.f32 %v12514_v42, %v5123_v61  ;;  %v4123_v36 = vpop.f32.mrb[240].mxu0 }
 0x539   : >> { %5658 = vst.msk [vmem:[#allocation2 + $0xc8] sm:$0xff] %vm301_vm0, %v5610_v46  ;;  %v4124_v43 = vadd.f32 %v4123_v36, %v12392_v49  ;;  %v4977_v60 = vpop.f32.mrb[238].mxu1  ;;  %v4125_v1 = vpop.f32.mrb[241].mxu0 }
 0x53a   : >> { %v5227_v19 = vmax.f32 %v5179_v25, 0.0  ;;  %v5124_v8 = vadd.f32 %v4977_v60, %v4119_v58  ;;  %v4979_v55 = vpop.f32.mrb[239].mxu1  ;;  %v5480_v60 = vpop.permute.xlu0 %5479 }
 0x53b   : >> { %vm5568_vm5 = vcmp.eq.s32.totalorder %v5480_v60, 1 }
 0x53c   : >> { %v5611_v40 = vsel %vm5563_vm14, %v5227_v19, 0.0  ;;  %v5180_v5 = vadd.f32 %v12514_v42, %v5124_v8  ;;  %v4128_v12 = vpop.f32.mrb[242].mxu0 }
 0x53d   : >> { %5659 = vst.msk [vmem:[#allocation2 + $0xd0] sm:$0xff] %vm301_vm0, %v5611_v40  ;;  %v4129_v14 = vadd.f32 %v4128_v12, %v12398_v54  ;;  %v4982_v27 = vpop.f32.mrb[240].mxu1  ;;  %v4130_v57 = vpop.f32.mrb[243].mxu0 }
 0x53e   : >> { %v5228_v4 = vmax.f32 %v5180_v5, 0.0  ;;  %v5125_v51 = vadd.f32 %v4982_v27, %v4124_v43  ;;  %v4984_v49 = vpop.f32.mrb[241].mxu1 }
 0x540   : >> { %v5612_v20 = vsel %vm5564_vm15, %v5228_v4, 0.0  ;;  %v5181_v26 = vadd.f32 %v12514_v42, %v5125_v51  ;;  %v4133_v9 = vpop.f32.mrb[244].mxu0 }
 0x541   : >> { %5660 = vst.msk [vmem:[#allocation2 + $0xd8] sm:$0xff] %vm301_vm0, %v5612_v20  ;;  %v4134_v16 = vadd.f32 %v4133_v9, %v12404_v45  ;;  %v4987_v48 = vpop.f32.mrb[242].mxu1  ;;  %v4135_v21 = vpop.f32.mrb[245].mxu0 }
 0x542   : >> { %v5229_v22 = vmax.f32 %v5181_v26, 0.0  ;;  %v5126_v30 = vadd.f32 %v4987_v48, %v4129_v14  ;;  %v4989_v54 = vpop.f32.mrb[243].mxu1  ;;  %v5483_v14 = vpop.permute.xlu1 %5482 }
 0x543   : >> { %vm5569_vm6 = vcmp.eq.s32.totalorder %v5483_v14, 1  ;;  %v5486_v9 = vpop.permute.xlu0 %5485 }
 0x544   : >> { %v5613_v52 = vsel %vm5565_vm2, %v5229_v22, 0.0  ;;  %v5182_v17 = vadd.f32 %v12514_v42, %v5126_v30  ;;  %v4138_v28 = vpop.f32.mrb[246].mxu0  ;;  %vm5570_vm7 = vcmp.eq.s32.totalorder %v5486_v9, 1 }
 0x545   : >> { %5661 = vst.msk [vmem:[#allocation2 + $0xe0] sm:$0xff] %vm301_vm0, %v5613_v52  ;;  %v4139_v23 = vadd.f32 %v4138_v28, %v12410_v35  ;;  %v4992_v6 = vpop.f32.mrb[244].mxu1  ;;  %v4140_v47 = vpop.f32.mrb[247].mxu0 }
 0x546   : >> { %v5230_v58 = vmax.f32 %v5182_v17, 0.0  ;;  %v5127_v18 = vadd.f32 %v4992_v6, %v4134_v16  ;;  %v4994_v45 = vpop.f32.mrb[245].mxu1  ;;  %v5489_v17 = vpop.permute.xlu1 %5488 }
 0x547   : >> { %vm5571_vm8 = vcmp.eq.s32.totalorder %v5489_v17, 1 }
 0x548   : >> { %v5614_v29 = vsel %vm5566_vm3, %v5230_v58, 0.0  ;;  %v5183_v61 = vadd.f32 %v12514_v42, %v5127_v18  ;;  %v4143_v33 = vpop.f32.mrb[248].mxu0 }
 0x549   : >> { %5662 = vst.msk [vmem:[#allocation2 + $0xe8] sm:$0xff] %vm301_vm0, %v5614_v29  ;;  %v4144_v56 = vadd.f32 %v4143_v33, %v12416_v62  ;;  %v4997_v46 = vpop.f32.mrb[246].mxu1  ;;  %v4145_v25 = vpop.f32.mrb[249].mxu0 }
 0x54a   : >> { %v5231_v36 = vmax.f32 %v5183_v61, 0.0  ;;  %v5128_v43 = vadd.f32 %v4997_v46, %v4139_v23  ;;  %v4999_v35 = vpop.f32.mrb[247].mxu1  ;;  %v5492_v29 = vpop.permute.xlu0 %5491 }
 0x54b   : >> { %vm5572_vm9 = vcmp.eq.s32.totalorder %v5492_v29, 1  ;;  %v5495_v60 = vpop.permute.xlu1 %5494 }
 0x54c   : >> { %v5615_v1 = vsel %vm5567_vm4, %v5231_v36, 0.0  ;;  %v5184_v19 = vadd.f32 %v12514_v42, %v5128_v43  ;;  %v4148_v8 = vpop.f32.mrb[250].mxu0  ;;  %vm5573_vm10 = vcmp.eq.s32.totalorder %v5495_v60, 1 }
 0x54d   : >> { %5663 = vst.msk [vmem:[#allocation2 + $0xf0] sm:$0xff] %vm301_vm0, %v5615_v1  ;;  %v4149_v55 = vadd.f32 %v4148_v8, %v12422_v32  ;;  %v5002_v31 = vpop.f32.mrb[248].mxu1  ;;  %v4150_v40 = vpop.f32.mrb[251].mxu0 }
 0x54e   : >> { %v5232_v5 = vmax.f32 %v5184_v19, 0.0  ;;  %v5129_v12 = vadd.f32 %v5002_v31, %v4144_v56  ;;  %v5004_v62 = vpop.f32.mrb[249].mxu1 }
 0x54f   : >> { %v5498_v62 = vpop.permute.xlu0 %5497 }
 0x550   : >> { %v5616_v27 = vsel %vm5568_vm5, %v5232_v5, 0.0  ;;  %v5185_v57 = vadd.f32 %v12514_v42, %v5129_v12  ;;  %v4153_v4 = vpop.f32.mrb[252].mxu0  ;;  %vm5574_vm11 = vcmp.eq.s32.totalorder %v5498_v62, 1 }
 0x551   : >> { %5664 = vst.msk [vmem:[#allocation2 + $0xf8] sm:$0xff] %vm301_vm0, %v5616_v27  ;;  %v4154_v51 = vadd.f32 %v4153_v4, %v12428_v11  ;;  %v5007_v49 = vpop.f32.mrb[250].mxu1  ;;  %v4155_v50 = vpop.f32.mrb[253].mxu0 }
 0x552   : >> { %v5233_v20 = vmax.f32 %v5185_v57, 0.0  ;;  %v5130_v26 = vadd.f32 %v5007_v49, %v4149_v55  ;;  %v5009_v32 = vpop.f32.mrb[251].mxu1 }
 0x554   : >> { %v5617_v16 = vsel %vm5569_vm6, %v5233_v20, 0.0  ;;  %v5186_v48 = vadd.f32 %v12514_v42, %v5130_v26  ;;  %v4158_v21 = vpop.f32.mrb[254].mxu0  ;;  %v5501_v26 = vpop.permute.xlu1 %5500 }
 0x555   : >> { %5665 = vst.msk [vmem:[#allocation2 + $0x100] sm:$0xff] %vm301_vm0, %v5617_v16  ;;  %v4159_v22 = vadd.f32 %v4158_v21, %v12434_v3  ;;  %v5012_v30 = vpop.f32.mrb[252].mxu1  ;;  %v4160_v54 = vpop.f32.mrb[255].mxu0  ;;  %vm5575_vm12 = vcmp.eq.s32.totalorder %v5501_v26, 1 }
 0x556   : >> { %v5234_v2 = vmax.f32 %v5186_v48, 0.0  ;;  %v5131_v52 = vadd.f32 %v5012_v30, %v4154_v51  ;;  %v5014_v11 = vpop.f32.mrb[253].mxu1 }
 0x558   : >> { %v5618_v28 = vsel %vm5570_vm7, %v5234_v2, 0.0  ;;  %v5187_v23 = vadd.f32 %v12514_v42, %v5131_v52  ;;  %v4163_v6 = vpop.f32.mrb[0].mxu0  ;;  %v5504_v2 = vpop.permute.xlu0 %5503 }
 0x559   : >> { %5666 = vst.msk [vmem:[#allocation2 + $0x108] sm:$0xff] %vm301_vm0, %v5618_v28  ;;  %v4164_v47 = vadd.f32 %v4163_v6, %v12440_v24  ;;  %v5017_v58 = vpop.f32.mrb[254].mxu1  ;;  %v4165_v18 = vpop.f32.mrb[1].mxu0  ;;  %vm5576_vm13 = vcmp.eq.s32.totalorder %v5504_v2, 1 }
 0x55a   : >> { %v5235_v45 = vmax.f32 %v5187_v23, 0.0  ;;  %v5132_v15 = vadd.f32 %v5017_v58, %v4159_v22  ;;  %v5019_v3 = vpop.f32.mrb[255].mxu1  ;;  %v5507_v18 = vpop.permute.xlu1 %5506 }
 0x55b   : >> { %vm5577_vm14 = vcmp.eq.s32.totalorder %v5507_v18, 1 }
 0x55c   : >> { %v5619_v61 = vsel %vm5571_vm8, %v5235_v45, 0.0  ;;  %v5188_v33 = vadd.f32 %v12514_v42, %v5132_v15  ;;  %v4168_v56 = vpop.f32.mrb[2].mxu0 }
 0x55d   : >> { %5667 = vst.msk [vmem:[#allocation2 + $0x110] sm:$0xff] %vm301_vm0, %v5619_v61  ;;  %v4169_v46 = vadd.f32 %v4168_v56, %v12446_v13  ;;  %v5022_v25 = vpop.f32.mrb[0].mxu1  ;;  %v4170_v36 = vpop.f32.mrb[3].mxu0 }
 0x55e   : >> { %v5236_v43 = vmax.f32 %v5188_v33, 0.0  ;;  %v5133_v35 = vadd.f32 %v5022_v25, %v4164_v47  ;;  %v5024_v24 = vpop.f32.mrb[1].mxu1  ;;  %v5510_v25 = vpop.permute.xlu0 %5509 }
 0x55f   : >> { %vm5578_vm15 = vcmp.eq.s32.totalorder %v5510_v25, 1 }
 0x560   : >> { %v5620_v1 = vsel %vm5572_vm9, %v5236_v43, 0.0  ;;  %v5189_v19 = vadd.f32 %v12514_v42, %v5133_v35  ;;  %v4173_v8 = vpop.f32.mrb[4].mxu0 }
 0x561   : >> { %5668 = vst.msk [vmem:[#allocation2 + $0x118] sm:$0xff] %vm301_vm0, %v5620_v1  ;;  %v4174_v55 = vadd.f32 %v4173_v8, %v12452_v0  ;;  %v5027_v31 = vpop.f32.mrb[2].mxu1  ;;  %v4175_v40 = vpop.f32.mrb[5].mxu0 }
 0x562   : >> { %v5237_v5 = vmax.f32 %v5189_v19, 0.0  ;;  %v5134_v12 = vadd.f32 %v5027_v31, %v4169_v46  ;;  %v5029_v13 = vpop.f32.mrb[3].mxu1 }
 0x564   : >> { %v5621_v14 = vsel %vm5573_vm10, %v5237_v5, 0.0  ;;  %v5190_v27 = vadd.f32 %v12514_v42, %v5134_v12  ;;  %v4178_v57 = vpop.f32.mrb[6].mxu0 }
 0x565   : >> { %5669 = vst.msk [vmem:[#allocation2 + $0x120] sm:$0xff] %vm301_vm0, %v5621_v14  ;;  %v4179_v4 = vadd.f32 %v4178_v57, %v12458_v63  ;;  %v5032_v51 = vpop.f32.mrb[4].mxu1  ;;  %v4180_v49 = vpop.f32.mrb[7].mxu0 }
 0x566   : >> { %v5238_v50 = vmax.f32 %v5190_v27, 0.0  ;;  %v5135_v20 = vadd.f32 %v5032_v51, %v4174_v55  ;;  %v5034_v0 = vpop.f32.mrb[5].mxu1  ;;  %v5513_v55 = vpop.permute.xlu1 %5512 }
 0x567   : >> { %vm5579_vm2 = vcmp.eq.s32.totalorder %v5513_v55, 1  ;;  %v5516_v57 = vpop.permute.xlu0 %5515 }
 0x568   : >> { %v5622_v32 = vsel %vm5574_vm11, %v5238_v50, 0.0  ;;  %v5191_v9 = vadd.f32 %v12514_v42, %v5135_v20  ;;  %v4183_v16 = vpop.f32.mrb[8].mxu0  ;;  %vm5580_vm3 = vcmp.eq.s32.totalorder %v5516_v57, 1 }
 0x569   : >> { %5670 = vst.msk [vmem:[#allocation2 + $0x128] sm:$0xff] %vm301_vm0, %v5622_v32  ;;  %v4184_v48 = vadd.f32 %v4183_v16, %v12464_v53  ;;  %v5037_v21 = vpop.f32.mrb[6].mxu1  ;;  %v4185_v22 = vpop.f32.mrb[9].mxu0 }
 0x56a   : >> { %v5239_v30 = vmax.f32 %v5191_v9, 0.0  ;;  %v5136_v54 = vadd.f32 %v5037_v21, %v4179_v4  ;;  %v5039_v63 = vpop.f32.mrb[7].mxu1  ;;  %v5519_v9 = vpop.permute.xlu1 %5518 }
 0x56b   : >> { %vm5581_vm4 = vcmp.eq.s32.totalorder %v5519_v9, 1 }
 0x56c   : >> { %v5623_v52 = vsel %vm5575_vm12, %v5239_v30, 0.0  ;;  %v5192_v11 = vadd.f32 %v12514_v42, %v5136_v54  ;;  %v4188_v17 = vpop.f32.mrb[10].mxu0 }
 0x56d   : >> { %5671 = vst.msk [vmem:[#allocation2 + $0x130] sm:$0xff] %vm301_vm0, %v5623_v52  ;;  %v4189_v28 = vadd.f32 %v4188_v17, %v12470_v34  ;;  %v5042_v23 = vpop.f32.mrb[8].mxu1  ;;  %v4190_v6 = vpop.f32.mrb[11].mxu0 }
 0x56e   : >> { %v5240_v47 = vmax.f32 %v5192_v11, 0.0  ;;  %v5137_v58 = vadd.f32 %v5042_v23, %v4184_v48  ;;  %v5044_v53 = vpop.f32.mrb[9].mxu1  ;;  %v5522_v52 = vpop.permute.xlu0 %5521 }
 0x56f   : >> { %vm5582_vm5 = vcmp.eq.s32.totalorder %v5522_v52, 1  ;;  %v5525_v18 = vpop.permute.xlu1 %5524 }
 0x570   : >> { %v5624_v45 = vsel %vm5576_vm13, %v5240_v47, 0.0  ;;  %v5193_v15 = vadd.f32 %v12514_v42, %v5137_v58  ;;  %v4193_v3 = vpop.f32.mrb[12].mxu0  ;;  %vm5583_vm6 = vcmp.eq.s32.totalorder %v5525_v18, 1 }
 0x571   : >> { %5672 = vst.msk [vmem:[#allocation2 + $0x138] sm:$0xff] %vm301_vm0, %v5624_v45  ;;  %v4194_v29 = vadd.f32 %v4193_v3, %v12476_v39  ;;  %v5047_v61 = vpop.f32.mrb[10].mxu1  ;;  %v4195_v33 = vpop.f32.mrb[13].mxu0 }
 0x572   : >> { %v5241_v56 = vmax.f32 %v5193_v15, 0.0  ;;  %v5138_v46 = vadd.f32 %v5047_v61, %v4189_v28  ;;  %v5049_v34 = vpop.f32.mrb[11].mxu1 }
 0x573   : >> { %v5528_v34 = vpop.permute.xlu0 %5527 }
 0x574   : >> { %v5625_v36 = vsel %vm5577_vm14, %v5241_v56, 0.0  ;;  %v5194_v43 = vadd.f32 %v12514_v42, %v5138_v46  ;;  %v4198_v35 = vpop.f32.mrb[14].mxu0  ;;  %vm5584_vm7 = vcmp.eq.s32.totalorder %v5528_v34, 1  ;;  %v6121_v34 = vld [vmem:[#allocation12 + $0xd8] sm:$0xff] (%p347_p7) }
 0x575   : >> { %5673 = vst.msk [vmem:[#allocation2 + $0x140] sm:$0xff] %vm301_vm0, %v5625_v36  ;;  %v4199_v24 = vadd.f32 %v4198_v35, %v12482_v38  ;;  %v5052_v60 = vpop.f32.mrb[12].mxu1  ;;  %v4200_v1 = vpop.f32.mrb[15].mxu0  ;;  %v9356_v36 = vld [vmem:[%s11390_s17 + $0x1] ss:$0 sm:$0xff] }
 0x576   : >> { %v5242_v19 = vmax.f32 %v5194_v43, 0.0  ;;  %v5139_v8 = vadd.f32 %v5052_v60, %v4194_v29  ;;  %v5054_v39 = vpop.f32.mrb[13].mxu1 }
 0x578   : >> { %v5626_v31 = vsel %vm5578_vm15, %v5242_v19, 0.0  ;;  %v5195_v40 = vadd.f32 %v12514_v42, %v5139_v8  ;;  %v4203_v5 = vpop.f32.mrb[16].mxu0  ;;  %v5531_v8 = vpop.permute.xlu1 %5530 }
 0x579   : >> { %5674 = vst.msk [vmem:[#allocation2 + $0x148] sm:$0xff] %vm301_vm0, %v5626_v31  ;;  %v4204_v12 = vadd.f32 %v4203_v5, %v12488_v41  ;;  %v5057_v13 = vpop.f32.mrb[14].mxu1  ;;  %v4205_v62 = vpop.f32.mrb[17].mxu0  ;;  %vm5585_vm8 = vcmp.eq.s32.totalorder %v5531_v8, 1  ;;  %v12683_v8 = vld [vmem:[#allocation2 + $0x58] sm:$0xff] (%p347_p7) }
 0x57a   : >> { %v5243_v14 = vmax.f32 %v5195_v40, 0.0  ;;  %v5140_v27 = vadd.f32 %v5057_v13, %v4199_v24  ;;  %v5059_v38 = vpop.f32.mrb[15].mxu1  ;;  %v14015_v40 = vld [vmem:[#allocation29_spill] sm:$0xff] }
 0x57c   : >> { %v5627_v4 = vsel %vm5579_vm2, %v5243_v14, 0.0  ;;  %v5196_v51 = vadd.f32 %v12514_v42, %v5140_v27  ;;  %v4208_v49 = vpop.f32.mrb[18].mxu0 }
 0x57d   : >> { %5675 = vst.msk [vmem:[#allocation2 + $0x150] sm:$0xff] %vm301_vm0, %v5627_v4  ;;  %v4209_v50 = vadd.f32 %v4208_v49, %v12494_v10  ;;  %v5062_v20 = vpop.f32.mrb[16].mxu1  ;;  %v4210_v0 = vpop.f32.mrb[19].mxu0 }
 0x57e   : >> { %v5244_v26 = vmax.f32 %v5196_v51, 0.0  ;;  %v5141_v32 = vadd.f32 %v5062_v20, %v4204_v12  ;;  %v5064_v41 = vpop.f32.mrb[17].mxu1  ;;  %v14016_v51 = vld [vmem:[#allocation30_spill] sm:$0xff] }
 0x57f   : >> { %v5537_v41 = vpop.permute.xlu1 %5536 }
 0x580   : >> { %v5628_v16 = vsel %vm5580_vm3, %v5244_v26, 0.0  ;;  %v5197_v48 = vadd.f32 %v12514_v42, %v5141_v32  ;;  %v4213_v21 = vpop.f32.mrb[20].mxu0  ;;  %vm5587_vm10 = vcmp.eq.s32.totalorder %v5537_v41, 1  ;;  %v6080_v41 = vld [vmem:[#allocation12 + $0x58] sm:$0xff] (%p347_p7) }
 0x581   : >> { %5676 = vst.msk [vmem:[#allocation2 + $0x158] sm:$0xff] %vm301_vm0, %v5628_v16  ;;  %v4214_v22 = vadd.f32 %v4213_v21, %v12499_v44  ;;  %v5067_v30 = vpop.f32.mrb[18].mxu1  ;;  %v4215_v54 = vpop.f32.mrb[21].mxu0 }
 0x582   : >> { %v5245_v63 = vmax.f32 %v5197_v48, 0.0  ;;  %v5142_v2 = vadd.f32 %v5067_v30, %v4209_v50  ;;  %v5069_v10 = vpop.f32.mrb[19].mxu1 }
 0x584   : >> { %v5629_v11 = vsel %vm5581_vm4, %v5245_v63, 0.0  ;;  %v5198_v17 = vadd.f32 %v12514_v42, %v5142_v2  ;;  %v4218_v28 = vpop.f32.mrb[22].mxu0 }
 0x585   : >> { %5677 = vst.msk [vmem:[#allocation2 + $0x160] sm:$0xff] %vm301_vm0, %v5629_v11  ;;  %v4219_v23 = vadd.f32 %v4218_v28, %v12501_v59  ;;  %v5072_v6 = vpop.f32.mrb[20].mxu1  ;;  %v4220_v47 = vpop.f32.mrb[23].mxu0  ;;  %v5733_v11 = vld [vmem:[#allocation2 + $0x8] sm:$0xff] (%p347_p7)  ;;  %v5734_v28 = vld [vmem:[#allocation2 + $0x10] sm:$0xff] (%p347_p7) }
 0x586   : >> { %v5246_v58 = vmax.f32 %v5198_v17, 0.0  ;;  %v5143_v53 = vadd.f32 %v5072_v6, %v4214_v22  ;;  %v5074_v44 = vpop.f32.mrb[21].mxu1  ;;  %v5736_v17 = vld [vmem:[#allocation2 + $0x20] sm:$0xff] (%p347_p7)  ;;  %v5737_v6 = vld [vmem:[#allocation2 + $0x28] sm:$0xff] (%p347_p7)  ;;  %v5735_v47 = vld [vmem:[#allocation2 + $0x18] sm:$0xff] (%p347_p7) }
 0x587   : > { %v9362_v18 = vpack.i.bf16 (%p347_p7), %v5737_v6, %v5734_v28  ;;  %v6133_v6 = vld [vmem:[#allocation12 + $0x138] sm:$0xff] (%p347_p7) }
 0x588   : >> { %v5630_v45 = vsel %vm5582_vm5, %v5246_v58, 0.0  ;;  %v5199_v15 = vadd.f32 %v12514_v42, %v5143_v53  ;;  %v4223_v3 = vpop.f32.mrb[24].mxu0  ;;  %v5738_v58 = vld [vmem:[#allocation2 + $0x30] sm:$0xff] (%p347_p7)  ;;  %v9757_v53 = vmov (%p347_p7), 0.0|0.0  }
 0x589   : >> { %5678 = vst.msk [vmem:[#allocation2 + $0x168] sm:$0xff] %vm301_vm0, %v5630_v45  ;;  %v4224_v29 = vadd.f32 %v4223_v3, %v12503_v37  ;;  %v5077_v61 = vpop.f32.mrb[22].mxu1  ;;  %v4225_v33 = vpop.f32.mrb[25].mxu0  ;;  %8882 = vmatprep.subr.bf16.mxu1 (%p347_p7), %v9757_v53  ;;  %8918 = vmatprep.subr.bf16.mxu0 (%p347_p7), %v9757_v53  ;;  %v9367_v44 = vpack.i.bf16 (%p347_p7), %v5738_v58, %v5735_v47  ;;  %v12661_v45 = vld [vmem:[#allocation2 + $0x38] sm:$0xff] (%p347_p7)  ;;  %v6083_v47 = vld [vmem:[#allocation12 + $0x70] sm:$0xff] (%p347_p7)  ;;  %v6084_v58 = vld [vmem:[#allocation12 + $0x78] sm:$0xff] (%p347_p7) }
 0x58a   : >> { %v5247_v56 = vmax.f32 %v5199_v15, 0.0  ;;  %v5144_v59 = vadd.f32 %v5077_v61, %v4219_v23  ;;  %v5079_v46 = vpop.f32.mrb[23].mxu1  ;;  %v9357_v23 = vpack.i.bf16 (%p347_p7), %v5736_v17, %v5733_v11  ;;  %v6118_v15 = vld [vmem:[#allocation12 + $0xc0] sm:$0xff] (%p347_p7)  ;;  %v6119_v3 = vld [vmem:[#allocation12 + $0xc8] sm:$0xff] (%p347_p7)  ;;  %v12666_v33 = vld [vmem:[#allocation2 + $0x40] sm:$0xff] (%p347_p7) }
 0x58b   : > { %9368 = vrot.lane.b32.xlu1 (%p347_p7), %v9367_v44, %s9758_s16  ;;  %v6070_v61 = vld [vmem:[#allocation12 + $0x8] sm:$0xff] (%p347_p7)  ;;  %v6120_v46 = vld [vmem:[#allocation12 + $0xd0] sm:$0xff] (%p347_p7) }
 0x58c   : >> { %v5631_v25 = vsel %vm5583_vm6, %v5247_v56, 0.0  ;;  %v5200_v43 = vadd.f32 %v9356_v36, %v5144_v59  ;;  %v4228_v35 = vpop.f32.mrb[26].mxu0  ;;  %9358 = vrot.lane.b32.xlu0 (%p347_p7), %v9357_v23, %s9758_s16  ;;  %v8883_v56 = vpack.c.bf16 (%p347_p7), %v6119_v3, %v6118_v15  ;;  %v12737_v11 = vld [vmem:[#allocation2 + $0x98] sm:$0xff] (%p347_p7)  ;;  %v6132_v23 = vld [vmem:[#allocation12 + $0x130] sm:$0xff] (%p347_p7)  ;;  %v12756_v3 = vpack.c.bf16 (%p347_p7), %v6084_v58, %v6083_v47  ;;  %v12828_v58 = vld [vmem:[#allocation2 + $0x108] sm:$0xff] (%p347_p7) }
 0x58d   : >> { %5679 = vst.msk [vmem:[#allocation2 + $0x170] sm:$0xff] %vm301_vm0, %v5631_v25  ;;  %v4229_v42 = vadd.f32 %v4228_v35, %v12505_v7  ;;  %v5082_v24 = vpop.f32.mrb[24].mxu1  ;;  %v4230_v60 = vpop.f32.mrb[27].mxu0  ;;  %v12670_v25 = vld [vmem:[#allocation2 + $0x48] sm:$0xff] (%p347_p7)  ;;  %v8886_v35 = vpack.c.bf16 (%p347_p7), %v6121_v34, %v6120_v46  ;;  %v12750_v44 = vld [vmem:[#allocation2 + $0xa0] sm:$0xff] (%p347_p7)  ;;  %v8904_v15 = vpack.c.bf16 (%p347_p7), %v6133_v6, %v6132_v23  ;;  %v6086_v46 = vld [vmem:[#allocation12 + $0x88] sm:$0xff] (%p347_p7) }
 0x58e   : >> { %v5248_v1 = vmax.f32 %v5200_v43, 0.0  ;;  %v5145_v19 = vadd.f32 %v5082_v24, %v4224_v29  ;;  %v5084_v37 = vpop.f32.mrb[25].mxu1  ;;  %v5534_v7 = vpop.permute.xlu0 %5533  ;;  %v6069_v29 = vld [vmem:[#allocation12] sm:$0xff] (%p347_p7)  ;;  %v6072_v43 = vld [vmem:[#allocation12 + $0x18] sm:$0xff] (%p347_p7)  ;;  %8884 = vmatpush1.bf16.msra.mxu1 (%p347_p7), %v8883_v56  ;;  %v6123_v60 = vld [vmem:[#allocation12 + $0xe8] sm:$0xff] (%p347_p7) }
 0x58f   : >> { %vm5586_vm9 = vcmp.eq.s32.totalorder %v5534_v7, 1  ;;  %5889 = vrot.lane.b32.xlu1 (%p347_p7), %v12661_v45, %s9758_s16  ;;  %v12668_v59 = vpack.c.bf16 (%p347_p7), %v6070_v61, %v6069_v29  ;;  %v6122_v24 = vld [vmem:[#allocation12 + $0xe0] sm:$0xff] (%p347_p7)  ;;  %8885 = vmatprep.subr.bf16.mxu1 (%p347_p7), %v9757_v53  ;;  %v6135_v61 = vld [vmem:[#allocation12 + $0x148] sm:$0xff] (%p347_p7)  ;;  %v12825_v47 = vld [vmem:[#allocation2 + $0x100] sm:$0xff] (%p347_p7) }
 0x590   : >> { %v5632_v39 = vsel %vm5584_vm7, %v5248_v1, 0.0  ;;  %v5201_v55 = vadd.f32 %v9356_v36, %v5145_v19  ;;  %v4233_v31 = vpop.f32.mrb[28].mxu0  ;;  %9363 = vrot.lane.b32.xlu0 (%p347_p7), %v9362_v18, %s9758_s16  ;;  %v6073_v1 = vld [vmem:[#allocation12 + $0x20] sm:$0xff] (%p347_p7)  ;;  %v6074_v19 = vld [vmem:[#allocation12 + $0x28] sm:$0xff] (%p347_p7)  ;;  %v12753_v18 = vld [vmem:[#allocation2 + $0xa8] sm:$0xff] (%p347_p7) }
 0x591   : >> { %5680 = vst.msk [vmem:[#allocation2 + $0x178] sm:$0xff] %vm301_vm0, %v5632_v39  ;;  %v4234_v5 = vadd.f32 %v4233_v31, %v14015_v40  ;;  %v5087_v12 = vpop.f32.mrb[26].mxu1  ;;  %v4235_v13 = vpop.f32.mrb[29].mxu0  ;;  %8920 = vmatpush1.bf16.msra.mxu0 (%p347_p7), %v12668_v59  ;;  %v12680_v37 = vld [vmem:[#allocation2 + $0x50] sm:$0xff] (%p347_p7)  ;;  %v8889_v39 = vpack.c.bf16 (%p347_p7), %v6123_v60, %v6122_v24  ;;  %v6124_v31 = vld [vmem:[#allocation12 + $0xf0] sm:$0xff] (%p347_p7)  ;;  %v6125_v40 = vld [vmem:[#allocation12 + $0xf8] sm:$0xff] (%p347_p7) }
 0x592   : >> { %v5249_v62 = vmax.f32 %v5201_v55, 0.0  ;;  %v5146_v14 = vadd.f32 %v5087_v12, %v4229_v42  ;;  %v5089_v27 = vpop.f32.mrb[27].mxu1  ;;  %v5540_v54 = vpop.permute.xlu0 %5539  ;;  %8921 = vmatprep.subr.bf16.mxu0 (%p347_p7), %v9757_v53  ;;  %8887 = vmatpush1.bf16.msra.mxu1 (%p347_p7), %v8886_v35  ;;  %v12686_v55 = vpack.c.bf16 (%p347_p7), %v6074_v19, %v6073_v1  ;;  %v6076_v12 = vld [vmem:[#allocation12 + $0x38] sm:$0xff] (%p347_p7)  ;;  %v12693_v13 = vld [vmem:[#allocation2 + $0x60] sm:$0xff] (%p347_p7)  ;;  %v6126_v7 = vld [vmem:[#allocation12 + $0x100] sm:$0xff] (%p347_p7) }
 0x593   : >> { %vm5588_vm11 = vcmp.eq.s32.totalorder %v5540_v54, 1  ;;  %5893 = vrot.lane.b32.xlu1 (%p347_p7), %v12670_v25, %s9758_s16  ;;  %8888 = vmatprep.subr.bf16.mxu1 (%p347_p7), %v9757_v53  ;;  %v6081_v54 = vld [vmem:[#allocation12 + $0x60] sm:$0xff] (%p347_p7)  ;;  %v6136_v24 = vld [vmem:[#allocation12 + $0x150] sm:$0xff] (%p347_p7)  ;;  %v6137_v60 = vld [vmem:[#allocation12 + $0x158] sm:$0xff] (%p347_p7) }
 0x594   : >> { %v5633_v38 = vsel %vm5585_vm8, %v5249_v62, 0.0  ;;  %v5202_v57 = vadd.f32 %v9356_v36, %v5146_v14  ;;  %v4238_v4 = vpop.f32.mrb[30].mxu0  ;;  %5891 = vrot.lane.b32.xlu0 (%p347_p7), %v12666_v33, %s9758_s16  ;;  %v12696_v62 = vld [vmem:[#allocation2 + $0x68] sm:$0xff] (%p347_p7)  ;;  %v8892_v14 = vpack.c.bf16 (%p347_p7), %v6125_v40, %v6124_v31  ;;  %v6134_v29 = vld [vmem:[#allocation12 + $0x140] sm:$0xff] (%p347_p7)  ;;  %v6087_v1 = vld [vmem:[#allocation12 + $0x90] sm:$0xff] (%p347_p7)  ;;  %v8910_v40 = vpack.c.bf16 (%p347_p7), %v6137_v60, %v6136_v24 }
 0x595   : >> { %5681 = vst.msk [vmem:[#allocation2 + $0x180] sm:$0xff] %vm301_vm0, %v5633_v38  ;;  %v4239_v49 = vadd.f32 %v4238_v4, %v14016_v51  ;;  %v5092_v50 = vpop.f32.mrb[28].mxu1  ;;  %v4240_v20 = vpop.f32.mrb[31].mxu0  ;;  %v6127_v38 = vld [vmem:[#allocation12 + $0x108] sm:$0xff] (%p347_p7)  ;;  %v12706_v51 = vld [vmem:[#allocation2 + $0x70] sm:$0xff] (%p347_p7)  ;;  %v6088_v19 = vld [vmem:[#allocation12 + $0x98] sm:$0xff] (%p347_p7) }
 0x596   : >> { %v5250_v0 = vmax.f32 %v5202_v57, 0.0  ;;  %v5147_v26 = vadd.f32 %v5092_v50, %v4234_v5  ;;  %v5094_v32 = vpop.f32.mrb[29].mxu1  ;;  %v6075_v5 = vld [vmem:[#allocation12 + $0x30] sm:$0xff] (%p347_p7)  ;;  %8890 = vmatpush1.bf16.msra.mxu1 (%p347_p7), %v8889_v39  ;;  %v6077_v57 = vld [vmem:[#allocation12 + $0x40] sm:$0xff] (%p347_p7)  ;;  %v6078_v4 = vld [vmem:[#allocation12 + $0x48] sm:$0xff] (%p347_p7)  ;;  %v8895_v50 = vpack.c.bf16 (%p347_p7), %v6127_v38, %v6126_v7 }
 0x597   : > { %5897 = vrot.lane.b32.xlu1 (%p347_p7), %v12683_v8, %s9758_s16  ;;  %v12699_v27 = vpack.c.bf16 (%p347_p7), %v6076_v12, %v6075_v5  ;;  %8891 = vmatprep.subr.bf16.mxu1 (%p347_p7), %v9757_v53  ;;  %v12712_v20 = vpack.c.bf16 (%p347_p7), %v6078_v4, %v6077_v57  ;;  %v6079_v32 = vld [vmem:[#allocation12 + $0x50] sm:$0xff] (%p347_p7)  ;;  %v6085_v56 = vld [vmem:[#allocation12 + $0x80] sm:$0xff] (%p347_p7)  ;;  %v12779_v31 = vld [vmem:[#allocation2 + $0xc8] sm:$0xff] (%p347_p7)  ;;  %v12782_v5 = vpack.c.bf16 (%p347_p7), %v6088_v19, %v6087_v1 }
 0x598   : >> { %v5634_v9 = vsel %vm5586_vm9, %v5250_v0, 0.0  ;;  %v5203_v16 = vadd.f32 %v9356_v36, %v5147_v26  ;;  %5895 = vrot.lane.b32.xlu0 (%p347_p7), %v12680_v37, %s9758_s16  ;;  %v6128_v0 = vld [vmem:[#allocation12 + $0x110] sm:$0xff] (%p347_p7)  ;;  %v6129_v26 = vld [vmem:[#allocation12 + $0x118] sm:$0xff] (%p347_p7)  ;;  %v12763_v34 = vld [vmem:[#allocation2 + $0xb0] sm:$0xff] (%p347_p7)  ;;  %v12769_v35 = vpack.c.bf16 (%p347_p7), %v6086_v46, %v6085_v56 }
 0x599   : >> { %5682 = vst.msk [vmem:[#allocation2 + $0x188] sm:$0xff] %vm301_vm0, %v5634_v9  ;;  %v5097_v48 = vpop.f32.mrb[30].mxu1  ;;  %v12719_v9 = vld [vmem:[#allocation2 + $0x80] sm:$0xff] (%p347_p7)  ;;  %v6138_v12 = vld [vmem:[#allocation12 + $0x160] sm:$0xff] (%p347_p7)  ;;  %v6090_v38 = vld [vmem:[#allocation12 + $0xa8] sm:$0xff] (%p347_p7) }
 0x59a   : >> { %v5251_v21 = vmax.f32 %v5203_v16, 0.0  ;;  %v5148_v22 = vadd.f32 %v5097_v48, %v4239_v49  ;;  %v5099_v30 = vpop.f32.mrb[31].mxu1  ;;  %v12709_v49 = vld [vmem:[#allocation2 + $0x78] sm:$0xff] (%p347_p7)  ;;  %8893 = vmatpush1.bf16.msra.mxu1 (%p347_p7), %v8892_v14  ;;  %v12722_v16 = vld [vmem:[#allocation2 + $0x88] sm:$0xff] (%p347_p7)  ;;  %v8898_v48 = vpack.c.bf16 (%p347_p7), %v6129_v26, %v6128_v0  ;;  %v12776_v39 = vld [vmem:[#allocation2 + $0xc0] sm:$0xff] (%p347_p7) }
 0x59b   : > { %349 = sbr.rel (!%p347_p7) target bundleno = 189 (0xbd), region = 168  ;;  %5901 = vrot.lane.b32.xlu1 (%p347_p7), %v12696_v62, %s9758_s16  ;;  %8894 = vmatprep.subr.bf16.mxu1 (%p347_p7), %v9757_v53  ;;  %v6131_v30 = vld [vmem:[#allocation12 + $0x128] sm:$0xff] (%p347_p7)  ;;  %v6089_v7 = vld [vmem:[#allocation12 + $0xa0] sm:$0xff] (%p347_p7)  ;;  %v12791_v4 = vld [vmem:[#allocation2 + $0xe0] sm:$0xff] (%p347_p7) }
 0x59c   : >> { %v5635_v63 = vsel %vm5587_vm10, %v5251_v21, 0.0  ;;  %v5204_v2 = vadd.f32 %v9356_v36, %v5148_v22  ;;  %v6071_v36 = vld [vmem:[#allocation12 + $0x10] sm:$0xff] (%p347_p7)  ;;  %5899 = vrot.lane.b32.xlu0 (%p347_p7), %v12693_v13, %s9758_s16  ;;  %v12725_v21 = vpack.c.bf16 (%p347_p7), %v6080_v41, %v6079_v32  ;;  %v6130_v22 = vld [vmem:[#allocation12 + $0x120] sm:$0xff] (%p347_p7)  ;;  %v6139_v14 = vld [vmem:[#allocation12 + $0x168] sm:$0xff] (%p347_p7)  ;;  %v12799_v32 = vpack.c.bf16 (%p347_p7), %v6090_v38, %v6089_v7 }
 0x59d   : >> { %5683 = vst.msk [vmem:[#allocation2 + $0x190] sm:$0xff] %vm301_vm0, %v5635_v63  ;;  %v12673_v42 = vpack.c.bf16 (%p347_p7), %v6072_v43, %v6071_v36  ;;  %v6082_v63 = vld [vmem:[#allocation12 + $0x68] sm:$0xff] (%p347_p7)  ;;  %v8901_v17 = vpack.c.bf16 (%p347_p7), %v6131_v30, %v6130_v22  ;;  %v8907_v43 = vpack.c.bf16 (%p347_p7), %v6135_v61, %v6134_v29  ;;  %v12789_v57 = vld [vmem:[#allocation2 + $0xd0] sm:$0xff] (%p347_p7)  ;;  %v12796_v0 = vld [vmem:[#allocation2 + $0xe8] sm:$0xff] (%p347_p7)  ;;  %v8913_v26 = vpack.c.bf16 (%p347_p7), %v6139_v14, %v6138_v12 }
 0x59e   : >> { %v5252_v10 = vmax.f32 %v5204_v2, 0.0  ;;  %8896 = vmatpush1.bf16.msra.mxu1 (%p347_p7), %v8895_v50  ;;  %v12730_v2 = vld [vmem:[#allocation2 + $0x21] sm:$0xff] (%p347_p7)  ;;  %v12743_v28 = vpack.c.bf16 (%p347_p7), %v6082_v63, %v6081_v54  ;;  %v12766_v36 = vld [vmem:[#allocation2 + $0xb8] sm:$0xff] (%p347_p7)  ;;  %v9377_v63 = vpack.i.bf16 (%p347_p7), %v12666_v33, %v12796_v0  ;;  %v5770_v24 = vld [vmem:[#allocation2 + $0x130] sm:$0xff] (%p347_p7) }
 0x59f   : > { %8923 = vmatpush1.bf16.msra.mxu0 (%p347_p7), %v12673_v42  ;;  %5905 = vrot.lane.b32.xlu1 (%p347_p7), %v12709_v49, %s9758_s16  ;;  %v12794_v50 = vld [vmem:[#allocation2 + $0xd8] sm:$0xff] (%p347_p7)  ;;  %v6140_v41 = vld [vmem:[#allocation12 + $0x170] sm:$0xff] (%p347_p7)  ;;  %v6141_v22 = vld [vmem:[#allocation12 + $0x178] sm:$0xff] (%p347_p7) }
 0x5a0   : >> { %v5636_v52 = vsel %vm5588_vm11, %v5252_v10, 0.0  ;;  %8924 = vmatprep.subr.bf16.mxu0 (%p347_p7), %v9757_v53  ;;  %5903 = vrot.lane.b32.xlu0 (%p347_p7), %v12706_v51, %s9758_s16  ;;  %v5781_v10 = vld [vmem:[#allocation2 + $0x9] sm:$0xff] (%p347_p7)  ;;  %v6091_v30 = vld [vmem:[#allocation12 + $0xb0] sm:$0xff] (%p347_p7)  ;;  %v5767_v29 = vld [vmem:[#allocation2 + $0x118] sm:$0xff] (%p347_p7) }
 0x5a1   : >> { %5684 = vst.msk [vmem:[#allocation2 + $0x198] sm:$0xff] %vm301_vm0, %v5636_v52  ;;  %8897 = vmatprep.subr.bf16.mxu1 (%p347_p7), %v9757_v53  ;;  %v12734_v52 = vld [vmem:[#allocation2 + $0x90] sm:$0xff] (%p347_p7)  ;;  %8512 = vmatprep.mubr.msk.f32.mxu1 (%p347_p7), %vm301_vm0, %v12730_v2  ;;  %v6092_v54 = vld [vmem:[#allocation12 + $0xb8] sm:$0xff] (%p347_p7)  ;;  %v9407_v56 = vpack.i.bf16 (%p347_p7), %v12706_v51, %v5767_v29  ;;  %v5771_v60 = vld [vmem:[#allocation2 + $0x138] sm:$0xff] (%p347_p7) }
 0x5a2   : > { %8560 = vmatprep.mubr.msk.f32.mxu0 %vm301_vm0, %v5781_v10  ;;  %8899 = vmatpush1.bf16.msra.mxu1 %v8898_v48  ;;  %v9372_v48 = vpack.i.bf16 %v12661_v45, %v12791_v4  ;;  %v12810_v10 = vld [vmem:[#allocation2 + $0xf0] sm:$0xff]  ;;  %v8916_v45 = vpack.c.bf16 %v6141_v22, %v6140_v41  ;;  %v12816_v23 = vpack.c.bf16 %v6092_v54, %v6091_v30  ;;  %v5769_v46 = vld [vmem:[#allocation2 + $0x128] sm:$0xff]  ;;  %v5772_v1 = vld [vmem:[#allocation2 + $0x140] sm:$0xff] }
 0x5a3   : > { %8926 = vmatpush1.bf16.msra.mxu0 %v12686_v55  ;;  %5909 = vrot.lane.b32.xlu1 %v12722_v16, %s9758_s16  ;;  %v9382_v6 = vpack.i.bf16 %v12670_v25, %v12810_v10  ;;  %v9392_v25 = vpack.i.bf16 %v12683_v8, %v12825_v47  ;;  %v5768_v8 = vld [vmem:[#allocation2 + $0x120] sm:$0xff]  ;;  %v9427_v51 = vpack.i.bf16 %v12734_v52, %v5771_v60  ;;  %v5773_v19 = vld [vmem:[#allocation2 + $0x148] sm:$0xff]  ;;  %v12855_v12 = vld [vmem:[#allocation2 + $0x158] sm:$0xff] }
 0x5a4   : > { %8927 = vmatprep.subr.bf16.mxu0 %v9757_v53  ;;  %5907 = vrot.lane.b32.xlu0 %v12719_v9, %s9758_s16  ;;  %v12862_v14 = vld [vmem:[#allocation2 + $0x160] sm:$0xff]  ;;  %v12864_v7 = vld [vmem:[#allocation2 + $0x168] sm:$0xff]  ;;  %v12874_v38 = vld [vmem:[#allocation2 + $0x178] sm:$0xff] }
 0x5a5   : > { %8900 = vmatprep.subr.bf16.mxu1 %v9757_v53  ;;  %v12884_v41 = vld [vmem:[#allocation2 + $0x188] sm:$0xff]  ;;  %v5688_v54 = vld [vmem:[#allocation2 + $0x1f] sm:$0xff] }
 0x5a6   : > { %8902 = vmatpush1.bf16.msra.mxu1 %v8901_v17  ;;  %v12813_v17 = vld [vmem:[#allocation2 + $0xf8] sm:$0xff] }
 0x5a7   : > { %8929 = vmatpush1.bf16.msra.mxu0 %v12699_v27  ;;  %5913 = vrot.lane.b32.xlu1 %v12737_v11, %s9758_s16  ;;  %v9387_v33 = vpack.i.bf16 %v12680_v37, %v12813_v17  ;;  %v9397_v37 = vpack.i.bf16 %v12693_v13, %v12828_v58  ;;  %v9417_v13 = vpack.i.bf16 %v12719_v9, %v5769_v46 }
 0x5a8   : > { %8930 = vmatprep.subr.bf16.mxu0 %v9757_v53  ;;  %5911 = vrot.lane.b32.xlu0 %v12734_v52, %s9758_s16  ;;  %v9437_v9 = vpack.i.bf16 %v12750_v44, %v5773_v19  ;;  %v9447_v52 = vpack.i.bf16 %v12763_v34, %v12855_v12  ;;  %v12894_v22 = vld [vmem:[#allocation2 + $0x198] sm:$0xff] }
 0x5a9   : > { %8903 = vmatprep.subr.bf16.mxu1 %v9757_v53  ;;  %v9487_v30 = vpack.i.bf16 %v12810_v10, %v12894_v22 }
 0x5aa   : > { %8905 = vmatpush1.bf16.msra.mxu1 %v8904_v15  ;;  %v5766_v15 = vld [vmem:[#allocation2 + $0x110] sm:$0xff] }
 0x5ab   : > { %8932 = vmatpush1.bf16.msra.mxu0 %v12712_v20  ;;  %5917 = vrot.lane.b32.xlu1 %v12753_v18, %s9758_s16  ;;  %v9402_v61 = vpack.i.bf16 %v12696_v62, %v5766_v15  ;;  %v9422_v62 = vpack.i.bf16 %v12722_v16, %v5770_v24 }
 0x5ac   : > { %8933 = vmatprep.subr.bf16.mxu0 %v9757_v53  ;;  %5915 = vrot.lane.b32.xlu0 %v12750_v44, %s9758_s16  ;;  %v9457_v44 = vpack.i.bf16 %v12776_v39, %v12864_v7 }
 0x5ad   : > { %8906 = vmatprep.subr.bf16.mxu1 %v9757_v53 }
 0x5ae   : > { %8908 = vmatpush1.bf16.msra.mxu1 %v8907_v43  ;;  %v9412_v43 = vpack.i.bf16 %v12709_v49, %v5768_v8  ;;  %v9432_v49 = vpack.i.bf16 %v12737_v11, %v5772_v1  ;;  %v9452_v11 = vpack.i.bf16 %v12766_v36, %v12862_v14 }
 0x5af   : > { %8935 = vmatpush1.bf16.msra.mxu0 %v12725_v21  ;;  %5921 = vrot.lane.b32.xlu1 %v12766_v36, %s9758_s16  ;;  %v12882_v36 = vld [vmem:[#allocation2 + $0x180] sm:$0xff] }
 0x5b0   : > { %8936 = vmatprep.subr.bf16.mxu0 %v9757_v53  ;;  %5919 = vrot.lane.b32.xlu0 %v12763_v34, %s9758_s16 }
 0x5b1   : > { %8909 = vmatprep.subr.bf16.mxu1 %v9757_v53 }
 0x5b2   : > { %8911 = vmatpush1.bf16.msra.mxu1 %v8910_v40  ;;  %v5774_v40 = vld [vmem:[#allocation2 + $0x150] sm:$0xff] }
 0x5b3   : > { %8938 = vmatpush1.bf16.msra.mxu0 %v12743_v28  ;;  %5925 = vrot.lane.b32.xlu1 %v12779_v31, %s9758_s16  ;;  %v9442_v16 = vpack.i.bf16 %v12753_v18, %v5774_v40  ;;  %v12872_v18 = vld [vmem:[#allocation2 + $0x170] sm:$0xff] }
 0x5b4   : > { %8939 = vmatprep.subr.bf16.mxu0 %v9757_v53  ;;  %5923 = vrot.lane.b32.xlu0 %v12776_v39, %s9758_s16  ;;  %v9462_v34 = vpack.i.bf16 %v12779_v31, %v12872_v18  ;;  %v9472_v39 = vpack.i.bf16 %v12794_v50, %v12882_v36  ;;  %v12892_v31 = vld [vmem:[#allocation2 + $0x190] sm:$0xff] }
 0x5b5   : > { %8912 = vmatprep.subr.bf16.mxu1 %v9757_v53 }
 0x5b6   : > { %8914 = vmatpush1.bf16.msra.mxu1 %v8913_v26  ;;  %v9467_v26 = vpack.i.bf16 %v12789_v57, %v12874_v38 }
 0x5b7   : > { %8941 = vmatpush1.bf16.msra.mxu0 %v12756_v3  ;;  %5929 = vrot.lane.b32.xlu1 %v12794_v50, %s9758_s16  ;;  %v7291_v50 = vld [vmem:[#allocation12 + $0x188] sm:$0xff] }
 0x5b8   : > { %8942 = vmatprep.subr.bf16.mxu0 %v9757_v53  ;;  %5927 = vrot.lane.b32.xlu0 %v12789_v57, %s9758_s16  ;;  %v9482_v57 = vpack.i.bf16 %v12796_v0, %v12892_v31 }
 0x5b9   : > { %8915 = vmatprep.subr.bf16.mxu1 %v9757_v53 }
 0x5ba   : > { %8917 = vmatpush1.bf16.msra.mxu1 %v8916_v45 }
 0x5bb   : > { %8944 = vmatpush1.bf16.msra.mxu0 %v12769_v35  ;;  %9378 = vrot.lane.b32.xlu1 %v9377_v63, %s9758_s16  ;;  %v5685_v63 = vld [vmem:[#allocation2 + $0x7] sm:$0xff] }
 0x5bc   : > { %8945 = vmatprep.subr.bf16.mxu0 %v9757_v53  ;;  %9373 = vrot.lane.b32.xlu0 %v9372_v48, %s9758_s16  ;;  %v9477_v48 = vpack.i.bf16 %v12791_v4, %v12884_v41  ;;  %v7290_v4 = vld [vmem:[#allocation12 + $0x180] sm:$0xff] }
 0x5bd   : > { %8990 = vmatprep.subr.bf16.mxu1 %v9757_v53  ;;  %v8955_v45 = vpack.c.bf16 %v7291_v50, %v7290_v4  ;;  %v7298_v50 = vld [vmem:[#allocation12 + $0x1c0] sm:$0xff] }
 0x5bf   : > { %8947 = vmatpush1.bf16.msra.mxu0 %v12782_v5  ;;  %9388 = vrot.lane.b32.xlu1 %v9387_v33, %s9758_s16 }
 0x5c0   : > { %8948 = vmatprep.subr.bf16.mxu0 %v9757_v53  ;;  %9383 = vrot.lane.b32.xlu0 %v9382_v6, %s9758_s16  ;;  %v12917_v6 = vld [vmem:[#allocation2 + $0x29] sm:$0xff] }
 0x5c3   : > { %8950 = vmatpush1.bf16.msra.mxu0 %v12799_v32  ;;  %9398 = vrot.lane.b32.xlu1 %v9397_v37, %s9758_s16  ;;  %v7292_v37 = vld [vmem:[#allocation12 + $0x190] sm:$0xff] }
 0x5c4   : > { %8951 = vmatprep.subr.bf16.mxu0 %v9757_v53  ;;  %9393 = vrot.lane.b32.xlu0 %v9392_v25, %s9758_s16  ;;  %v5782_v25 = vld [vmem:[#allocation2 + $0x11] sm:$0xff] }
 0x5c7   : > { %8953 = vmatpush1.bf16.msra.mxu0 %v12816_v23  ;;  %9408 = vrot.lane.b32.xlu1 %v9407_v56, %s9758_s16  ;;  %v5686_v56 = vld [vmem:[#allocation2 + $0xf] sm:$0xff] }
 0x5c8   : > { %8954 = vmatprep.subr.bf16.mxu0 %v9757_v53  ;;  %9403 = vrot.lane.b32.xlu0 %v9402_v61, %s9758_s16  ;;  %v5689_v61 = vld [vmem:[#allocation2 + $0x27] sm:$0xff] }
 0x5cb   : > { %9418 = vrot.lane.b32.xlu1 %v9417_v13, %s9758_s16 }
 0x5cc   : > { %9413 = vrot.lane.b32.xlu0 %v9412_v43, %s9758_s16 }
 0x5cf   : > { %9428 = vrot.lane.b32.xlu1 %v9427_v51, %s9758_s16  ;;  %v5687_v51 = vld [vmem:[#allocation2 + $0x17] sm:$0xff] }
 0x5d0   : > { %9423 = vrot.lane.b32.xlu0 %v9422_v62, %s9758_s16  ;;  %v5690_v62 = vld [vmem:[#allocation2 + $0x2f] sm:$0xff] }
 0x5d3   : > { %9438 = vrot.lane.b32.xlu1 %v9437_v9, %s9758_s16  ;;  %v7295_v9 = vld [vmem:[#allocation12 + $0x1a8] sm:$0xff] }
 0x5d4   : > { %9433 = vrot.lane.b32.xlu0 %v9432_v49, %s9758_s16 }
 0x5d7   : > { %9448 = vrot.lane.b32.xlu1 %v9447_v52, %s9758_s16 }
 0x5d8   : > { %9443 = vrot.lane.b32.xlu0 %v9442_v16, %s9758_s16 }
 0x5db   : > { %9458 = vrot.lane.b32.xlu1 %v9457_v44, %s9758_s16  ;;  %v12940_v44 = vld [vmem:[#allocation2 + $0x39] sm:$0xff] }
 0x5dc   : > { %9453 = vrot.lane.b32.xlu0 %v9452_v11, %s9758_s16  ;;  %v12938_v11 = vld [vmem:[#allocation2 + $0x37] sm:$0xff] }
 0x5df   : > { %9468 = vrot.lane.b32.xlu1 %v9467_v26, %s9758_s16  ;;  %v7296_v26 = vld [vmem:[#allocation12 + $0x1b0] sm:$0xff] }
 0x5e0   : > { %9463 = vrot.lane.b32.xlu0 %v9462_v34, %s9758_s16 }
 0x5e3   : > { %9478 = vrot.lane.b32.xlu1 %v9477_v48, %s9758_s16 }
 0x5e4   : > { %9473 = vrot.lane.b32.xlu0 %v9472_v39, %s9758_s16  ;;  %v7297_v39 = vld [vmem:[#allocation12 + $0x1b8] sm:$0xff] }
 0x5e5   : > { %v8964_v4 = vpack.c.bf16 %v7297_v39, %v7296_v26  ;;  %v7311_v39 = vld [vmem:[#allocation12 + $0x228] sm:$0xff] }
 0x5e7   : > { %9488 = vrot.lane.b32.xlu1 %v9487_v30, %s9758_s16  ;;  %v12953_v30 = vld [vmem:[#allocation2 + $0x41] sm:$0xff] }
 0x5e8   : > { %9483 = vrot.lane.b32.xlu0 %v9482_v57, %s9758_s16 }
 0x5eb   : > { %7147 = vrot.lane.b32.xlu1 %v12825_v47, %s9758_s16 }
 0x5ec   : > { %7145 = vrot.lane.b32.xlu0 %v12813_v17, %s9758_s16 }
 0x5ef   : > { %7151 = vrot.lane.b32.xlu1 %v5766_v15, %s9758_s16  ;;  %v7293_v15 = vld [vmem:[#allocation12 + $0x198] sm:$0xff] }
 0x5f0   : > { %7149 = vrot.lane.b32.xlu0 %v12828_v58, %s9758_s16 }
 0x5f3   : > { %7155 = vrot.lane.b32.xlu1 %v5768_v8, %s9758_s16 }
 0x5f4   : > { %7153 = vrot.lane.b32.xlu0 %v5767_v29, %s9758_s16 }
 0x5f7   : > { %7159 = vrot.lane.b32.xlu1 %v5770_v24, %s9758_s16  ;;  %v12924_v24 = vld [vmem:[#allocation2 + $0x31] sm:$0xff] }
 0x5f8   : > { %7157 = vrot.lane.b32.xlu0 %v5769_v46, %s9758_s16 }
 0x5fb   : > { %7163 = vrot.lane.b32.xlu1 %v5772_v1, %s9758_s16  ;;  %v8958_v1 = vpack.c.bf16 %v7293_v15, %v7292_v37  ;;  %v7303_v37 = vld [vmem:[#allocation12 + $0x1e8] sm:$0xff] }
 0x5fc   : > { %7161 = vrot.lane.b32.xlu0 %v5771_v60, %s9758_s16  ;;  %v5783_v60 = vld [vmem:[#allocation2 + $0x19] sm:$0xff] }
 0x5fd   : > { %v9369_v33 = vpop.permute.xlu1 %9368 }
 0x5fe   : > { %v9359_v0 = vpop.permute.xlu0 %9358  ;;  %v9371_v43 = vunpack.i.h.bf16 %v9369_v33  ;;  %v9370_v13 = vunpack.i.l.bf16 %v9369_v33 }
 0x5ff   : > { %v9361_v10 = vunpack.i.h.bf16 %v9359_v0  ;;  %v9360_v17 = vunpack.i.l.bf16 %v9359_v0  ;;  %7167 = vrot.lane.b32.xlu1 %v5774_v40, %s9758_s16  ;;  %v7299_v0 = vld [vmem:[#allocation12 + $0x1c8] sm:$0xff] }
 0x600   : > { %7165 = vrot.lane.b32.xlu0 %v5773_v19, %s9758_s16  ;;  %v6026_v40 = vsel %vm301_vm0, %v5690_v62, %v9371_v43  ;;  %v6023_v16 = vsel %vm301_vm0, %v5687_v51, %v9370_v13  ;;  %v7306_v62 = vld [vmem:[#allocation12 + $0x200] sm:$0xff]  ;;  %v7307_v51 = vld [vmem:[#allocation12 + $0x208] sm:$0xff] }
 0x601   : > { %v6024_v47 = vsel %vm301_vm0, %v5688_v54, %v9361_v10  ;;  %v6021_v58 = vsel %vm301_vm0, %v5685_v63, %v9360_v17  ;;  %v5890_v52 = vpop.permute.xlu1 %5889  ;;  %v12964_v63 = vld [vmem:[#allocation2 + $0x47] sm:$0xff]  ;;  %v8967_v10 = vpack.c.bf16 %v7299_v0, %v7298_v50  ;;  %v13046_v50 = vld [vmem:[#allocation2 + $0x79] sm:$0xff] }
 0x602   : > { %v9364_v29 = vpop.permute.xlu0 %9363  ;;  %6351 = vmatmul.mubr.f32.vlgmr.msra.gmra.mrb[0].mxu1 %v6024_v47  ;;  %6665 = vmatmul.mubr.f32.vlgmr.msra.gmra.mrb[0].mxu0 %v6021_v58  ;;  %v6027_v48 = vsel %vm301_vm0, %v12938_v11, %v5890_v52  ;;  %v7300_v17 = vld [vmem:[#allocation12 + $0x1d0] sm:$0xff] }
 0x603   : > { %v9366_v8 = vunpack.i.h.bf16 %v9364_v29  ;;  %v9365_v46 = vunpack.i.l.bf16 %v9364_v29  ;;  %9002 = vmatpush1.bf16.msra.mxu1 %v12668_v59  ;;  %8956 = vmatpush1.bf16.msra.mxu0 %v8955_v45  ;;  %v7294_v59 = vld [vmem:[#allocation12 + $0x1a0] sm:$0xff]  ;;  %v7301_v45 = vld [vmem:[#allocation12 + $0x1d8] sm:$0xff] }
 0x604   : > { %8513 = vmatprep.mubr.msk.f32.mxu1 %vm301_vm0, %v12917_v6  ;;  %8561 = vmatprep.mubr.msk.f32.mxu0 %vm301_vm0, %v5782_v25  ;;  %v8961_v34 = vpack.c.bf16 %v7295_v9, %v7294_v59  ;;  %v8970_v58 = vpack.c.bf16 %v7301_v45, %v7300_v17  ;;  %v7302_v25 = vld [vmem:[#allocation12 + $0x1e0] sm:$0xff]  ;;  %v8979_v59 = vpack.c.bf16 %v7307_v51, %v7306_v62  ;;  %v7308_v9 = vld [vmem:[#allocation12 + $0x210] sm:$0xff] }
 0x605   : > { %v6025_v19 = vsel %vm301_vm0, %v5689_v61, %v9366_v8  ;;  %v6022_v49 = vsel %vm301_vm0, %v5686_v56, %v9365_v46  ;;  %8957 = vmatprep.subr.bf16.mxu0 %v9757_v53  ;;  %8991 = vmatprep.subr.bf16.mxu1 %v9757_v53  ;;  %v5894_v54 = vpop.permute.xlu1 %5893  ;;  %v12990_v61 = vld [vmem:[#allocation2 + $0x57] sm:$0xff]  ;;  %v8973_v56 = vpack.c.bf16 %v7303_v37, %v7302_v25  ;;  %v7304_v8 = vld [vmem:[#allocation12 + $0x1f0] sm:$0xff]  ;;  %v7305_v46 = vld [vmem:[#allocation12 + $0x1f8] sm:$0xff] }
 0x606   : > { %6356 = vmatmul.mubr.f32.gmra.mrb[2].mxu1 %v6025_v19  ;;  %6670 = vmatmul.mubr.f32.gmra.mrb[2].mxu0 %v6022_v49  ;;  %v5892_v57 = vpop.permute.xlu0 %5891  ;;  %v13016_v49 = vld [vmem:[#allocation2 + $0x67] sm:$0xff]  ;;  %v13087_v25 = vld [vmem:[#allocation2 + $0x8f] sm:$0xff] }
 0x607   : > { %8514 = vmatprep.mubr.msk.f32.mxu1 %vm301_vm0, %v12924_v24  ;;  %8562 = vmatprep.mubr.msk.f32.mxu0 %vm301_vm0, %v5783_v60  ;;  %v8976_v60 = vpack.c.bf16 %v7305_v46, %v7304_v8  ;;  %v13060_v17 = vld [vmem:[#allocation2 + $0x81] sm:$0xff]  ;;  %v13089_v37 = vld [vmem:[#allocation2 + $0x91] sm:$0xff] }
 0x608   : > { %8959 = vmatpush1.bf16.msra.mxu0 %v8958_v1  ;;  %9003 = vmatpush1.bf16.msra.mxu1 %v12673_v42  ;;  %v12951_v42 = vld [vmem:[#allocation2 + $0x3f] sm:$0xff]  ;;  %v13140_v51 = vld [vmem:[#allocation2 + $0xaf] sm:$0xff] }
 0x609   : > { %8960 = vmatprep.subr.bf16.mxu0 %v9757_v53  ;;  %8992 = vmatprep.subr.bf16.mxu1 %v9757_v53  ;;  %v5898_v29 = vpop.permute.xlu1 %5897  ;;  %v13118_v8 = vld [vmem:[#allocation2 + $0x9f] sm:$0xff] }
 0x60a   : > { %6361 = vmatmul.mubr.f32.gmra.mrb[4].mxu1 %v6026_v40  ;;  %6675 = vmatmul.mubr.f32.gmra.mrb[4].mxu0 %v6023_v16  ;;  %v5896_v33 = vpop.permute.xlu0 %5895  ;;  %v6031_v43 = vsel %vm301_vm0, %v12990_v61, %v5898_v29  ;;  %v13105_v29 = vld [vmem:[#allocation2 + $0x99] sm:$0xff] }
 0x60b   : > { %8515 = vmatprep.mubr.msk.f32.mxu1 %vm301_vm0, %v12940_v44  ;;  %8563 = vmatprep.mubr.msk.f32.mxu0 %vm301_vm0, %v12730_v2  ;;  %v6028_v2 = vsel %vm301_vm0, %v12951_v42, %v5892_v57 }
 0x60c   : > { %8962 = vmatpush1.bf16.msra.mxu0 %v8961_v34  ;;  %9004 = vmatpush1.bf16.msra.mxu1 %v12686_v55  ;;  %v12966_v55 = vld [vmem:[#allocation2 + $0x49] sm:$0xff]  ;;  %v13032_v34 = vld [vmem:[#allocation2 + $0x71] sm:$0xff] }
 0x60d   : > { %8963 = vmatprep.subr.bf16.mxu0 %v9757_v53  ;;  %8993 = vmatprep.subr.bf16.mxu1 %v9757_v53 }
 0x60e   : > { %6366 = vmatmul.mubr.f32.gmra.mrb[6].mxu1 %v6027_v48  ;;  %6680 = vmatmul.mubr.f32.gmra.mrb[6].mxu0 %v6024_v47  ;;  %v12977_v47 = vld [vmem:[#allocation2 + $0x4f] sm:$0xff]  ;;  %v5900_v13 = vpop.permute.xlu0 %5899 }
 0x60f   : > { %8516 = vmatprep.mubr.msk.f32.mxu1 %vm301_vm0, %v12953_v30  ;;  %8564 = vmatprep.mubr.msk.f32.mxu0 %vm301_vm0, %v12917_v6  ;;  %v6029_v6 = vsel %vm301_vm0, %v12964_v63, %v5894_v54  ;;  %v6030_v15 = vsel %vm301_vm0, %v12977_v47, %v5896_v33  ;;  %v13073_v33 = vld [vmem:[#allocation2 + $0x87] sm:$0xff] }
 0x610   : > { %8965 = vmatpush1.bf16.msra.mxu0 %v8964_v4  ;;  %9005 = vmatpush1.bf16.msra.mxu1 %v12699_v27  ;;  %v12979_v27 = vld [vmem:[#allocation2 + $0x51] sm:$0xff] }
 0x611   : > { %8966 = vmatprep.subr.bf16.mxu0 %v9757_v53  ;;  %8994 = vmatprep.subr.bf16.mxu1 %v9757_v53  ;;  %v13044_v4 = vld [vmem:[#allocation2 + $0x77] sm:$0xff] }
 0x612   : > { %6371 = vmatmul.mubr.f32.gmra.mrb[8].mxu1 %v6028_v2  ;;  %6685 = vmatmul.mubr.f32.gmra.mrb[8].mxu0 %v6025_v19  ;;  %v5902_v19 = vpop.permute.xlu1 %5901  ;;  %v5904_v52 = vpop.permute.xlu0 %5903 }
 0x613   : > { %8517 = vmatprep.mubr.msk.f32.mxu1 %vm301_vm0, %v12966_v55  ;;  %8565 = vmatprep.mubr.msk.f32.mxu0 %vm301_vm0, %v12924_v24  ;;  %v13003_v24 = vld [vmem:[#allocation2 + $0x5f] sm:$0xff]  ;;  %v6033_v16 = vsel %vm301_vm0, %v13016_v49, %v5902_v19 }
 0x614   : > { %8968 = vmatpush1.bf16.msra.mxu0 %v8967_v10  ;;  %9006 = vmatpush1.bf16.msra.mxu1 %v12712_v20  ;;  %v12992_v20 = vld [vmem:[#allocation2 + $0x59] sm:$0xff]  ;;  %v6032_v1 = vsel %vm301_vm0, %v13003_v24, %v5900_v13  ;;  %v13132_v13 = vld [vmem:[#allocation2 + $0xa9] sm:$0xff] }
 0x615   : > { %8969 = vmatprep.subr.bf16.mxu0 %v9757_v53  ;;  %8995 = vmatprep.subr.bf16.mxu1 %v9757_v53 }
 0x616   : > { %6376 = vmatmul.mubr.f32.gmra.mrb[10].mxu1 %v6029_v6  ;;  %6690 = vmatmul.mubr.f32.gmra.mrb[10].mxu0 %v6026_v40  ;;  %v7309_v40 = vld [vmem:[#allocation12 + $0x218] sm:$0xff]  ;;  %v5906_v57 = vpop.permute.xlu1 %5905  ;;  %v5908_v10 = vpop.permute.xlu0 %5907 }
 0x617   : > { %8518 = vmatprep.mubr.msk.f32.mxu1 %vm301_vm0, %v12979_v27  ;;  %8566 = vmatprep.mubr.msk.f32.mxu0 %vm301_vm0, %v12940_v44  ;;  %v8982_v26 = vpack.c.bf16 %v7309_v40, %v7308_v9  ;;  %v6035_v54 = vsel %vm301_vm0, %v13044_v4, %v5906_v57  ;;  %v13150_v9 = vld [vmem:[#allocation2 + $0xb7] sm:$0xff]  ;;  %v13170_v57 = vld [vmem:[#allocation2 + $0xc7] sm:$0xff] }
 0x618   : > { %8971 = vmatpush1.bf16.msra.mxu0 %v8970_v58  ;;  %9007 = vmatpush1.bf16.msra.mxu1 %v12725_v21  ;;  %v13005_v21 = vld [vmem:[#allocation2 + $0x61] sm:$0xff]  ;;  %v13152_v40 = vld [vmem:[#allocation2 + $0xb9] sm:$0xff] }
 0x619   : > { %8972 = vmatprep.subr.bf16.mxu0 %v9757_v53  ;;  %8996 = vmatprep.subr.bf16.mxu1 %v9757_v53 }
 0x61a   : > { %6381 = vmatmul.mubr.f32.gmra.mrb[12].mxu1 %v6030_v15  ;;  %6695 = vmatmul.mubr.f32.gmra.mrb[12].mxu0 %v6027_v48  ;;  %v5912_v58 = vpop.permute.xlu0 %5911 }
 0x61b   : > { %8519 = vmatprep.mubr.msk.f32.mxu1 %vm301_vm0, %v12992_v20  ;;  %8567 = vmatprep.mubr.msk.f32.mxu0 %vm301_vm0, %v12953_v30 }
 0x61c   : > { %8974 = vmatpush1.bf16.msra.mxu0 %v8973_v56  ;;  %9008 = vmatpush1.bf16.msra.mxu1 %v12743_v28  ;;  %v13018_v28 = vld [vmem:[#allocation2 + $0x69] sm:$0xff] }
 0x61d   : > { %8975 = vmatprep.subr.bf16.mxu0 %v9757_v53  ;;  %8997 = vmatprep.subr.bf16.mxu1 %v9757_v53 }
 0x61e   : > { %6386 = vmatmul.mubr.f32.gmra.mrb[14].mxu1 %v6031_v43  ;;  %6700 = vmatmul.mubr.f32.gmra.mrb[14].mxu0 %v6028_v2  ;;  %v7313_v2 = vld [vmem:[#allocation12 + $0x238] sm:$0xff] }
 0x61f   : > { %8520 = vmatprep.mubr.msk.f32.mxu1 %vm301_vm0, %v13005_v21  ;;  %8568 = vmatprep.mubr.msk.f32.mxu0 %vm301_vm0, %v12966_v55 }
 0x620   : > { %8977 = vmatpush1.bf16.msra.mxu0 %v8976_v60  ;;  %9009 = vmatpush1.bf16.msra.mxu1 %v12756_v3  ;;  %v13030_v3 = vld [vmem:[#allocation2 + $0x6f] sm:$0xff] }
 0x621   : > { %8978 = vmatprep.subr.bf16.mxu0 %v9757_v53  ;;  %7169 = vrot.lane.b32.xlu0 %v12855_v12, %s9758_s16  ;;  %v7310_v12 = vld [vmem:[#allocation12 + $0x220] sm:$0xff]  ;;  %v6034_v48 = vsel %vm301_vm0, %v13030_v3, %v5904_v52 }
 0x622   : > { %6391 = vmatmul.mubr.f32.gmra.mrb[16].mxu1 %v6032_v1  ;;  %6705 = vmatmul.mubr.f32.gmra.mrb[16].mxu0 %v6029_v6  ;;  %v8985_v0 = vpack.c.bf16 %v7311_v39, %v7310_v12  ;;  %v5910_v6 = vpop.permute.xlu1 %5909  ;;  %v13162_v12 = vld [vmem:[#allocation2 + $0xc1] sm:$0xff] }
 0x623   : > { %8521 = vmatprep.mubr.msk.f32.mxu1 %vm301_vm0, %v13018_v28  ;;  %8569 = vmatprep.mubr.msk.f32.mxu0 %vm301_vm0, %v12979_v27 }
 0x624   : > { %8980 = vmatpush1.bf16.msra.mxu0 %v8979_v59  ;;  %8998 = vmatprep.subr.bf16.mxu1 %v9757_v53 }
 0x625   : > { %8981 = vmatprep.subr.bf16.mxu0 %v9757_v53  ;;  %7171 = vrot.lane.b32.xlu1 %v12862_v14, %s9758_s16  ;;  %v7312_v14 = vld [vmem:[#allocation12 + $0x230] sm:$0xff] }
 0x626   : > { %6396 = vmatmul.mubr.f32.gmra.mrb[18].mxu1 %v6033_v16  ;;  %6710 = vmatmul.mubr.f32.gmra.mrb[18].mxu0 %v6030_v15  ;;  %v8988_v45 = vpack.c.bf16 %v7313_v2, %v7312_v14  ;;  %v13103_v15 = vld [vmem:[#allocation2 + $0x97] sm:$0xff] }
 0x627   : > { %8522 = vmatprep.mubr.msk.f32.mxu1 %vm301_vm0, %v13032_v34  ;;  %8570 = vmatprep.mubr.msk.f32.mxu0 %vm301_vm0, %v12992_v20 }
 0x628   : > { %8983 = vmatpush1.bf16.msra.mxu0 %v8982_v26  ;;  %9010 = vmatpush1.bf16.msra.mxu1 %v12769_v35  ;;  %v13058_v35 = vld [vmem:[#allocation2 + $0x7f] sm:$0xff] }
 0x629   : > { %8984 = vmatprep.subr.bf16.mxu0 %v9757_v53  ;;  %7173 = vrot.lane.b32.xlu0 %v12864_v7, %s9758_s16  ;;  %v6036_v7 = vsel %vm301_vm0, %v13058_v35, %v5908_v10  ;;  %v13160_v26 = vld [vmem:[#allocation2 + $0xbf] sm:$0xff]  ;;  %v13184_v10 = vld [vmem:[#allocation2 + $0xd1] sm:$0xff] }
 0x62a   : > { %6401 = vmatmul.mubr.f32.gmra.mrb[20].mxu1 %v6034_v48  ;;  %6715 = vmatmul.mubr.f32.gmra.mrb[20].mxu0 %v6031_v43  ;;  %v13130_v43 = vld [vmem:[#allocation2 + $0xa7] sm:$0xff] }
 0x62b   : > { %8523 = vmatprep.mubr.msk.f32.mxu1 %vm301_vm0, %v13046_v50  ;;  %8571 = vmatprep.mubr.msk.f32.mxu0 %vm301_vm0, %v13005_v21 }
 0x62c   : > { %8986 = vmatpush1.bf16.msra.mxu0 %v8985_v0  ;;  %7175 = vrot.lane.b32.xlu1 %v12872_v18, %s9758_s16  ;;  %v13075_v18 = vld [vmem:[#allocation2 + $0x89] sm:$0xff] }
 0x62d   : > { %8987 = vmatprep.subr.bf16.mxu0 %v9757_v53  ;;  %7177 = vrot.lane.b32.xlu0 %v12874_v38, %s9758_s16  ;;  %v6037_v38 = vsel %vm301_vm0, %v13073_v33, %v5910_v6  ;;  %v13172_v0 = vld [vmem:[#allocation2 + $0xc9] sm:$0xff]  ;;  %v13195_v6 = vld [vmem:[#allocation2 + $0xd7] sm:$0xff] }
 0x62e   : > { %6406 = vmatmul.mubr.f32.gmra.mrb[22].mxu1 %v6035_v54  ;;  %6720 = vmatmul.mubr.f32.gmra.mrb[22].mxu0 %v6032_v1  ;;  %v13142_v1 = vld [vmem:[#allocation2 + $0xb1] sm:$0xff] }
 0x62f   : > { %8524 = vmatprep.mubr.msk.f32.mxu1 %vm301_vm0, %v13060_v17  ;;  %8572 = vmatprep.mubr.msk.f32.mxu0 %vm301_vm0, %v13018_v28 }
 0x630   : > { %8989 = vmatpush1.bf16.msra.mxu0 %v8988_v45  ;;  %8999 = vmatprep.subr.bf16.mxu1 %v9757_v53 }
 0x631   : > { %7179 = vrot.lane.b32.xlu1 %v12882_v36, %s9758_s16  ;;  %9011 = vmatpush1.bf16.msra.mxu1 %v12782_v5  ;;  %v6998_v5 = vld [vmem:[#allocation2 + $0x1a0] sm:$0xff]  ;;  %v6038_v36 = vsel %vm301_vm0, %v13087_v25, %v5912_v58 }
 0x632   : > { %6411 = vmatmul.mubr.f32.gmra.mrb[24].mxu1 %v6036_v7  ;;  %6725 = vmatmul.mubr.f32.gmra.mrb[24].mxu0 %v6033_v16 }
 0x633   : > { %8525 = vmatprep.mubr.msk.f32.mxu1 %vm301_vm0, %v13075_v18  ;;  %8573 = vmatprep.mubr.msk.f32.mxu0 %vm301_vm0, %v13032_v34 }
 0x634   : > { %7181 = vrot.lane.b32.xlu0 %v12884_v41, %s9758_s16  ;;  %9000 = vmatprep.subr.bf16.mxu1 %v9757_v53  ;;  %v5914_v41 = vpop.permute.xlu1 %5913 }
 0x635   : > { %7183 = vrot.lane.b32.xlu1 %v12892_v31, %s9758_s16  ;;  %9012 = vmatpush1.bf16.msra.mxu1 %v12799_v32  ;;  %v6999_v32 = vld [vmem:[#allocation2 + $0x1a8] sm:$0xff]  ;;  %v7000_v31 = vld [vmem:[#allocation2 + $0x1b0] sm:$0xff]  ;;  %v6039_v56 = vsel %vm301_vm0, %v13103_v15, %v5914_v41 }
 0x636   : > { %6416 = vmatmul.mubr.f32.gmra.mrb[26].mxu1 %v6037_v38  ;;  %6730 = vmatmul.mubr.f32.gmra.mrb[26].mxu0 %v6034_v48 }
 0x637   : > { %8526 = vmatprep.mubr.msk.f32.mxu1 %vm301_vm0, %v13089_v37  ;;  %8574 = vmatprep.mubr.msk.f32.mxu0 %vm301_vm0, %v13046_v50 }
 0x638   : > { %7185 = vrot.lane.b32.xlu0 %v12894_v22, %s9758_s16  ;;  %9001 = vmatprep.subr.bf16.mxu1 %v9757_v53  ;;  %v5916_v22 = vpop.permute.xlu0 %5915  ;;  %v13120_v53 = vld [vmem:[#allocation2 + $0xa1] sm:$0xff]  ;;  %v5918_v46 = vpop.permute.xlu1 %5917 }
 0x639   : > { %7187 = vrot.lane.b32.xlu1 %v6998_v5, %s9758_s16  ;;  %9013 = vmatpush1.bf16.msra.mxu1 %v12816_v23  ;;  %v6040_v23 = vsel %vm301_vm0, %v13118_v8, %v5916_v22  ;;  %v6041_v60 = vsel %vm301_vm0, %v13130_v43, %v5918_v46 }
 0x63a   : > { %6421 = vmatmul.mubr.f32.gmra.mrb[28].mxu1 %v6038_v36  ;;  %6735 = vmatmul.mubr.f32.gmra.mrb[28].mxu0 %v6035_v54  ;;  %v13182_v54 = vld [vmem:[#allocation2 + $0xcf] sm:$0xff] }
 0x63b   : > { %8527 = vmatprep.mubr.msk.f32.mxu1 %vm301_vm0, %v13105_v29  ;;  %8575 = vmatprep.mubr.msk.f32.mxu0 %vm301_vm0, %v13060_v17 }
 0x63c   : > { %7189 = vrot.lane.b32.xlu0 %v6999_v32, %s9758_s16  ;;  %v5920_v62 = vpop.permute.xlu0 %5919  ;;  %v5922_v59 = vpop.permute.xlu1 %5921  ;;  %v13208_v32 = vld [vmem:[#allocation2 + $0xe1] sm:$0xff] }
 0x63d   : > { %7191 = vrot.lane.b32.xlu1 %v7000_v31, %s9758_s16  ;;  %v6042_v19 = vsel %vm301_vm0, %v13140_v51, %v5920_v62  ;;  %v6043_v16 = vsel %vm301_vm0, %v13150_v9, %v5922_v59  ;;  %v13223_v62 = vld [vmem:[#allocation2 + $0xe9] sm:$0xff] }
 0x63e   : > { %6426 = vmatmul.mubr.f32.gmra.mrb[30].mxu1 %v6039_v56  ;;  %6740 = vmatmul.mubr.f32.gmra.mrb[30].mxu0 %v6036_v7  ;;  %v13225_v59 = vld [vmem:[#allocation2 + $0xe7] sm:$0xff] }
 0x63f   : > { %8528 = vmatprep.mubr.msk.f32.mxu1 %vm301_vm0, %v13120_v53  ;;  %8576 = vmatprep.mubr.msk.f32.mxu0 %vm301_vm0, %v13075_v18 }
 0x640   : > { %v5924_v52 = vpop.permute.xlu0 %5923  ;;  %v5926_v48 = vpop.permute.xlu1 %5925 }
 0x641   : > { %v6044_v39 = vsel %vm301_vm0, %v13160_v26, %v5924_v52  ;;  %v13176_v14 = vsel %vm301_vm0, %v13170_v57, %v5926_v48 }
 0x642   : > { %6431 = vmatmul.mubr.f32.gmra.mrb[32].mxu1 %v6040_v23  ;;  %6745 = vmatmul.mubr.f32.gmra.mrb[32].mxu0 %v6037_v38  ;;  %v13197_v38 = vld [vmem:[#allocation2 + $0xd9] sm:$0xff] }
 0x643   : > { %8529 = vmatprep.mubr.msk.f32.mxu1 %vm301_vm0, %v13132_v13  ;;  %8577 = vmatprep.mubr.msk.f32.mxu0 %vm301_vm0, %v13089_v37 }
 0x644   : > { %v5928_v2 = vpop.permute.xlu0 %5927  ;;  %v5930_v7 = vpop.permute.xlu1 %5929 }
 0x645   : > { %v13189_v45 = vsel %vm301_vm0, %v13182_v54, %v5928_v2  ;;  %v13202_v5 = vsel %vm301_vm0, %v13195_v6, %v5930_v7  ;;  %v13240_v2 = vld [vmem:[#allocation2 + $0xef] sm:$0xff] }
 0x646   : > { %6436 = vmatmul.mubr.f32.gmra.mrb[34].mxu1 %v6041_v60  ;;  %6750 = vmatmul.mubr.f32.gmra.mrb[34].mxu0 %v6038_v36 }
 0x647   : > { %8530 = vmatprep.mubr.msk.f32.mxu1 %vm301_vm0, %v13142_v1  ;;  %8578 = vmatprep.mubr.msk.f32.mxu0 %vm301_vm0, %v13105_v29 }
 0x648   : > { %v9374_v58 = vpop.permute.xlu0 %9373  ;;  %v9379_v31 = vpop.permute.xlu1 %9378 }
 0x649   : > { %v9376_v36 = vunpack.i.h.bf16 %v9374_v58  ;;  %v9375_v41 = vunpack.i.l.bf16 %v9374_v58  ;;  %v9380_v46 = vunpack.i.l.bf16 %v9379_v31 }
 0x64a   : > { %6441 = vmatmul.mubr.f32.gmra.mrb[36].mxu1 %v6042_v19  ;;  %6755 = vmatmul.mubr.f32.gmra.mrb[36].mxu0 %v6039_v56  ;;  %v13210_v56 = vld [vmem:[#allocation2 + $0xdf] sm:$0xff] }
 0x64b   : > { %8531 = vmatprep.mubr.msk.f32.mxu1 %vm301_vm0, %v13152_v40  ;;  %8579 = vmatprep.mubr.msk.f32.mxu0 %vm301_vm0, %v13120_v53  ;;  %v7241_v22 = vsel %vm301_vm0, %v12938_v11, %v9376_v36  ;;  %v13253_v36 = vld [vmem:[#allocation2 + $0xf9] sm:$0xff] }
 0x64c   : > { %v9389_v48 = vpop.permute.xlu1 %9388 }
 0x64d   : > { %v9390_v7 = vunpack.i.l.bf16 %v9389_v48 }
 0x64e   : > { %6446 = vmatmul.mubr.f32.gmra.mrb[38].mxu1 %v6043_v16  ;;  %6760 = vmatmul.mubr.f32.gmra.mrb[38].mxu0 %v6040_v23  ;;  %v9381_v23 = vunpack.i.h.bf16 %v9379_v31  ;;  %v13255_v31 = vld [vmem:[#allocation2 + $0xf7] sm:$0xff] }
 0x64f   : > { %8532 = vmatprep.mubr.msk.f32.mxu1 %vm301_vm0, %v13162_v12  ;;  %8580 = vmatprep.mubr.msk.f32.mxu0 %vm301_vm0, %v13132_v13 }
 0x650   : > { %v7242_v52 = vsel %vm301_vm0, %v12951_v42, %v9381_v23  ;;  %v13264_v23 = vsel %vm301_vm0, %v13255_v31, %v9390_v7  ;;  %v13285_v7 = vld [vmem:[#allocation2 + $0x107] sm:$0xff] }
 0x652   : > { %6451 = vmatmul.mubr.f32.gmra.mrb[40].mxu1 %v6044_v39  ;;  %6765 = vmatmul.mubr.f32.gmra.mrb[40].mxu0 %v6041_v60  ;;  %v13221_v60 = vsel %vm301_vm0, %v13210_v56, %v9375_v41 }
 0x653   : > { %8533 = vmatprep.mubr.msk.f32.mxu1 %vm301_vm0, %v13172_v0  ;;  %8581 = vmatprep.mubr.msk.f32.mxu0 %vm301_vm0, %v13142_v1 }
 0x656   : > { %6456 = vmatmul.mubr.f32.gmra.mrb[42].mxu1 %v13176_v14  ;;  %6770 = vmatmul.mubr.f32.gmra.mrb[42].mxu0 %v6042_v19  ;;  %v9384_v19 = vpop.permute.xlu0 %9383 }
 0x657   : > { %8534 = vmatprep.mubr.msk.f32.mxu1 %vm301_vm0, %v13184_v10  ;;  %8582 = vmatprep.mubr.msk.f32.mxu0 %vm301_vm0, %v13152_v40  ;;  %v9386_v11 = vunpack.i.h.bf16 %v9384_v19 }
 0x659   : > { %v7243_v42 = vsel %vm301_vm0, %v12964_v63, %v9386_v11  ;;  %v13270_v11 = vld [vmem:[#allocation2 + $0xff] sm:$0xff] }
 0x65a   : > { %6461 = vmatmul.mubr.f32.gmra.mrb[44].mxu1 %v13189_v45  ;;  %6775 = vmatmul.mubr.f32.gmra.mrb[44].mxu0 %v6043_v16  ;;  %v13234_v16 = vsel %vm301_vm0, %v13225_v59, %v9380_v46  ;;  %v9394_v41 = vpop.permute.xlu0 %9393  ;;  %v13268_v46 = vld [vmem:[#allocation2 + $0x101] sm:$0xff] }
 0x65b   : > { %8535 = vmatprep.mubr.msk.f32.mxu1 %vm301_vm0, %v13197_v38  ;;  %8583 = vmatprep.mubr.msk.f32.mxu0 %vm301_vm0, %v13162_v12 }
 0x65e   : > { %6466 = vmatmul.mubr.f32.gmra.mrb[46].mxu1 %v13202_v5  ;;  %6780 = vmatmul.mubr.f32.gmra.mrb[46].mxu0 %v6044_v39  ;;  %v13238_v39 = vld [vmem:[#allocation2 + $0xf1] sm:$0xff] }
 0x65f   : > { %8536 = vmatprep.mubr.msk.f32.mxu1 %vm301_vm0, %v13208_v32  ;;  %8608 = vmatprep.mubr.msk.f32.mxu0 %vm301_vm0, %v12940_v44  ;;  %v9385_v44 = vunpack.i.l.bf16 %v9384_v19  ;;  %v9399_v19 = vpop.permute.xlu1 %9398 }
 0x661   : > { %v13249_v58 = vsel %vm301_vm0, %v13240_v2, %v9385_v44  ;;  %v9400_v44 = vunpack.i.l.bf16 %v9399_v19 }
 0x662   : > { %6471 = vmatmul.mubr.f32.gmra.mrb[48].mxu1 %v13221_v60  ;;  %7523 = vmatmul.mubr.f32.vlgmr.msra.gmra.mrb[0].mxu0 %v7241_v22  ;;  %v9395_v22 = vunpack.i.l.bf16 %v9394_v41 }
 0x663   : > { %8537 = vmatprep.mubr.msk.f32.mxu1 %vm301_vm0, %v13223_v62  ;;  %8609 = vmatprep.mubr.msk.f32.mxu0 %vm301_vm0, %v12953_v30  ;;  %v9391_v30 = vunpack.i.h.bf16 %v9389_v48  ;;  %v13283_v48 = vld [vmem:[#allocation2 + $0x109] sm:$0xff] }
 0x665   : > { %v7244_v63 = vsel %vm301_vm0, %v12977_v47, %v9391_v30  ;;  %v9404_v30 = vpop.permute.xlu0 %9403 }
 0x666   : > { %6476 = vmatmul.mubr.f32.gmra.mrb[50].mxu1 %v13234_v16  ;;  %7528 = vmatmul.mubr.f32.gmra.mrb[2].mxu0 %v7242_v52  ;;  %v13279_v52 = vsel %vm301_vm0, %v13270_v11, %v9395_v22  ;;  %v9409_v22 = vpop.permute.xlu1 %9408 }
 0x667   : > { %8538 = vmatprep.mubr.msk.f32.mxu1 %vm301_vm0, %v13238_v39  ;;  %8610 = vmatprep.mubr.msk.f32.mxu0 %vm301_vm0, %v12966_v55  ;;  %v9396_v55 = vunpack.i.h.bf16 %v9394_v41  ;;  %v13294_v41 = vsel %vm301_vm0, %v13285_v7, %v9400_v44 }
 0x669   : > { %v7245_v47 = vsel %vm301_vm0, %v12990_v61, %v9396_v55  ;;  %v13298_v55 = vld [vmem:[#allocation2 + $0x111] sm:$0xff] }
 0x66a   : > { %6481 = vmatmul.mubr.f32.gmra.mrb[52].mxu1 %v13249_v58  ;;  %7533 = vmatmul.mubr.f32.gmra.mrb[4].mxu0 %v7243_v42  ;;  %v9405_v42 = vunpack.i.l.bf16 %v9404_v30 }
 0x66b   : > { %8539 = vmatprep.mubr.msk.f32.mxu1 %vm301_vm0, %v13253_v36  ;;  %8611 = vmatprep.mubr.msk.f32.mxu0 %vm301_vm0, %v12979_v27  ;;  %v9401_v27 = vunpack.i.h.bf16 %v9399_v19  ;;  %v9410_v19 = vunpack.i.l.bf16 %v9409_v22 }
 0x66d   : > { %v7246_v61 = vsel %vm301_vm0, %v13003_v24, %v9401_v27  ;;  %v13313_v27 = vld [vmem:[#allocation2 + $0x119] sm:$0xff] }
 0x66e   : > { %6486 = vmatmul.mubr.f32.gmra.mrb[54].mxu1 %v13264_v23  ;;  %7538 = vmatmul.mubr.f32.gmra.mrb[6].mxu0 %v7244_v63  ;;  %v13300_v63 = vld [vmem:[#allocation2 + $0x10f] sm:$0xff] }
 0x66f   : > { %8540 = vmatprep.mubr.msk.f32.mxu1 %vm301_vm0, %v13268_v46  ;;  %8612 = vmatprep.mubr.msk.f32.mxu0 %vm301_vm0, %v12992_v20  ;;  %v9406_v20 = vunpack.i.h.bf16 %v9404_v30  ;;  %v13309_v44 = vsel %vm301_vm0, %v13300_v63, %v9405_v42  ;;  %v13315_v30 = vld [vmem:[#allocation2 + $0x117] sm:$0xff] }
 0x670   : > { %14017 = vst [vmem:[#allocation31_spill] sm:$0xff] %v13309_v44 }
 0x671   : > { %v7247_v24 = vsel %vm301_vm0, %v13016_v49, %v9406_v20  ;;  %v13328_v20 = vld [vmem:[#allocation2 + $0x121] sm:$0xff] }
 0x672   : > { %6491 = vmatmul.mubr.f32.gmra.mrb[56].mxu1 %v13279_v52  ;;  %7543 = vmatmul.mubr.f32.gmra.mrb[8].mxu0 %v7245_v47  ;;  %v9414_v47 = vpop.permute.xlu0 %9413 }
 0x673   : > { %8541 = vmatprep.mubr.msk.f32.mxu1 %vm301_vm0, %v13283_v48  ;;  %8613 = vmatprep.mubr.msk.f32.mxu0 %vm301_vm0, %v13005_v21  ;;  %v9411_v21 = vunpack.i.h.bf16 %v9409_v22  ;;  %v9415_v42 = vunpack.i.l.bf16 %v9414_v47  ;;  %v9419_v22 = vpop.permute.xlu1 %9418 }
 0x675   : > { %v7248_v49 = vsel %vm301_vm0, %v13030_v3, %v9411_v21  ;;  %v13343_v21 = vld [vmem:[#allocation2 + $0x129] sm:$0xff] }
 0x676   : > { %6496 = vmatmul.mubr.f32.gmra.mrb[58].mxu1 %v13294_v41  ;;  %7548 = vmatmul.mubr.f32.gmra.mrb[10].mxu0 %v7246_v61  ;;  %v13324_v61 = vsel %vm301_vm0, %v13315_v30, %v9410_v19  ;;  %v9420_v19 = vunpack.i.l.bf16 %v9419_v22 }
 0x677   : > { %8542 = vmatprep.mubr.msk.f32.mxu1 %vm301_vm0, %v13298_v55  ;;  %8614 = vmatprep.mubr.msk.f32.mxu0 %vm301_vm0, %v13018_v28  ;;  %v9416_v28 = vunpack.i.h.bf16 %v9414_v47  ;;  %14018 = vst [vmem:[#allocation32_spill] sm:$0xff] %v13324_v61  ;;  %v9424_v47 = vpop.permute.xlu0 %9423 }
 0x679   : > { %v7249_v3 = vsel %vm301_vm0, %v13044_v4, %v9416_v28  ;;  %v13358_v28 = vld [vmem:[#allocation2 + $0x131] sm:$0xff] }
 0x67a   : > { %6501 = vmatmul.mubr.f32.gmra.mrb[60].mxu1 %v13309_v44  ;;  %7553 = vmatmul.mubr.f32.gmra.mrb[12].mxu0 %v7247_v24  ;;  %v13330_v44 = vld [vmem:[#allocation2 + $0x11f] sm:$0xff] }
 0x67b   : > { %8543 = vmatprep.mubr.msk.f32.mxu1 %vm301_vm0, %v13313_v27  ;;  %8615 = vmatprep.mubr.msk.f32.mxu0 %vm301_vm0, %v13032_v34  ;;  %v9421_v34 = vunpack.i.h.bf16 %v9419_v22  ;;  %v13339_v24 = vsel %vm301_vm0, %v13330_v44, %v9415_v42  ;;  %v9425_v42 = vunpack.i.l.bf16 %v9424_v47  ;;  %v9429_v22 = vpop.permute.xlu1 %9428 }
 0x67c   : > { %14019 = vst [vmem:[#allocation33_spill] sm:$0xff] %v13339_v24 }
 0x67d   : > { %v7250_v4 = vsel %vm301_vm0, %v13058_v35, %v9421_v34  ;;  %v13373_v34 = vld [vmem:[#allocation2 + $0x139] sm:$0xff] }
 0x67e   : > { %6506 = vmatmul.mubr.f32.gmra.mrb[62].mxu1 %v13324_v61  ;;  %7558 = vmatmul.mubr.f32.gmra.mrb[14].mxu0 %v7248_v49  ;;  %v13345_v61 = vld [vmem:[#allocation2 + $0x127] sm:$0xff] }
 0x67f   : > { %8544 = vmatprep.mubr.msk.f32.mxu1 %vm301_vm0, %v13328_v20  ;;  %8616 = vmatprep.mubr.msk.f32.mxu0 %vm301_vm0, %v13046_v50  ;;  %v9426_v50 = vunpack.i.h.bf16 %v9424_v47  ;;  %v13354_v49 = vsel %vm301_vm0, %v13345_v61, %v9420_v19  ;;  %v9430_v19 = vunpack.i.l.bf16 %v9429_v22  ;;  %v9434_v47 = vpop.permute.xlu0 %9433 }
 0x680   : > { %14020 = vst [vmem:[#allocation34_spill] sm:$0xff] %v13354_v49 }
 0x681   : > { %v7251_v35 = vsel %vm301_vm0, %v13073_v33, %v9426_v50  ;;  %v13388_v50 = vld [vmem:[#allocation2 + $0x141] sm:$0xff] }
 0x682   : > { %6511 = vmatmul.mubr.f32.gmra.mrb[64].mxu1 %v13339_v24  ;;  %7563 = vmatmul.mubr.f32.gmra.mrb[16].mxu0 %v7249_v3  ;;  %v13360_v24 = vld [vmem:[#allocation2 + $0x12f] sm:$0xff] }
 0x683   : > { %8545 = vmatprep.mubr.msk.f32.mxu1 %vm301_vm0, %v13343_v21  ;;  %8617 = vmatprep.mubr.msk.f32.mxu0 %vm301_vm0, %v13060_v17  ;;  %v9431_v17 = vunpack.i.h.bf16 %v9429_v22  ;;  %v13369_v3 = vsel %vm301_vm0, %v13360_v24, %v9425_v42  ;;  %v9435_v42 = vunpack.i.l.bf16 %v9434_v47  ;;  %v9439_v22 = vpop.permute.xlu1 %9438 }
 0x684   : > { %14021 = vst [vmem:[#allocation35_spill] sm:$0xff] %v13369_v3 }
 0x685   : > { %v7252_v33 = vsel %vm301_vm0, %v13087_v25, %v9431_v17  ;;  %v13403_v17 = vld [vmem:[#allocation2 + $0x149] sm:$0xff] }
 0x686   : > { %6516 = vmatmul.mubr.f32.gmra.mrb[66].mxu1 %v13354_v49  ;;  %7568 = vmatmul.mubr.f32.gmra.mrb[18].mxu0 %v7250_v4  ;;  %v13375_v49 = vld [vmem:[#allocation2 + $0x137] sm:$0xff] }
 0x687   : > { %8546 = vmatprep.mubr.msk.f32.mxu1 %vm301_vm0, %v13358_v28  ;;  %8618 = vmatprep.mubr.msk.f32.mxu0 %vm301_vm0, %v13075_v18  ;;  %v9436_v18 = vunpack.i.h.bf16 %v9434_v47  ;;  %v13384_v4 = vsel %vm301_vm0, %v13375_v49, %v9430_v19  ;;  %v9440_v19 = vunpack.i.l.bf16 %v9439_v22  ;;  %v9444_v47 = vpop.permute.xlu0 %9443 }
 0x688   : > { %14022 = vst [vmem:[#allocation36_spill] sm:$0xff] %v13384_v4 }
 0x689   : > { %v7253_v25 = vsel %vm301_vm0, %v13103_v15, %v9436_v18  ;;  %v13418_v18 = vld [vmem:[#allocation2 + $0x151] sm:$0xff] }
 0x68a   : > { %6521 = vmatmul.mubr.f32.gmra.mrb[68].mxu1 %v13369_v3  ;;  %7573 = vmatmul.mubr.f32.gmra.mrb[20].mxu0 %v7251_v35  ;;  %v13390_v3 = vld [vmem:[#allocation2 + $0x13f] sm:$0xff] }
 0x68b   : > { %8547 = vmatprep.mubr.msk.f32.mxu1 %vm301_vm0, %v13373_v34  ;;  %8619 = vmatprep.mubr.msk.f32.mxu0 %vm301_vm0, %v13089_v37  ;;  %v9441_v37 = vunpack.i.h.bf16 %v9439_v22  ;;  %v13399_v35 = vsel %vm301_vm0, %v13390_v3, %v9435_v42  ;;  %v9445_v42 = vunpack.i.l.bf16 %v9444_v47  ;;  %v9449_v22 = vpop.permute.xlu1 %9448 }
 0x68c   : > { %14023 = vst [vmem:[#allocation37_spill] sm:$0xff] %v13399_v35 }
 0x68d   : > { %v7254_v15 = vsel %vm301_vm0, %v13118_v8, %v9441_v37  ;;  %v13433_v37 = vld [vmem:[#allocation2 + $0x159] sm:$0xff] }
 0x68e   : > { %6526 = vmatmul.mubr.f32.gmra.mrb[70].mxu1 %v13384_v4  ;;  %7578 = vmatmul.mubr.f32.gmra.mrb[22].mxu0 %v7252_v33  ;;  %v13405_v4 = vld [vmem:[#allocation2 + $0x147] sm:$0xff] }
 0x68f   : > { %8548 = vmatprep.mubr.msk.f32.mxu1 %vm301_vm0, %v13388_v50  ;;  %8620 = vmatprep.mubr.msk.f32.mxu0 %vm301_vm0, %v13105_v29  ;;  %v9446_v29 = vunpack.i.h.bf16 %v9444_v47  ;;  %v13414_v33 = vsel %vm301_vm0, %v13405_v4, %v9440_v19  ;;  %v9450_v19 = vunpack.i.l.bf16 %v9449_v22  ;;  %v9454_v47 = vpop.permute.xlu0 %9453 }
 0x690   : > { %14024 = vst [vmem:[#allocation38_spill] sm:$0xff] %v13414_v33 }
 0x691   : > { %v7255_v8 = vsel %vm301_vm0, %v13130_v43, %v9446_v29  ;;  %v13448_v29 = vld [vmem:[#allocation2 + $0x161] sm:$0xff] }
 0x692   : > { %6531 = vmatmul.mubr.f32.gmra.mrb[72].mxu1 %v13399_v35  ;;  %7583 = vmatmul.mubr.f32.gmra.mrb[24].mxu0 %v7253_v25  ;;  %v13420_v35 = vld [vmem:[#allocation2 + $0x14f] sm:$0xff] }
 0x693   : > { %8549 = vmatprep.mubr.msk.f32.mxu1 %vm301_vm0, %v13403_v17  ;;  %8621 = vmatprep.mubr.msk.f32.mxu0 %vm301_vm0, %v13120_v53  ;;  %v9451_v53 = vunpack.i.h.bf16 %v9449_v22  ;;  %v13429_v25 = vsel %vm301_vm0, %v13420_v35, %v9445_v42  ;;  %v9455_v42 = vunpack.i.l.bf16 %v9454_v47  ;;  %v9459_v22 = vpop.permute.xlu1 %9458 }
 0x694   : > { %14025 = vst [vmem:[#allocation39_spill] sm:$0xff] %v13429_v25 }
 0x695   : > { %v7256_v43 = vsel %vm301_vm0, %v13140_v51, %v9451_v53  ;;  %v13463_v53 = vld [vmem:[#allocation2 + $0x169] sm:$0xff] }
 0x696   : > { %6536 = vmatmul.mubr.f32.gmra.mrb[74].mxu1 %v13414_v33  ;;  %7588 = vmatmul.mubr.f32.gmra.mrb[26].mxu0 %v7254_v15  ;;  %v13435_v33 = vld [vmem:[#allocation2 + $0x157] sm:$0xff] }
 0x697   : > { %8550 = vmatprep.mubr.msk.f32.mxu1 %vm301_vm0, %v13418_v18  ;;  %8622 = vmatprep.mubr.msk.f32.mxu0 %vm301_vm0, %v13132_v13  ;;  %v9456_v13 = vunpack.i.h.bf16 %v9454_v47  ;;  %v13444_v15 = vsel %vm301_vm0, %v13435_v33, %v9450_v19  ;;  %v9460_v19 = vunpack.i.l.bf16 %v9459_v22  ;;  %v9464_v47 = vpop.permute.xlu0 %9463 }
 0x698   : > { %14026 = vst [vmem:[#allocation40_spill] sm:$0xff] %v13444_v15 }
 0x699   : > { %v7257_v51 = vsel %vm301_vm0, %v13150_v9, %v9456_v13  ;;  %v13478_v13 = vld [vmem:[#allocation2 + $0x171] sm:$0xff] }
 0x69a   : > { %6541 = vmatmul.mubr.f32.gmra.mrb[76].mxu1 %v13429_v25  ;;  %7593 = vmatmul.mubr.f32.gmra.mrb[28].mxu0 %v7255_v8  ;;  %v13450_v25 = vld [vmem:[#allocation2 + $0x15f] sm:$0xff]  ;;  %14029 = vst [vmem:[#allocation43_spill] sm:$0xff] %v13478_v13 }
 0x69b   : > { %8551 = vmatprep.mubr.msk.f32.mxu1 %vm301_vm0, %v13433_v37  ;;  %8623 = vmatprep.mubr.msk.f32.mxu0 %vm301_vm0, %v13142_v1  ;;  %v9461_v1 = vunpack.i.h.bf16 %v9459_v22  ;;  %v13459_v8 = vsel %vm301_vm0, %v13450_v25, %v9455_v42  ;;  %v9465_v42 = vunpack.i.l.bf16 %v9464_v47  ;;  %v9469_v22 = vpop.permute.xlu1 %9468 }
 0x69c   : > { %14027 = vst [vmem:[#allocation41_spill] sm:$0xff] %v13459_v8 }
 0x69d   : > { %v7258_v9 = vsel %vm301_vm0, %v13160_v26, %v9461_v1  ;;  %v13493_v1 = vld [vmem:[#allocation2 + $0x179] sm:$0xff] }
 0x69e   : > { %6546 = vmatmul.mubr.f32.gmra.mrb[78].mxu1 %v13444_v15  ;;  %7598 = vmatmul.mubr.f32.gmra.mrb[30].mxu0 %v7256_v43  ;;  %v13465_v15 = vld [vmem:[#allocation2 + $0x167] sm:$0xff]  ;;  %14031 = vst [vmem:[#allocation45_spill] sm:$0xff] %v13493_v1 }
 0x69f   : > { %8552 = vmatprep.mubr.msk.f32.mxu1 %vm301_vm0, %v13448_v29  ;;  %8624 = vmatprep.mubr.msk.f32.mxu0 %vm301_vm0, %v13152_v40  ;;  %v9466_v40 = vunpack.i.h.bf16 %v9464_v47  ;;  %v13474_v43 = vsel %vm301_vm0, %v13465_v15, %v9460_v19  ;;  %v9470_v19 = vunpack.i.l.bf16 %v9469_v22  ;;  %v9474_v47 = vpop.permute.xlu0 %9473 }
 0x6a0   : > { %14028 = vst [vmem:[#allocation42_spill] sm:$0xff] %v13474_v43 }
 0x6a1   : > { %v7259_v26 = vsel %vm301_vm0, %v13170_v57, %v9466_v40  ;;  %v13508_v40 = vld [vmem:[#allocation2 + $0x181] sm:$0xff] }
 0x6a2   : > { %6551 = vmatmul.mubr.f32.gmra.mrb[80].mxu1 %v13459_v8  ;;  %7603 = vmatmul.mubr.f32.gmra.mrb[32].mxu0 %v7257_v51  ;;  %v13480_v8 = vld [vmem:[#allocation2 + $0x16f] sm:$0xff]  ;;  %14033 = vst [vmem:[#allocation47_spill] sm:$0xff] %v13508_v40 }
 0x6a3   : > { %8553 = vmatprep.mubr.msk.f32.mxu1 %vm301_vm0, %v13463_v53  ;;  %8625 = vmatprep.mubr.msk.f32.mxu0 %vm301_vm0, %v13162_v12  ;;  %v9471_v12 = vunpack.i.h.bf16 %v9469_v22  ;;  %v13489_v51 = vsel %vm301_vm0, %v13480_v8, %v9465_v42  ;;  %v9475_v42 = vunpack.i.l.bf16 %v9474_v47 }
 0x6a4   : > { %14030 = vst [vmem:[#allocation44_spill] sm:$0xff] %v13489_v51 }
 0x6a5   : > { %v7260_v57 = vsel %vm301_vm0, %v13182_v54, %v9471_v12  ;;  %v13523_v12 = vld [vmem:[#allocation2 + $0x189] sm:$0xff] }
 0x6a6   : > { %6556 = vmatmul.mubr.f32.gmra.mrb[82].mxu1 %v13474_v43  ;;  %7608 = vmatmul.mubr.f32.gmra.mrb[34].mxu0 %v7258_v9  ;;  %v13495_v43 = vld [vmem:[#allocation2 + $0x177] sm:$0xff]  ;;  %v9476_v9 = vunpack.i.h.bf16 %v9474_v47 }
 0x6a7   : > { %8554 = vmatprep.mubr.msk.f32.mxu1 %vm301_vm0, %v13478_v13  ;;  %8626 = vmatprep.mubr.msk.f32.mxu0 %vm301_vm0, %v13172_v0  ;;  %v13504_v22 = vsel %vm301_vm0, %v13495_v43, %v9470_v19  ;;  %v9479_v13 = vpop.permute.xlu1 %9478 }
 0x6a8   : > { %14032 = vst [vmem:[#allocation46_spill] sm:$0xff] %v13504_v22  ;;  %v9480_v19 = vunpack.i.l.bf16 %v9479_v13  ;;  %v7261_v54 = vsel %vm301_vm0, %v13195_v6, %v9476_v9  ;;  %v13536_v9 = vld [vmem:[#allocation2 + $0x191] sm:$0xff] }
 0x6aa   : > { %6561 = vmatmul.mubr.f32.gmra.mrb[84].mxu1 %v13489_v51  ;;  %7613 = vmatmul.mubr.f32.gmra.mrb[36].mxu0 %v7259_v26  ;;  %v13510_v51 = vld [vmem:[#allocation2 + $0x17f] sm:$0xff]  ;;  %v9481_v26 = vunpack.i.h.bf16 %v9479_v13 }
 0x6ab   : > { %8555 = vmatprep.mubr.msk.f32.mxu1 %vm301_vm0, %v13493_v1  ;;  %8627 = vmatprep.mubr.msk.f32.mxu0 %vm301_vm0, %v13184_v10  ;;  %14034 = vst [vmem:[#allocation48_spill] sm:$0xff] %v13510_v51  ;;  %v13519_v47 = vsel %vm301_vm0, %v13510_v51, %v9475_v42  ;;  %v9484_v1 = vpop.permute.xlu0 %9483  ;;  %v13538_v51 = vld [vmem:[#allocation2 + $0x18f] sm:$0xff] }
 0x6ac   : > { %14035 = vst [vmem:[#allocation49_spill] sm:$0xff] %v13519_v47  ;;  %v9486_v13 = vunpack.i.h.bf16 %v9484_v1  ;;  %v9485_v42 = vunpack.i.l.bf16 %v9484_v1  ;;  %v7262_v6 = vsel %vm301_vm0, %v13210_v56, %v9481_v26  ;;  %v13548_v26 = vld [vmem:[#allocation2 + $0x199] sm:$0xff] }
 0x6ae   : > { %6566 = vmatmul.mubr.f32.gmra.mrb[86].mxu1 %v13504_v22  ;;  %7618 = vmatmul.mubr.f32.gmra.mrb[38].mxu0 %v7260_v57  ;;  %v13525_v22 = vld [vmem:[#allocation2 + $0x187] sm:$0xff]  ;;  %v7263_v56 = vsel %vm301_vm0, %v13225_v59, %v9486_v13 }
 0x6af   : > { %8556 = vmatprep.mubr.msk.f32.mxu1 %vm301_vm0, %v13508_v40  ;;  %8628 = vmatprep.mubr.msk.f32.mxu0 %vm301_vm0, %v13197_v38  ;;  %v6114_v57 = vsel %vm301_vm0, %v13525_v22, %v9480_v19  ;;  %v9489_v40 = vpop.permute.xlu1 %9488  ;;  %v6115_v19 = vsel %vm301_vm0, %v13538_v51, %v9485_v42 }
 0x6b0   : > { %v9491_v1 = vunpack.i.h.bf16 %v9489_v40 }
 0x6b2   : > { %6571 = vmatmul.mubr.f32.gmra.mrb[88].mxu1 %v13519_v47  ;;  %7623 = vmatmul.mubr.f32.gmra.mrb[40].mxu0 %v7261_v54  ;;  %v9490_v54 = vunpack.i.l.bf16 %v9489_v40  ;;  %v13550_v47 = vld [vmem:[#allocation2 + $0x197] sm:$0xff]  ;;  %v7264_v42 = vsel %vm301_vm0, %v13240_v2, %v9491_v1 }
 0x6b3   : > { %8557 = vmatprep.mubr.msk.f32.mxu1 %vm301_vm0, %v13523_v12  ;;  %8629 = vmatprep.mubr.msk.f32.mxu0 %vm301_vm0, %v13208_v32  ;;  %v7148_v13 = vpop.permute.xlu1 %7147  ;;  %v14036_v1 = vld [vmem:[#allocation31_spill] sm:$0xff] }
 0x6b4   : > { %v6116_v40 = vsel %vm301_vm0, %v13550_v47, %v9490_v54 }
 0x6b6   : > { %6576 = vmatmul.mubr.f32.gmra.mrb[90].mxu1 %v6114_v57  ;;  %7628 = vmatmul.mubr.f32.gmra.mrb[42].mxu0 %v7262_v6  ;;  %v7146_v57 = vpop.permute.xlu0 %7145  ;;  %v7266_v6 = vsel %vm301_vm0, %v13270_v11, %v7148_v13  ;;  %v14039_v13 = vld [vmem:[#allocation34_spill] sm:$0xff] }
 0x6b7   : > { %8558 = vmatprep.mubr.msk.f32.mxu1 %vm301_vm0, %v13536_v9  ;;  %8630 = vmatprep.mubr.msk.f32.mxu0 %vm301_vm0, %v13223_v62  ;;  %v7265_v59 = vsel %vm301_vm0, %v13255_v31, %v7146_v57 }
 0x6ba   : > { %6581 = vmatmul.mubr.f32.gmra.mrb[92].mxu1 %v6115_v19  ;;  %7633 = vmatmul.mubr.f32.gmra.mrb[44].mxu0 %v7263_v56  ;;  %v7150_v2 = vpop.permute.xlu0 %7149  ;;  %v14037_v19 = vld [vmem:[#allocation32_spill] sm:$0xff] }
 0x6bb   : > { %8559 = vmatprep.mubr.msk.f32.mxu1 %vm301_vm0, %v13548_v26  ;;  %8631 = vmatprep.mubr.msk.f32.mxu0 %vm301_vm0, %v13238_v39 }
 0x6be   : > { %6586 = vmatmul.mubr.f32.gmra.mrb[94].mxu1 %v6116_v40  ;;  %7638 = vmatmul.mubr.f32.gmra.mrb[46].mxu0 %v7264_v42  ;;  %v14038_v42 = vld [vmem:[#allocation33_spill] sm:$0xff] }
 0x6bf   : > { %8584 = vmatprep.mubr.msk.f32.mxu1 %vm301_vm0, %v13172_v0  ;;  %8632 = vmatprep.mubr.msk.f32.mxu0 %vm301_vm0, %v13253_v36  ;;  %v7267_v0 = vsel %vm301_vm0, %v13285_v7, %v7150_v2 }
 0x6c2   : > { %6785 = vmatmul.mubr.f32.vlgmr.msra.gmra.mrb[48].mxu1 %v13176_v14  ;;  %7643 = vmatmul.mubr.f32.gmra.mrb[48].mxu0 %v7265_v59  ;;  %v7152_v14 = vpop.permute.xlu1 %7151 }
 0x6c3   : > { %8585 = vmatprep.mubr.msk.f32.mxu1 %vm301_vm0, %v13184_v10  ;;  %8633 = vmatprep.mubr.msk.f32.mxu0 %vm301_vm0, %v13268_v46  ;;  %v7268_v10 = vsel %vm301_vm0, %v13300_v63, %v7152_v14 }
 0x6c6   : > { %6790 = vmatmul.mubr.f32.gmra.mrb[50].mxu1 %v13189_v45  ;;  %7648 = vmatmul.mubr.f32.gmra.mrb[50].mxu0 %v7266_v6  ;;  %v7154_v45 = vpop.permute.xlu0 %7153 }
 0x6c7   : > { %8586 = vmatprep.mubr.msk.f32.mxu1 %vm301_vm0, %v13197_v38  ;;  %8634 = vmatprep.mubr.msk.f32.mxu0 %vm301_vm0, %v13283_v48  ;;  %v7269_v38 = vsel %vm301_vm0, %v13315_v30, %v7154_v45  ;;  %v14041_v45 = vld [vmem:[#allocation36_spill] sm:$0xff] }
 0x6ca   : > { %6795 = vmatmul.mubr.f32.gmra.mrb[52].mxu1 %v13202_v5  ;;  %7653 = vmatmul.mubr.f32.gmra.mrb[52].mxu0 %v7267_v0  ;;  %v7156_v5 = vpop.permute.xlu1 %7155  ;;  %v14040_v0 = vld [vmem:[#allocation35_spill] sm:$0xff] }
 0x6cb   : > { %8587 = vmatprep.mubr.msk.f32.mxu1 %vm301_vm0, %v13208_v32  ;;  %8635 = vmatprep.mubr.msk.f32.mxu0 %vm301_vm0, %v13298_v55  ;;  %v7270_v32 = vsel %vm301_vm0, %v13330_v44, %v7156_v5 }
 0x6ce   : > { %6800 = vmatmul.mubr.f32.gmra.mrb[54].mxu1 %v13221_v60  ;;  %7658 = vmatmul.mubr.f32.gmra.mrb[54].mxu0 %v7268_v10  ;;  %v7158_v60 = vpop.permute.xlu0 %7157 }
 0x6cf   : > { %8588 = vmatprep.mubr.msk.f32.mxu1 %vm301_vm0, %v13223_v62  ;;  %8636 = vmatprep.mubr.msk.f32.mxu0 %vm301_vm0, %v13313_v27 }
 0x6d2   : > { %6805 = vmatmul.mubr.f32.gmra.mrb[56].mxu1 %v13234_v16  ;;  %7663 = vmatmul.mubr.f32.gmra.mrb[56].mxu0 %v7269_v38  ;;  %v7271_v16 = vsel %vm301_vm0, %v13345_v61, %v7158_v60  ;;  %v14043_v60 = vld [vmem:[#allocation37_spill] sm:$0xff] }
 0x6d3   : > { %8589 = vmatprep.mubr.msk.f32.mxu1 %vm301_vm0, %v13238_v39  ;;  %8637 = vmatprep.mubr.msk.f32.mxu0 %vm301_vm0, %v13328_v20  ;;  %v7160_v39 = vpop.permute.xlu1 %7159 }
 0x6d5   : > { %v13601_v31 = vpop.f32.mrb[0].mxu1 }
 0x6d6   : > { %v6354_v62 = vpop.f32.mrb[1].mxu1  ;;  %6810 = vmatmul.mubr.f32.gmra.mrb[58].mxu1 %v13249_v58  ;;  %7668 = vmatmul.mubr.f32.gmra.mrb[58].mxu0 %v7270_v32  ;;  %v7272_v58 = vsel %vm301_vm0, %v13360_v24, %v7160_v39 }
 0x6d7   : > { %8590 = vmatprep.mubr.msk.f32.mxu1 %vm301_vm0, %v13253_v36  ;;  %8638 = vmatprep.mubr.msk.f32.mxu0 %vm301_vm0, %v13343_v21  ;;  %v7162_v36 = vpop.permute.xlu0 %7161 }
 0x6d9   : > { %v13610_v11 = vpop.f32.mrb[2].mxu1 }
 0x6da   : > { %v6359_v7 = vpop.f32.mrb[3].mxu1  ;;  %6815 = vmatmul.mubr.f32.gmra.mrb[60].mxu1 %v13264_v23  ;;  %7673 = vmatmul.mubr.f32.gmra.mrb[60].mxu0 %v7271_v16  ;;  %v7273_v23 = vsel %vm301_vm0, %v13375_v49, %v7162_v36 }
 0x6db   : > { %8591 = vmatprep.mubr.msk.f32.mxu1 %vm301_vm0, %v13268_v46  ;;  %8639 = vmatprep.mubr.msk.f32.mxu0 %vm301_vm0, %v13358_v28  ;;  %v7164_v46 = vpop.permute.xlu1 %7163  ;;  %v14045_v7 = vld [vmem:[#allocation38_spill] sm:$0xff] }
 0x6dd   : > { %v13619_v63 = vpop.f32.mrb[4].mxu1 }
 0x6de   : > { %v6364_v44 = vpop.f32.mrb[5].mxu1  ;;  %6820 = vmatmul.mubr.f32.gmra.mrb[62].mxu1 %v13279_v52  ;;  %7678 = vmatmul.mubr.f32.gmra.mrb[62].mxu0 %v7272_v58  ;;  %v7274_v52 = vsel %vm301_vm0, %v13390_v3, %v7164_v46  ;;  %v14046_v58 = vld [vmem:[#allocation48_spill] sm:$0xff]  ;;  %v14048_v46 = vld [vmem:[#allocation39_spill] sm:$0xff] }
 0x6df   : > { %8592 = vmatprep.mubr.msk.f32.mxu1 %vm301_vm0, %v13283_v48  ;;  %8640 = vmatprep.mubr.msk.f32.mxu0 %vm301_vm0, %v13373_v34  ;;  %v7166_v48 = vpop.permute.xlu0 %7165 }
 0x6e1   : > { %v13628_v30 = vpop.f32.mrb[6].mxu1 }
 0x6e2   : > { %v6369_v61 = vpop.f32.mrb[7].mxu1  ;;  %6825 = vmatmul.mubr.f32.gmra.mrb[64].mxu1 %v13294_v41  ;;  %7683 = vmatmul.mubr.f32.gmra.mrb[64].mxu0 %v7273_v23  ;;  %v7275_v41 = vsel %vm301_vm0, %v13405_v4, %v7166_v48 }
 0x6e3   : > { %8593 = vmatprep.mubr.msk.f32.mxu1 %vm301_vm0, %v13298_v55  ;;  %8641 = vmatprep.mubr.msk.f32.mxu0 %vm301_vm0, %v13388_v50  ;;  %v7168_v55 = vpop.permute.xlu1 %7167 }
 0x6e4   : > { %v7276_v56 = vsel %vm301_vm0, %v13420_v35, %v7168_v55 }
 0x6e5   : > { %v13637_v24 = vpop.f32.mrb[8].mxu1 }
 0x6e6   : > { %v6374_v49 = vpop.f32.mrb[9].mxu1  ;;  %6830 = vmatmul.mubr.f32.gmra.mrb[66].mxu1 %v14036_v1  ;;  %7688 = vmatmul.mubr.f32.gmra.mrb[66].mxu0 %v7274_v52 }
 0x6e7   : > { %8594 = vmatprep.mubr.msk.f32.mxu1 %vm301_vm0, %v13313_v27  ;;  %8642 = vmatprep.mubr.msk.f32.mxu0 %vm301_vm0, %v13403_v17  ;;  %v7170_v27 = vpop.permute.xlu0 %7169  ;;  %v14049_v49 = vld [vmem:[#allocation40_spill] sm:$0xff] }
 0x6e8   : > { %v7277_v57 = vsel %vm301_vm0, %v13435_v33, %v7170_v27 }
 0x6e9   : > { %v13646_v3 = vpop.f32.mrb[10].mxu1 }
 0x6ea   : > { %v6379_v54 = vpop.f32.mrb[11].mxu1  ;;  %6835 = vmatmul.mubr.f32.gmra.mrb[68].mxu1 %v14037_v19  ;;  %7693 = vmatmul.mubr.f32.gmra.mrb[68].mxu0 %v7275_v41  ;;  %v14050_v41 = vld [vmem:[#allocation41_spill] sm:$0xff] }
 0x6eb   : > { %8595 = vmatprep.mubr.msk.f32.mxu1 %vm301_vm0, %v13328_v20  ;;  %8643 = vmatprep.mubr.msk.f32.mxu0 %vm301_vm0, %v13418_v18  ;;  %v7172_v20 = vpop.permute.xlu1 %7171  ;;  %v7046_v54 = vld [vmem:[#allocation2 + $0x1a1] sm:$0xff] }
 0x6ec   : > { %v7278_v6 = vsel %vm301_vm0, %v13450_v25, %v7172_v20 }
 0x6ed   : > { %v13655_v4 = vpop.f32.mrb[12].mxu1 }
 0x6ee   : > { %v6384_v40 = vpop.f32.mrb[13].mxu1  ;;  %6840 = vmatmul.mubr.f32.gmra.mrb[70].mxu1 %v14038_v42  ;;  %7698 = vmatmul.mubr.f32.gmra.mrb[70].mxu0 %v7276_v56  ;;  %v14051_v56 = vld [vmem:[#allocation42_spill] sm:$0xff] }
 0x6ef   : > { %8596 = vmatprep.mubr.msk.f32.mxu1 %vm301_vm0, %v13343_v21  ;;  %8644 = vmatprep.mubr.msk.f32.mxu0 %vm301_vm0, %v13433_v37  ;;  %v7174_v21 = vpop.permute.xlu0 %7173  ;;  %v7047_v40 = vld [vmem:[#allocation2 + $0x1a9] sm:$0xff] }
 0x6f0   : > { %v7279_v14 = vsel %vm301_vm0, %v13465_v15, %v7174_v21  ;;  %v14042_v15 = vld [vmem:[#allocation43_spill] sm:$0xff] }
 0x6f1   : > { %v13664_v35 = vpop.f32.mrb[14].mxu1 }
 0x6f2   : > { %v6389_v59 = vpop.f32.mrb[15].mxu1  ;;  %6845 = vmatmul.mubr.f32.gmra.mrb[72].mxu1 %v14039_v13  ;;  %7703 = vmatmul.mubr.f32.gmra.mrb[72].mxu0 %v7277_v57  ;;  %v14052_v57 = vld [vmem:[#allocation44_spill] sm:$0xff] }
 0x6f3   : > { %8597 = vmatprep.mubr.msk.f32.mxu1 %vm301_vm0, %v13358_v28  ;;  %8645 = vmatprep.mubr.msk.f32.mxu0 %vm301_vm0, %v13448_v29  ;;  %v7176_v28 = vpop.permute.xlu1 %7175  ;;  %v6952_v59 = vld [vmem:[#allocation2 + $0x1af] sm:$0xff] }
 0x6f4   : > { %v7280_v38 = vsel %vm301_vm0, %v13480_v8, %v7176_v28  ;;  %v14044_v8 = vld [vmem:[#allocation45_spill] sm:$0xff] }
 0x6f5   : > { %v13673_v33 = vpop.f32.mrb[16].mxu1 }
 0x6f6   : > { %v6394_v2 = vpop.f32.mrb[17].mxu1  ;;  %6850 = vmatmul.mubr.f32.gmra.mrb[74].mxu1 %v14040_v0  ;;  %7708 = vmatmul.mubr.f32.gmra.mrb[74].mxu0 %v7278_v6  ;;  %v7048_v6 = vld [vmem:[#allocation2 + $0x1b1] sm:$0xff]  ;;  %v14053_v0 = vld [vmem:[#allocation46_spill] sm:$0xff] }
 0x6f7   : > { %8598 = vmatprep.mubr.msk.f32.mxu1 %vm301_vm0, %v13373_v34  ;;  %8646 = vmatprep.mubr.msk.f32.mxu0 %vm301_vm0, %v13463_v53  ;;  %v7178_v34 = vpop.permute.xlu0 %7177 }
 0x6f8   : > { %v7281_v62 = vsel %vm301_vm0, %v13495_v43, %v7178_v34  ;;  %v14047_v43 = vld [vmem:[#allocation47_spill] sm:$0xff] }
 0x6f9   : > { %v13682_v25 = vpop.f32.mrb[18].mxu1 }
 0x6fa   : > { %v6399_v10 = vpop.f32.mrb[19].mxu1  ;;  %6855 = vmatmul.mubr.f32.gmra.mrb[76].mxu1 %v14041_v45  ;;  %7713 = vmatmul.mubr.f32.gmra.mrb[76].mxu0 %v7279_v14  ;;  %v14054_v45 = vld [vmem:[#allocation49_spill] sm:$0xff] }
 0x6fb   : > { %8599 = vmatprep.mubr.msk.f32.mxu1 %vm301_vm0, %v13388_v50  ;;  %8647 = vmatprep.mubr.msk.f32.mxu0 %vm301_vm0, %v14042_v15  ;;  %v7180_v50 = vpop.permute.xlu1 %7179 }
 0x6fc   : > { %v7282_v36 = vsel %vm301_vm0, %v14046_v58, %v7180_v50 }
 0x6fd   : > { %v13691_v5 = vpop.f32.mrb[20].mxu1 }
 0x6fe   : > { %v6404_v32 = vpop.f32.mrb[21].mxu1  ;;  %6860 = vmatmul.mubr.f32.gmra.mrb[78].mxu1 %v14043_v60  ;;  %7718 = vmatmul.mubr.f32.gmra.mrb[78].mxu0 %v7280_v38 }
 0x6ff   : > { %8600 = vmatprep.mubr.msk.f32.mxu1 %vm301_vm0, %v13403_v17  ;;  %8648 = vmatprep.mubr.msk.f32.mxu0 %vm301_vm0, %v14044_v8  ;;  %v7182_v17 = vpop.permute.xlu0 %7181 }
 0x700   : > { %v7283_v61 = vsel %vm301_vm0, %v13525_v22, %v7182_v17 }
 0x701   : > { %v13700_v16 = vpop.f32.mrb[22].mxu1 }
 0x702   : > { %v6409_v39 = vpop.f32.mrb[23].mxu1  ;;  %6865 = vmatmul.mubr.f32.gmra.mrb[80].mxu1 %v14045_v7  ;;  %7723 = vmatmul.mubr.f32.gmra.mrb[80].mxu0 %v7281_v62 }
 0x703   : > { %8601 = vmatprep.mubr.msk.f32.mxu1 %vm301_vm0, %v13418_v18  ;;  %8649 = vmatprep.mubr.msk.f32.mxu0 %vm301_vm0, %v14047_v43  ;;  %v7184_v18 = vpop.permute.xlu1 %7183 }
 0x704   : > { %v7284_v1 = vsel %vm301_vm0, %v13538_v51, %v7184_v18 }
 0x705   : > { %v13709_v44 = vpop.f32.mrb[24].mxu1 }
 0x706   : > { %v6414_v23 = vpop.f32.mrb[25].mxu1  ;;  %6870 = vmatmul.mubr.f32.gmra.mrb[82].mxu1 %v14048_v46  ;;  %7728 = vmatmul.mubr.f32.gmra.mrb[82].mxu0 %v7282_v36 }
 0x707   : > { %8602 = vmatprep.mubr.msk.f32.mxu1 %vm301_vm0, %v13433_v37  ;;  %8650 = vmatprep.mubr.msk.f32.mxu0 %vm301_vm0, %v13523_v12  ;;  %v7186_v37 = vpop.permute.xlu0 %7185  ;;  %v7188_v51 = vpop.permute.xlu1 %7187 }
 0x708   : > { %v7285_v55 = vsel %vm301_vm0, %v13550_v47, %v7186_v37 }
 0x709   : > { %v13718_v52 = vpop.f32.mrb[26].mxu1 }
 0x70a   : > { %v6419_v48 = vpop.f32.mrb[27].mxu1  ;;  %6875 = vmatmul.mubr.f32.gmra.mrb[84].mxu1 %v14049_v49  ;;  %7733 = vmatmul.mubr.f32.gmra.mrb[84].mxu0 %v7283_v61 }
 0x70b   : > { %8603 = vmatprep.mubr.msk.f32.mxu1 %vm301_vm0, %v13448_v29  ;;  %8651 = vmatprep.mubr.msk.f32.mxu0 %vm301_vm0, %v13536_v9  ;;  %v6950_v29 = vld [vmem:[#allocation2 + $0x19f] sm:$0xff]  ;;  %v7190_v47 = vpop.permute.xlu0 %7189  ;;  %v7192_v13 = vpop.permute.xlu1 %7191 }
 0x70c   : > { %v7286_v27 = vsel %vm301_vm0, %v6950_v29, %v7188_v51  ;;  %v7288_v14 = vsel %vm301_vm0, %v6952_v59, %v7192_v13 }
 0x70d   : > { %v13727_v22 = vpop.f32.mrb[28].mxu1 }
 0x70e   : > { %v6424_v12 = vpop.f32.mrb[29].mxu1  ;;  %6880 = vmatmul.mubr.f32.gmra.mrb[86].mxu1 %v14050_v41  ;;  %7738 = vmatmul.mubr.f32.gmra.mrb[86].mxu0 %v7284_v1 }
 0x70f   : > { %8604 = vmatprep.mubr.msk.f32.mxu1 %vm301_vm0, %v13463_v53  ;;  %8652 = vmatprep.mubr.msk.f32.mxu0 %vm301_vm0, %v13548_v26  ;;  %v6951_v53 = vld [vmem:[#allocation2 + $0x1a7] sm:$0xff] }
 0x710   : > { %v7287_v20 = vsel %vm301_vm0, %v6951_v53, %v7190_v47 }
 0x711   : > { %v13736_v9 = vpop.f32.mrb[30].mxu1 }
 0x712   : > { %v6429_v19 = vpop.f32.mrb[31].mxu1  ;;  %6885 = vmatmul.mubr.f32.gmra.mrb[88].mxu1 %v14051_v56  ;;  %7743 = vmatmul.mubr.f32.gmra.mrb[88].mxu0 %v7285_v55 }
 0x713   : > { %8605 = vmatprep.mubr.msk.f32.mxu1 %vm301_vm0, %v14042_v15  ;;  %8653 = vmatprep.mubr.msk.f32.mxu0 %vm301_vm0, %v7046_v54 }
 0x715   : > { %v13743_v26 = vpop.f32.mrb[32].mxu1 }
 0x716   : > { %v6434_v42 = vpop.f32.mrb[33].mxu1  ;;  %6890 = vmatmul.mubr.f32.gmra.mrb[90].mxu1 %v14052_v57  ;;  %7748 = vmatmul.mubr.f32.gmra.mrb[90].mxu0 %v7286_v27 }
 0x717   : > { %8606 = vmatprep.mubr.msk.f32.mxu1 %vm301_vm0, %v14044_v8  ;;  %8654 = vmatprep.mubr.msk.f32.mxu0 %vm301_vm0, %v7047_v40 }
 0x719   : > { %v13750_v21 = vpop.f32.mrb[34].mxu1 }
 0x71a   : > { %v6439_v2 = vpop.f32.mrb[35].mxu1  ;;  %6895 = vmatmul.mubr.f32.gmra.mrb[92].mxu1 %v14053_v0  ;;  %7753 = vmatmul.mubr.f32.gmra.mrb[92].mxu0 %v7287_v20 }
 0x71b   : > { %8607 = vmatprep.mubr.msk.f32.mxu1 %vm301_vm0, %v14047_v43  ;;  %8655 = vmatprep.mubr.msk.f32.mxu0 %vm301_vm0, %v7048_v6 }
 0x71d   : > { %v13757_v28 = vpop.f32.mrb[36].mxu1 }
 0x71e   : > { %v6444_v10 = vpop.f32.mrb[37].mxu1  ;;  %6900 = vmatmul.mubr.f32.gmra.mrb[94].mxu1 %v14054_v45  ;;  %7758 = vmatmul.mubr.f32.gmra.mrb[94].mxu0 %v7288_v14 }
 0x721   : > { %v13760_v38 = vpop.f32.mrb[38].mxu1 }
 0x722   : > { %v6449_v15 = vpop.f32.mrb[39].mxu1 }
 0x725   : > { %v13762_v34 = vpop.f32.mrb[40].mxu1 }
 0x726   : > { %v6454_v32 = vpop.f32.mrb[41].mxu1 }
 0x729   : > { %v13764_v60 = vpop.f32.mrb[42].mxu1 }
 0x72a   : > { %v6459_v62 = vpop.f32.mrb[43].mxu1 }
 0x72d   : > { %v13766_v8 = vpop.f32.mrb[44].mxu1 }
 0x72e   : > { %v6464_v50 = vpop.f32.mrb[45].mxu1 }
 0x731   : > { %v13768_v39 = vpop.f32.mrb[46].mxu1 }
 0x732   : > { %v6469_v7 = vpop.f32.mrb[47].mxu1 }
 0x735   : > { %v7524_v58 = vpop.f32.mrb[0].mxu0 }
 0x736   : > { %v9014_v36 = vadd.f32 %v7524_v58, %v13601_v31  ;;  %v7526_v43 = vpop.f32.mrb[1].mxu0 }
 0x738   : > { %7812 = vst.msk [vmem:[#allocation3 + $0x20] sm:$0xff] %vm342_vm1, %v9014_v36 }
 0x739   : > { %v7529_v17 = vpop.f32.mrb[2].mxu0 }
 0x73a   : > { %v9015_v23 = vadd.f32 %v7529_v17, %v13610_v11  ;;  %v7531_v46 = vpop.f32.mrb[3].mxu0 }
 0x73c   : > { %7813 = vst.msk [vmem:[#allocation3 + $0x28] sm:$0xff] %vm342_vm1, %v9015_v23 }
 0x73d   : > { %v7534_v61 = vpop.f32.mrb[4].mxu0 }
 0x73e   : > { %v9016_v18 = vadd.f32 %v7534_v61, %v13619_v63  ;;  %v7536_v48 = vpop.f32.mrb[5].mxu0 }
 0x740   : > { %7814 = vst.msk [vmem:[#allocation3 + $0x30] sm:$0xff] %vm342_vm1, %v9016_v18 }
 0x741   : > { %v7539_v49 = vpop.f32.mrb[6].mxu0 }
 0x742   : > { %v9017_v1 = vadd.f32 %v7539_v49, %v13628_v30  ;;  %v7541_v37 = vpop.f32.mrb[7].mxu0 }
 0x744   : > { %7815 = vst.msk [vmem:[#allocation3 + $0x38] sm:$0xff] %vm342_vm1, %v9017_v1 }
 0x745   : > { %v7544_v31 = vpop.f32.mrb[8].mxu0 }
 0x746   : > { %v9018_v12 = vadd.f32 %v7544_v31, %v13637_v24  ;;  %v7546_v41 = vpop.f32.mrb[9].mxu0 }
 0x748   : > { %7816 = vst.msk [vmem:[#allocation3 + $0x40] sm:$0xff] %vm342_vm1, %v9018_v12 }
 0x749   : > { %v7549_v11 = vpop.f32.mrb[10].mxu0 }
 0x74a   : > { %v9019_v55 = vadd.f32 %v7549_v11, %v13646_v3  ;;  %v7551_v29 = vpop.f32.mrb[11].mxu0 }
 0x74c   : > { %7817 = vst.msk [vmem:[#allocation3 + $0x48] sm:$0xff] %vm342_vm1, %v9019_v55 }
 0x74d   : > { %v7554_v63 = vpop.f32.mrb[12].mxu0 }
 0x74e   : > { %v9020_v51 = vadd.f32 %v7554_v63, %v13655_v4  ;;  %v7556_v54 = vpop.f32.mrb[13].mxu0 }
 0x750   : > { %7818 = vst.msk [vmem:[#allocation3 + $0x50] sm:$0xff] %vm342_vm1, %v9020_v51 }
 0x751   : > { %v7559_v30 = vpop.f32.mrb[14].mxu0 }
 0x752   : > { %v9021_v19 = vadd.f32 %v7559_v30, %v13664_v35  ;;  %v7561_v56 = vpop.f32.mrb[15].mxu0 }
 0x754   : > { %7819 = vst.msk [vmem:[#allocation3 + $0x58] sm:$0xff] %vm342_vm1, %v9021_v19 }
 0x755   : > { %v7564_v24 = vpop.f32.mrb[16].mxu0 }
 0x756   : > { %v9022_v27 = vadd.f32 %v7564_v24, %v13673_v33  ;;  %v7566_v53 = vpop.f32.mrb[17].mxu0 }
 0x758   : > { %7820 = vst.msk [vmem:[#allocation3 + $0x60] sm:$0xff] %vm342_vm1, %v9022_v27 }
 0x759   : > { %v7569_v3 = vpop.f32.mrb[18].mxu0 }
 0x75a   : > { %v9023_v47 = vadd.f32 %v7569_v3, %v13682_v25  ;;  %v7571_v40 = vpop.f32.mrb[19].mxu0 }
 0x75c   : > { %7821 = vst.msk [vmem:[#allocation3 + $0x68] sm:$0xff] %vm342_vm1, %v9023_v47 }
 0x75d   : > { %v7574_v4 = vpop.f32.mrb[20].mxu0 }
 0x75e   : > { %v9024_v42 = vadd.f32 %v7574_v4, %v13691_v5  ;;  %v7576_v57 = vpop.f32.mrb[21].mxu0 }
 0x760   : > { %7822 = vst.msk [vmem:[#allocation3 + $0x70] sm:$0xff] %vm342_vm1, %v9024_v42 }
 0x761   : > { %v7579_v35 = vpop.f32.mrb[22].mxu0 }
 0x762   : > { %v9025_v20 = vadd.f32 %v7579_v35, %v13700_v16  ;;  %v7581_v59 = vpop.f32.mrb[23].mxu0 }
 0x764   : > { %7823 = vst.msk [vmem:[#allocation3 + $0x78] sm:$0xff] %vm342_vm1, %v9025_v20 }
 0x765   : > { %v7584_v33 = vpop.f32.mrb[24].mxu0 }
 0x766   : > { %v9026_v13 = vadd.f32 %v7584_v33, %v13709_v44  ;;  %v7586_v6 = vpop.f32.mrb[25].mxu0 }
 0x768   : > { %7824 = vst.msk [vmem:[#allocation3 + $0x80] sm:$0xff] %vm342_vm1, %v9026_v13 }
 0x769   : > { %v7589_v25 = vpop.f32.mrb[26].mxu0 }
 0x76a   : > { %v9027_v2 = vadd.f32 %v7589_v25, %v13718_v52  ;;  %v7591_v0 = vpop.f32.mrb[27].mxu0 }
 0x76c   : > { %7825 = vst.msk [vmem:[#allocation3 + $0x88] sm:$0xff] %vm342_vm1, %v9027_v2 }
 0x76d   : > { %v7594_v5 = vpop.f32.mrb[28].mxu0 }
 0x76e   : > { %v9028_v14 = vadd.f32 %v7594_v5, %v13727_v22  ;;  %v7596_v10 = vpop.f32.mrb[29].mxu0 }
 0x770   : > { %7826 = vst.msk [vmem:[#allocation3 + $0x90] sm:$0xff] %vm342_vm1, %v9028_v14 }
 0x771   : > { %v7599_v16 = vpop.f32.mrb[30].mxu0 }
 0x772   : > { %v9029_v45 = vadd.f32 %v7599_v16, %v13736_v9  ;;  %v7601_v15 = vpop.f32.mrb[31].mxu0 }
 0x774   : > { %7827 = vst.msk [vmem:[#allocation3 + $0x98] sm:$0xff] %vm342_vm1, %v9029_v45 }
 0x775   : > { %v7604_v44 = vpop.f32.mrb[32].mxu0 }
 0x776   : > { %v9030_v32 = vadd.f32 %v7604_v44, %v13743_v26  ;;  %v7606_v62 = vpop.f32.mrb[33].mxu0 }
 0x778   : > { %7828 = vst.msk [vmem:[#allocation3 + $0xa0] sm:$0xff] %vm342_vm1, %v9030_v32 }
 0x779   : > { %v7609_v52 = vpop.f32.mrb[34].mxu0 }
 0x77a   : > { %v9031_v50 = vadd.f32 %v7609_v52, %v13750_v21  ;;  %v7611_v7 = vpop.f32.mrb[35].mxu0 }
 0x77c   : > { %7829 = vst.msk [vmem:[#allocation3 + $0xa8] sm:$0xff] %vm342_vm1, %v9031_v50 }
 0x77d   : > { %v7614_v22 = vpop.f32.mrb[36].mxu0 }
 0x77e   : > { %v9032_v58 = vadd.f32 %v7614_v22, %v13757_v28  ;;  %v7616_v36 = vpop.f32.mrb[37].mxu0 }
 0x780   : > { %7830 = vst.msk [vmem:[#allocation3 + $0xb0] sm:$0xff] %vm342_vm1, %v9032_v58 }
 0x781   : > { %v7619_v9 = vpop.f32.mrb[38].mxu0 }
 0x782   : > { %v9033_v43 = vadd.f32 %v7619_v9, %v13760_v38  ;;  %v7621_v17 = vpop.f32.mrb[39].mxu0 }
 0x784   : > { %7831 = vst.msk [vmem:[#allocation3 + $0xb8] sm:$0xff] %vm342_vm1, %v9033_v43 }
 0x785   : > { %v7624_v26 = vpop.f32.mrb[40].mxu0 }
 0x786   : > { %v9034_v23 = vadd.f32 %v7624_v26, %v13762_v34  ;;  %v7626_v46 = vpop.f32.mrb[41].mxu0 }
 0x788   : > { %7832 = vst.msk [vmem:[#allocation3 + $0xc0] sm:$0xff] %vm342_vm1, %v9034_v23 }
 0x789   : > { %v7629_v21 = vpop.f32.mrb[42].mxu0 }
 0x78a   : > { %v9035_v61 = vadd.f32 %v7629_v21, %v13764_v60  ;;  %v7631_v18 = vpop.f32.mrb[43].mxu0 }
 0x78c   : > { %7833 = vst.msk [vmem:[#allocation3 + $0xc8] sm:$0xff] %vm342_vm1, %v9035_v61 }
 0x78d   : > { %v7634_v28 = vpop.f32.mrb[44].mxu0 }
 0x78e   : > { %v9036_v48 = vadd.f32 %v7634_v28, %v13766_v8  ;;  %v7636_v49 = vpop.f32.mrb[45].mxu0 }
 0x790   : > { %7834 = vst.msk [vmem:[#allocation3 + $0xd0] sm:$0xff] %vm342_vm1, %v9036_v48 }
 0x791   : > { %v7639_v38 = vpop.f32.mrb[46].mxu0 }
 0x792   : > { %v9037_v1 = vadd.f32 %v7639_v38, %v13768_v39  ;;  %v7641_v37 = vpop.f32.mrb[47].mxu0 }
 0x794   : > { %7835 = vst.msk [vmem:[#allocation3 + $0xd8] sm:$0xff] %vm342_vm1, %v9037_v1 }
 0x795   : > { %v6786_v34 = vpop.f32.mrb[48].mxu1  ;;  %v7644_v31 = vpop.f32.mrb[48].mxu0 }
 0x796   : > { %v9038_v12 = vadd.f32 %v7644_v31, %v6786_v34  ;;  %v6788_v41 = vpop.f32.mrb[49].mxu1  ;;  %v7646_v60 = vpop.f32.mrb[49].mxu0 }
 0x798   : > { %7836 = vst.msk [vmem:[#allocation3 + $0xe0] sm:$0xff] %vm342_vm1, %v9038_v12 }
 0x799   : > { %v6791_v11 = vpop.f32.mrb[50].mxu1  ;;  %v7649_v55 = vpop.f32.mrb[50].mxu0 }
 0x79a   : > { %v9039_v29 = vadd.f32 %v7649_v55, %v6791_v11  ;;  %v6793_v8 = vpop.f32.mrb[51].mxu1  ;;  %v7651_v63 = vpop.f32.mrb[51].mxu0 }
 0x79c   : > { %7837 = vst.msk [vmem:[#allocation3 + $0xe8] sm:$0xff] %vm342_vm1, %v9039_v29 }
 0x79d   : > { %v6796_v51 = vpop.f32.mrb[52].mxu1  ;;  %v7654_v54 = vpop.f32.mrb[52].mxu0 }
 0x79e   : > { %v9040_v39 = vadd.f32 %v7654_v54, %v6796_v51  ;;  %v6798_v30 = vpop.f32.mrb[53].mxu1  ;;  %v7656_v19 = vpop.f32.mrb[53].mxu0 }
 0x7a0   : > { %7838 = vst.msk [vmem:[#allocation3 + $0xf0] sm:$0xff] %vm342_vm1, %v9040_v39 }
 0x7a1   : > { %v6801_v56 = vpop.f32.mrb[54].mxu1  ;;  %v7659_v24 = vpop.f32.mrb[54].mxu0 }
 0x7a2   : > { %v9041_v27 = vadd.f32 %v7659_v24, %v6801_v56  ;;  %v6803_v53 = vpop.f32.mrb[55].mxu1  ;;  %v7661_v3 = vpop.f32.mrb[55].mxu0 }
 0x7a4   : > { %7839 = vst.msk [vmem:[#allocation3 + $0xf8] sm:$0xff] %vm342_vm1, %v9041_v27 }
 0x7a5   : > { %v6806_v47 = vpop.f32.mrb[56].mxu1  ;;  %v7664_v40 = vpop.f32.mrb[56].mxu0 }
 0x7a6   : > { %v9042_v4 = vadd.f32 %v7664_v40, %v6806_v47  ;;  %v6808_v42 = vpop.f32.mrb[57].mxu1  ;;  %v7666_v57 = vpop.f32.mrb[57].mxu0 }
 0x7a8   : > { %7840 = vst.msk [vmem:[#allocation3 + $0x100] sm:$0xff] %vm342_vm1, %v9042_v4 }
 0x7a9   : > { %v6811_v35 = vpop.f32.mrb[58].mxu1  ;;  %v7669_v20 = vpop.f32.mrb[58].mxu0 }
 0x7aa   : > { %v9043_v59 = vadd.f32 %v7669_v20, %v6811_v35  ;;  %v6813_v33 = vpop.f32.mrb[59].mxu1  ;;  %v7671_v13 = vpop.f32.mrb[59].mxu0 }
 0x7ac   : > { %7841 = vst.msk [vmem:[#allocation3 + $0x108] sm:$0xff] %vm342_vm1, %v9043_v59 }
 0x7ad   : > { %v6816_v6 = vpop.f32.mrb[60].mxu1  ;;  %v7674_v25 = vpop.f32.mrb[60].mxu0 }
 0x7ae   : > { %v9044_v2 = vadd.f32 %v7674_v25, %v6816_v6  ;;  %v6818_v0 = vpop.f32.mrb[61].mxu1  ;;  %v7676_v5 = vpop.f32.mrb[61].mxu0 }
 0x7b0   : > { %7842 = vst.msk [vmem:[#allocation3 + $0x110] sm:$0xff] %vm342_vm1, %v9044_v2 }
 0x7b1   : > { %v6821_v14 = vpop.f32.mrb[62].mxu1  ;;  %v7679_v10 = vpop.f32.mrb[62].mxu0 }
 0x7b2   : > { %v9045_v16 = vadd.f32 %v7679_v10, %v6821_v14  ;;  %v6823_v45 = vpop.f32.mrb[63].mxu1  ;;  %v7681_v15 = vpop.f32.mrb[63].mxu0 }
 0x7b4   : > { %7843 = vst.msk [vmem:[#allocation3 + $0x118] sm:$0xff] %vm342_vm1, %v9045_v16 }
 0x7b5   : > { %v6826_v44 = vpop.f32.mrb[64].mxu1  ;;  %v7684_v32 = vpop.f32.mrb[64].mxu0 }
 0x7b6   : > { %v9046_v62 = vadd.f32 %v7684_v32, %v6826_v44  ;;  %v6828_v52 = vpop.f32.mrb[65].mxu1  ;;  %v7686_v50 = vpop.f32.mrb[65].mxu0 }
 0x7b8   : > { %7844 = vst.msk [vmem:[#allocation3 + $0x120] sm:$0xff] %vm342_vm1, %v9046_v62 }
 0x7b9   : > { %v6831_v7 = vpop.f32.mrb[66].mxu1  ;;  %v7689_v22 = vpop.f32.mrb[66].mxu0 }
 0x7ba   : > { %v9047_v58 = vadd.f32 %v7689_v22, %v6831_v7  ;;  %v6833_v36 = vpop.f32.mrb[67].mxu1  ;;  %v7691_v9 = vpop.f32.mrb[67].mxu0 }
 0x7bc   : > { %7845 = vst.msk [vmem:[#allocation3 + $0x128] sm:$0xff] %vm342_vm1, %v9047_v58 }
 0x7bd   : > { %v6836_v43 = vpop.f32.mrb[68].mxu1  ;;  %v7694_v17 = vpop.f32.mrb[68].mxu0 }
 0x7be   : > { %v9048_v26 = vadd.f32 %v7694_v17, %v6836_v43  ;;  %v6838_v23 = vpop.f32.mrb[69].mxu1  ;;  %v7696_v46 = vpop.f32.mrb[69].mxu0 }
 0x7c0   : > { %7846 = vst.msk [vmem:[#allocation3 + $0x130] sm:$0xff] %vm342_vm1, %v9048_v26 }
 0x7c1   : > { %v6841_v21 = vpop.f32.mrb[70].mxu1  ;;  %v7699_v61 = vpop.f32.mrb[70].mxu0 }
 0x7c2   : > { %v9049_v18 = vadd.f32 %v7699_v61, %v6841_v21  ;;  %v6843_v28 = vpop.f32.mrb[71].mxu1  ;;  %v7701_v48 = vpop.f32.mrb[71].mxu0 }
 0x7c4   : > { %7847 = vst.msk [vmem:[#allocation3 + $0x138] sm:$0xff] %vm342_vm1, %v9049_v18 }
 0x7c5   : > { %v6846_v49 = vpop.f32.mrb[72].mxu1  ;;  %v7704_v38 = vpop.f32.mrb[72].mxu0 }
 0x7c6   : > { %v9050_v1 = vadd.f32 %v7704_v38, %v6846_v49  ;;  %v6848_v37 = vpop.f32.mrb[73].mxu1  ;;  %v7706_v34 = vpop.f32.mrb[73].mxu0 }
 0x7c8   : > { %7848 = vst.msk [vmem:[#allocation3 + $0x140] sm:$0xff] %vm342_vm1, %v9050_v1 }
 0x7c9   : > { %v6851_v31 = vpop.f32.mrb[74].mxu1  ;;  %v7709_v12 = vpop.f32.mrb[74].mxu0 }
 0x7ca   : > { %v9051_v41 = vadd.f32 %v7709_v12, %v6851_v31  ;;  %v6853_v60 = vpop.f32.mrb[75].mxu1  ;;  %v7711_v11 = vpop.f32.mrb[75].mxu0 }
 0x7cc   : > { %7849 = vst.msk [vmem:[#allocation3 + $0x148] sm:$0xff] %vm342_vm1, %v9051_v41 }
 0x7cd   : > { %v6856_v55 = vpop.f32.mrb[76].mxu1  ;;  %v7714_v29 = vpop.f32.mrb[76].mxu0 }
 0x7ce   : > { %v9052_v8 = vadd.f32 %v7714_v29, %v6856_v55  ;;  %v6858_v63 = vpop.f32.mrb[77].mxu1  ;;  %v7716_v51 = vpop.f32.mrb[77].mxu0 }
 0x7d0   : > { %7850 = vst.msk [vmem:[#allocation3 + $0x150] sm:$0xff] %vm342_vm1, %v9052_v8 }
 0x7d1   : > { %v6861_v54 = vpop.f32.mrb[78].mxu1  ;;  %v7719_v39 = vpop.f32.mrb[78].mxu0 }
 0x7d2   : > { %v9053_v30 = vadd.f32 %v7719_v39, %v6861_v54  ;;  %v6863_v19 = vpop.f32.mrb[79].mxu1  ;;  %v7721_v56 = vpop.f32.mrb[79].mxu0 }
 0x7d4   : > { %7851 = vst.msk [vmem:[#allocation3 + $0x158] sm:$0xff] %vm342_vm1, %v9053_v30 }
 0x7d5   : > { %v6866_v24 = vpop.f32.mrb[80].mxu1  ;;  %v7724_v27 = vpop.f32.mrb[80].mxu0 }
 0x7d6   : > { %v9054_v53 = vadd.f32 %v7724_v27, %v6866_v24  ;;  %v6868_v3 = vpop.f32.mrb[81].mxu1  ;;  %v7726_v47 = vpop.f32.mrb[81].mxu0 }
 0x7d8   : > { %7852 = vst.msk [vmem:[#allocation3 + $0x160] sm:$0xff] %vm342_vm1, %v9054_v53 }
 0x7d9   : > { %v6871_v40 = vpop.f32.mrb[82].mxu1  ;;  %v7729_v4 = vpop.f32.mrb[82].mxu0 }
 0x7da   : > { %v9055_v42 = vadd.f32 %v7729_v4, %v6871_v40  ;;  %v6873_v57 = vpop.f32.mrb[83].mxu1  ;;  %v7731_v35 = vpop.f32.mrb[83].mxu0 }
 0x7dc   : > { %7853 = vst.msk [vmem:[#allocation3 + $0x168] sm:$0xff] %vm342_vm1, %v9055_v42 }
 0x7dd   : > { %v6876_v20 = vpop.f32.mrb[84].mxu1  ;;  %v7734_v59 = vpop.f32.mrb[84].mxu0 }
 0x7de   : > { %v9056_v33 = vadd.f32 %v7734_v59, %v6876_v20  ;;  %v6878_v13 = vpop.f32.mrb[85].mxu1  ;;  %v7736_v6 = vpop.f32.mrb[85].mxu0 }
 0x7e0   : > { %7854 = vst.msk [vmem:[#allocation3 + $0x170] sm:$0xff] %vm342_vm1, %v9056_v33 }
 0x7e1   : > { %v6881_v25 = vpop.f32.mrb[86].mxu1  ;;  %v7739_v2 = vpop.f32.mrb[86].mxu0 }
 0x7e2   : > { %v9057_v0 = vadd.f32 %v7739_v2, %v6881_v25  ;;  %v6883_v5 = vpop.f32.mrb[87].mxu1  ;;  %v7741_v14 = vpop.f32.mrb[87].mxu0 }
 0x7e4   : > { %7855 = vst.msk [vmem:[#allocation3 + $0x178] sm:$0xff] %vm342_vm1, %v9057_v0 }
 0x7e5   : > { %v6886_v10 = vpop.f32.mrb[88].mxu1  ;;  %v7744_v16 = vpop.f32.mrb[88].mxu0 }
 0x7e6   : > { %v9058_v45 = vadd.f32 %v7744_v16, %v6886_v10  ;;  %v6888_v15 = vpop.f32.mrb[89].mxu1  ;;  %v7746_v44 = vpop.f32.mrb[89].mxu0 }
 0x7e8   : > { %7856 = vst.msk [vmem:[#allocation3 + $0x180] sm:$0xff] %vm342_vm1, %v9058_v45 }
 0x7e9   : > { %v6891_v32 = vpop.f32.mrb[90].mxu1  ;;  %v7749_v62 = vpop.f32.mrb[90].mxu0 }
 0x7ea   : > { %v9059_v52 = vadd.f32 %v7749_v62, %v6891_v32  ;;  %v6893_v50 = vpop.f32.mrb[91].mxu1  ;;  %v7751_v7 = vpop.f32.mrb[91].mxu0 }
 0x7ec   : > { %7857 = vst.msk [vmem:[#allocation3 + $0x188] sm:$0xff] %vm342_vm1, %v9059_v52 }
 0x7ed   : > { %v6896_v22 = vpop.f32.mrb[92].mxu1  ;;  %v7754_v58 = vpop.f32.mrb[92].mxu0 }
 0x7ee   : > { %v9060_v36 = vadd.f32 %v7754_v58, %v6896_v22  ;;  %v6898_v9 = vpop.f32.mrb[93].mxu1  ;;  %v7756_v43 = vpop.f32.mrb[93].mxu0 }
 0x7f0   : > { %7858 = vst.msk [vmem:[#allocation3 + $0x190] sm:$0xff] %vm342_vm1, %v9060_v36 }
 0x7f1   : > { %v6901_v17 = vpop.f32.mrb[94].mxu1  ;;  %v7759_v26 = vpop.f32.mrb[94].mxu0 }
 0x7f2   : > { %v9061_v23 = vadd.f32 %v7759_v26, %v6901_v17  ;;  %v6903_v46 = vpop.f32.mrb[95].mxu1  ;;  %v7761_v21 = vpop.f32.mrb[95].mxu0 }
 0x7f4   : > { %7859 = vst.msk [vmem:[#allocation3 + $0x198] sm:$0xff] %vm342_vm1, %v9061_v23 }
 0x7f5 LB: >> { %s7973_s7 = smul.u32 24, %s9740_s28  ;;  %s8658_s6 = sshll.u32 %s9740_s28, 4  ;;  %s9740_s28 = sphi %s9738_s28, %s7865_s28  }
 0x7f6   : >> { %s7872_s14 = scalar_lea.vmem %s10023_s13, %s8658_s6 [#allocation4]  ;;  %s7877_s23 = scalar_lea.vmem %s10049_s24, %s8658_s6 [#allocation13] }
 0x7f7   : >> { %v7873_v61 = vld [vmem:[%s7872_s14] sm:$0xff]  ;;  %v7874_v18 = vld [vmem:[%s7872_s14 + $0x8] sm:$0xff]  ;;  %s7974_s8 = scalar_lea.vmem [#allocation3], %s7973_s7  ;;  %s7865_s28 = sadd.s32 1, %s9740_s28  }
 0x7f8   : >> { %p7862_p12 = scmp.ge.s32.totalorder %s7865_s28, 16  }
 0x7f9   : > { %s8665_s15 = sshll.u32 (%p7862_p12), %s9813_s22, 12  ;;  %s7894_s26 = sshll.u32 (%p7862_p12), %s10049_s24, 4  ;;  %s13853_s26 = int_to_ptr.vmem [resolvable:$true] %s7894_s26 }
 0x7fa   : > { %7864 = sbr.rel (!%p7862_p12) target bundleno = 2037 (0x7f5), region = 179  ;;  %s13850_s11 = scalar_lea.hbm (%p7862_p12), %s13902_s5, %s8665_s15 }
 0x7fb   : >> { %v8656_v28 = vld [vmem:[%s7974_s8 + $0x20] sm:$0xff]  ;;  %v8657_v48 = vld [vmem:[%s7974_s8 + $0x28] sm:$0xff]  ;;  %s7881_s17 = scalar_lea.sflag (%p7862_p12), [#allocation6], %s10019_s12  ;;  %s9634_s16 = scalar_lea.vmem (%p7862_p12), %s13853_s26, 4096 }
 0x7fc   : >> { %v7875_v49 = vsub.f32 %v7873_v61, %v8656_v28  ;;  %v7876_v38 = vsub.f32 %v7874_v18, %v8657_v48  ;;  %p9635_p1 = scmp.ne.s32.totalorder (%p7862_p12), %s13853_s26, %s9634_s16  ;;  %s9759_s13 = smov (%p7862_p12), [#allocation13]  }
 0x7fd   : > { %s9638_s28 = sshll.u32 (%p7862_p12), %s9759_s13, 4  ;;  %s9639_s28 = int_to_ptr.vmem [resolvable:$false] %s9638_s28 }
 0x7fe   : >> { %7878 = vst.msk [vmem:[%s7877_s23] sm:$0xff] %vm342_vm1, %v7875_v49  ;;  %7879 = vst.msk [vmem:[%s7877_s23 + $0x8] sm:$0xff] %vm342_vm1, %v7876_v38  ;;  %p9636_p2 = pnand (%p7862_p12), %p9635_p1, %p9967_p3  ;;  %s9640_s22 = scalar_lea.vmem (%p7862_p12), %s9639_s28, 8192 }
 0x7ff   : > { %p9641_p9 = scmp.lt.s32.totalorder (%p7862_p12), %s13853_s26, %s9639_s28  ;;  %p9642_p0 = scmp.lt.s32.totalorder (%p7862_p12), %s9640_s22, %s9634_s16 }
 0x800   : > { %p9637_p13 = pneg (%p7862_p12), %p9636_p2 }
 0x801   : > { %p9643_p11 = por %p9642_p0, %p9641_p9 }
 0x803   : > { %p9644_p6 = pnand %p9643_p11, %p9637_p13 }
 0x805   : > { %9647 = shalt.err (!%p9644_p6)
}
 0x806   : > { %s9648_s24 = scalar_lea.hbm %s13850_s11, 4096  ;;  %s9652_s14 = scalar_lea.hbm %s13902_s5, 8192 }
 0x807   : > { %p9649_p4 = scmp.ne.s32.totalorder %s13850_s11, %s9648_s24  ;;  %p9653_p5 = scmp.lt.u32.totalorder %s13850_s11, %s13902_s5 }
 0x808   : > { %p9654_p7 = scmp.lt.u32.totalorder %s9652_s14, %s9648_s24  ;;  %p9656_p1 = scmp.lt.u32.totalorder %s9648_s24, %s13850_s11 }
 0x809   : > { %p9650_p8 = pnand %p9649_p4, %p9967_p3 }
 0x80a   : > { %p9655_p12 = por %p9654_p7, %p9653_p5 }
 0x80b   : > { %p9651_p10 = pneg %p9650_p8 }
 0x80c   : > { %p9657_p2 = por %p9656_p1, %p9655_p12 }
 0x80e   : > { %p9658_p13 = pnand %p9657_p2, %p9651_p10 }
 0x810   : > { %9661 = shalt.err (!%p9658_p13)
}
 0x811   : > { %s9760_s15 = smov 128   ;;  %s9761_s10 = smov 8  }
 0x812   : > { %9176 = dma.vmem_to_hbm [thread:$0]  (%p9967_p3), %s13853_s26, 4096, %s13850_s11, %s7881_s17, %s9760_s15, %s9760_s15, %s9761_s10  }
 0x813 PF: > { %s7909_s9 = sand.u32 1, %s9712_s18   ;;  %p14055_p9 = scmp.ne.s32.totalorder %s13948_s25, 0 }
 0x814   : > { %p14056_p0 = scmp.ge.s32.totalorder %s9724_s21, 2  ;;  %s7910_s16 = scalar_lea.sflag [#allocation6], %s7909_s9 }
 0x816   : > { %p9196_p11 = pnand %p14056_p0, %p14055_p9 }
 0x818   : > { %9707 = dma.done.wait (!%p9196_p11), %s7910_s16, 4096  }
 0x819   : > { %9709 = vsyncadd (!%p9196_p11), %s7910_s16, 4294963200  ;;  %p20_p6 = scmp.ge.s32.totalorder %s9954_s29, 4   ;;  %s14057_s18 = smov %s9716_s19 }
 0x81a   : > { %s14058_s19 = smov %s9720_s20  ;;  %s14059_s20 = smov %s9963_s27 }
 0x81b   : > { %s14060_s21 = smov %s9954_s29  ;;  %22 = sbr.rel (!%p20_p6) target bundleno = 7 (0x7), region = 190 }
 0x822   :  { %7915 = vsyncpa [#allocation5], 1 }
 0x823   :  { %7917 = vsyncpa [#allocation5 + $0x1], 1 }
 0x824   :  { %7918 = vsyncpa [#allocation8], 1 }
 0x825   :  { %7919 = vsyncpa [#allocation11], 1 }
 0x826   :  { %7920 = vsyncpa [#allocation6], 1 }
 0x827   :  { %7922 = vsyncpa [#allocation6 + $0x1], 1 }

</bundles_post_ra>
